<compile_context>
chip_gen: v5e
topology: v5e:2x2
jax: 0.10.0
libtpu: 0.0.40
codegen_flags: <defaults>
</compile_context>

<pallas_src>
import functools

import jax
import jax.numpy as jnp
from jax import lax
from jax.experimental import pallas as pl
from jax.experimental.pallas import tpu as pltpu


FC1_IN = 8640                      # 64 * 9 * 15, hard-coded by the PyTorch module
FC1_HIDDEN = 512
FC1_TK = 2176                      # 17 * 128  -> K padded to 8704 = 4 * 2176
FC1_KP = 4 * FC1_TK                # 8704 (padded contraction dim, 4 grid steps)
FC1_WEIGHT_DTYPE = jnp.bfloat16    # halves the dominant HBM stream (review item)


def _round_up(x, m):
    return (x + m - 1) // m * m


# ----------------------------------------------------------------------------
# Conv GEMM: single-block fused matmul + bias + ReLU.
# ----------------------------------------------------------------------------
def _conv_gemm_kernel(x_ref, w_ref, b_ref, o_ref):
    y = jnp.dot(x_ref[...], w_ref[...], preferred_element_type=jnp.float32)
    o_ref[...] = jnp.maximum(y + b_ref[...], 0.0).astype(o_ref.dtype)


def conv_gemm_bias_relu(x, w, b_row):
    """relu(x @ w + b).  x: (M, K), w: (K, N), b_row: (1, N).

    K and N are kept at their full (unpadded) sizes; full-array block dims are
    legal even when not multiples of (8, 128).  M is only tiled if large."""
    M, K = x.shape
    _, N = w.shape

    if M <= 4096:                       # whole problem in one VMEM block
        tm, mpad = M, M
        xp = x
    else:                               # generic fallback for large batches
        tm = 1024
        mpad = _round_up(M, tm)
        xp = jnp.pad(x, ((0, mpad - M), (0, 0)))

    out = pl.pallas_call(
        _conv_gemm_kernel,
        out_shape=jax.ShapeDtypeStruct((mpad, N), jnp.float32),
        grid_spec=pltpu.PrefetchScalarGridSpec(
            num_scalar_prefetch=0,
            grid=(mpad // tm,),
            in_specs=[
                pl.BlockSpec((tm, K), lambda i: (i, 0)),
                pl.BlockSpec((K, N), lambda i: (0, 0)),
                pl.BlockSpec((1, N), lambda i: (0, 0)),
            ],
            out_specs=pl.BlockSpec((tm, N), lambda i: (i, 0)),
        ),
        compiler_params=pltpu.CompilerParams(
            dimension_semantics=("parallel",)),
    )(xp, w, b_row)
    return out if mpad == M else out[:M]


# ----------------------------------------------------------------------------
# Conv2d (valid padding, strided) = patch extraction + Pallas GEMM + ReLU.
# ----------------------------------------------------------------------------
def conv2d_relu(x_nhwc, wmat, b_row, *, ksize, stride):
    B, H, W, C = x_nhwc.shape
    oh = (H - ksize) // stride + 1
    ow = (W - ksize) // stride + 1
    # Patch feature order is (c, kh, kw) (channel-major), matching the wmat
    # layout built once in prepare_params.  Precision.HIGHEST keeps the
    # identity-kernel gather exact in f32.
    patches = lax.conv_general_dilated_patches(
        x_nhwc,
        filter_shape=(ksize, ksize),
        window_strides=(stride, stride),
        padding="VALID",
        dimension_numbers=("NHWC", "HWIO", "NHWC"),
        precision=lax.Precision.HIGHEST,
    )
    patches = patches.reshape(B * oh * ow, C * ksize * ksize)
    y = conv_gemm_bias_relu(patches, wmat, b_row)
    return y.reshape(B, oh, ow, wmat.shape[1])


# ----------------------------------------------------------------------------
# Fused fc1 + ReLU + fc2 kernel (K streamed in multi-MB lane-dense blocks).
# ----------------------------------------------------------------------------
def _fused_fc_kernel(x_ref, w1_ref, b1_ref, w2_ref, b2_ref, o_ref, acc_ref):
    k = pl.program_id(0)

    @pl.when(k == 0)
    def _():
        acc_ref[...] = jnp.zeros_like(acc_ref)

    acc_ref[...] += jnp.dot(
        x_ref[...].astype(w1_ref.dtype), w1_ref[...],
        preferred_element_type=jnp.float32)

    @pl.when(k == pl.num_programs(0) - 1)
    def _():
        h = jnp.maximum(acc_ref[...] + b1_ref[...], 0.0)          # f32 epilogue
        out = jnp.dot(h, w2_ref[...], preferred_element_type=jnp.float32)
        o_ref[...] = (out + b2_ref[...]).astype(o_ref.dtype)


def fused_fc(x, w1, b1_row, w2, b2_row):
    """out = relu(x @ w1 + b1) @ w2 + b2.

    x: (Mp, Kp) with Mp multiple of 8 and Kp multiple of FC1_TK (zero-padded);
    w1: (Kp, 512) pre-padded (optionally bf16); w2: (512, Np2) pre-padded."""
    mpad, kpadded = x.shape
    _, n1 = w1.shape
    _, n2 = w2.shape
    assert kpadded % FC1_TK == 0, (kpadded, FC1_TK)

    return pl.pallas_call(
        _fused_fc_kernel,
        out_shape=jax.ShapeDtypeStruct((mpad, n2), jnp.float32),
        grid_spec=pltpu.PrefetchScalarGridSpec(
            num_scalar_prefetch=0,
            grid=(kpadded // FC1_TK,),
            in_specs=[
                pl.BlockSpec((mpad, FC1_TK), lambda k: (0, k)),
                pl.BlockSpec((FC1_TK, n1), lambda k: (k, 0)),
                pl.BlockSpec((1, n1), lambda k: (0, 0)),
                pl.BlockSpec((n1, n2), lambda k: (0, 0)),
                pl.BlockSpec((1, n2), lambda k: (0, 0)),
            ],
            out_specs=pl.BlockSpec((mpad, n2), lambda k: (0, 0)),
            scratch_shapes=[pltpu.VMEM((mpad, n1), jnp.float32)],
        ),
        compiler_params=pltpu.CompilerParams(
            dimension_semantics=("arbitrary",),
            vmem_limit_bytes=32 * 1024 * 1024,
        ),
    )(x, w1, b1_row, w2, b2_row)


# ----------------------------------------------------------------------------
# BoxModel forward.
# ----------------------------------------------------------------------------
def box_model_forward(x_nchw, kp, *, num_actions):
    # NCHW (PyTorch) -> NHWC (channels in the lane dimension).
    x = jnp.transpose(x_nchw, (0, 2, 3, 1))

    x = conv2d_relu(x, kp["w1m"], kp["b1r"], ksize=8, stride=4)   # (B, 24, 36, 32)
    x = conv2d_relu(x, kp["w2m"], kp["b2r"], ksize=4, stride=2)   # (B, 11, 17, 64)
    x = conv2d_relu(x, kp["w3m"], kp["b3r"], ksize=3, stride=1)   # (B,  9, 15, 64)

    # Flatten in PyTorch NCHW order: (B, C, H, W) -> (B, C*H*W) = (B, 8640).
    B = x.shape[0]
    flat = jnp.transpose(x, (0, 3, 1, 2)).reshape(B, -1)

    # Tiny per-forward activation pad (batch -> sublane multiple, K -> padded K
    # of the pre-padded wf1); zero rows/cols contribute nothing.
    mpad = _round_up(B, 8)
    kpadded = kp["wf1"].shape[0]
    flat = jnp.pad(flat, ((0, mpad - B), (0, kpadded - flat.shape[1])))

    out = fused_fc(flat, kp["wf1"], kp["bf1"], kp["wf2"], kp["bf2"])
    return out[:B, :num_actions]


# ----------------------------------------------------------------------------
# Parameters: PyTorch-layout init + one-time kernel-ready preprocessing.
# ----------------------------------------------------------------------------
def init_params(key, num_actions):
    ks = jax.random.split(key, 10)

    def u(k, shape, fan_in):
        bound = 1.0 / float(fan_in) ** 0.5
        return jax.random.uniform(k, shape, jnp.float32, -bound, bound)

    return {
        # Conv2d(1, 32, k=8, s=4)
        "w1": u(ks[0], (32, 1, 8, 8), 1 * 8 * 8),
        "b1": u(ks[1], (32,), 1 * 8 * 8),
        # Conv2d(32, 64, k=4, s=2)
        "w2": u(ks[2], (64, 32, 4, 4), 32 * 4 * 4),
        "b2": u(ks[3], (64,), 32 * 4 * 4),
        # Conv2d(64, 64, k=3, s=1)
        "w3": u(ks[4], (64, 64, 3, 3), 64 * 3 * 3),
        "b3": u(ks[5], (64,), 64 * 3 * 3),
        # Linear(8640, 512)   (stored as (in, out); y = x @ W + b)
        "wf1": u(ks[6], (FC1_IN, FC1_HIDDEN), FC1_IN),
        "bf1": u(ks[7], (FC1_HIDDEN,), FC1_IN),
        # Linear(512, num_actions)
        "wf2": u(ks[8], (FC1_HIDDEN, num_actions), FC1_HIDDEN),
        "bf2": u(ks[9], (num_actions,), FC1_HIDDEN),
    }


def prepare_params(params, *, num_actions):
    """One-time, loop-invariant conversion of PyTorch-layout params into
    kernel-ready tensors (hoisted out of the forward pass)."""
    def conv_mat(w_oihw):
        oc, ic, kh, kw = w_oihw.shape
        # Row order (c, kh, kw) matches conv_general_dilated_patches features.
        return jnp.transpose(w_oihw, (1, 2, 3, 0)).reshape(ic * kh * kw, oc)

    na_p = _round_up(num_actions, 128)
    wf1p = jnp.pad(params["wf1"], ((0, FC1_KP - FC1_IN), (0, 0)))
    return {
        "w1m": conv_mat(params["w1"]), "b1r": params["b1"].reshape(1, -1),
        "w2m": conv_mat(params["w2"]), "b2r": params["b2"].reshape(1, -1),
        "w3m": conv_mat(params["w3"]), "b3r": params["b3"].reshape(1, -1),
        "wf1": wf1p.astype(FC1_WEIGHT_DTYPE),
        "bf1": params["bf1"].reshape(1, -1),
        "wf2": jnp.pad(params["wf2"], ((0, 0), (0, na_p - num_actions))),
        "bf2": jnp.pad(params["bf2"], ((0, na_p - num_actions),)).reshape(1, -1),
    }


if __name__ == "__main__":
    num_actions = 4
    key = jax.random.PRNGKey(0)
    k_params, k_x = jax.random.split(key)

    params = init_params(k_params, num_actions)
    kparams = jax.tree_util.tree_map(jnp.asarray,
                                     prepare_params(params, num_actions=num_actions))

    # Input: batch=2, 1 channel, 100x148 spatial (required by Linear(8640, 512)).
    x = jax.random.normal(k_x, (2, 1, 100, 148), dtype=jnp.float32)

    fwd = jax.jit(functools.partial(box_model_forward, num_actions=num_actions))
    out = fwd(x, kparams)
    out = jax.block_until_ready(out)

    assert out.shape == (2, num_actions), out.shape
    assert out.dtype == jnp.float32
    assert bool(jnp.all(jnp.isfinite(out)))
    print("KERNEL_OK")
</pallas_src>

<mosaic_0001>
module attributes {stable_mosaic.version = 11 : i64} {
  func.func @_conv_gemm_kernel(%arg0: i32, %arg1: memref<1728x64xf32, #tpu.memory_space<vmem>>, %arg2: memref<64x32xf32, #tpu.memory_space<vmem>>, %arg3: memref<1x32xf32, #tpu.memory_space<vmem>>, %arg4: memref<1728x32xf32, #tpu.memory_space<vmem>>) attributes {dimension_semantics = [#tpu.dimension_semantics<parallel>], iteration_bounds = array<i64: 1>, scalar_prefetch = 0 : i64, scratch_operands = 0 : i64, tpu.core_type = #tpu.core_type<tc>, window_params = [{transform_indices = @transform_0, window_bounds = array<i64: 1728, 64>}, {pipeline_mode = #tpu.pipeline_mode<synchronous>, transform_indices = @transform_1, window_bounds = array<i64: 64, 32>}, {pipeline_mode = #tpu.pipeline_mode<synchronous>, transform_indices = @transform_2, window_bounds = array<i64: 1, 32>}, {transform_indices = @transform_3, window_bounds = array<i64: 1728, 32>}]} {
    %c0 = arith.constant 0 : index
    %c0_0 = arith.constant 0 : index
    %0 = vector.load %arg1[%c0, %c0_0] : memref<1728x64xf32, #tpu.memory_space<vmem>>, vector<1728x64xf32>
    %c0_1 = arith.constant 0 : index
    %c0_2 = arith.constant 0 : index
    %1 = vector.load %arg2[%c0_1, %c0_2] : memref<64x32xf32, #tpu.memory_space<vmem>>, vector<64x32xf32>
    %cst = arith.constant dense<0.000000e+00> : vector<1728x32xf32>
    %2 = tpu.matmul %0, %1, %cst {dimension_numbers = #tpu.dot_dimension_numbers<[1], [0], [0], [1], [0, 0, 1, 1], [], []>} : vector<1728x64xf32>, vector<64x32xf32>, vector<1728x32xf32> -> vector<1728x32xf32>
    %c0_3 = arith.constant 0 : index
    %c0_4 = arith.constant 0 : index
    %3 = vector.load %arg3[%c0_3, %c0_4] : memref<1x32xf32, #tpu.memory_space<vmem>>, vector<1x32xf32>
    %4 = vector.broadcast %3 : vector<1x32xf32> to vector<1728x32xf32>
    %5 = arith.addf %2, %4 : vector<1728x32xf32>
    %cst_5 = arith.constant 0.000000e+00 : f32
    %6 = vector.broadcast %cst_5 : f32 to vector<1728x32xf32>
    %7 = arith.maximumf %5, %6 : vector<1728x32xf32>
    %c0_6 = arith.constant 0 : index
    %c0_7 = arith.constant 0 : index
    %8 = vector.load %arg4[%c0_6, %c0_7] : memref<1728x32xf32, #tpu.memory_space<vmem>>, vector<1728x32xf32>
    tpu.vector_store %arg4[%c0_6, %c0_7], %7 {strides = array<i32>} : memref<1728x32xf32, #tpu.memory_space<vmem>>, vector<1728x32xf32>,
    return
  }
  func.func @transform_0(%arg0: i32) -> (i32, i32) {
    %c0_i32 = arith.constant 0 : i32
    %c0_i32_0 = arith.constant 0 : i32
    return %arg0, %c0_i32 : i32, i32
  }
  func.func @transform_1(%arg0: i32) -> (i32, i32) {
    %c0_i32 = arith.constant 0 : i32
    %c0_i32_0 = arith.constant 0 : i32
    %c0_i32_1 = arith.constant 0 : i32
    return %c0_i32, %c0_i32_0 : i32, i32
  }
  func.func @transform_2(%arg0: i32) -> (i32, i32) {
    %c0_i32 = arith.constant 0 : i32
    %c0_i32_0 = arith.constant 0 : i32
    %c0_i32_1 = arith.constant 0 : i32
    return %c0_i32, %c0_i32_0 : i32, i32
  }
  func.func @transform_3(%arg0: i32) -> (i32, i32) {
    %c0_i32 = arith.constant 0 : i32
    %c0_i32_0 = arith.constant 0 : i32
    return %arg0, %c0_i32 : i32, i32
  }
}

module attributes {stable_mosaic.version = 11 : i64} {
  func.func @_conv_gemm_kernel(%arg0: i32, %arg1: memref<374x512xf32, #tpu.memory_space<vmem>>, %arg2: memref<512x64xf32, #tpu.memory_space<vmem>>, %arg3: memref<1x64xf32, #tpu.memory_space<vmem>>, %arg4: memref<374x64xf32, #tpu.memory_space<vmem>>) attributes {dimension_semantics = [#tpu.dimension_semantics<parallel>], iteration_bounds = array<i64: 1>, scalar_prefetch = 0 : i64, scratch_operands = 0 : i64, tpu.core_type = #tpu.core_type<tc>, window_params = [{transform_indices = @transform_0, window_bounds = array<i64: 374, 512>}, {pipeline_mode = #tpu.pipeline_mode<synchronous>, transform_indices = @transform_1, window_bounds = array<i64: 512, 64>}, {pipeline_mode = #tpu.pipeline_mode<synchronous>, transform_indices = @transform_2, window_bounds = array<i64: 1, 64>}, {transform_indices = @transform_3, window_bounds = array<i64: 374, 64>}]} {
    %c0 = arith.constant 0 : index
    %c0_0 = arith.constant 0 : index
    %0 = vector.load %arg1[%c0, %c0_0] : memref<374x512xf32, #tpu.memory_space<vmem>>, vector<374x512xf32>
    %c0_1 = arith.constant 0 : index
    %c0_2 = arith.constant 0 : index
    %1 = vector.load %arg2[%c0_1, %c0_2] : memref<512x64xf32, #tpu.memory_space<vmem>>, vector<512x64xf32>
    %cst = arith.constant dense<0.000000e+00> : vector<374x64xf32>
    %2 = tpu.matmul %0, %1, %cst {dimension_numbers = #tpu.dot_dimension_numbers<[1], [0], [0], [1], [0, 0, 1, 1], [], []>} : vector<374x512xf32>, vector<512x64xf32>, vector<374x64xf32> -> vector<374x64xf32>
    %c0_3 = arith.constant 0 : index
    %c0_4 = arith.constant 0 : index
    %3 = vector.load %arg3[%c0_3, %c0_4] : memref<1x64xf32, #tpu.memory_space<vmem>>, vector<1x64xf32>
    %4 = vector.broadcast %3 : vector<1x64xf32> to vector<374x64xf32>
    %5 = arith.addf %2, %4 : vector<374x64xf32>
    %cst_5 = arith.constant 0.000000e+00 : f32
    %6 = vector.broadcast %cst_5 : f32 to vector<374x64xf32>
    %7 = arith.maximumf %5, %6 : vector<374x64xf32>
    %c0_6 = arith.constant 0 : index
    %c0_7 = arith.constant 0 : index
    %8 = vector.load %arg4[%c0_6, %c0_7] : memref<374x64xf32, #tpu.memory_space<vmem>>, vector<374x64xf32>
    tpu.vector_store %arg4[%c0_6, %c0_7], %7 {strides = array<i32>} : memref<374x64xf32, #tpu.memory_space<vmem>>, vector<374x64xf32>,
    return
  }
  func.func @transform_0(%arg0: i32) -> (i32, i32) {
    %c0_i32 = arith.constant 0 : i32
    %c0_i32_0 = arith.constant 0 : i32
    return %arg0, %c0_i32 : i32, i32
  }
  func.func @transform_1(%arg0: i32) -> (i32, i32) {
    %c0_i32 = arith.constant 0 : i32
    %c0_i32_0 = arith.constant 0 : i32
    %c0_i32_1 = arith.constant 0 : i32
    return %c0_i32, %c0_i32_0 : i32, i32
  }
  func.func @transform_2(%arg0: i32) -> (i32, i32) {
    %c0_i32 = arith.constant 0 : i32
    %c0_i32_0 = arith.constant 0 : i32
    %c0_i32_1 = arith.constant 0 : i32
    return %c0_i32, %c0_i32_0 : i32, i32
  }
  func.func @transform_3(%arg0: i32) -> (i32, i32) {
    %c0_i32 = arith.constant 0 : i32
    %c0_i32_0 = arith.constant 0 : i32
    return %arg0, %c0_i32 : i32, i32
  }
}

module attributes {stable_mosaic.version = 11 : i64} {
  func.func @_conv_gemm_kernel(%arg0: i32, %arg1: memref<270x576xf32, #tpu.memory_space<vmem>>, %arg2: memref<576x64xf32, #tpu.memory_space<vmem>>, %arg3: memref<1x64xf32, #tpu.memory_space<vmem>>, %arg4: memref<270x64xf32, #tpu.memory_space<vmem>>) attributes {dimension_semantics = [#tpu.dimension_semantics<parallel>], iteration_bounds = array<i64: 1>, scalar_prefetch = 0 : i64, scratch_operands = 0 : i64, tpu.core_type = #tpu.core_type<tc>, window_params = [{transform_indices = @transform_0, window_bounds = array<i64: 270, 576>}, {pipeline_mode = #tpu.pipeline_mode<synchronous>, transform_indices = @transform_1, window_bounds = array<i64: 576, 64>}, {pipeline_mode = #tpu.pipeline_mode<synchronous>, transform_indices = @transform_2, window_bounds = array<i64: 1, 64>}, {transform_indices = @transform_3, window_bounds = array<i64: 270, 64>}]} {
    %c0 = arith.constant 0 : index
    %c0_0 = arith.constant 0 : index
    %0 = vector.load %arg1[%c0, %c0_0] : memref<270x576xf32, #tpu.memory_space<vmem>>, vector<270x576xf32>
    %c0_1 = arith.constant 0 : index
    %c0_2 = arith.constant 0 : index
    %1 = vector.load %arg2[%c0_1, %c0_2] : memref<576x64xf32, #tpu.memory_space<vmem>>, vector<576x64xf32>
    %cst = arith.constant dense<0.000000e+00> : vector<270x64xf32>
    %2 = tpu.matmul %0, %1, %cst {dimension_numbers = #tpu.dot_dimension_numbers<[1], [0], [0], [1], [0, 0, 1, 1], [], []>} : vector<270x576xf32>, vector<576x64xf32>, vector<270x64xf32> -> vector<270x64xf32>
    %c0_3 = arith.constant 0 : index
    %c0_4 = arith.constant 0 : index
    %3 = vector.load %arg3[%c0_3, %c0_4] : memref<1x64xf32, #tpu.memory_space<vmem>>, vector<1x64xf32>
    %4 = vector.broadcast %3 : vector<1x64xf32> to vector<270x64xf32>
    %5 = arith.addf %2, %4 : vector<270x64xf32>
    %cst_5 = arith.constant 0.000000e+00 : f32
    %6 = vector.broadcast %cst_5 : f32 to vector<270x64xf32>
    %7 = arith.maximumf %5, %6 : vector<270x64xf32>
    %c0_6 = arith.constant 0 : index
    %c0_7 = arith.constant 0 : index
    %8 = vector.load %arg4[%c0_6, %c0_7] : memref<270x64xf32, #tpu.memory_space<vmem>>, vector<270x64xf32>
    tpu.vector_store %arg4[%c0_6, %c0_7], %7 {strides = array<i32>} : memref<270x64xf32, #tpu.memory_space<vmem>>, vector<270x64xf32>,
    return
  }
  func.func @transform_0(%arg0: i32) -> (i32, i32) {
    %c0_i32 = arith.constant 0 : i32
    %c0_i32_0 = arith.constant 0 : i32
    return %arg0, %c0_i32 : i32, i32
  }
  func.func @transform_1(%arg0: i32) -> (i32, i32) {
    %c0_i32 = arith.constant 0 : i32
    %c0_i32_0 = arith.constant 0 : i32
    %c0_i32_1 = arith.constant 0 : i32
    return %c0_i32, %c0_i32_0 : i32, i32
  }
  func.func @transform_2(%arg0: i32) -> (i32, i32) {
    %c0_i32 = arith.constant 0 : i32
    %c0_i32_0 = arith.constant 0 : i32
    %c0_i32_1 = arith.constant 0 : i32
    return %c0_i32, %c0_i32_0 : i32, i32
  }
  func.func @transform_3(%arg0: i32) -> (i32, i32) {
    %c0_i32 = arith.constant 0 : i32
    %c0_i32_0 = arith.constant 0 : i32
    return %arg0, %c0_i32 : i32, i32
  }
}

module attributes {stable_mosaic.version = 11 : i64} {
  func.func @_fused_fc_kernel(%arg0: i32, %arg1: memref<8x2176xf32, #tpu.memory_space<vmem>>, %arg2: memref<2176x512xbf16, #tpu.memory_space<vmem>>, %arg3: memref<1x512xf32, #tpu.memory_space<vmem>>, %arg4: memref<512x128xf32, #tpu.memory_space<vmem>>, %arg5: memref<1x128xf32, #tpu.memory_space<vmem>>, %arg6: memref<8x128xf32, #tpu.memory_space<vmem>>, %arg7: memref<8x512xf32, #tpu.memory_space<vmem>>) attributes {dimension_semantics = [#tpu.dimension_semantics<arbitrary>], iteration_bounds = array<i64: 4>, scalar_prefetch = 0 : i64, scratch_operands = 1 : i64, tpu.core_type = #tpu.core_type<tc>, window_params = [{transform_indices = @transform_0, window_bounds = array<i64: 8, 2176>}, {transform_indices = @transform_1, window_bounds = array<i64: 2176, 512>}, {pipeline_mode = #tpu.pipeline_mode<synchronous>, transform_indices = @transform_2, window_bounds = array<i64: 1, 512>}, {pipeline_mode = #tpu.pipeline_mode<synchronous>, transform_indices = @transform_3, window_bounds = array<i64: 512, 128>}, {pipeline_mode = #tpu.pipeline_mode<synchronous>, transform_indices = @transform_4, window_bounds = array<i64: 1, 128>}, {pipeline_mode = #tpu.pipeline_mode<synchronous>, transform_indices = @transform_5, window_bounds = array<i64: 8, 128>}]} {
    %c0_i32 = arith.constant 0 : i32
    %0 = arith.cmpi eq, %arg0, %c0_i32 : i32
    %1 = arith.extui %0 : i1 to i32
    %c0_i32_0 = arith.constant 0 : i32
    %2 = arith.cmpi ne, %1, %c0_i32_0 : i32
    scf.if %2 {
      %cst_9 = arith.constant 0.000000e+00 : f32
      %13 = vector.broadcast %cst_9 : f32 to vector<8x512xf32>
      %c0_10 = arith.constant 0 : index
      %c0_11 = arith.constant 0 : index
      %14 = vector.load %arg7[%c0_10, %c0_11] : memref<8x512xf32, #tpu.memory_space<vmem>>, vector<8x512xf32>
      tpu.vector_store %arg7[%c0_10, %c0_11], %13 {strides = array<i32>} : memref<8x512xf32, #tpu.memory_space<vmem>>, vector<8x512xf32>,
    } else {
    }
    %c0 = arith.constant 0 : index
    %c0_1 = arith.constant 0 : index
    %3 = vector.load %arg7[%c0, %c0_1] : memref<8x512xf32, #tpu.memory_space<vmem>>, vector<8x512xf32>
    %c0_2 = arith.constant 0 : index
    %c0_3 = arith.constant 0 : index
    %4 = vector.load %arg1[%c0_2, %c0_3] : memref<8x2176xf32, #tpu.memory_space<vmem>>, vector<8x2176xf32>
    %5 = arith.truncf %4 : vector<8x2176xf32> to vector<8x2176xbf16>
    %c0_4 = arith.constant 0 : index
    %c0_5 = arith.constant 0 : index
    %6 = vector.load %arg2[%c0_4, %c0_5] : memref<2176x512xbf16, #tpu.memory_space<vmem>>, vector<2176x512xbf16>
    %cst = arith.constant dense<0.000000e+00> : vector<8x512xf32>
    %7 = tpu.matmul %5, %6, %cst {dimension_numbers = #tpu.dot_dimension_numbers<[1], [0], [0], [1], [0, 0, 1, 1], [], []>} : vector<8x2176xbf16>, vector<2176x512xbf16>, vector<8x512xf32> -> vector<8x512xf32>
    %8 = arith.addf %3, %7 : vector<8x512xf32>
    %c0_6 = arith.constant 0 : index
    %c0_7 = arith.constant 0 : index
    %9 = vector.load %arg7[%c0_6, %c0_7] : memref<8x512xf32, #tpu.memory_space<vmem>>, vector<8x512xf32>
    tpu.vector_store %arg7[%c0_6, %c0_7], %8 {strides = array<i32>} : memref<8x512xf32, #tpu.memory_space<vmem>>, vector<8x512xf32>,
    %c3_i32 = arith.constant 3 : i32
    %10 = arith.cmpi eq, %arg0, %c3_i32 : i32
    %11 = arith.extui %10 : i1 to i32
    %c0_i32_8 = arith.constant 0 : i32
    %12 = arith.cmpi ne, %11, %c0_i32_8 : i32
    scf.if %12 {
      %c0_9 = arith.constant 0 : index
      %c0_10 = arith.constant 0 : index
      %13 = vector.load %arg7[%c0_9, %c0_10] : memref<8x512xf32, #tpu.memory_space<vmem>>, vector<8x512xf32>
      %c0_11 = arith.constant 0 : index
      %c0_12 = arith.constant 0 : index
      %14 = vector.load %arg3[%c0_11, %c0_12] : memref<1x512xf32, #tpu.memory_space<vmem>>, vector<1x512xf32>
      %15 = vector.broadcast %14 : vector<1x512xf32> to vector<8x512xf32>
      %16 = arith.addf %13, %15 : vector<8x512xf32>
      %cst_13 = arith.constant 0.000000e+00 : f32
      %17 = vector.broadcast %cst_13 : f32 to vector<8x512xf32>
      %18 = arith.maximumf %16, %17 : vector<8x512xf32>
      %c0_14 = arith.constant 0 : index
      %c0_15 = arith.constant 0 : index
      %19 = vector.load %arg4[%c0_14, %c0_15] : memref<512x128xf32, #tpu.memory_space<vmem>>, vector<512x128xf32>
      %cst_16 = arith.constant dense<0.000000e+00> : vector<8x128xf32>
      %20 = tpu.matmul %18, %19, %cst_16 {dimension_numbers = #tpu.dot_dimension_numbers<[1], [0], [0], [1], [0, 0, 1, 1], [], []>} : vector<8x512xf32>, vector<512x128xf32>, vector<8x128xf32> -> vector<8x128xf32>
      %c0_17 = arith.constant 0 : index
      %c0_18 = arith.constant 0 : index
      %21 = vector.load %arg5[%c0_17, %c0_18] : memref<1x128xf32, #tpu.memory_space<vmem>>, vector<1x128xf32>
      %22 = vector.broadcast %21 : vector<1x128xf32> to vector<8x128xf32>
      %23 = arith.addf %20, %22 : vector<8x128xf32>
      %c0_19 = arith.constant 0 : index
      %c0_20 = arith.constant 0 : index
      %24 = vector.load %arg6[%c0_19, %c0_20] : memref<8x128xf32, #tpu.memory_space<vmem>>, vector<8x128xf32>
      tpu.vector_store %arg6[%c0_19, %c0_20], %23 {strides = array<i32>} : memref<8x128xf32, #tpu.memory_space<vmem>>, vector<8x128xf32>,
    } else {
    }
    return
  }
  func.func @transform_0(%arg0: i32) -> (i32, i32) {
    %c0_i32 = arith.constant 0 : i32
    %c0_i32_0 = arith.constant 0 : i32
    return %c0_i32, %arg0 : i32, i32
  }
  func.func @transform_1(%arg0: i32) -> (i32, i32) {
    %c0_i32 = arith.constant 0 : i32
    %c0_i32_0 = arith.constant 0 : i32
    return %arg0, %c0_i32 : i32, i32
  }
  func.func @transform_2(%arg0: i32) -> (i32, i32) {
    %c0_i32 = arith.constant 0 : i32
    %c0_i32_0 = arith.constant 0 : i32
    %c0_i32_1 = arith.constant 0 : i32
    return %c0_i32, %c0_i32_0 : i32, i32
  }
  func.func @transform_3(%arg0: i32) -> (i32, i32) {
    %c0_i32 = arith.constant 0 : i32
    %c0_i32_0 = arith.constant 0 : i32
    %c0_i32_1 = arith.constant 0 : i32
    return %c0_i32, %c0_i32_0 : i32, i32
  }
  func.func @transform_4(%arg0: i32) -> (i32, i32) {
    %c0_i32 = arith.constant 0 : i32
    %c0_i32_0 = arith.constant 0 : i32
    %c0_i32_1 = arith.constant 0 : i32
    return %c0_i32, %c0_i32_0 : i32, i32
  }
  func.func @transform_5(%arg0: i32) -> (i32, i32) {
    %c0_i32 = arith.constant 0 : i32
    %c0_i32_0 = arith.constant 0 : i32
    %c0_i32_1 = arith.constant 0 : i32
    return %c0_i32, %c0_i32_0 : i32, i32
  }
}

</mosaic_0001>

<bundles_post_ra>
// kernel: box_model_forward.4
= control target key start
LH: loop header
LB: loop body
LE: loop exit
PB: predicated region body
PF: predicated region fallthrough
CT: control target
= control target key end

     0   :  { %vm242_vm0 = vcmask 523264   ;;  %vm1772_vm1 = vcmask 261120   ;;  %s4239_s1 = inlined_call_operand.vmem [shape: f32[64,32], index: 1, kind: input, shape index: {}]   ;;  %s4240_s0 = inlined_call_operand.vmem [shape: f32[1728,64], index: 0, kind: input, shape index: {}]   ;;  %s4241_s2 = inlined_call_operand.vmem [shape: f32[1,32], index: 2, kind: input, shape index: {}]   ;;  %s4242_s3 = inlined_call_operand.vmem [shape: f32[1728,32], index: 3, kind: output, shape index: {}]  }
   0x1   :  { %v237_v0 = vld [vmem:[%s4239_s1 + $0x38] sm:$0xff]  ;;  %v236_v1 = vld [vmem:[%s4239_s1 + $0x30] sm:$0xff]  ;;  %v235_v2 = vld [vmem:[%s4239_s1 + $0x28] sm:$0xff] }
   0x2   :  { %2210 = vmatpush.msra.mxu2 %v237_v0  ;;  %2211 = vmatpush.msra.mxu3 %v237_v0  ;;  %v234_v3 = vld [vmem:[%s4239_s1 + $0x20] sm:$0xff]  ;;  %v233_v4 = vld [vmem:[%s4239_s1 + $0x18] sm:$0xff]  ;;  %v232_v5 = vld [vmem:[%s4239_s1 + $0x10] sm:$0xff] }
   0x3   :  { %899 = vmatpush.msra.mxu0 %v237_v0  ;;  %2209 = vmatpush.msra.mxu1 %v237_v0  ;;  %v231_v6 = vld [vmem:[%s4239_s1 + $0x8] sm:$0xff]  ;;  %v230_v7 = vld [vmem:[%s4239_s1] sm:$0xff]  ;;  %v176_v9 = vld [vmem:[%s4240_s0 + $0x510] sm:$0xff] }
   0x4   :  { %2213 = vmatpush.msra.mxu2 %v236_v1  ;;  %2214 = vmatpush.msra.mxu3 %v236_v1  ;;  %v122_v8 = vld [vmem:[%s4240_s0 + $0x360] sm:$0xff]  ;;  %v68_v11 = vld [vmem:[%s4240_s0 + $0x1b0] sm:$0xff]  ;;  %v123_v12 = vld [vmem:[%s4240_s0 + $0x368] sm:$0xff] }
   0x5   :  { %900 = vmatpush.msra.mxu0 %v236_v1  ;;  %2212 = vmatpush.msra.mxu1 %v236_v1  ;;  %v14_v10 = vld [vmem:[%s4240_s0] sm:$0xff]  ;;  %v177_v13 = vld [vmem:[%s4240_s0 + $0x518] sm:$0xff]  ;;  %v15_v14 = vld [vmem:[%s4240_s0 + $0x8] sm:$0xff] }
   0x6   :  { %2216 = vmatpush.msra.mxu2 %v235_v2  ;;  %2217 = vmatpush.msra.mxu3 %v235_v2  ;;  %v69_v15 = vld [vmem:[%s4240_s0 + $0x1b8] sm:$0xff]  ;;  %v124_v16 = vld [vmem:[%s4240_s0 + $0x370] sm:$0xff]  ;;  %v178_v17 = vld [vmem:[%s4240_s0 + $0x520] sm:$0xff] }
   0x7   :  { %901 = vmatpush.msra.mxu0 %v235_v2  ;;  %2215 = vmatpush.msra.mxu1 %v235_v2  ;;  %v16_v18 = vld [vmem:[%s4240_s0 + $0x10] sm:$0xff]  ;;  %v70_v19 = vld [vmem:[%s4240_s0 + $0x1c0] sm:$0xff]  ;;  %v125_v20 = vld [vmem:[%s4240_s0 + $0x378] sm:$0xff] }
   0x8   :  { %2219 = vmatpush.msra.mxu2 %v234_v3  ;;  %2220 = vmatpush.msra.mxu3 %v234_v3  ;;  %v179_v21 = vld [vmem:[%s4240_s0 + $0x528] sm:$0xff]  ;;  %v17_v22 = vld [vmem:[%s4240_s0 + $0x18] sm:$0xff]  ;;  %v126_v24 = vld [vmem:[%s4240_s0 + $0x380] sm:$0xff] }
   0x9   :  { %902 = vmatpush.msra.mxu0 %v234_v3  ;;  %2218 = vmatpush.msra.mxu1 %v234_v3  ;;  %v71_v23 = vld [vmem:[%s4240_s0 + $0x1c8] sm:$0xff]  ;;  %v180_v25 = vld [vmem:[%s4240_s0 + $0x530] sm:$0xff]  ;;  %v18_v26 = vld [vmem:[%s4240_s0 + $0x20] sm:$0xff] }
   0xa   :  { %2222 = vmatpush.msra.mxu2 %v233_v4  ;;  %2223 = vmatpush.msra.mxu3 %v233_v4  ;;  %v72_v27 = vld [vmem:[%s4240_s0 + $0x1d0] sm:$0xff]  ;;  %v127_v28 = vld [vmem:[%s4240_s0 + $0x388] sm:$0xff]  ;;  %v181_v29 = vld [vmem:[%s4240_s0 + $0x538] sm:$0xff] }
   0xb   :  { %903 = vmatpush.msra.mxu0 %v233_v4  ;;  %2221 = vmatpush.msra.mxu1 %v233_v4  ;;  %v19_v30 = vld [vmem:[%s4240_s0 + $0x28] sm:$0xff]  ;;  %v73_v31 = vld [vmem:[%s4240_s0 + $0x1d8] sm:$0xff]  ;;  %v128_v32 = vld [vmem:[%s4240_s0 + $0x390] sm:$0xff] }
   0xc   :  { %2225 = vmatpush.msra.mxu2 %v232_v5  ;;  %2226 = vmatpush.msra.mxu3 %v232_v5  ;;  %v182_v33 = vld [vmem:[%s4240_s0 + $0x540] sm:$0xff]  ;;  %v20_v34 = vld [vmem:[%s4240_s0 + $0x30] sm:$0xff]  ;;  %v129_v36 = vld [vmem:[%s4240_s0 + $0x398] sm:$0xff] }
   0xd   :  { %904 = vmatpush.msra.mxu0 %v232_v5  ;;  %2224 = vmatpush.msra.mxu1 %v232_v5  ;;  %v74_v35 = vld [vmem:[%s4240_s0 + $0x1e0] sm:$0xff]  ;;  %v183_v37 = vld [vmem:[%s4240_s0 + $0x548] sm:$0xff]  ;;  %v21_v38 = vld [vmem:[%s4240_s0 + $0x38] sm:$0xff] }
   0xe   :  { %2228 = vmatpush.msra.mxu2 %v231_v6  ;;  %2229 = vmatpush.msra.mxu3 %v231_v6  ;;  %v75_v39 = vld [vmem:[%s4240_s0 + $0x1e8] sm:$0xff]  ;;  %v130_v40 = vld [vmem:[%s4240_s0 + $0x3a0] sm:$0xff]  ;;  %v184_v41 = vld [vmem:[%s4240_s0 + $0x550] sm:$0xff] }
   0xf   :  { %905 = vmatpush.msra.mxu0 %v231_v6  ;;  %2227 = vmatpush.msra.mxu1 %v231_v6  ;;  %v22_v42 = vld [vmem:[%s4240_s0 + $0x40] sm:$0xff]  ;;  %v76_v43 = vld [vmem:[%s4240_s0 + $0x1f0] sm:$0xff]  ;;  %v131_v44 = vld [vmem:[%s4240_s0 + $0x3a8] sm:$0xff] }
  0x10   :  { %2231 = vmatpush.msra.mxu2 %v230_v7  ;;  %2232 = vmatpush.msra.mxu3 %v230_v7  ;;  %v185_v45 = vld [vmem:[%s4240_s0 + $0x558] sm:$0xff]  ;;  %v23_v46 = vld [vmem:[%s4240_s0 + $0x48] sm:$0xff]  ;;  %v132_v48 = vld [vmem:[%s4240_s0 + $0x3b0] sm:$0xff] }
  0x11   :  { %2101 = vmatmul.msk.f32.vlgmr.msra.gmra.mxu2 %vm242_vm0, %v122_v8  ;;  %2155 = vmatmul.msk.f32.vlgmr.msra.gmra.mxu3 %vm242_vm0, %v176_v9  ;;  %v77_v47 = vld [vmem:[%s4240_s0 + $0x1f8] sm:$0xff]  ;;  %v186_v49 = vld [vmem:[%s4240_s0 + $0x560] sm:$0xff]  ;;  %v24_v50 = vld [vmem:[%s4240_s0 + $0x50] sm:$0xff] }
  0x12   :  { %906 = vmatpush.msra.mxu0 %v230_v7  ;;  %2230 = vmatpush.msra.mxu1 %v230_v7  ;;  %v78_v51 = vld [vmem:[%s4240_s0 + $0x200] sm:$0xff]  ;;  %v133_v52 = vld [vmem:[%s4240_s0 + $0x3b8] sm:$0xff]  ;;  %v187_v53 = vld [vmem:[%s4240_s0 + $0x568] sm:$0xff] }
  0x13   :  { %1993 = vmatmul.msk.f32.vlgmr.msra.gmra.mxu0 %vm242_vm0, %v14_v10  ;;  %2047 = vmatmul.msk.f32.vlgmr.msra.gmra.mxu1 %vm242_vm0, %v68_v11  ;;  %v25_v54 = vld [vmem:[%s4240_s0 + $0x58] sm:$0xff]  ;;  %v79_v55 = vld [vmem:[%s4240_s0 + $0x208] sm:$0xff]  ;;  %v134_v56 = vld [vmem:[%s4240_s0 + $0x3c0] sm:$0xff] }
  0x14   :  { %v188_v57 = vld [vmem:[%s4240_s0 + $0x570] sm:$0xff]  ;;  %v26_v58 = vld [vmem:[%s4240_s0 + $0x60] sm:$0xff]  ;;  %v135_v60 = vld [vmem:[%s4240_s0 + $0x3c8] sm:$0xff] }
  0x15   :  { %v80_v59 = vld [vmem:[%s4240_s0 + $0x210] sm:$0xff]  ;;  %v189_v61 = vld [vmem:[%s4240_s0 + $0x578] sm:$0xff]  ;;  %v27_v62 = vld [vmem:[%s4240_s0 + $0x68] sm:$0xff] }
  0x16   :  { %v81_v63 = vld [vmem:[%s4240_s0 + $0x218] sm:$0xff]  ;;  %v136_v0 = vld [vmem:[%s4240_s0 + $0x3d0] sm:$0xff]  ;;  %v190_v1 = vld [vmem:[%s4240_s0 + $0x580] sm:$0xff] }
  0x17   :  { %v28_v2 = vld [vmem:[%s4240_s0 + $0x70] sm:$0xff]  ;;  %v82_v3 = vld [vmem:[%s4240_s0 + $0x220] sm:$0xff]  ;;  %v137_v4 = vld [vmem:[%s4240_s0 + $0x3d8] sm:$0xff] }
  0x18   :  { %v191_v5 = vld [vmem:[%s4240_s0 + $0x588] sm:$0xff]  ;;  %v29_v6 = vld [vmem:[%s4240_s0 + $0x78] sm:$0xff]  ;;  %v2539_v8 = vld [vmem:[%s4241_s2] ss:$0 sm:$0xff] }
  0x19   :  { %2102 = vmatmul.msk.f32.gmra.mxu2 %vm242_vm0, %v123_v12  ;;  %2156 = vmatmul.msk.f32.gmra.mxu3 %vm242_vm0, %v177_v13  ;;  %v83_v7 = vld [vmem:[%s4240_s0 + $0x228] sm:$0xff]  ;;  %v138_v9 = vld [vmem:[%s4240_s0 + $0x3e0] sm:$0xff]  ;;  %v192_v10 = vld [vmem:[%s4240_s0 + $0x590] sm:$0xff] }
  0x1a   :  { %v30_v13 = vld [vmem:[%s4240_s0 + $0x80] sm:$0xff] }
  0x1b   :  { %1994 = vmatmul.msk.f32.gmra.mxu0 %vm242_vm0, %v15_v14  ;;  %2048 = vmatmul.msk.f32.gmra.mxu1 %vm242_vm0, %v69_v15  ;;  %v84_v14 = vld [vmem:[%s4240_s0 + $0x230] sm:$0xff] }
  0x21   :  { %2103 = vmatmul.msk.f32.gmra.mxu2 %vm242_vm0, %v124_v16  ;;  %2157 = vmatmul.msk.f32.gmra.mxu3 %vm242_vm0, %v178_v17 }
  0x23   :  { %1995 = vmatmul.msk.f32.gmra.mxu0 %vm242_vm0, %v16_v18  ;;  %2049 = vmatmul.msk.f32.gmra.mxu1 %vm242_vm0, %v70_v19 }
  0x29   :  { %2104 = vmatmul.msk.f32.gmra.mxu2 %vm242_vm0, %v125_v20  ;;  %2158 = vmatmul.msk.f32.gmra.mxu3 %vm242_vm0, %v179_v21 }
  0x2b   :  { %1996 = vmatmul.msk.f32.gmra.mxu0 %vm242_vm0, %v17_v22  ;;  %2050 = vmatmul.msk.f32.gmra.mxu1 %vm242_vm0, %v71_v23  ;;  %v139_v23 = vld [vmem:[%s4240_s0 + $0x3e8] sm:$0xff] }
  0x31   :  { %2105 = vmatmul.msk.f32.gmra.mxu2 %vm242_vm0, %v126_v24  ;;  %2159 = vmatmul.msk.f32.gmra.mxu3 %vm242_vm0, %v180_v25  ;;  %v193_v24 = vld [vmem:[%s4240_s0 + $0x598] sm:$0xff] }
  0x33   :  { %1997 = vmatmul.msk.f32.gmra.mxu0 %vm242_vm0, %v18_v26  ;;  %2051 = vmatmul.msk.f32.gmra.mxu1 %vm242_vm0, %v72_v27 }
  0x39   :  { %2106 = vmatmul.msk.f32.gmra.mxu2 %vm242_vm0, %v127_v28  ;;  %2160 = vmatmul.msk.f32.gmra.mxu3 %vm242_vm0, %v181_v29  ;;  %v31_v29 = vld [vmem:[%s4240_s0 + $0x88] sm:$0xff] }
  0x3b   :  { %1998 = vmatmul.msk.f32.gmra.mxu0 %vm242_vm0, %v19_v30  ;;  %2052 = vmatmul.msk.f32.gmra.mxu1 %vm242_vm0, %v73_v31  ;;  %v85_v30 = vld [vmem:[%s4240_s0 + $0x238] sm:$0xff] }
  0x41   :  { %2107 = vmatmul.msk.f32.gmra.mxu2 %vm242_vm0, %v128_v32  ;;  %2161 = vmatmul.msk.f32.gmra.mxu3 %vm242_vm0, %v182_v33 }
  0x43   :  { %1999 = vmatmul.msk.f32.gmra.mxu0 %vm242_vm0, %v20_v34  ;;  %2053 = vmatmul.msk.f32.gmra.mxu1 %vm242_vm0, %v74_v35 }
  0x49   :  { %2108 = vmatmul.msk.f32.gmra.mxu2 %vm242_vm0, %v129_v36  ;;  %2162 = vmatmul.msk.f32.gmra.mxu3 %vm242_vm0, %v183_v37 }
  0x4b   :  { %2000 = vmatmul.msk.f32.gmra.mxu0 %vm242_vm0, %v21_v38  ;;  %2054 = vmatmul.msk.f32.gmra.mxu1 %vm242_vm0, %v75_v39  ;;  %v140_v39 = vld [vmem:[%s4240_s0 + $0x3f0] sm:$0xff] }
  0x51   :  { %2109 = vmatmul.msk.f32.gmra.mxu2 %vm242_vm0, %v130_v40  ;;  %2163 = vmatmul.msk.f32.gmra.mxu3 %vm242_vm0, %v184_v41  ;;  %v194_v40 = vld [vmem:[%s4240_s0 + $0x5a0] sm:$0xff] }
  0x53   :  { %2001 = vmatmul.msk.f32.gmra.mxu0 %vm242_vm0, %v22_v42  ;;  %2055 = vmatmul.msk.f32.gmra.mxu1 %vm242_vm0, %v76_v43 }
  0x59   :  { %2110 = vmatmul.msk.f32.gmra.mxu2 %vm242_vm0, %v131_v44  ;;  %2164 = vmatmul.msk.f32.gmra.mxu3 %vm242_vm0, %v185_v45  ;;  %v32_v45 = vld [vmem:[%s4240_s0 + $0x90] sm:$0xff] }
  0x5b   :  { %2002 = vmatmul.msk.f32.gmra.mxu0 %vm242_vm0, %v23_v46  ;;  %2056 = vmatmul.msk.f32.gmra.mxu1 %vm242_vm0, %v77_v47  ;;  %v86_v46 = vld [vmem:[%s4240_s0 + $0x240] sm:$0xff] }
  0x61   :  { %2111 = vmatmul.msk.f32.gmra.mxu2 %vm242_vm0, %v132_v48  ;;  %2165 = vmatmul.msk.f32.gmra.mxu3 %vm242_vm0, %v186_v49 }
  0x63   :  { %2003 = vmatmul.msk.f32.gmra.mxu0 %vm242_vm0, %v24_v50  ;;  %2057 = vmatmul.msk.f32.gmra.mxu1 %vm242_vm0, %v78_v51 }
  0x69   :  { %2112 = vmatmul.msk.f32.gmra.mxu2 %vm242_vm0, %v133_v52  ;;  %2166 = vmatmul.msk.f32.gmra.mxu3 %vm242_vm0, %v187_v53 }
  0x6b   :  { %2004 = vmatmul.msk.f32.gmra.mxu0 %vm242_vm0, %v25_v54  ;;  %2058 = vmatmul.msk.f32.gmra.mxu1 %vm242_vm0, %v79_v55  ;;  %v141_v55 = vld [vmem:[%s4240_s0 + $0x3f8] sm:$0xff] }
  0x71   :  { %2113 = vmatmul.msk.f32.gmra.mxu2 %vm242_vm0, %v134_v56  ;;  %2167 = vmatmul.msk.f32.gmra.mxu3 %vm242_vm0, %v188_v57  ;;  %v195_v56 = vld [vmem:[%s4240_s0 + $0x5a8] sm:$0xff] }
  0x73   :  { %2005 = vmatmul.msk.f32.gmra.mxu0 %vm242_vm0, %v26_v58  ;;  %2059 = vmatmul.msk.f32.gmra.mxu1 %vm242_vm0, %v80_v59 }
  0x79   :  { %2114 = vmatmul.msk.f32.gmra.mxu2 %vm242_vm0, %v135_v60  ;;  %2168 = vmatmul.msk.f32.gmra.mxu3 %vm242_vm0, %v189_v61  ;;  %v33_v61 = vld [vmem:[%s4240_s0 + $0x98] sm:$0xff] }
  0x7b   :  { %2006 = vmatmul.msk.f32.gmra.mxu0 %vm242_vm0, %v27_v62  ;;  %2060 = vmatmul.msk.f32.gmra.mxu1 %vm242_vm0, %v81_v63  ;;  %v87_v62 = vld [vmem:[%s4240_s0 + $0x248] sm:$0xff] }
  0x81   :  { %2115 = vmatmul.msk.f32.gmra.mxu2 %vm242_vm0, %v136_v0  ;;  %2169 = vmatmul.msk.f32.gmra.mxu3 %vm242_vm0, %v190_v1 }
  0x83   :  { %2007 = vmatmul.msk.f32.gmra.mxu0 %vm242_vm0, %v28_v2  ;;  %2061 = vmatmul.msk.f32.gmra.mxu1 %vm242_vm0, %v82_v3 }
  0x89   :  { %2116 = vmatmul.msk.f32.gmra.mxu2 %vm242_vm0, %v137_v4  ;;  %2170 = vmatmul.msk.f32.gmra.mxu3 %vm242_vm0, %v191_v5 }
  0x8b   :  { %2008 = vmatmul.msk.f32.gmra.mxu0 %vm242_vm0, %v29_v6  ;;  %2062 = vmatmul.msk.f32.gmra.mxu1 %vm242_vm0, %v83_v7  ;;  %v142_v7 = vld [vmem:[%s4240_s0 + $0x400] sm:$0xff] }
  0x90   :  { %v908_v11 = vpop.f32.mrf.mxu0  ;;  %v1070_v12 = vpop.f32.mrf.mxu1 }
  0x91   :  { %2117 = vmatmul.msk.f32.gmra.mxu2 %vm242_vm0, %v138_v9  ;;  %2171 = vmatmul.msk.f32.gmra.mxu3 %vm242_vm0, %v192_v10  ;;  %v909_v15 = vadd.f32 %v2539_v8, %v908_v11  ;;  %v1071_v16 = vadd.f32 %v2539_v8, %v1070_v12  ;;  %v196_v9 = vld [vmem:[%s4240_s0 + $0x5b0] sm:$0xff] }
  0x93   :  { %v1556_v17 = vmax.f32 %v909_v15, 0.0  ;;  %v1610_v18 = vmax.f32 %v1071_v16, 0.0  ;;  %2009 = vmatmul.msk.f32.gmra.mxu0 %vm242_vm0, %v30_v13  ;;  %2063 = vmatmul.msk.f32.gmra.mxu1 %vm242_vm0, %v84_v14  ;;  %v34_v14 = vld [vmem:[%s4240_s0 + $0xa0] sm:$0xff]  ;;  %v88_v15 = vld [vmem:[%s4240_s0 + $0x250] sm:$0xff] }
  0x94   :  { %v1232_v19 = vpop.f32.mrf.mxu2  ;;  %v1394_v20 = vpop.f32.mrf.mxu3 }
  0x95   :  { %1773 = vst.msk [vmem:[%s4242_s3] sm:$0xff] %vm1772_vm1, %v1556_v17  ;;  %v1233_v21 = vadd.f32 %v2539_v8, %v1232_v19  ;;  %v1395_v22 = vadd.f32 %v2539_v8, %v1394_v20 }
  0x96   :  { %1827 = vst.msk [vmem:[%s4242_s3 + $0x1b0] sm:$0xff] %vm1772_vm1, %v1610_v18 }
  0x97   :  { %v1664_v25 = vmax.f32 %v1233_v21, 0.0  ;;  %v1718_v26 = vmax.f32 %v1395_v22, 0.0 }
  0x98   :  { %v911_v27 = vpop.f32.mrf.mxu0  ;;  %v1073_v28 = vpop.f32.mrf.mxu1 }
  0x99   :  { %1881 = vst.msk [vmem:[%s4242_s3 + $0x360] sm:$0xff] %vm1772_vm1, %v1664_v25  ;;  %2118 = vmatmul.msk.f32.gmra.mxu2 %vm242_vm0, %v139_v23  ;;  %2172 = vmatmul.msk.f32.gmra.mxu3 %vm242_vm0, %v193_v24  ;;  %v912_v31 = vadd.f32 %v2539_v8, %v911_v27  ;;  %v1074_v32 = vadd.f32 %v2539_v8, %v1073_v28  ;;  %v143_v24 = vld [vmem:[%s4240_s0 + $0x408] sm:$0xff]  ;;  %v197_v25 = vld [vmem:[%s4240_s0 + $0x5b8] sm:$0xff] }
  0x9a   :  { %1935 = vst.msk [vmem:[%s4242_s3 + $0x510] sm:$0xff] %vm1772_vm1, %v1718_v26 }
  0x9b   :  { %v1557_v33 = vmax.f32 %v912_v31, 0.0  ;;  %v1611_v34 = vmax.f32 %v1074_v32, 0.0  ;;  %2010 = vmatmul.msk.f32.gmra.mxu0 %vm242_vm0, %v31_v29  ;;  %2064 = vmatmul.msk.f32.gmra.mxu1 %vm242_vm0, %v85_v30  ;;  %v35_v30 = vld [vmem:[%s4240_s0 + $0xa8] sm:$0xff]  ;;  %v89_v31 = vld [vmem:[%s4240_s0 + $0x258] sm:$0xff] }
  0x9c   :  { %v1235_v35 = vpop.f32.mrf.mxu2  ;;  %v1397_v36 = vpop.f32.mrf.mxu3 }
  0x9d   :  { %1774 = vst.msk [vmem:[%s4242_s3 + $0x8] sm:$0xff] %vm1772_vm1, %v1557_v33  ;;  %v1236_v37 = vadd.f32 %v2539_v8, %v1235_v35  ;;  %v1398_v38 = vadd.f32 %v2539_v8, %v1397_v36 }
  0x9e   :  { %1828 = vst.msk [vmem:[%s4242_s3 + $0x1b8] sm:$0xff] %vm1772_vm1, %v1611_v34 }
  0x9f   :  { %v1665_v41 = vmax.f32 %v1236_v37, 0.0  ;;  %v1719_v42 = vmax.f32 %v1398_v38, 0.0 }
  0xa0   :  { %v914_v43 = vpop.f32.mrf.mxu0  ;;  %v1076_v44 = vpop.f32.mrf.mxu1 }
  0xa1   :  { %1882 = vst.msk [vmem:[%s4242_s3 + $0x368] sm:$0xff] %vm1772_vm1, %v1665_v41  ;;  %2119 = vmatmul.msk.f32.gmra.mxu2 %vm242_vm0, %v140_v39  ;;  %2173 = vmatmul.msk.f32.gmra.mxu3 %vm242_vm0, %v194_v40  ;;  %v915_v47 = vadd.f32 %v2539_v8, %v914_v43  ;;  %v1077_v48 = vadd.f32 %v2539_v8, %v1076_v44  ;;  %v144_v40 = vld [vmem:[%s4240_s0 + $0x410] sm:$0xff]  ;;  %v198_v41 = vld [vmem:[%s4240_s0 + $0x5c0] sm:$0xff] }
  0xa2   :  { %1936 = vst.msk [vmem:[%s4242_s3 + $0x518] sm:$0xff] %vm1772_vm1, %v1719_v42 }
  0xa3   :  { %v1558_v49 = vmax.f32 %v915_v47, 0.0  ;;  %v1612_v50 = vmax.f32 %v1077_v48, 0.0  ;;  %2011 = vmatmul.msk.f32.gmra.mxu0 %vm242_vm0, %v32_v45  ;;  %2065 = vmatmul.msk.f32.gmra.mxu1 %vm242_vm0, %v86_v46  ;;  %v36_v46 = vld [vmem:[%s4240_s0 + $0xb0] sm:$0xff]  ;;  %v90_v47 = vld [vmem:[%s4240_s0 + $0x260] sm:$0xff] }
  0xa4   :  { %v1238_v51 = vpop.f32.mrf.mxu2  ;;  %v1400_v52 = vpop.f32.mrf.mxu3 }
  0xa5   :  { %1775 = vst.msk [vmem:[%s4242_s3 + $0x10] sm:$0xff] %vm1772_vm1, %v1558_v49  ;;  %v1239_v53 = vadd.f32 %v2539_v8, %v1238_v51  ;;  %v1401_v54 = vadd.f32 %v2539_v8, %v1400_v52 }
  0xa6   :  { %1829 = vst.msk [vmem:[%s4242_s3 + $0x1c0] sm:$0xff] %vm1772_vm1, %v1612_v50 }
  0xa7   :  { %v1666_v57 = vmax.f32 %v1239_v53, 0.0  ;;  %v1720_v58 = vmax.f32 %v1401_v54, 0.0 }
  0xa8   :  { %v917_v59 = vpop.f32.mrf.mxu0  ;;  %v1079_v60 = vpop.f32.mrf.mxu1 }
  0xa9   :  { %1883 = vst.msk [vmem:[%s4242_s3 + $0x370] sm:$0xff] %vm1772_vm1, %v1666_v57  ;;  %2120 = vmatmul.msk.f32.gmra.mxu2 %vm242_vm0, %v141_v55  ;;  %2174 = vmatmul.msk.f32.gmra.mxu3 %vm242_vm0, %v195_v56  ;;  %v918_v63 = vadd.f32 %v2539_v8, %v917_v59  ;;  %v1080_v0 = vadd.f32 %v2539_v8, %v1079_v60  ;;  %v145_v56 = vld [vmem:[%s4240_s0 + $0x418] sm:$0xff]  ;;  %v199_v57 = vld [vmem:[%s4240_s0 + $0x5c8] sm:$0xff] }
  0xaa   :  { %1937 = vst.msk [vmem:[%s4242_s3 + $0x520] sm:$0xff] %vm1772_vm1, %v1720_v58 }
  0xab   :  { %v1559_v1 = vmax.f32 %v918_v63, 0.0  ;;  %v1613_v2 = vmax.f32 %v1080_v0, 0.0  ;;  %2012 = vmatmul.msk.f32.gmra.mxu0 %vm242_vm0, %v33_v61  ;;  %2066 = vmatmul.msk.f32.gmra.mxu1 %vm242_vm0, %v87_v62  ;;  %v37_v62 = vld [vmem:[%s4240_s0 + $0xb8] sm:$0xff]  ;;  %v91_v63 = vld [vmem:[%s4240_s0 + $0x268] sm:$0xff] }
  0xac   :  { %v1241_v3 = vpop.f32.mrf.mxu2  ;;  %v1403_v4 = vpop.f32.mrf.mxu3 }
  0xad   :  { %1776 = vst.msk [vmem:[%s4242_s3 + $0x18] sm:$0xff] %vm1772_vm1, %v1559_v1  ;;  %v1242_v5 = vadd.f32 %v2539_v8, %v1241_v3  ;;  %v1404_v6 = vadd.f32 %v2539_v8, %v1403_v4 }
  0xae   :  { %1830 = vst.msk [vmem:[%s4242_s3 + $0x1c8] sm:$0xff] %vm1772_vm1, %v1613_v2 }
  0xaf   :  { %v1667_v10 = vmax.f32 %v1242_v5, 0.0  ;;  %v1721_v11 = vmax.f32 %v1404_v6, 0.0 }
  0xb0   :  { %v920_v12 = vpop.f32.mrf.mxu0  ;;  %v1082_v13 = vpop.f32.mrf.mxu1 }
  0xb1   :  { %1884 = vst.msk [vmem:[%s4242_s3 + $0x378] sm:$0xff] %vm1772_vm1, %v1667_v10  ;;  %2121 = vmatmul.msk.f32.gmra.mxu2 %vm242_vm0, %v142_v7  ;;  %2175 = vmatmul.msk.f32.gmra.mxu3 %vm242_vm0, %v196_v9  ;;  %v921_v16 = vadd.f32 %v2539_v8, %v920_v12  ;;  %v1083_v17 = vadd.f32 %v2539_v8, %v1082_v13  ;;  %v146_v9 = vld [vmem:[%s4240_s0 + $0x420] sm:$0xff]  ;;  %v200_v10 = vld [vmem:[%s4240_s0 + $0x5d0] sm:$0xff] }
  0xb2   :  { %1938 = vst.msk [vmem:[%s4242_s3 + $0x528] sm:$0xff] %vm1772_vm1, %v1721_v11 }
  0xb3   :  { %v1560_v18 = vmax.f32 %v921_v16, 0.0  ;;  %v1614_v19 = vmax.f32 %v1083_v17, 0.0  ;;  %2013 = vmatmul.msk.f32.gmra.mxu0 %vm242_vm0, %v34_v14  ;;  %2067 = vmatmul.msk.f32.gmra.mxu1 %vm242_vm0, %v88_v15  ;;  %v38_v15 = vld [vmem:[%s4240_s0 + $0xc0] sm:$0xff]  ;;  %v92_v16 = vld [vmem:[%s4240_s0 + $0x270] sm:$0xff] }
  0xb4   :  { %v1244_v20 = vpop.f32.mrf.mxu2  ;;  %v1406_v21 = vpop.f32.mrf.mxu3 }
  0xb5   :  { %1777 = vst.msk [vmem:[%s4242_s3 + $0x20] sm:$0xff] %vm1772_vm1, %v1560_v18  ;;  %v1245_v22 = vadd.f32 %v2539_v8, %v1244_v20  ;;  %v1407_v23 = vadd.f32 %v2539_v8, %v1406_v21 }
  0xb6   :  { %1831 = vst.msk [vmem:[%s4242_s3 + $0x1d0] sm:$0xff] %vm1772_vm1, %v1614_v19 }
  0xb7   :  { %v1668_v26 = vmax.f32 %v1245_v22, 0.0  ;;  %v1722_v27 = vmax.f32 %v1407_v23, 0.0 }
  0xb8   :  { %v923_v28 = vpop.f32.mrf.mxu0  ;;  %v1085_v29 = vpop.f32.mrf.mxu1 }
  0xb9   :  { %1885 = vst.msk [vmem:[%s4242_s3 + $0x380] sm:$0xff] %vm1772_vm1, %v1668_v26  ;;  %2122 = vmatmul.msk.f32.gmra.mxu2 %vm242_vm0, %v143_v24  ;;  %2176 = vmatmul.msk.f32.gmra.mxu3 %vm242_vm0, %v197_v25  ;;  %v924_v32 = vadd.f32 %v2539_v8, %v923_v28  ;;  %v1086_v33 = vadd.f32 %v2539_v8, %v1085_v29  ;;  %v147_v25 = vld [vmem:[%s4240_s0 + $0x428] sm:$0xff]  ;;  %v201_v26 = vld [vmem:[%s4240_s0 + $0x5d8] sm:$0xff] }
  0xba   :  { %1939 = vst.msk [vmem:[%s4242_s3 + $0x530] sm:$0xff] %vm1772_vm1, %v1722_v27 }
  0xbb   :  { %v1561_v34 = vmax.f32 %v924_v32, 0.0  ;;  %v1615_v35 = vmax.f32 %v1086_v33, 0.0  ;;  %2014 = vmatmul.msk.f32.gmra.mxu0 %vm242_vm0, %v35_v30  ;;  %2068 = vmatmul.msk.f32.gmra.mxu1 %vm242_vm0, %v89_v31  ;;  %v39_v31 = vld [vmem:[%s4240_s0 + $0xc8] sm:$0xff]  ;;  %v93_v32 = vld [vmem:[%s4240_s0 + $0x278] sm:$0xff] }
  0xbc   :  { %v1247_v36 = vpop.f32.mrf.mxu2  ;;  %v1409_v37 = vpop.f32.mrf.mxu3 }
  0xbd   :  { %1778 = vst.msk [vmem:[%s4242_s3 + $0x28] sm:$0xff] %vm1772_vm1, %v1561_v34  ;;  %v1248_v38 = vadd.f32 %v2539_v8, %v1247_v36  ;;  %v1410_v39 = vadd.f32 %v2539_v8, %v1409_v37 }
  0xbe   :  { %1832 = vst.msk [vmem:[%s4242_s3 + $0x1d8] sm:$0xff] %vm1772_vm1, %v1615_v35 }
  0xbf   :  { %v1669_v42 = vmax.f32 %v1248_v38, 0.0  ;;  %v1723_v43 = vmax.f32 %v1410_v39, 0.0 }
  0xc0   :  { %v926_v44 = vpop.f32.mrf.mxu0  ;;  %v1088_v45 = vpop.f32.mrf.mxu1 }
  0xc1   :  { %1886 = vst.msk [vmem:[%s4242_s3 + $0x388] sm:$0xff] %vm1772_vm1, %v1669_v42  ;;  %2123 = vmatmul.msk.f32.gmra.mxu2 %vm242_vm0, %v144_v40  ;;  %2177 = vmatmul.msk.f32.gmra.mxu3 %vm242_vm0, %v198_v41  ;;  %v927_v48 = vadd.f32 %v2539_v8, %v926_v44  ;;  %v1089_v49 = vadd.f32 %v2539_v8, %v1088_v45  ;;  %v148_v41 = vld [vmem:[%s4240_s0 + $0x430] sm:$0xff]  ;;  %v202_v42 = vld [vmem:[%s4240_s0 + $0x5e0] sm:$0xff] }
  0xc2   :  { %1940 = vst.msk [vmem:[%s4242_s3 + $0x538] sm:$0xff] %vm1772_vm1, %v1723_v43 }
  0xc3   :  { %v1562_v50 = vmax.f32 %v927_v48, 0.0  ;;  %v1616_v51 = vmax.f32 %v1089_v49, 0.0  ;;  %2015 = vmatmul.msk.f32.gmra.mxu0 %vm242_vm0, %v36_v46  ;;  %2069 = vmatmul.msk.f32.gmra.mxu1 %vm242_vm0, %v90_v47  ;;  %v40_v47 = vld [vmem:[%s4240_s0 + $0xd0] sm:$0xff]  ;;  %v94_v48 = vld [vmem:[%s4240_s0 + $0x280] sm:$0xff] }
  0xc4   :  { %v1250_v52 = vpop.f32.mrf.mxu2  ;;  %v1412_v53 = vpop.f32.mrf.mxu3 }
  0xc5   :  { %1779 = vst.msk [vmem:[%s4242_s3 + $0x30] sm:$0xff] %vm1772_vm1, %v1562_v50  ;;  %v1251_v54 = vadd.f32 %v2539_v8, %v1250_v52  ;;  %v1413_v55 = vadd.f32 %v2539_v8, %v1412_v53 }
  0xc6   :  { %1833 = vst.msk [vmem:[%s4242_s3 + $0x1e0] sm:$0xff] %vm1772_vm1, %v1616_v51 }
  0xc7   :  { %v1670_v58 = vmax.f32 %v1251_v54, 0.0  ;;  %v1724_v59 = vmax.f32 %v1413_v55, 0.0 }
  0xc8   :  { %v929_v60 = vpop.f32.mrf.mxu0  ;;  %v1091_v61 = vpop.f32.mrf.mxu1 }
  0xc9   :  { %1887 = vst.msk [vmem:[%s4242_s3 + $0x390] sm:$0xff] %vm1772_vm1, %v1670_v58  ;;  %2124 = vmatmul.msk.f32.gmra.mxu2 %vm242_vm0, %v145_v56  ;;  %2178 = vmatmul.msk.f32.gmra.mxu3 %vm242_vm0, %v199_v57  ;;  %v930_v0 = vadd.f32 %v2539_v8, %v929_v60  ;;  %v1092_v1 = vadd.f32 %v2539_v8, %v1091_v61  ;;  %v149_v57 = vld [vmem:[%s4240_s0 + $0x438] sm:$0xff]  ;;  %v203_v58 = vld [vmem:[%s4240_s0 + $0x5e8] sm:$0xff] }
  0xca   :  { %1941 = vst.msk [vmem:[%s4242_s3 + $0x540] sm:$0xff] %vm1772_vm1, %v1724_v59 }
  0xcb   :  { %v1563_v2 = vmax.f32 %v930_v0, 0.0  ;;  %v1617_v3 = vmax.f32 %v1092_v1, 0.0  ;;  %2016 = vmatmul.msk.f32.gmra.mxu0 %vm242_vm0, %v37_v62  ;;  %2070 = vmatmul.msk.f32.gmra.mxu1 %vm242_vm0, %v91_v63  ;;  %v41_v63 = vld [vmem:[%s4240_s0 + $0xd8] sm:$0xff]  ;;  %v95_v0 = vld [vmem:[%s4240_s0 + $0x288] sm:$0xff] }
  0xcc   :  { %v1253_v4 = vpop.f32.mrf.mxu2  ;;  %v1415_v5 = vpop.f32.mrf.mxu3 }
  0xcd   :  { %1780 = vst.msk [vmem:[%s4242_s3 + $0x38] sm:$0xff] %vm1772_vm1, %v1563_v2  ;;  %v1254_v6 = vadd.f32 %v2539_v8, %v1253_v4  ;;  %v1416_v7 = vadd.f32 %v2539_v8, %v1415_v5 }
  0xce   :  { %1834 = vst.msk [vmem:[%s4242_s3 + $0x1e8] sm:$0xff] %vm1772_vm1, %v1617_v3 }
  0xcf   :  { %v1671_v11 = vmax.f32 %v1254_v6, 0.0  ;;  %v1725_v12 = vmax.f32 %v1416_v7, 0.0 }
  0xd0   :  { %v932_v13 = vpop.f32.mrf.mxu0  ;;  %v1094_v14 = vpop.f32.mrf.mxu1 }
  0xd1   :  { %1888 = vst.msk [vmem:[%s4242_s3 + $0x398] sm:$0xff] %vm1772_vm1, %v1671_v11  ;;  %2125 = vmatmul.msk.f32.gmra.mxu2 %vm242_vm0, %v146_v9  ;;  %2179 = vmatmul.msk.f32.gmra.mxu3 %vm242_vm0, %v200_v10  ;;  %v933_v17 = vadd.f32 %v2539_v8, %v932_v13  ;;  %v1095_v18 = vadd.f32 %v2539_v8, %v1094_v14  ;;  %v150_v10 = vld [vmem:[%s4240_s0 + $0x440] sm:$0xff]  ;;  %v204_v11 = vld [vmem:[%s4240_s0 + $0x5f0] sm:$0xff] }
  0xd2   :  { %1942 = vst.msk [vmem:[%s4242_s3 + $0x548] sm:$0xff] %vm1772_vm1, %v1725_v12 }
  0xd3   :  { %v1564_v19 = vmax.f32 %v933_v17, 0.0  ;;  %v1618_v20 = vmax.f32 %v1095_v18, 0.0  ;;  %2017 = vmatmul.msk.f32.gmra.mxu0 %vm242_vm0, %v38_v15  ;;  %2071 = vmatmul.msk.f32.gmra.mxu1 %vm242_vm0, %v92_v16  ;;  %v42_v16 = vld [vmem:[%s4240_s0 + $0xe0] sm:$0xff]  ;;  %v96_v17 = vld [vmem:[%s4240_s0 + $0x290] sm:$0xff] }
  0xd4   :  { %v1256_v21 = vpop.f32.mrf.mxu2  ;;  %v1418_v22 = vpop.f32.mrf.mxu3 }
  0xd5   :  { %1781 = vst.msk [vmem:[%s4242_s3 + $0x40] sm:$0xff] %vm1772_vm1, %v1564_v19  ;;  %v1257_v23 = vadd.f32 %v2539_v8, %v1256_v21  ;;  %v1419_v24 = vadd.f32 %v2539_v8, %v1418_v22 }
  0xd6   :  { %1835 = vst.msk [vmem:[%s4242_s3 + $0x1f0] sm:$0xff] %vm1772_vm1, %v1618_v20 }
  0xd7   :  { %v1672_v27 = vmax.f32 %v1257_v23, 0.0  ;;  %v1726_v28 = vmax.f32 %v1419_v24, 0.0 }
  0xd8   :  { %v935_v29 = vpop.f32.mrf.mxu0  ;;  %v1097_v30 = vpop.f32.mrf.mxu1 }
  0xd9   :  { %1889 = vst.msk [vmem:[%s4242_s3 + $0x3a0] sm:$0xff] %vm1772_vm1, %v1672_v27  ;;  %2126 = vmatmul.msk.f32.gmra.mxu2 %vm242_vm0, %v147_v25  ;;  %2180 = vmatmul.msk.f32.gmra.mxu3 %vm242_vm0, %v201_v26  ;;  %v936_v33 = vadd.f32 %v2539_v8, %v935_v29  ;;  %v1098_v34 = vadd.f32 %v2539_v8, %v1097_v30  ;;  %v151_v26 = vld [vmem:[%s4240_s0 + $0x448] sm:$0xff]  ;;  %v205_v27 = vld [vmem:[%s4240_s0 + $0x5f8] sm:$0xff] }
  0xda   :  { %1943 = vst.msk [vmem:[%s4242_s3 + $0x550] sm:$0xff] %vm1772_vm1, %v1726_v28 }
  0xdb   :  { %v1565_v35 = vmax.f32 %v936_v33, 0.0  ;;  %v1619_v36 = vmax.f32 %v1098_v34, 0.0  ;;  %2018 = vmatmul.msk.f32.gmra.mxu0 %vm242_vm0, %v39_v31  ;;  %2072 = vmatmul.msk.f32.gmra.mxu1 %vm242_vm0, %v93_v32  ;;  %v43_v32 = vld [vmem:[%s4240_s0 + $0xe8] sm:$0xff]  ;;  %v97_v33 = vld [vmem:[%s4240_s0 + $0x298] sm:$0xff] }
  0xdc   :  { %v1259_v37 = vpop.f32.mrf.mxu2  ;;  %v1421_v38 = vpop.f32.mrf.mxu3 }
  0xdd   :  { %1782 = vst.msk [vmem:[%s4242_s3 + $0x48] sm:$0xff] %vm1772_vm1, %v1565_v35  ;;  %v1260_v39 = vadd.f32 %v2539_v8, %v1259_v37  ;;  %v1422_v40 = vadd.f32 %v2539_v8, %v1421_v38 }
  0xde   :  { %1836 = vst.msk [vmem:[%s4242_s3 + $0x1f8] sm:$0xff] %vm1772_vm1, %v1619_v36 }
  0xdf   :  { %v1673_v43 = vmax.f32 %v1260_v39, 0.0  ;;  %v1727_v44 = vmax.f32 %v1422_v40, 0.0 }
  0xe0   :  { %v938_v45 = vpop.f32.mrf.mxu0  ;;  %v1100_v46 = vpop.f32.mrf.mxu1 }
  0xe1   :  { %1890 = vst.msk [vmem:[%s4242_s3 + $0x3a8] sm:$0xff] %vm1772_vm1, %v1673_v43  ;;  %2127 = vmatmul.msk.f32.gmra.mxu2 %vm242_vm0, %v148_v41  ;;  %2181 = vmatmul.msk.f32.gmra.mxu3 %vm242_vm0, %v202_v42  ;;  %v939_v49 = vadd.f32 %v2539_v8, %v938_v45  ;;  %v1101_v50 = vadd.f32 %v2539_v8, %v1100_v46  ;;  %v152_v42 = vld [vmem:[%s4240_s0 + $0x450] sm:$0xff]  ;;  %v206_v43 = vld [vmem:[%s4240_s0 + $0x600] sm:$0xff] }
  0xe2   :  { %1944 = vst.msk [vmem:[%s4242_s3 + $0x558] sm:$0xff] %vm1772_vm1, %v1727_v44 }
  0xe3   :  { %v1566_v51 = vmax.f32 %v939_v49, 0.0  ;;  %v1620_v52 = vmax.f32 %v1101_v50, 0.0  ;;  %2019 = vmatmul.msk.f32.gmra.mxu0 %vm242_vm0, %v40_v47  ;;  %2073 = vmatmul.msk.f32.gmra.mxu1 %vm242_vm0, %v94_v48  ;;  %v44_v48 = vld [vmem:[%s4240_s0 + $0xf0] sm:$0xff]  ;;  %v98_v49 = vld [vmem:[%s4240_s0 + $0x2a0] sm:$0xff] }
  0xe4   :  { %v1262_v53 = vpop.f32.mrf.mxu2  ;;  %v1424_v54 = vpop.f32.mrf.mxu3 }
  0xe5   :  { %1783 = vst.msk [vmem:[%s4242_s3 + $0x50] sm:$0xff] %vm1772_vm1, %v1566_v51  ;;  %v1263_v55 = vadd.f32 %v2539_v8, %v1262_v53  ;;  %v1425_v56 = vadd.f32 %v2539_v8, %v1424_v54 }
  0xe6   :  { %1837 = vst.msk [vmem:[%s4242_s3 + $0x200] sm:$0xff] %vm1772_vm1, %v1620_v52 }
  0xe7   :  { %v1674_v59 = vmax.f32 %v1263_v55, 0.0  ;;  %v1728_v60 = vmax.f32 %v1425_v56, 0.0 }
  0xe8   :  { %v941_v61 = vpop.f32.mrf.mxu0  ;;  %v1103_v62 = vpop.f32.mrf.mxu1 }
  0xe9   :  { %1891 = vst.msk [vmem:[%s4242_s3 + $0x3b0] sm:$0xff] %vm1772_vm1, %v1674_v59  ;;  %2128 = vmatmul.msk.f32.gmra.mxu2 %vm242_vm0, %v149_v57  ;;  %2182 = vmatmul.msk.f32.gmra.mxu3 %vm242_vm0, %v203_v58  ;;  %v942_v1 = vadd.f32 %v2539_v8, %v941_v61  ;;  %v1104_v2 = vadd.f32 %v2539_v8, %v1103_v62  ;;  %v153_v58 = vld [vmem:[%s4240_s0 + $0x458] sm:$0xff]  ;;  %v207_v59 = vld [vmem:[%s4240_s0 + $0x608] sm:$0xff] }
  0xea   :  { %1945 = vst.msk [vmem:[%s4242_s3 + $0x560] sm:$0xff] %vm1772_vm1, %v1728_v60 }
  0xeb   :  { %v1567_v3 = vmax.f32 %v942_v1, 0.0  ;;  %v1621_v4 = vmax.f32 %v1104_v2, 0.0  ;;  %2020 = vmatmul.msk.f32.gmra.mxu0 %vm242_vm0, %v41_v63  ;;  %2074 = vmatmul.msk.f32.gmra.mxu1 %vm242_vm0, %v95_v0  ;;  %v45_v0 = vld [vmem:[%s4240_s0 + $0xf8] sm:$0xff]  ;;  %v99_v1 = vld [vmem:[%s4240_s0 + $0x2a8] sm:$0xff] }
  0xec   :  { %v1265_v5 = vpop.f32.mrf.mxu2  ;;  %v1427_v6 = vpop.f32.mrf.mxu3 }
  0xed   :  { %1784 = vst.msk [vmem:[%s4242_s3 + $0x58] sm:$0xff] %vm1772_vm1, %v1567_v3  ;;  %v1266_v7 = vadd.f32 %v2539_v8, %v1265_v5  ;;  %v1428_v9 = vadd.f32 %v2539_v8, %v1427_v6 }
  0xee   :  { %1838 = vst.msk [vmem:[%s4242_s3 + $0x208] sm:$0xff] %vm1772_vm1, %v1621_v4 }
  0xef   :  { %v1675_v12 = vmax.f32 %v1266_v7, 0.0  ;;  %v1729_v13 = vmax.f32 %v1428_v9, 0.0 }
  0xf0   :  { %v944_v14 = vpop.f32.mrf.mxu0  ;;  %v1106_v15 = vpop.f32.mrf.mxu1 }
  0xf1   :  { %1892 = vst.msk [vmem:[%s4242_s3 + $0x3b8] sm:$0xff] %vm1772_vm1, %v1675_v12  ;;  %2129 = vmatmul.msk.f32.gmra.mxu2 %vm242_vm0, %v150_v10  ;;  %2183 = vmatmul.msk.f32.gmra.mxu3 %vm242_vm0, %v204_v11  ;;  %v945_v18 = vadd.f32 %v2539_v8, %v944_v14  ;;  %v1107_v19 = vadd.f32 %v2539_v8, %v1106_v15  ;;  %v154_v11 = vld [vmem:[%s4240_s0 + $0x460] sm:$0xff]  ;;  %v208_v12 = vld [vmem:[%s4240_s0 + $0x610] sm:$0xff] }
  0xf2   :  { %1946 = vst.msk [vmem:[%s4242_s3 + $0x568] sm:$0xff] %vm1772_vm1, %v1729_v13 }
  0xf3   :  { %v1568_v20 = vmax.f32 %v945_v18, 0.0  ;;  %v1622_v21 = vmax.f32 %v1107_v19, 0.0  ;;  %2021 = vmatmul.msk.f32.gmra.mxu0 %vm242_vm0, %v42_v16  ;;  %2075 = vmatmul.msk.f32.gmra.mxu1 %vm242_vm0, %v96_v17  ;;  %v46_v17 = vld [vmem:[%s4240_s0 + $0x100] sm:$0xff]  ;;  %v100_v18 = vld [vmem:[%s4240_s0 + $0x2b0] sm:$0xff] }
  0xf4   :  { %v1268_v22 = vpop.f32.mrf.mxu2  ;;  %v1430_v23 = vpop.f32.mrf.mxu3 }
  0xf5   :  { %1785 = vst.msk [vmem:[%s4242_s3 + $0x60] sm:$0xff] %vm1772_vm1, %v1568_v20  ;;  %v1269_v24 = vadd.f32 %v2539_v8, %v1268_v22  ;;  %v1431_v25 = vadd.f32 %v2539_v8, %v1430_v23 }
  0xf6   :  { %1839 = vst.msk [vmem:[%s4242_s3 + $0x210] sm:$0xff] %vm1772_vm1, %v1622_v21 }
  0xf7   :  { %v1676_v28 = vmax.f32 %v1269_v24, 0.0  ;;  %v1730_v29 = vmax.f32 %v1431_v25, 0.0 }
  0xf8   :  { %v947_v30 = vpop.f32.mrf.mxu0  ;;  %v1109_v31 = vpop.f32.mrf.mxu1 }
  0xf9   :  { %1893 = vst.msk [vmem:[%s4242_s3 + $0x3c0] sm:$0xff] %vm1772_vm1, %v1676_v28  ;;  %2130 = vmatmul.msk.f32.gmra.mxu2 %vm242_vm0, %v151_v26  ;;  %2184 = vmatmul.msk.f32.gmra.mxu3 %vm242_vm0, %v205_v27  ;;  %v948_v34 = vadd.f32 %v2539_v8, %v947_v30  ;;  %v1110_v35 = vadd.f32 %v2539_v8, %v1109_v31  ;;  %v155_v27 = vld [vmem:[%s4240_s0 + $0x468] sm:$0xff]  ;;  %v209_v28 = vld [vmem:[%s4240_s0 + $0x618] sm:$0xff] }
  0xfa   :  { %1947 = vst.msk [vmem:[%s4242_s3 + $0x570] sm:$0xff] %vm1772_vm1, %v1730_v29 }
  0xfb   :  { %v1569_v36 = vmax.f32 %v948_v34, 0.0  ;;  %v1623_v37 = vmax.f32 %v1110_v35, 0.0  ;;  %2022 = vmatmul.msk.f32.gmra.mxu0 %vm242_vm0, %v43_v32  ;;  %2076 = vmatmul.msk.f32.gmra.mxu1 %vm242_vm0, %v97_v33  ;;  %v47_v33 = vld [vmem:[%s4240_s0 + $0x108] sm:$0xff]  ;;  %v101_v34 = vld [vmem:[%s4240_s0 + $0x2b8] sm:$0xff] }
  0xfc   :  { %v1271_v38 = vpop.f32.mrf.mxu2  ;;  %v1433_v39 = vpop.f32.mrf.mxu3 }
  0xfd   :  { %1786 = vst.msk [vmem:[%s4242_s3 + $0x68] sm:$0xff] %vm1772_vm1, %v1569_v36  ;;  %v1272_v40 = vadd.f32 %v2539_v8, %v1271_v38  ;;  %v1434_v41 = vadd.f32 %v2539_v8, %v1433_v39 }
  0xfe   :  { %1840 = vst.msk [vmem:[%s4242_s3 + $0x218] sm:$0xff] %vm1772_vm1, %v1623_v37 }
  0xff   :  { %v1677_v44 = vmax.f32 %v1272_v40, 0.0  ;;  %v1731_v45 = vmax.f32 %v1434_v41, 0.0 }
 0x100   :  { %v950_v46 = vpop.f32.mrf.mxu0  ;;  %v1112_v47 = vpop.f32.mrf.mxu1 }
 0x101   :  { %1894 = vst.msk [vmem:[%s4242_s3 + $0x3c8] sm:$0xff] %vm1772_vm1, %v1677_v44  ;;  %2131 = vmatmul.msk.f32.gmra.mxu2 %vm242_vm0, %v152_v42  ;;  %2185 = vmatmul.msk.f32.gmra.mxu3 %vm242_vm0, %v206_v43  ;;  %v951_v50 = vadd.f32 %v2539_v8, %v950_v46  ;;  %v1113_v51 = vadd.f32 %v2539_v8, %v1112_v47  ;;  %v156_v43 = vld [vmem:[%s4240_s0 + $0x470] sm:$0xff]  ;;  %v210_v44 = vld [vmem:[%s4240_s0 + $0x620] sm:$0xff] }
 0x102   :  { %1948 = vst.msk [vmem:[%s4242_s3 + $0x578] sm:$0xff] %vm1772_vm1, %v1731_v45 }
 0x103   :  { %v1570_v52 = vmax.f32 %v951_v50, 0.0  ;;  %v1624_v53 = vmax.f32 %v1113_v51, 0.0  ;;  %2023 = vmatmul.msk.f32.gmra.mxu0 %vm242_vm0, %v44_v48  ;;  %2077 = vmatmul.msk.f32.gmra.mxu1 %vm242_vm0, %v98_v49  ;;  %v48_v49 = vld [vmem:[%s4240_s0 + $0x110] sm:$0xff]  ;;  %v102_v50 = vld [vmem:[%s4240_s0 + $0x2c0] sm:$0xff] }
 0x104   :  { %v1274_v54 = vpop.f32.mrf.mxu2  ;;  %v1436_v55 = vpop.f32.mrf.mxu3 }
 0x105   :  { %1787 = vst.msk [vmem:[%s4242_s3 + $0x70] sm:$0xff] %vm1772_vm1, %v1570_v52  ;;  %v1275_v56 = vadd.f32 %v2539_v8, %v1274_v54  ;;  %v1437_v57 = vadd.f32 %v2539_v8, %v1436_v55 }
 0x106   :  { %1841 = vst.msk [vmem:[%s4242_s3 + $0x220] sm:$0xff] %vm1772_vm1, %v1624_v53 }
 0x107   :  { %v1678_v60 = vmax.f32 %v1275_v56, 0.0  ;;  %v1732_v61 = vmax.f32 %v1437_v57, 0.0 }
 0x108   :  { %v953_v62 = vpop.f32.mrf.mxu0  ;;  %v1115_v63 = vpop.f32.mrf.mxu1 }
 0x109   :  { %1895 = vst.msk [vmem:[%s4242_s3 + $0x3d0] sm:$0xff] %vm1772_vm1, %v1678_v60  ;;  %2132 = vmatmul.msk.f32.gmra.mxu2 %vm242_vm0, %v153_v58  ;;  %2186 = vmatmul.msk.f32.gmra.mxu3 %vm242_vm0, %v207_v59  ;;  %v954_v2 = vadd.f32 %v2539_v8, %v953_v62  ;;  %v1116_v3 = vadd.f32 %v2539_v8, %v1115_v63  ;;  %v157_v59 = vld [vmem:[%s4240_s0 + $0x478] sm:$0xff]  ;;  %v211_v60 = vld [vmem:[%s4240_s0 + $0x628] sm:$0xff] }
 0x10a   :  { %1949 = vst.msk [vmem:[%s4242_s3 + $0x580] sm:$0xff] %vm1772_vm1, %v1732_v61 }
 0x10b   :  { %v1571_v4 = vmax.f32 %v954_v2, 0.0  ;;  %v1625_v5 = vmax.f32 %v1116_v3, 0.0  ;;  %2024 = vmatmul.msk.f32.gmra.mxu0 %vm242_vm0, %v45_v0  ;;  %2078 = vmatmul.msk.f32.gmra.mxu1 %vm242_vm0, %v99_v1  ;;  %v49_v1 = vld [vmem:[%s4240_s0 + $0x118] sm:$0xff]  ;;  %v103_v2 = vld [vmem:[%s4240_s0 + $0x2c8] sm:$0xff] }
 0x10c   :  { %v1277_v6 = vpop.f32.mrf.mxu2  ;;  %v1439_v7 = vpop.f32.mrf.mxu3 }
 0x10d   :  { %1788 = vst.msk [vmem:[%s4242_s3 + $0x78] sm:$0xff] %vm1772_vm1, %v1571_v4  ;;  %v1278_v9 = vadd.f32 %v2539_v8, %v1277_v6  ;;  %v1440_v10 = vadd.f32 %v2539_v8, %v1439_v7 }
 0x10e   :  { %1842 = vst.msk [vmem:[%s4242_s3 + $0x228] sm:$0xff] %vm1772_vm1, %v1625_v5 }
 0x10f   :  { %v1679_v13 = vmax.f32 %v1278_v9, 0.0  ;;  %v1733_v14 = vmax.f32 %v1440_v10, 0.0 }
 0x110   :  { %v956_v15 = vpop.f32.mrf.mxu0  ;;  %v1118_v16 = vpop.f32.mrf.mxu1 }
 0x111   :  { %1896 = vst.msk [vmem:[%s4242_s3 + $0x3d8] sm:$0xff] %vm1772_vm1, %v1679_v13  ;;  %2133 = vmatmul.msk.f32.gmra.mxu2 %vm242_vm0, %v154_v11  ;;  %2187 = vmatmul.msk.f32.gmra.mxu3 %vm242_vm0, %v208_v12  ;;  %v957_v19 = vadd.f32 %v2539_v8, %v956_v15  ;;  %v1119_v20 = vadd.f32 %v2539_v8, %v1118_v16  ;;  %v158_v12 = vld [vmem:[%s4240_s0 + $0x480] sm:$0xff]  ;;  %v212_v13 = vld [vmem:[%s4240_s0 + $0x630] sm:$0xff] }
 0x112   :  { %1950 = vst.msk [vmem:[%s4242_s3 + $0x588] sm:$0xff] %vm1772_vm1, %v1733_v14 }
 0x113   :  { %v1572_v21 = vmax.f32 %v957_v19, 0.0  ;;  %v1626_v22 = vmax.f32 %v1119_v20, 0.0  ;;  %2025 = vmatmul.msk.f32.gmra.mxu0 %vm242_vm0, %v46_v17  ;;  %2079 = vmatmul.msk.f32.gmra.mxu1 %vm242_vm0, %v100_v18  ;;  %v50_v18 = vld [vmem:[%s4240_s0 + $0x120] sm:$0xff]  ;;  %v104_v19 = vld [vmem:[%s4240_s0 + $0x2d0] sm:$0xff] }
 0x114   :  { %v1280_v23 = vpop.f32.mrf.mxu2  ;;  %v1442_v24 = vpop.f32.mrf.mxu3 }
 0x115   :  { %1789 = vst.msk [vmem:[%s4242_s3 + $0x80] sm:$0xff] %vm1772_vm1, %v1572_v21  ;;  %v1281_v25 = vadd.f32 %v2539_v8, %v1280_v23  ;;  %v1443_v26 = vadd.f32 %v2539_v8, %v1442_v24 }
 0x116   :  { %1843 = vst.msk [vmem:[%s4242_s3 + $0x230] sm:$0xff] %vm1772_vm1, %v1626_v22 }
 0x117   :  { %v1680_v29 = vmax.f32 %v1281_v25, 0.0  ;;  %v1734_v30 = vmax.f32 %v1443_v26, 0.0 }
 0x118   :  { %v959_v31 = vpop.f32.mrf.mxu0  ;;  %v1121_v32 = vpop.f32.mrf.mxu1 }
 0x119   :  { %1897 = vst.msk [vmem:[%s4242_s3 + $0x3e0] sm:$0xff] %vm1772_vm1, %v1680_v29  ;;  %2134 = vmatmul.msk.f32.gmra.mxu2 %vm242_vm0, %v155_v27  ;;  %2188 = vmatmul.msk.f32.gmra.mxu3 %vm242_vm0, %v209_v28  ;;  %v960_v35 = vadd.f32 %v2539_v8, %v959_v31  ;;  %v1122_v36 = vadd.f32 %v2539_v8, %v1121_v32  ;;  %v159_v28 = vld [vmem:[%s4240_s0 + $0x488] sm:$0xff]  ;;  %v213_v29 = vld [vmem:[%s4240_s0 + $0x638] sm:$0xff] }
 0x11a   :  { %1951 = vst.msk [vmem:[%s4242_s3 + $0x590] sm:$0xff] %vm1772_vm1, %v1734_v30 }
 0x11b   :  { %v1573_v37 = vmax.f32 %v960_v35, 0.0  ;;  %v1627_v38 = vmax.f32 %v1122_v36, 0.0  ;;  %2026 = vmatmul.msk.f32.gmra.mxu0 %vm242_vm0, %v47_v33  ;;  %2080 = vmatmul.msk.f32.gmra.mxu1 %vm242_vm0, %v101_v34  ;;  %v105_v34 = vld [vmem:[%s4240_s0 + $0x2d8] sm:$0xff]  ;;  %v3310_v35 = vld [vmem:[%s4241_s2] ss:$0 sm:$0xff] }
 0x11c   :  { %v1283_v39 = vpop.f32.mrf.mxu2  ;;  %v1445_v40 = vpop.f32.mrf.mxu3 }
 0x11d   :  { %1790 = vst.msk [vmem:[%s4242_s3 + $0x88] sm:$0xff] %vm1772_vm1, %v1573_v37  ;;  %v1284_v41 = vadd.f32 %v2539_v8, %v1283_v39  ;;  %v1446_v42 = vadd.f32 %v2539_v8, %v1445_v40 }
 0x11e   :  { %1844 = vst.msk [vmem:[%s4242_s3 + $0x238] sm:$0xff] %vm1772_vm1, %v1627_v38 }
 0x11f   :  { %v1681_v45 = vmax.f32 %v1284_v41, 0.0  ;;  %v1735_v46 = vmax.f32 %v1446_v42, 0.0 }
 0x120   :  { %v962_v47 = vpop.f32.mrf.mxu0  ;;  %v1124_v48 = vpop.f32.mrf.mxu1 }
 0x121   :  { %1898 = vst.msk [vmem:[%s4242_s3 + $0x3e8] sm:$0xff] %vm1772_vm1, %v1681_v45  ;;  %2135 = vmatmul.msk.f32.gmra.mxu2 %vm242_vm0, %v156_v43  ;;  %2189 = vmatmul.msk.f32.gmra.mxu3 %vm242_vm0, %v210_v44  ;;  %v963_v51 = vadd.f32 %v2539_v8, %v962_v47  ;;  %v1125_v52 = vadd.f32 %v2539_v8, %v1124_v48  ;;  %v160_v44 = vld [vmem:[%s4240_s0 + $0x490] sm:$0xff]  ;;  %v214_v45 = vld [vmem:[%s4240_s0 + $0x640] sm:$0xff] }
 0x122   :  { %1952 = vst.msk [vmem:[%s4242_s3 + $0x598] sm:$0xff] %vm1772_vm1, %v1735_v46 }
 0x123   :  { %v1574_v53 = vmax.f32 %v963_v51, 0.0  ;;  %v1628_v54 = vmax.f32 %v1125_v52, 0.0  ;;  %2027 = vmatmul.msk.f32.gmra.mxu0 %vm242_vm0, %v48_v49  ;;  %2081 = vmatmul.msk.f32.gmra.mxu1 %vm242_vm0, %v102_v50  ;;  %v52_v50 = vld [vmem:[%s4240_s0 + $0x130] sm:$0xff]  ;;  %v106_v51 = vld [vmem:[%s4240_s0 + $0x2e0] sm:$0xff] }
 0x124   :  { %v1286_v55 = vpop.f32.mrf.mxu2  ;;  %v1448_v56 = vpop.f32.mrf.mxu3 }
 0x125   :  { %1791 = vst.msk [vmem:[%s4242_s3 + $0x90] sm:$0xff] %vm1772_vm1, %v1574_v53  ;;  %v1287_v57 = vadd.f32 %v2539_v8, %v1286_v55  ;;  %v1449_v58 = vadd.f32 %v2539_v8, %v1448_v56 }
 0x126   :  { %1845 = vst.msk [vmem:[%s4242_s3 + $0x240] sm:$0xff] %vm1772_vm1, %v1628_v54 }
 0x127   :  { %v1682_v61 = vmax.f32 %v1287_v57, 0.0  ;;  %v1736_v62 = vmax.f32 %v1449_v58, 0.0 }
 0x128   :  { %v965_v63 = vpop.f32.mrf.mxu0  ;;  %v1127_v0 = vpop.f32.mrf.mxu1 }
 0x129   :  { %1899 = vst.msk [vmem:[%s4242_s3 + $0x3f0] sm:$0xff] %vm1772_vm1, %v1682_v61  ;;  %2136 = vmatmul.msk.f32.gmra.mxu2 %vm242_vm0, %v157_v59  ;;  %2190 = vmatmul.msk.f32.gmra.mxu3 %vm242_vm0, %v211_v60  ;;  %v966_v3 = vadd.f32 %v2539_v8, %v965_v63  ;;  %v1128_v4 = vadd.f32 %v2539_v8, %v1127_v0  ;;  %v161_v60 = vld [vmem:[%s4240_s0 + $0x498] sm:$0xff]  ;;  %v215_v61 = vld [vmem:[%s4240_s0 + $0x648] sm:$0xff] }
 0x12a   :  { %1953 = vst.msk [vmem:[%s4242_s3 + $0x5a0] sm:$0xff] %vm1772_vm1, %v1736_v62 }
 0x12b   :  { %v1575_v5 = vmax.f32 %v966_v3, 0.0  ;;  %v1629_v6 = vmax.f32 %v1128_v4, 0.0  ;;  %2028 = vmatmul.msk.f32.gmra.mxu0 %vm242_vm0, %v49_v1  ;;  %2082 = vmatmul.msk.f32.gmra.mxu1 %vm242_vm0, %v103_v2  ;;  %v53_v2 = vld [vmem:[%s4240_s0 + $0x138] sm:$0xff]  ;;  %v107_v3 = vld [vmem:[%s4240_s0 + $0x2e8] sm:$0xff] }
 0x12c   :  { %v1289_v7 = vpop.f32.mrf.mxu2  ;;  %v1451_v9 = vpop.f32.mrf.mxu3 }
 0x12d   :  { %1792 = vst.msk [vmem:[%s4242_s3 + $0x98] sm:$0xff] %vm1772_vm1, %v1575_v5  ;;  %v1290_v10 = vadd.f32 %v2539_v8, %v1289_v7  ;;  %v1452_v11 = vadd.f32 %v2539_v8, %v1451_v9 }
 0x12e   :  { %1846 = vst.msk [vmem:[%s4242_s3 + $0x248] sm:$0xff] %vm1772_vm1, %v1629_v6 }
 0x12f   :  { %v1683_v14 = vmax.f32 %v1290_v10, 0.0  ;;  %v1737_v15 = vmax.f32 %v1452_v11, 0.0 }
 0x130   :  { %v968_v16 = vpop.f32.mrf.mxu0  ;;  %v1130_v17 = vpop.f32.mrf.mxu1 }
 0x131   :  { %1900 = vst.msk [vmem:[%s4242_s3 + $0x3f8] sm:$0xff] %vm1772_vm1, %v1683_v14  ;;  %2137 = vmatmul.msk.f32.gmra.mxu2 %vm242_vm0, %v158_v12  ;;  %2191 = vmatmul.msk.f32.gmra.mxu3 %vm242_vm0, %v212_v13  ;;  %v969_v20 = vadd.f32 %v2539_v8, %v968_v16  ;;  %v1131_v21 = vadd.f32 %v2539_v8, %v1130_v17  ;;  %v162_v13 = vld [vmem:[%s4240_s0 + $0x4a0] sm:$0xff]  ;;  %v216_v14 = vld [vmem:[%s4240_s0 + $0x650] sm:$0xff] }
 0x132   :  { %1954 = vst.msk [vmem:[%s4242_s3 + $0x5a8] sm:$0xff] %vm1772_vm1, %v1737_v15 }
 0x133   :  { %v1576_v22 = vmax.f32 %v969_v20, 0.0  ;;  %v1630_v23 = vmax.f32 %v1131_v21, 0.0  ;;  %2029 = vmatmul.msk.f32.gmra.mxu0 %vm242_vm0, %v50_v18  ;;  %2083 = vmatmul.msk.f32.gmra.mxu1 %vm242_vm0, %v104_v19  ;;  %v54_v19 = vld [vmem:[%s4240_s0 + $0x140] sm:$0xff]  ;;  %v108_v20 = vld [vmem:[%s4240_s0 + $0x2f0] sm:$0xff] }
 0x134   :  { %v1292_v24 = vpop.f32.mrf.mxu2  ;;  %v1454_v25 = vpop.f32.mrf.mxu3 }
 0x135   :  { %1793 = vst.msk [vmem:[%s4242_s3 + $0xa0] sm:$0xff] %vm1772_vm1, %v1576_v22  ;;  %v1293_v26 = vadd.f32 %v2539_v8, %v1292_v24  ;;  %v1455_v27 = vadd.f32 %v2539_v8, %v1454_v25  ;;  %v51_v8 = vld [vmem:[%s4240_s0 + $0x128] sm:$0xff] }
 0x136   :  { %1847 = vst.msk [vmem:[%s4242_s3 + $0x250] sm:$0xff] %vm1772_vm1, %v1630_v23 }
 0x137   :  { %v1684_v30 = vmax.f32 %v1293_v26, 0.0  ;;  %v1738_v31 = vmax.f32 %v1455_v27, 0.0 }
 0x138   :  { %v971_v32 = vpop.f32.mrf.mxu0  ;;  %v1133_v33 = vpop.f32.mrf.mxu1 }
 0x139   :  { %1901 = vst.msk [vmem:[%s4242_s3 + $0x400] sm:$0xff] %vm1772_vm1, %v1684_v30  ;;  %2138 = vmatmul.msk.f32.gmra.mxu2 %vm242_vm0, %v159_v28  ;;  %2192 = vmatmul.msk.f32.gmra.mxu3 %vm242_vm0, %v213_v29  ;;  %v972_v36 = vadd.f32 %v3310_v35, %v971_v32  ;;  %v1134_v37 = vadd.f32 %v3310_v35, %v1133_v33  ;;  %v163_v29 = vld [vmem:[%s4240_s0 + $0x4a8] sm:$0xff]  ;;  %v217_v30 = vld [vmem:[%s4240_s0 + $0x658] sm:$0xff] }
 0x13a   :  { %1955 = vst.msk [vmem:[%s4242_s3 + $0x5b0] sm:$0xff] %vm1772_vm1, %v1738_v31 }
 0x13b   :  { %v1577_v38 = vmax.f32 %v972_v36, 0.0  ;;  %v1631_v39 = vmax.f32 %v1134_v37, 0.0  ;;  %2030 = vmatmul.msk.f32.gmra.mxu0 %vm242_vm0, %v51_v8  ;;  %2084 = vmatmul.msk.f32.gmra.mxu1 %vm242_vm0, %v105_v34  ;;  %v55_v34 = vld [vmem:[%s4240_s0 + $0x148] sm:$0xff]  ;;  %v109_v36 = vld [vmem:[%s4240_s0 + $0x2f8] sm:$0xff] }
 0x13c   :  { %v1295_v40 = vpop.f32.mrf.mxu2  ;;  %v1457_v41 = vpop.f32.mrf.mxu3 }
 0x13d   :  { %1794 = vst.msk [vmem:[%s4242_s3 + $0xa8] sm:$0xff] %vm1772_vm1, %v1577_v38  ;;  %v1296_v42 = vadd.f32 %v3310_v35, %v1295_v40  ;;  %v1458_v43 = vadd.f32 %v3310_v35, %v1457_v41 }
 0x13e   :  { %1848 = vst.msk [vmem:[%s4242_s3 + $0x258] sm:$0xff] %vm1772_vm1, %v1631_v39 }
 0x13f   :  { %v1685_v46 = vmax.f32 %v1296_v42, 0.0  ;;  %v1739_v47 = vmax.f32 %v1458_v43, 0.0 }
 0x140   :  { %v974_v48 = vpop.f32.mrf.mxu0  ;;  %v1136_v49 = vpop.f32.mrf.mxu1 }
 0x141   :  { %1902 = vst.msk [vmem:[%s4242_s3 + $0x408] sm:$0xff] %vm1772_vm1, %v1685_v46  ;;  %2139 = vmatmul.msk.f32.gmra.mxu2 %vm242_vm0, %v160_v44  ;;  %2193 = vmatmul.msk.f32.gmra.mxu3 %vm242_vm0, %v214_v45  ;;  %v975_v52 = vadd.f32 %v3310_v35, %v974_v48  ;;  %v1137_v53 = vadd.f32 %v3310_v35, %v1136_v49  ;;  %v164_v45 = vld [vmem:[%s4240_s0 + $0x4b0] sm:$0xff]  ;;  %v218_v46 = vld [vmem:[%s4240_s0 + $0x660] sm:$0xff] }
 0x142   :  { %1956 = vst.msk [vmem:[%s4242_s3 + $0x5b8] sm:$0xff] %vm1772_vm1, %v1739_v47 }
 0x143   :  { %v1578_v54 = vmax.f32 %v975_v52, 0.0  ;;  %v1632_v55 = vmax.f32 %v1137_v53, 0.0  ;;  %2031 = vmatmul.msk.f32.gmra.mxu0 %vm242_vm0, %v52_v50  ;;  %2085 = vmatmul.msk.f32.gmra.mxu1 %vm242_vm0, %v106_v51  ;;  %v56_v51 = vld [vmem:[%s4240_s0 + $0x150] sm:$0xff]  ;;  %v110_v52 = vld [vmem:[%s4240_s0 + $0x300] sm:$0xff] }
 0x144   :  { %v1298_v56 = vpop.f32.mrf.mxu2  ;;  %v1460_v57 = vpop.f32.mrf.mxu3 }
 0x145   :  { %1795 = vst.msk [vmem:[%s4242_s3 + $0xb0] sm:$0xff] %vm1772_vm1, %v1578_v54  ;;  %v1299_v58 = vadd.f32 %v3310_v35, %v1298_v56  ;;  %v1461_v59 = vadd.f32 %v3310_v35, %v1460_v57 }
 0x146   :  { %1849 = vst.msk [vmem:[%s4242_s3 + $0x260] sm:$0xff] %vm1772_vm1, %v1632_v55 }
 0x147   :  { %v1686_v62 = vmax.f32 %v1299_v58, 0.0  ;;  %v1740_v63 = vmax.f32 %v1461_v59, 0.0 }
 0x148   :  { %v977_v0 = vpop.f32.mrf.mxu0  ;;  %v1139_v1 = vpop.f32.mrf.mxu1 }
 0x149   :  { %1903 = vst.msk [vmem:[%s4242_s3 + $0x410] sm:$0xff] %vm1772_vm1, %v1686_v62  ;;  %2140 = vmatmul.msk.f32.gmra.mxu2 %vm242_vm0, %v161_v60  ;;  %2194 = vmatmul.msk.f32.gmra.mxu3 %vm242_vm0, %v215_v61  ;;  %v978_v4 = vadd.f32 %v3310_v35, %v977_v0  ;;  %v1140_v5 = vadd.f32 %v3310_v35, %v1139_v1  ;;  %v165_v61 = vld [vmem:[%s4240_s0 + $0x4b8] sm:$0xff]  ;;  %v219_v62 = vld [vmem:[%s4240_s0 + $0x668] sm:$0xff] }
 0x14a   :  { %1957 = vst.msk [vmem:[%s4242_s3 + $0x5c0] sm:$0xff] %vm1772_vm1, %v1740_v63 }
 0x14b   :  { %v1579_v6 = vmax.f32 %v978_v4, 0.0  ;;  %v1633_v7 = vmax.f32 %v1140_v5, 0.0  ;;  %2032 = vmatmul.msk.f32.gmra.mxu0 %vm242_vm0, %v53_v2  ;;  %2086 = vmatmul.msk.f32.gmra.mxu1 %vm242_vm0, %v107_v3  ;;  %v57_v3 = vld [vmem:[%s4240_s0 + $0x158] sm:$0xff]  ;;  %v111_v4 = vld [vmem:[%s4240_s0 + $0x308] sm:$0xff] }
 0x14c   :  { %v1301_v9 = vpop.f32.mrf.mxu2  ;;  %v1463_v10 = vpop.f32.mrf.mxu3 }
 0x14d   :  { %1796 = vst.msk [vmem:[%s4242_s3 + $0xb8] sm:$0xff] %vm1772_vm1, %v1579_v6  ;;  %v1302_v11 = vadd.f32 %v3310_v35, %v1301_v9  ;;  %v1464_v12 = vadd.f32 %v3310_v35, %v1463_v10 }
 0x14e   :  { %1850 = vst.msk [vmem:[%s4242_s3 + $0x268] sm:$0xff] %vm1772_vm1, %v1633_v7 }
 0x14f   :  { %v1687_v15 = vmax.f32 %v1302_v11, 0.0  ;;  %v1741_v16 = vmax.f32 %v1464_v12, 0.0 }
 0x150   :  { %v980_v17 = vpop.f32.mrf.mxu0  ;;  %v1142_v18 = vpop.f32.mrf.mxu1 }
 0x151   :  { %1904 = vst.msk [vmem:[%s4242_s3 + $0x418] sm:$0xff] %vm1772_vm1, %v1687_v15  ;;  %2141 = vmatmul.msk.f32.gmra.mxu2 %vm242_vm0, %v162_v13  ;;  %2195 = vmatmul.msk.f32.gmra.mxu3 %vm242_vm0, %v216_v14  ;;  %v981_v21 = vadd.f32 %v3310_v35, %v980_v17  ;;  %v1143_v22 = vadd.f32 %v3310_v35, %v1142_v18  ;;  %v166_v14 = vld [vmem:[%s4240_s0 + $0x4c0] sm:$0xff]  ;;  %v220_v15 = vld [vmem:[%s4240_s0 + $0x670] sm:$0xff] }
 0x152   :  { %1958 = vst.msk [vmem:[%s4242_s3 + $0x5c8] sm:$0xff] %vm1772_vm1, %v1741_v16 }
 0x153   :  { %v1580_v23 = vmax.f32 %v981_v21, 0.0  ;;  %v1634_v24 = vmax.f32 %v1143_v22, 0.0  ;;  %2033 = vmatmul.msk.f32.gmra.mxu0 %vm242_vm0, %v54_v19  ;;  %2087 = vmatmul.msk.f32.gmra.mxu1 %vm242_vm0, %v108_v20  ;;  %v58_v20 = vld [vmem:[%s4240_s0 + $0x160] sm:$0xff]  ;;  %v112_v21 = vld [vmem:[%s4240_s0 + $0x310] sm:$0xff] }
 0x154   :  { %v1304_v25 = vpop.f32.mrf.mxu2  ;;  %v1466_v26 = vpop.f32.mrf.mxu3 }
 0x155   :  { %1797 = vst.msk [vmem:[%s4242_s3 + $0xc0] sm:$0xff] %vm1772_vm1, %v1580_v23  ;;  %v1305_v27 = vadd.f32 %v3310_v35, %v1304_v25  ;;  %v1467_v28 = vadd.f32 %v3310_v35, %v1466_v26 }
 0x156   :  { %1851 = vst.msk [vmem:[%s4242_s3 + $0x270] sm:$0xff] %vm1772_vm1, %v1634_v24 }
 0x157   :  { %v1688_v31 = vmax.f32 %v1305_v27, 0.0  ;;  %v1742_v32 = vmax.f32 %v1467_v28, 0.0 }
 0x158   :  { %v983_v33 = vpop.f32.mrf.mxu0  ;;  %v1145_v8 = vpop.f32.mrf.mxu1 }
 0x159   :  { %1905 = vst.msk [vmem:[%s4242_s3 + $0x420] sm:$0xff] %vm1772_vm1, %v1688_v31  ;;  %2142 = vmatmul.msk.f32.gmra.mxu2 %vm242_vm0, %v163_v29  ;;  %2196 = vmatmul.msk.f32.gmra.mxu3 %vm242_vm0, %v217_v30  ;;  %v984_v37 = vadd.f32 %v3310_v35, %v983_v33  ;;  %v1146_v38 = vadd.f32 %v3310_v35, %v1145_v8  ;;  %v167_v30 = vld [vmem:[%s4240_s0 + $0x4c8] sm:$0xff]  ;;  %v221_v31 = vld [vmem:[%s4240_s0 + $0x678] sm:$0xff] }
 0x15a   :  { %1959 = vst.msk [vmem:[%s4242_s3 + $0x5d0] sm:$0xff] %vm1772_vm1, %v1742_v32 }
 0x15b   :  { %v1581_v39 = vmax.f32 %v984_v37, 0.0  ;;  %v1635_v40 = vmax.f32 %v1146_v38, 0.0  ;;  %2034 = vmatmul.msk.f32.gmra.mxu0 %vm242_vm0, %v55_v34  ;;  %2088 = vmatmul.msk.f32.gmra.mxu1 %vm242_vm0, %v109_v36  ;;  %v59_v36 = vld [vmem:[%s4240_s0 + $0x168] sm:$0xff]  ;;  %v113_v37 = vld [vmem:[%s4240_s0 + $0x318] sm:$0xff] }
 0x15c   :  { %v1307_v41 = vpop.f32.mrf.mxu2  ;;  %v1469_v42 = vpop.f32.mrf.mxu3 }
 0x15d   :  { %1798 = vst.msk [vmem:[%s4242_s3 + $0xc8] sm:$0xff] %vm1772_vm1, %v1581_v39  ;;  %v1308_v43 = vadd.f32 %v3310_v35, %v1307_v41  ;;  %v1470_v44 = vadd.f32 %v3310_v35, %v1469_v42 }
 0x15e   :  { %1852 = vst.msk [vmem:[%s4242_s3 + $0x278] sm:$0xff] %vm1772_vm1, %v1635_v40 }
 0x15f   :  { %v1689_v47 = vmax.f32 %v1308_v43, 0.0  ;;  %v1743_v48 = vmax.f32 %v1470_v44, 0.0 }
 0x160   :  { %v986_v49 = vpop.f32.mrf.mxu0  ;;  %v1148_v50 = vpop.f32.mrf.mxu1 }
 0x161   :  { %1906 = vst.msk [vmem:[%s4242_s3 + $0x428] sm:$0xff] %vm1772_vm1, %v1689_v47  ;;  %2143 = vmatmul.msk.f32.gmra.mxu2 %vm242_vm0, %v164_v45  ;;  %2197 = vmatmul.msk.f32.gmra.mxu3 %vm242_vm0, %v218_v46  ;;  %v987_v53 = vadd.f32 %v3310_v35, %v986_v49  ;;  %v1149_v54 = vadd.f32 %v3310_v35, %v1148_v50  ;;  %v168_v46 = vld [vmem:[%s4240_s0 + $0x4d0] sm:$0xff]  ;;  %v222_v47 = vld [vmem:[%s4240_s0 + $0x680] sm:$0xff] }
 0x162   :  { %1960 = vst.msk [vmem:[%s4242_s3 + $0x5d8] sm:$0xff] %vm1772_vm1, %v1743_v48 }
 0x163   :  { %v1582_v55 = vmax.f32 %v987_v53, 0.0  ;;  %v1636_v56 = vmax.f32 %v1149_v54, 0.0  ;;  %2035 = vmatmul.msk.f32.gmra.mxu0 %vm242_vm0, %v56_v51  ;;  %2089 = vmatmul.msk.f32.gmra.mxu1 %vm242_vm0, %v110_v52  ;;  %v60_v52 = vld [vmem:[%s4240_s0 + $0x170] sm:$0xff]  ;;  %v114_v53 = vld [vmem:[%s4240_s0 + $0x320] sm:$0xff] }
 0x164   :  { %v1310_v57 = vpop.f32.mrf.mxu2  ;;  %v1472_v58 = vpop.f32.mrf.mxu3 }
 0x165   :  { %1799 = vst.msk [vmem:[%s4242_s3 + $0xd0] sm:$0xff] %vm1772_vm1, %v1582_v55  ;;  %v1311_v59 = vadd.f32 %v3310_v35, %v1310_v57  ;;  %v1473_v60 = vadd.f32 %v3310_v35, %v1472_v58 }
 0x166   :  { %1853 = vst.msk [vmem:[%s4242_s3 + $0x280] sm:$0xff] %vm1772_vm1, %v1636_v56 }
 0x167   :  { %v1690_v63 = vmax.f32 %v1311_v59, 0.0  ;;  %v1744_v0 = vmax.f32 %v1473_v60, 0.0 }
 0x168   :  { %v989_v1 = vpop.f32.mrf.mxu0  ;;  %v1151_v2 = vpop.f32.mrf.mxu1 }
 0x169   :  { %1907 = vst.msk [vmem:[%s4242_s3 + $0x430] sm:$0xff] %vm1772_vm1, %v1690_v63  ;;  %2144 = vmatmul.msk.f32.gmra.mxu2 %vm242_vm0, %v165_v61  ;;  %2198 = vmatmul.msk.f32.gmra.mxu3 %vm242_vm0, %v219_v62  ;;  %v990_v5 = vadd.f32 %v3310_v35, %v989_v1  ;;  %v1152_v6 = vadd.f32 %v3310_v35, %v1151_v2  ;;  %v169_v62 = vld [vmem:[%s4240_s0 + $0x4d8] sm:$0xff]  ;;  %v223_v63 = vld [vmem:[%s4240_s0 + $0x688] sm:$0xff] }
 0x16a   :  { %1961 = vst.msk [vmem:[%s4242_s3 + $0x5e0] sm:$0xff] %vm1772_vm1, %v1744_v0 }
 0x16b   :  { %v1583_v7 = vmax.f32 %v990_v5, 0.0  ;;  %v1637_v9 = vmax.f32 %v1152_v6, 0.0  ;;  %2036 = vmatmul.msk.f32.gmra.mxu0 %vm242_vm0, %v57_v3  ;;  %2090 = vmatmul.msk.f32.gmra.mxu1 %vm242_vm0, %v111_v4  ;;  %v61_v4 = vld [vmem:[%s4240_s0 + $0x178] sm:$0xff]  ;;  %v115_v5 = vld [vmem:[%s4240_s0 + $0x328] sm:$0xff] }
 0x16c   :  { %v1313_v10 = vpop.f32.mrf.mxu2  ;;  %v1475_v11 = vpop.f32.mrf.mxu3 }
 0x16d   :  { %1800 = vst.msk [vmem:[%s4242_s3 + $0xd8] sm:$0xff] %vm1772_vm1, %v1583_v7  ;;  %v1314_v12 = vadd.f32 %v3310_v35, %v1313_v10  ;;  %v1476_v13 = vadd.f32 %v3310_v35, %v1475_v11 }
 0x16e   :  { %1854 = vst.msk [vmem:[%s4242_s3 + $0x288] sm:$0xff] %vm1772_vm1, %v1637_v9 }
 0x16f   :  { %v1691_v16 = vmax.f32 %v1314_v12, 0.0  ;;  %v1745_v17 = vmax.f32 %v1476_v13, 0.0 }
 0x170   :  { %v992_v18 = vpop.f32.mrf.mxu0  ;;  %v1154_v19 = vpop.f32.mrf.mxu1 }
 0x171   :  { %1908 = vst.msk [vmem:[%s4242_s3 + $0x438] sm:$0xff] %vm1772_vm1, %v1691_v16  ;;  %2145 = vmatmul.msk.f32.gmra.mxu2 %vm242_vm0, %v166_v14  ;;  %2199 = vmatmul.msk.f32.gmra.mxu3 %vm242_vm0, %v220_v15  ;;  %v993_v22 = vadd.f32 %v3310_v35, %v992_v18  ;;  %v1155_v23 = vadd.f32 %v3310_v35, %v1154_v19  ;;  %v170_v15 = vld [vmem:[%s4240_s0 + $0x4e0] sm:$0xff]  ;;  %v224_v16 = vld [vmem:[%s4240_s0 + $0x690] sm:$0xff] }
 0x172   :  { %1962 = vst.msk [vmem:[%s4242_s3 + $0x5e8] sm:$0xff] %vm1772_vm1, %v1745_v17 }
 0x173   :  { %v1584_v24 = vmax.f32 %v993_v22, 0.0  ;;  %v1638_v25 = vmax.f32 %v1155_v23, 0.0  ;;  %2037 = vmatmul.msk.f32.gmra.mxu0 %vm242_vm0, %v58_v20  ;;  %2091 = vmatmul.msk.f32.gmra.mxu1 %vm242_vm0, %v112_v21  ;;  %v62_v21 = vld [vmem:[%s4240_s0 + $0x180] sm:$0xff]  ;;  %v116_v22 = vld [vmem:[%s4240_s0 + $0x330] sm:$0xff] }
 0x174   :  { %v1316_v26 = vpop.f32.mrf.mxu2  ;;  %v1478_v27 = vpop.f32.mrf.mxu3 }
 0x175   :  { %1801 = vst.msk [vmem:[%s4242_s3 + $0xe0] sm:$0xff] %vm1772_vm1, %v1584_v24  ;;  %v1317_v28 = vadd.f32 %v3310_v35, %v1316_v26  ;;  %v1479_v29 = vadd.f32 %v3310_v35, %v1478_v27 }
 0x176   :  { %1855 = vst.msk [vmem:[%s4242_s3 + $0x290] sm:$0xff] %vm1772_vm1, %v1638_v25 }
 0x177   :  { %v1692_v32 = vmax.f32 %v1317_v28, 0.0  ;;  %v1746_v33 = vmax.f32 %v1479_v29, 0.0 }
 0x178   :  { %v995_v8 = vpop.f32.mrf.mxu0  ;;  %v1157_v34 = vpop.f32.mrf.mxu1 }
 0x179   :  { %1909 = vst.msk [vmem:[%s4242_s3 + $0x440] sm:$0xff] %vm1772_vm1, %v1692_v32  ;;  %2146 = vmatmul.msk.f32.gmra.mxu2 %vm242_vm0, %v167_v30  ;;  %2200 = vmatmul.msk.f32.gmra.mxu3 %vm242_vm0, %v221_v31  ;;  %v996_v38 = vadd.f32 %v3310_v35, %v995_v8  ;;  %v1158_v39 = vadd.f32 %v3310_v35, %v1157_v34  ;;  %v171_v31 = vld [vmem:[%s4240_s0 + $0x4e8] sm:$0xff]  ;;  %v225_v32 = vld [vmem:[%s4240_s0 + $0x698] sm:$0xff] }
 0x17a   :  { %1963 = vst.msk [vmem:[%s4242_s3 + $0x5f0] sm:$0xff] %vm1772_vm1, %v1746_v33 }
 0x17b   :  { %v1585_v40 = vmax.f32 %v996_v38, 0.0  ;;  %v1639_v41 = vmax.f32 %v1158_v39, 0.0  ;;  %2038 = vmatmul.msk.f32.gmra.mxu0 %vm242_vm0, %v59_v36  ;;  %2092 = vmatmul.msk.f32.gmra.mxu1 %vm242_vm0, %v113_v37  ;;  %v63_v37 = vld [vmem:[%s4240_s0 + $0x188] sm:$0xff]  ;;  %v117_v38 = vld [vmem:[%s4240_s0 + $0x338] sm:$0xff] }
 0x17c   :  { %v1319_v42 = vpop.f32.mrf.mxu2  ;;  %v1481_v43 = vpop.f32.mrf.mxu3 }
 0x17d   :  { %1802 = vst.msk [vmem:[%s4242_s3 + $0xe8] sm:$0xff] %vm1772_vm1, %v1585_v40  ;;  %v1320_v44 = vadd.f32 %v3310_v35, %v1319_v42  ;;  %v1482_v45 = vadd.f32 %v3310_v35, %v1481_v43 }
 0x17e   :  { %1856 = vst.msk [vmem:[%s4242_s3 + $0x298] sm:$0xff] %vm1772_vm1, %v1639_v41 }
 0x17f   :  { %v1693_v48 = vmax.f32 %v1320_v44, 0.0  ;;  %v1747_v49 = vmax.f32 %v1482_v45, 0.0 }
 0x180   :  { %v998_v50 = vpop.f32.mrf.mxu0  ;;  %v1160_v51 = vpop.f32.mrf.mxu1 }
 0x181   :  { %1910 = vst.msk [vmem:[%s4242_s3 + $0x448] sm:$0xff] %vm1772_vm1, %v1693_v48  ;;  %2147 = vmatmul.msk.f32.gmra.mxu2 %vm242_vm0, %v168_v46  ;;  %2201 = vmatmul.msk.f32.gmra.mxu3 %vm242_vm0, %v222_v47  ;;  %v999_v54 = vadd.f32 %v3310_v35, %v998_v50  ;;  %v1161_v55 = vadd.f32 %v3310_v35, %v1160_v51  ;;  %v172_v47 = vld [vmem:[%s4240_s0 + $0x4f0] sm:$0xff]  ;;  %v226_v48 = vld [vmem:[%s4240_s0 + $0x6a0] sm:$0xff] }
 0x182   :  { %1964 = vst.msk [vmem:[%s4242_s3 + $0x5f8] sm:$0xff] %vm1772_vm1, %v1747_v49 }
 0x183   :  { %v1586_v56 = vmax.f32 %v999_v54, 0.0  ;;  %v1640_v57 = vmax.f32 %v1161_v55, 0.0  ;;  %2039 = vmatmul.msk.f32.gmra.mxu0 %vm242_vm0, %v60_v52  ;;  %2093 = vmatmul.msk.f32.gmra.mxu1 %vm242_vm0, %v114_v53  ;;  %v64_v53 = vld [vmem:[%s4240_s0 + $0x190] sm:$0xff]  ;;  %v118_v54 = vld [vmem:[%s4240_s0 + $0x340] sm:$0xff] }
 0x184   :  { %v1322_v58 = vpop.f32.mrf.mxu2  ;;  %v1484_v59 = vpop.f32.mrf.mxu3 }
 0x185   :  { %1803 = vst.msk [vmem:[%s4242_s3 + $0xf0] sm:$0xff] %vm1772_vm1, %v1586_v56  ;;  %v1323_v60 = vadd.f32 %v3310_v35, %v1322_v58  ;;  %v1485_v61 = vadd.f32 %v3310_v35, %v1484_v59 }
 0x186   :  { %1857 = vst.msk [vmem:[%s4242_s3 + $0x2a0] sm:$0xff] %vm1772_vm1, %v1640_v57 }
 0x187   :  { %v1694_v0 = vmax.f32 %v1323_v60, 0.0  ;;  %v1748_v1 = vmax.f32 %v1485_v61, 0.0 }
 0x188   :  { %v1001_v2 = vpop.f32.mrf.mxu0  ;;  %v1163_v3 = vpop.f32.mrf.mxu1 }
 0x189   :  { %1911 = vst.msk [vmem:[%s4242_s3 + $0x450] sm:$0xff] %vm1772_vm1, %v1694_v0  ;;  %2148 = vmatmul.msk.f32.gmra.mxu2 %vm242_vm0, %v169_v62  ;;  %2202 = vmatmul.msk.f32.gmra.mxu3 %vm242_vm0, %v223_v63  ;;  %v1002_v6 = vadd.f32 %v3310_v35, %v1001_v2  ;;  %v1164_v7 = vadd.f32 %v3310_v35, %v1163_v3  ;;  %v173_v63 = vld [vmem:[%s4240_s0 + $0x4f8] sm:$0xff]  ;;  %v227_v0 = vld [vmem:[%s4240_s0 + $0x6a8] sm:$0xff] }
 0x18a   :  { %1965 = vst.msk [vmem:[%s4242_s3 + $0x600] sm:$0xff] %vm1772_vm1, %v1748_v1 }
 0x18b   :  { %v1587_v9 = vmax.f32 %v1002_v6, 0.0  ;;  %v1641_v10 = vmax.f32 %v1164_v7, 0.0  ;;  %2040 = vmatmul.msk.f32.gmra.mxu0 %vm242_vm0, %v61_v4  ;;  %2094 = vmatmul.msk.f32.gmra.mxu1 %vm242_vm0, %v115_v5  ;;  %v65_v5 = vld [vmem:[%s4240_s0 + $0x198] sm:$0xff]  ;;  %v119_v6 = vld [vmem:[%s4240_s0 + $0x348] sm:$0xff] }
 0x18c   :  { %v1325_v11 = vpop.f32.mrf.mxu2  ;;  %v1487_v12 = vpop.f32.mrf.mxu3 }
 0x18d   :  { %1804 = vst.msk [vmem:[%s4242_s3 + $0xf8] sm:$0xff] %vm1772_vm1, %v1587_v9  ;;  %v1326_v13 = vadd.f32 %v3310_v35, %v1325_v11  ;;  %v1488_v14 = vadd.f32 %v3310_v35, %v1487_v12 }
 0x18e   :  { %1858 = vst.msk [vmem:[%s4242_s3 + $0x2a8] sm:$0xff] %vm1772_vm1, %v1641_v10 }
 0x18f   :  { %v1695_v17 = vmax.f32 %v1326_v13, 0.0  ;;  %v1749_v18 = vmax.f32 %v1488_v14, 0.0 }
 0x190   :  { %v1004_v19 = vpop.f32.mrf.mxu0  ;;  %v1166_v20 = vpop.f32.mrf.mxu1 }
 0x191   :  { %1912 = vst.msk [vmem:[%s4242_s3 + $0x458] sm:$0xff] %vm1772_vm1, %v1695_v17  ;;  %2149 = vmatmul.msk.f32.gmra.mxu2 %vm242_vm0, %v170_v15  ;;  %2203 = vmatmul.msk.f32.gmra.mxu3 %vm242_vm0, %v224_v16  ;;  %v1005_v23 = vadd.f32 %v3310_v35, %v1004_v19  ;;  %v1167_v24 = vadd.f32 %v3310_v35, %v1166_v20  ;;  %v174_v16 = vld [vmem:[%s4240_s0 + $0x500] sm:$0xff]  ;;  %v228_v17 = vld [vmem:[%s4240_s0 + $0x6b0] sm:$0xff] }
 0x192   :  { %1966 = vst.msk [vmem:[%s4242_s3 + $0x608] sm:$0xff] %vm1772_vm1, %v1749_v18 }
 0x193   :  { %v1588_v25 = vmax.f32 %v1005_v23, 0.0  ;;  %v1642_v26 = vmax.f32 %v1167_v24, 0.0  ;;  %2041 = vmatmul.msk.f32.gmra.mxu0 %vm242_vm0, %v62_v21  ;;  %2095 = vmatmul.msk.f32.gmra.mxu1 %vm242_vm0, %v116_v22  ;;  %v66_v22 = vld [vmem:[%s4240_s0 + $0x1a0] sm:$0xff]  ;;  %v120_v23 = vld [vmem:[%s4240_s0 + $0x350] sm:$0xff] }
 0x194   :  { %v1328_v27 = vpop.f32.mrf.mxu2  ;;  %v1490_v28 = vpop.f32.mrf.mxu3 }
 0x195   :  { %1805 = vst.msk [vmem:[%s4242_s3 + $0x100] sm:$0xff] %vm1772_vm1, %v1588_v25  ;;  %v1329_v29 = vadd.f32 %v3310_v35, %v1328_v27  ;;  %v1491_v30 = vadd.f32 %v3310_v35, %v1490_v28 }
 0x196   :  { %1859 = vst.msk [vmem:[%s4242_s3 + $0x2b0] sm:$0xff] %vm1772_vm1, %v1642_v26 }
 0x197   :  { %v1696_v33 = vmax.f32 %v1329_v29, 0.0  ;;  %v1750_v8 = vmax.f32 %v1491_v30, 0.0 }
 0x198   :  { %v1007_v34 = vpop.f32.mrf.mxu0  ;;  %v1169_v36 = vpop.f32.mrf.mxu1 }
 0x199   :  { %1913 = vst.msk [vmem:[%s4242_s3 + $0x460] sm:$0xff] %vm1772_vm1, %v1696_v33  ;;  %2150 = vmatmul.msk.f32.gmra.mxu2 %vm242_vm0, %v171_v31  ;;  %2204 = vmatmul.msk.f32.gmra.mxu3 %vm242_vm0, %v225_v32  ;;  %v1008_v39 = vadd.f32 %v3310_v35, %v1007_v34  ;;  %v1170_v40 = vadd.f32 %v3310_v35, %v1169_v36  ;;  %v175_v32 = vld [vmem:[%s4240_s0 + $0x508] sm:$0xff]  ;;  %v229_v33 = vld [vmem:[%s4240_s0 + $0x6b8] sm:$0xff] }
 0x19a   :  { %1967 = vst.msk [vmem:[%s4242_s3 + $0x610] sm:$0xff] %vm1772_vm1, %v1750_v8 }
 0x19b   :  { %v1589_v41 = vmax.f32 %v1008_v39, 0.0  ;;  %v1643_v42 = vmax.f32 %v1170_v40, 0.0  ;;  %2042 = vmatmul.msk.f32.gmra.mxu0 %vm242_vm0, %v63_v37  ;;  %2096 = vmatmul.msk.f32.gmra.mxu1 %vm242_vm0, %v117_v38  ;;  %v67_v38 = vld [vmem:[%s4240_s0 + $0x1a8] sm:$0xff]  ;;  %v121_v39 = vld [vmem:[%s4240_s0 + $0x358] sm:$0xff] }
 0x19c   :  { %v1331_v43 = vpop.f32.mrf.mxu2  ;;  %v1493_v44 = vpop.f32.mrf.mxu3 }
 0x19d   :  { %1806 = vst.msk [vmem:[%s4242_s3 + $0x108] sm:$0xff] %vm1772_vm1, %v1589_v41  ;;  %v1332_v45 = vadd.f32 %v3310_v35, %v1331_v43  ;;  %v1494_v46 = vadd.f32 %v3310_v35, %v1493_v44 }
 0x19e   :  { %1860 = vst.msk [vmem:[%s4242_s3 + $0x2b8] sm:$0xff] %vm1772_vm1, %v1643_v42 }
 0x19f   :  { %v1697_v49 = vmax.f32 %v1332_v45, 0.0  ;;  %v1751_v50 = vmax.f32 %v1494_v46, 0.0 }
 0x1a0   :  { %v1010_v51 = vpop.f32.mrf.mxu0  ;;  %v1172_v52 = vpop.f32.mrf.mxu1 }
 0x1a1   :  { %1914 = vst.msk [vmem:[%s4242_s3 + $0x468] sm:$0xff] %vm1772_vm1, %v1697_v49  ;;  %2151 = vmatmul.msk.f32.gmra.mxu2 %vm242_vm0, %v172_v47  ;;  %2205 = vmatmul.msk.f32.gmra.mxu3 %vm242_vm0, %v226_v48  ;;  %v1011_v55 = vadd.f32 %v3310_v35, %v1010_v51  ;;  %v1173_v56 = vadd.f32 %v3310_v35, %v1172_v52 }
 0x1a2   :  { %1968 = vst.msk [vmem:[%s4242_s3 + $0x618] sm:$0xff] %vm1772_vm1, %v1751_v50 }
 0x1a3   :  { %v1590_v57 = vmax.f32 %v1011_v55, 0.0  ;;  %v1644_v58 = vmax.f32 %v1173_v56, 0.0  ;;  %2043 = vmatmul.msk.f32.gmra.mxu0 %vm242_vm0, %v64_v53  ;;  %2097 = vmatmul.msk.f32.gmra.mxu1 %vm242_vm0, %v118_v54 }
 0x1a4   :  { %v1334_v59 = vpop.f32.mrf.mxu2  ;;  %v1496_v60 = vpop.f32.mrf.mxu3 }
 0x1a5   :  { %1807 = vst.msk [vmem:[%s4242_s3 + $0x110] sm:$0xff] %vm1772_vm1, %v1590_v57  ;;  %v1335_v61 = vadd.f32 %v3310_v35, %v1334_v59  ;;  %v1497_v62 = vadd.f32 %v3310_v35, %v1496_v60 }
 0x1a6   :  { %1861 = vst.msk [vmem:[%s4242_s3 + $0x2c0] sm:$0xff] %vm1772_vm1, %v1644_v58 }
 0x1a7   :  { %v1698_v1 = vmax.f32 %v1335_v61, 0.0  ;;  %v1752_v2 = vmax.f32 %v1497_v62, 0.0 }
 0x1a8   :  { %v1013_v3 = vpop.f32.mrf.mxu0  ;;  %v1175_v4 = vpop.f32.mrf.mxu1 }
 0x1a9   :  { %1915 = vst.msk [vmem:[%s4242_s3 + $0x470] sm:$0xff] %vm1772_vm1, %v1698_v1  ;;  %2152 = vmatmul.msk.f32.gmra.mxu2 %vm242_vm0, %v173_v63  ;;  %2206 = vmatmul.msk.f32.gmra.mxu3 %vm242_vm0, %v227_v0  ;;  %v1014_v7 = vadd.f32 %v3310_v35, %v1013_v3  ;;  %v1176_v9 = vadd.f32 %v3310_v35, %v1175_v4 }
 0x1aa   :  { %1969 = vst.msk [vmem:[%s4242_s3 + $0x620] sm:$0xff] %vm1772_vm1, %v1752_v2 }
 0x1ab   :  { %v1591_v10 = vmax.f32 %v1014_v7, 0.0  ;;  %v1645_v11 = vmax.f32 %v1176_v9, 0.0  ;;  %2044 = vmatmul.msk.f32.gmra.mxu0 %vm242_vm0, %v65_v5  ;;  %2098 = vmatmul.msk.f32.gmra.mxu1 %vm242_vm0, %v119_v6 }
 0x1ac   :  { %v1337_v12 = vpop.f32.mrf.mxu2  ;;  %v1499_v13 = vpop.f32.mrf.mxu3 }
 0x1ad   :  { %1808 = vst.msk [vmem:[%s4242_s3 + $0x118] sm:$0xff] %vm1772_vm1, %v1591_v10  ;;  %v1338_v14 = vadd.f32 %v3310_v35, %v1337_v12  ;;  %v1500_v15 = vadd.f32 %v3310_v35, %v1499_v13 }
 0x1ae   :  { %1862 = vst.msk [vmem:[%s4242_s3 + $0x2c8] sm:$0xff] %vm1772_vm1, %v1645_v11 }
 0x1af   :  { %v1699_v18 = vmax.f32 %v1338_v14, 0.0  ;;  %v1753_v19 = vmax.f32 %v1500_v15, 0.0 }
 0x1b0   :  { %v1016_v20 = vpop.f32.mrf.mxu0  ;;  %v1178_v21 = vpop.f32.mrf.mxu1 }
 0x1b1   :  { %1916 = vst.msk [vmem:[%s4242_s3 + $0x478] sm:$0xff] %vm1772_vm1, %v1699_v18  ;;  %2153 = vmatmul.msk.f32.gmra.mxu2 %vm242_vm0, %v174_v16  ;;  %2207 = vmatmul.msk.f32.gmra.mxu3 %vm242_vm0, %v228_v17  ;;  %v1017_v24 = vadd.f32 %v3310_v35, %v1016_v20  ;;  %v1179_v25 = vadd.f32 %v3310_v35, %v1178_v21 }
 0x1b2   :  { %1970 = vst.msk [vmem:[%s4242_s3 + $0x628] sm:$0xff] %vm1772_vm1, %v1753_v19 }
 0x1b3   :  { %v1592_v26 = vmax.f32 %v1017_v24, 0.0  ;;  %v1646_v27 = vmax.f32 %v1179_v25, 0.0  ;;  %2045 = vmatmul.msk.f32.gmra.mxu0 %vm242_vm0, %v66_v22  ;;  %2099 = vmatmul.msk.f32.gmra.mxu1 %vm242_vm0, %v120_v23 }
 0x1b4   :  { %v1340_v28 = vpop.f32.mrf.mxu2  ;;  %v1502_v29 = vpop.f32.mrf.mxu3 }
 0x1b5   :  { %1809 = vst.msk [vmem:[%s4242_s3 + $0x120] sm:$0xff] %vm1772_vm1, %v1592_v26  ;;  %v1341_v30 = vadd.f32 %v3310_v35, %v1340_v28  ;;  %v1503_v31 = vadd.f32 %v3310_v35, %v1502_v29 }
 0x1b6   :  { %1863 = vst.msk [vmem:[%s4242_s3 + $0x2d0] sm:$0xff] %vm1772_vm1, %v1646_v27 }
 0x1b7   :  { %v1700_v8 = vmax.f32 %v1341_v30, 0.0  ;;  %v1754_v34 = vmax.f32 %v1503_v31, 0.0 }
 0x1b8   :  { %v1019_v36 = vpop.f32.mrf.mxu0  ;;  %v1181_v37 = vpop.f32.mrf.mxu1 }
 0x1b9   :  { %1917 = vst.msk [vmem:[%s4242_s3 + $0x480] sm:$0xff] %vm1772_vm1, %v1700_v8  ;;  %2154 = vmatmul.msk.f32.gmra.mxu2 %vm242_vm0, %v175_v32  ;;  %2208 = vmatmul.msk.f32.gmra.mxu3 %vm242_vm0, %v229_v33  ;;  %v1020_v40 = vadd.f32 %v3310_v35, %v1019_v36  ;;  %v1182_v41 = vadd.f32 %v3310_v35, %v1181_v37 }
 0x1ba   :  { %1971 = vst.msk [vmem:[%s4242_s3 + $0x630] sm:$0xff] %vm1772_vm1, %v1754_v34 }
 0x1bb   :  { %v1593_v42 = vmax.f32 %v1020_v40, 0.0  ;;  %v1647_v43 = vmax.f32 %v1182_v41, 0.0  ;;  %2046 = vmatmul.msk.f32.gmra.mxu0 %vm242_vm0, %v67_v38  ;;  %2100 = vmatmul.msk.f32.gmra.mxu1 %vm242_vm0, %v121_v39 }
 0x1bc   :  { %v1343_v44 = vpop.f32.mrf.mxu2  ;;  %v1505_v45 = vpop.f32.mrf.mxu3 }
 0x1bd   :  { %1810 = vst.msk [vmem:[%s4242_s3 + $0x128] sm:$0xff] %vm1772_vm1, %v1593_v42  ;;  %v1344_v46 = vadd.f32 %v3310_v35, %v1343_v44  ;;  %v1506_v47 = vadd.f32 %v3310_v35, %v1505_v45 }
 0x1be   :  { %1864 = vst.msk [vmem:[%s4242_s3 + $0x2d8] sm:$0xff] %vm1772_vm1, %v1647_v43 }
 0x1bf   :  { %v1701_v48 = vmax.f32 %v1344_v46, 0.0  ;;  %v1755_v49 = vmax.f32 %v1506_v47, 0.0 }
 0x1c0   :  { %v1022_v50 = vpop.f32.mrf.mxu0  ;;  %v1184_v51 = vpop.f32.mrf.mxu1 }
 0x1c1   :  { %1918 = vst.msk [vmem:[%s4242_s3 + $0x488] sm:$0xff] %vm1772_vm1, %v1701_v48  ;;  %v1023_v52 = vadd.f32 %v3310_v35, %v1022_v50  ;;  %v1185_v53 = vadd.f32 %v3310_v35, %v1184_v51 }
 0x1c2   :  { %1972 = vst.msk [vmem:[%s4242_s3 + $0x638] sm:$0xff] %vm1772_vm1, %v1755_v49 }
 0x1c3   :  { %v1594_v54 = vmax.f32 %v1023_v52, 0.0  ;;  %v1648_v55 = vmax.f32 %v1185_v53, 0.0 }
 0x1c4   :  { %v1346_v56 = vpop.f32.mrf.mxu2  ;;  %v1508_v57 = vpop.f32.mrf.mxu3 }
 0x1c5   :  { %1811 = vst.msk [vmem:[%s4242_s3 + $0x130] sm:$0xff] %vm1772_vm1, %v1594_v54  ;;  %v1347_v58 = vadd.f32 %v3310_v35, %v1346_v56  ;;  %v1509_v59 = vadd.f32 %v3310_v35, %v1508_v57 }
 0x1c6   :  { %1865 = vst.msk [vmem:[%s4242_s3 + $0x2e0] sm:$0xff] %vm1772_vm1, %v1648_v55 }
 0x1c7   :  { %v1702_v60 = vmax.f32 %v1347_v58, 0.0  ;;  %v1756_v61 = vmax.f32 %v1509_v59, 0.0 }
 0x1c8   :  { %v1025_v62 = vpop.f32.mrf.mxu0  ;;  %v1187_v63 = vpop.f32.mrf.mxu1 }
 0x1c9   :  { %1919 = vst.msk [vmem:[%s4242_s3 + $0x490] sm:$0xff] %vm1772_vm1, %v1702_v60  ;;  %v1026_v0 = vadd.f32 %v3310_v35, %v1025_v62  ;;  %v1188_v1 = vadd.f32 %v3310_v35, %v1187_v63 }
 0x1ca   :  { %1973 = vst.msk [vmem:[%s4242_s3 + $0x640] sm:$0xff] %vm1772_vm1, %v1756_v61 }
 0x1cb   :  { %v1595_v2 = vmax.f32 %v1026_v0, 0.0  ;;  %v1649_v3 = vmax.f32 %v1188_v1, 0.0 }
 0x1cc   :  { %v1349_v4 = vpop.f32.mrf.mxu2  ;;  %v1511_v5 = vpop.f32.mrf.mxu3 }
 0x1cd   :  { %1812 = vst.msk [vmem:[%s4242_s3 + $0x138] sm:$0xff] %vm1772_vm1, %v1595_v2  ;;  %v1350_v6 = vadd.f32 %v3310_v35, %v1349_v4  ;;  %v1512_v7 = vadd.f32 %v3310_v35, %v1511_v5 }
 0x1ce   :  { %1866 = vst.msk [vmem:[%s4242_s3 + $0x2e8] sm:$0xff] %vm1772_vm1, %v1649_v3 }
 0x1cf   :  { %v1703_v9 = vmax.f32 %v1350_v6, 0.0  ;;  %v1757_v10 = vmax.f32 %v1512_v7, 0.0 }
 0x1d0   :  { %v1028_v11 = vpop.f32.mrf.mxu0  ;;  %v1190_v12 = vpop.f32.mrf.mxu1 }
 0x1d1   :  { %1920 = vst.msk [vmem:[%s4242_s3 + $0x498] sm:$0xff] %vm1772_vm1, %v1703_v9  ;;  %v1029_v13 = vadd.f32 %v3310_v35, %v1028_v11  ;;  %v1191_v14 = vadd.f32 %v3310_v35, %v1190_v12 }
 0x1d2   :  { %1974 = vst.msk [vmem:[%s4242_s3 + $0x648] sm:$0xff] %vm1772_vm1, %v1757_v10  ;;  %v4053_v10 = vld [vmem:[%s4241_s2] ss:$0 sm:$0xff] }
 0x1d3   :  { %v1596_v15 = vmax.f32 %v1029_v13, 0.0  ;;  %v1650_v16 = vmax.f32 %v1191_v14, 0.0 }
 0x1d4   :  { %v1352_v17 = vpop.f32.mrf.mxu2  ;;  %v1514_v18 = vpop.f32.mrf.mxu3 }
 0x1d5   :  { %1813 = vst.msk [vmem:[%s4242_s3 + $0x140] sm:$0xff] %vm1772_vm1, %v1596_v15  ;;  %v1353_v19 = vadd.f32 %v3310_v35, %v1352_v17  ;;  %v1515_v20 = vadd.f32 %v3310_v35, %v1514_v18 }
 0x1d6   :  { %1867 = vst.msk [vmem:[%s4242_s3 + $0x2f0] sm:$0xff] %vm1772_vm1, %v1650_v16 }
 0x1d7   :  { %v1704_v21 = vmax.f32 %v1353_v19, 0.0  ;;  %v1758_v22 = vmax.f32 %v1515_v20, 0.0 }
 0x1d8   :  { %v1031_v23 = vpop.f32.mrf.mxu0  ;;  %v1193_v24 = vpop.f32.mrf.mxu1 }
 0x1d9   :  { %1921 = vst.msk [vmem:[%s4242_s3 + $0x4a0] sm:$0xff] %vm1772_vm1, %v1704_v21  ;;  %v1032_v25 = vadd.f32 %v3310_v35, %v1031_v23  ;;  %v1194_v26 = vadd.f32 %v3310_v35, %v1193_v24 }
 0x1da   :  { %1975 = vst.msk [vmem:[%s4242_s3 + $0x650] sm:$0xff] %vm1772_vm1, %v1758_v22 }
 0x1db   :  { %v1597_v27 = vmax.f32 %v1032_v25, 0.0  ;;  %v1651_v28 = vmax.f32 %v1194_v26, 0.0 }
 0x1dc   :  { %v1355_v29 = vpop.f32.mrf.mxu2  ;;  %v1517_v30 = vpop.f32.mrf.mxu3 }
 0x1dd   :  { %1814 = vst.msk [vmem:[%s4242_s3 + $0x148] sm:$0xff] %vm1772_vm1, %v1597_v27  ;;  %v1356_v31 = vadd.f32 %v3310_v35, %v1355_v29  ;;  %v1518_v32 = vadd.f32 %v3310_v35, %v1517_v30 }
 0x1de   :  { %1868 = vst.msk [vmem:[%s4242_s3 + $0x2f8] sm:$0xff] %vm1772_vm1, %v1651_v28 }
 0x1df   :  { %v1705_v33 = vmax.f32 %v1356_v31, 0.0  ;;  %v1759_v8 = vmax.f32 %v1518_v32, 0.0 }
 0x1e0   :  { %v1034_v34 = vpop.f32.mrf.mxu0  ;;  %v1196_v36 = vpop.f32.mrf.mxu1 }
 0x1e1   :  { %1922 = vst.msk [vmem:[%s4242_s3 + $0x4a8] sm:$0xff] %vm1772_vm1, %v1705_v33  ;;  %v1035_v37 = vadd.f32 %v3310_v35, %v1034_v34  ;;  %v1197_v38 = vadd.f32 %v3310_v35, %v1196_v36 }
 0x1e2   :  { %1976 = vst.msk [vmem:[%s4242_s3 + $0x658] sm:$0xff] %vm1772_vm1, %v1759_v8 }
 0x1e3   :  { %v1598_v39 = vmax.f32 %v1035_v37, 0.0  ;;  %v1652_v40 = vmax.f32 %v1197_v38, 0.0 }
 0x1e4   :  { %v1358_v41 = vpop.f32.mrf.mxu2  ;;  %v1520_v42 = vpop.f32.mrf.mxu3 }
 0x1e5   :  { %1815 = vst.msk [vmem:[%s4242_s3 + $0x150] sm:$0xff] %vm1772_vm1, %v1598_v39  ;;  %v1359_v43 = vadd.f32 %v3310_v35, %v1358_v41  ;;  %v1521_v44 = vadd.f32 %v3310_v35, %v1520_v42 }
 0x1e6   :  { %1869 = vst.msk [vmem:[%s4242_s3 + $0x300] sm:$0xff] %vm1772_vm1, %v1652_v40 }
 0x1e7   :  { %v1706_v45 = vmax.f32 %v1359_v43, 0.0  ;;  %v1760_v46 = vmax.f32 %v1521_v44, 0.0 }
 0x1e8   :  { %v1037_v47 = vpop.f32.mrf.mxu0  ;;  %v1199_v48 = vpop.f32.mrf.mxu1 }
 0x1e9   :  { %1923 = vst.msk [vmem:[%s4242_s3 + $0x4b0] sm:$0xff] %vm1772_vm1, %v1706_v45  ;;  %v1038_v49 = vadd.f32 %v3310_v35, %v1037_v47  ;;  %v1200_v50 = vadd.f32 %v3310_v35, %v1199_v48 }
 0x1ea   :  { %1977 = vst.msk [vmem:[%s4242_s3 + $0x660] sm:$0xff] %vm1772_vm1, %v1760_v46 }
 0x1eb   :  { %v1599_v51 = vmax.f32 %v1038_v49, 0.0  ;;  %v1653_v52 = vmax.f32 %v1200_v50, 0.0 }
 0x1ec   :  { %v1361_v53 = vpop.f32.mrf.mxu2  ;;  %v1523_v54 = vpop.f32.mrf.mxu3 }
 0x1ed   :  { %1816 = vst.msk [vmem:[%s4242_s3 + $0x158] sm:$0xff] %vm1772_vm1, %v1599_v51  ;;  %v1362_v55 = vadd.f32 %v3310_v35, %v1361_v53  ;;  %v1524_v56 = vadd.f32 %v3310_v35, %v1523_v54 }
 0x1ee   :  { %1870 = vst.msk [vmem:[%s4242_s3 + $0x308] sm:$0xff] %vm1772_vm1, %v1653_v52 }
 0x1ef   :  { %v1707_v57 = vmax.f32 %v1362_v55, 0.0  ;;  %v1761_v58 = vmax.f32 %v1524_v56, 0.0 }
 0x1f0   :  { %v1040_v59 = vpop.f32.mrf.mxu0  ;;  %v1202_v60 = vpop.f32.mrf.mxu1 }
 0x1f1   :  { %1924 = vst.msk [vmem:[%s4242_s3 + $0x4b8] sm:$0xff] %vm1772_vm1, %v1707_v57  ;;  %v1041_v61 = vadd.f32 %v3310_v35, %v1040_v59  ;;  %v1203_v62 = vadd.f32 %v3310_v35, %v1202_v60 }
 0x1f2   :  { %1978 = vst.msk [vmem:[%s4242_s3 + $0x668] sm:$0xff] %vm1772_vm1, %v1761_v58 }
 0x1f3   :  { %v1600_v63 = vmax.f32 %v1041_v61, 0.0  ;;  %v1654_v0 = vmax.f32 %v1203_v62, 0.0 }
 0x1f4   :  { %v1364_v1 = vpop.f32.mrf.mxu2  ;;  %v1526_v2 = vpop.f32.mrf.mxu3 }
 0x1f5   :  { %1817 = vst.msk [vmem:[%s4242_s3 + $0x160] sm:$0xff] %vm1772_vm1, %v1600_v63  ;;  %v1365_v3 = vadd.f32 %v3310_v35, %v1364_v1  ;;  %v1527_v4 = vadd.f32 %v3310_v35, %v1526_v2 }
 0x1f6   :  { %1871 = vst.msk [vmem:[%s4242_s3 + $0x310] sm:$0xff] %vm1772_vm1, %v1654_v0 }
 0x1f7   :  { %v1708_v5 = vmax.f32 %v1365_v3, 0.0  ;;  %v1762_v6 = vmax.f32 %v1527_v4, 0.0 }
 0x1f8   :  { %v1043_v7 = vpop.f32.mrf.mxu0  ;;  %v1205_v9 = vpop.f32.mrf.mxu1 }
 0x1f9   :  { %1925 = vst.msk [vmem:[%s4242_s3 + $0x4c0] sm:$0xff] %vm1772_vm1, %v1708_v5  ;;  %v1044_v35 = vadd.f32 %v4053_v10, %v1043_v7  ;;  %v1206_v11 = vadd.f32 %v4053_v10, %v1205_v9 }
 0x1fa   :  { %1979 = vst.msk [vmem:[%s4242_s3 + $0x670] sm:$0xff] %vm1772_vm1, %v1762_v6 }
 0x1fb   :  { %v1601_v12 = vmax.f32 %v1044_v35, 0.0  ;;  %v1655_v13 = vmax.f32 %v1206_v11, 0.0 }
 0x1fc   :  { %v1367_v14 = vpop.f32.mrf.mxu2  ;;  %v1529_v15 = vpop.f32.mrf.mxu3 }
 0x1fd   :  { %1818 = vst.msk [vmem:[%s4242_s3 + $0x168] sm:$0xff] %vm1772_vm1, %v1601_v12  ;;  %v1368_v16 = vadd.f32 %v4053_v10, %v1367_v14  ;;  %v1530_v17 = vadd.f32 %v4053_v10, %v1529_v15 }
 0x1fe   :  { %1872 = vst.msk [vmem:[%s4242_s3 + $0x318] sm:$0xff] %vm1772_vm1, %v1655_v13 }
 0x1ff   :  { %v1709_v18 = vmax.f32 %v1368_v16, 0.0  ;;  %v1763_v19 = vmax.f32 %v1530_v17, 0.0 }
 0x200   :  { %v1046_v20 = vpop.f32.mrf.mxu0  ;;  %v1208_v21 = vpop.f32.mrf.mxu1 }
 0x201   :  { %1926 = vst.msk [vmem:[%s4242_s3 + $0x4c8] sm:$0xff] %vm1772_vm1, %v1709_v18  ;;  %v1047_v22 = vadd.f32 %v4053_v10, %v1046_v20  ;;  %v1209_v23 = vadd.f32 %v4053_v10, %v1208_v21 }
 0x202   :  { %1980 = vst.msk [vmem:[%s4242_s3 + $0x678] sm:$0xff] %vm1772_vm1, %v1763_v19 }
 0x203   :  { %v1602_v24 = vmax.f32 %v1047_v22, 0.0  ;;  %v1656_v25 = vmax.f32 %v1209_v23, 0.0 }
 0x204   :  { %v1370_v26 = vpop.f32.mrf.mxu2  ;;  %v1532_v27 = vpop.f32.mrf.mxu3 }
 0x205   :  { %1819 = vst.msk [vmem:[%s4242_s3 + $0x170] sm:$0xff] %vm1772_vm1, %v1602_v24  ;;  %v1371_v28 = vadd.f32 %v4053_v10, %v1370_v26  ;;  %v1533_v29 = vadd.f32 %v4053_v10, %v1532_v27 }
 0x206   :  { %1873 = vst.msk [vmem:[%s4242_s3 + $0x320] sm:$0xff] %vm1772_vm1, %v1656_v25 }
 0x207   :  { %v1710_v30 = vmax.f32 %v1371_v28, 0.0  ;;  %v1764_v31 = vmax.f32 %v1533_v29, 0.0 }
 0x208   :  { %v1049_v32 = vpop.f32.mrf.mxu0  ;;  %v1211_v33 = vpop.f32.mrf.mxu1 }
 0x209   :  { %1927 = vst.msk [vmem:[%s4242_s3 + $0x4d0] sm:$0xff] %vm1772_vm1, %v1710_v30  ;;  %v1050_v8 = vadd.f32 %v4053_v10, %v1049_v32  ;;  %v1212_v34 = vadd.f32 %v4053_v10, %v1211_v33 }
 0x20a   :  { %1981 = vst.msk [vmem:[%s4242_s3 + $0x680] sm:$0xff] %vm1772_vm1, %v1764_v31 }
 0x20b   :  { %v1603_v36 = vmax.f32 %v1050_v8, 0.0  ;;  %v1657_v37 = vmax.f32 %v1212_v34, 0.0 }
 0x20c   :  { %v1373_v38 = vpop.f32.mrf.mxu2  ;;  %v1535_v39 = vpop.f32.mrf.mxu3 }
 0x20d   :  { %1820 = vst.msk [vmem:[%s4242_s3 + $0x178] sm:$0xff] %vm1772_vm1, %v1603_v36  ;;  %v1374_v40 = vadd.f32 %v4053_v10, %v1373_v38  ;;  %v1536_v41 = vadd.f32 %v4053_v10, %v1535_v39 }
 0x20e   :  { %1874 = vst.msk [vmem:[%s4242_s3 + $0x328] sm:$0xff] %vm1772_vm1, %v1657_v37 }
 0x20f   :  { %v1711_v42 = vmax.f32 %v1374_v40, 0.0  ;;  %v1765_v43 = vmax.f32 %v1536_v41, 0.0 }
 0x210   :  { %v1052_v44 = vpop.f32.mrf.mxu0  ;;  %v1214_v45 = vpop.f32.mrf.mxu1 }
 0x211   :  { %1928 = vst.msk [vmem:[%s4242_s3 + $0x4d8] sm:$0xff] %vm1772_vm1, %v1711_v42  ;;  %v1053_v46 = vadd.f32 %v4053_v10, %v1052_v44  ;;  %v1215_v47 = vadd.f32 %v4053_v10, %v1214_v45 }
 0x212   :  { %1982 = vst.msk [vmem:[%s4242_s3 + $0x688] sm:$0xff] %vm1772_vm1, %v1765_v43 }
 0x213   :  { %v1604_v48 = vmax.f32 %v1053_v46, 0.0  ;;  %v1658_v49 = vmax.f32 %v1215_v47, 0.0 }
 0x214   :  { %v1376_v50 = vpop.f32.mrf.mxu2  ;;  %v1538_v51 = vpop.f32.mrf.mxu3 }
 0x215   :  { %1821 = vst.msk [vmem:[%s4242_s3 + $0x180] sm:$0xff] %vm1772_vm1, %v1604_v48  ;;  %v1377_v52 = vadd.f32 %v4053_v10, %v1376_v50  ;;  %v1539_v53 = vadd.f32 %v4053_v10, %v1538_v51 }
 0x216   :  { %1875 = vst.msk [vmem:[%s4242_s3 + $0x330] sm:$0xff] %vm1772_vm1, %v1658_v49 }
 0x217   :  { %v1712_v54 = vmax.f32 %v1377_v52, 0.0  ;;  %v1766_v55 = vmax.f32 %v1539_v53, 0.0 }
 0x218   :  { %v1055_v56 = vpop.f32.mrf.mxu0  ;;  %v1217_v57 = vpop.f32.mrf.mxu1 }
 0x219   :  { %1929 = vst.msk [vmem:[%s4242_s3 + $0x4e0] sm:$0xff] %vm1772_vm1, %v1712_v54  ;;  %v1056_v58 = vadd.f32 %v4053_v10, %v1055_v56  ;;  %v1218_v59 = vadd.f32 %v4053_v10, %v1217_v57 }
 0x21a   :  { %1983 = vst.msk [vmem:[%s4242_s3 + $0x690] sm:$0xff] %vm1772_vm1, %v1766_v55 }
 0x21b   :  { %v1605_v60 = vmax.f32 %v1056_v58, 0.0  ;;  %v1659_v61 = vmax.f32 %v1218_v59, 0.0 }
 0x21c   :  { %v1379_v62 = vpop.f32.mrf.mxu2  ;;  %v1541_v63 = vpop.f32.mrf.mxu3 }
 0x21d   :  { %1822 = vst.msk [vmem:[%s4242_s3 + $0x188] sm:$0xff] %vm1772_vm1, %v1605_v60  ;;  %v1380_v0 = vadd.f32 %v4053_v10, %v1379_v62  ;;  %v1542_v1 = vadd.f32 %v4053_v10, %v1541_v63 }
 0x21e   :  { %1876 = vst.msk [vmem:[%s4242_s3 + $0x338] sm:$0xff] %vm1772_vm1, %v1659_v61 }
 0x21f   :  { %v1713_v2 = vmax.f32 %v1380_v0, 0.0  ;;  %v1767_v3 = vmax.f32 %v1542_v1, 0.0 }
 0x220   :  { %v1058_v4 = vpop.f32.mrf.mxu0  ;;  %v1220_v5 = vpop.f32.mrf.mxu1 }
 0x221   :  { %1930 = vst.msk [vmem:[%s4242_s3 + $0x4e8] sm:$0xff] %vm1772_vm1, %v1713_v2  ;;  %v1059_v6 = vadd.f32 %v4053_v10, %v1058_v4  ;;  %v1221_v7 = vadd.f32 %v4053_v10, %v1220_v5 }
 0x222   :  { %1984 = vst.msk [vmem:[%s4242_s3 + $0x698] sm:$0xff] %vm1772_vm1, %v1767_v3 }
 0x223   :  { %v1606_v9 = vmax.f32 %v1059_v6, 0.0  ;;  %v1660_v35 = vmax.f32 %v1221_v7, 0.0 }
 0x224   :  { %v1382_v11 = vpop.f32.mrf.mxu2  ;;  %v1544_v12 = vpop.f32.mrf.mxu3 }
 0x225   :  { %1823 = vst.msk [vmem:[%s4242_s3 + $0x190] sm:$0xff] %vm1772_vm1, %v1606_v9  ;;  %v1383_v13 = vadd.f32 %v4053_v10, %v1382_v11  ;;  %v1545_v14 = vadd.f32 %v4053_v10, %v1544_v12 }
 0x226   :  { %1877 = vst.msk [vmem:[%s4242_s3 + $0x340] sm:$0xff] %vm1772_vm1, %v1660_v35 }
 0x227   :  { %v1714_v15 = vmax.f32 %v1383_v13, 0.0  ;;  %v1768_v16 = vmax.f32 %v1545_v14, 0.0 }
 0x228   :  { %v1061_v17 = vpop.f32.mrf.mxu0  ;;  %v1223_v18 = vpop.f32.mrf.mxu1 }
 0x229   :  { %1931 = vst.msk [vmem:[%s4242_s3 + $0x4f0] sm:$0xff] %vm1772_vm1, %v1714_v15  ;;  %v1062_v19 = vadd.f32 %v4053_v10, %v1061_v17  ;;  %v1224_v20 = vadd.f32 %v4053_v10, %v1223_v18 }
 0x22a   :  { %1985 = vst.msk [vmem:[%s4242_s3 + $0x6a0] sm:$0xff] %vm1772_vm1, %v1768_v16 }
 0x22b   :  { %v1607_v21 = vmax.f32 %v1062_v19, 0.0  ;;  %v1661_v22 = vmax.f32 %v1224_v20, 0.0 }
 0x22c   :  { %v1385_v23 = vpop.f32.mrf.mxu2  ;;  %v1547_v24 = vpop.f32.mrf.mxu3 }
 0x22d   :  { %1824 = vst.msk [vmem:[%s4242_s3 + $0x198] sm:$0xff] %vm1772_vm1, %v1607_v21  ;;  %v1386_v25 = vadd.f32 %v4053_v10, %v1385_v23  ;;  %v1548_v26 = vadd.f32 %v4053_v10, %v1547_v24 }
 0x22e   :  { %1878 = vst.msk [vmem:[%s4242_s3 + $0x348] sm:$0xff] %vm1772_vm1, %v1661_v22 }
 0x22f   :  { %v1715_v27 = vmax.f32 %v1386_v25, 0.0  ;;  %v1769_v28 = vmax.f32 %v1548_v26, 0.0 }
 0x230   :  { %v1064_v29 = vpop.f32.mrf.mxu0  ;;  %v1226_v30 = vpop.f32.mrf.mxu1 }
 0x231   :  { %1932 = vst.msk [vmem:[%s4242_s3 + $0x4f8] sm:$0xff] %vm1772_vm1, %v1715_v27  ;;  %v1065_v31 = vadd.f32 %v4053_v10, %v1064_v29  ;;  %v1227_v32 = vadd.f32 %v4053_v10, %v1226_v30 }
 0x232   :  { %1986 = vst.msk [vmem:[%s4242_s3 + $0x6a8] sm:$0xff] %vm1772_vm1, %v1769_v28 }
 0x233   :  { %v1608_v33 = vmax.f32 %v1065_v31, 0.0  ;;  %v1662_v8 = vmax.f32 %v1227_v32, 0.0 }
 0x234   :  { %v1388_v34 = vpop.f32.mrf.mxu2  ;;  %v1550_v36 = vpop.f32.mrf.mxu3 }
 0x235   :  { %1825 = vst.msk [vmem:[%s4242_s3 + $0x1a0] sm:$0xff] %vm1772_vm1, %v1608_v33  ;;  %v1389_v37 = vadd.f32 %v4053_v10, %v1388_v34  ;;  %v1551_v38 = vadd.f32 %v4053_v10, %v1550_v36 }
 0x236   :  { %1879 = vst.msk [vmem:[%s4242_s3 + $0x350] sm:$0xff] %vm1772_vm1, %v1662_v8 }
 0x237   :  { %v1716_v39 = vmax.f32 %v1389_v37, 0.0  ;;  %v1770_v40 = vmax.f32 %v1551_v38, 0.0 }
 0x238   :  { %v1067_v41 = vpop.f32.mrf.mxu0  ;;  %v1229_v42 = vpop.f32.mrf.mxu1 }
 0x239   :  { %1933 = vst.msk [vmem:[%s4242_s3 + $0x500] sm:$0xff] %vm1772_vm1, %v1716_v39  ;;  %v1068_v43 = vadd.f32 %v4053_v10, %v1067_v41  ;;  %v1230_v44 = vadd.f32 %v4053_v10, %v1229_v42 }
 0x23a   :  { %1987 = vst.msk [vmem:[%s4242_s3 + $0x6b0] sm:$0xff] %vm1772_vm1, %v1770_v40 }
 0x23b   :  { %v1609_v45 = vmax.f32 %v1068_v43, 0.0  ;;  %v1663_v46 = vmax.f32 %v1230_v44, 0.0 }
 0x23c   :  { %v1391_v47 = vpop.f32.mrf.mxu2  ;;  %v1553_v48 = vpop.f32.mrf.mxu3 }
 0x23d   :  { %1826 = vst.msk [vmem:[%s4242_s3 + $0x1a8] sm:$0xff] %vm1772_vm1, %v1609_v45  ;;  %v1392_v49 = vadd.f32 %v4053_v10, %v1391_v47  ;;  %v1554_v50 = vadd.f32 %v4053_v10, %v1553_v48 }
 0x23e   :  { %1880 = vst.msk [vmem:[%s4242_s3 + $0x358] sm:$0xff] %vm1772_vm1, %v1663_v46 }
 0x23f   :  { %v1717_v51 = vmax.f32 %v1392_v49, 0.0  ;;  %v1771_v52 = vmax.f32 %v1554_v50, 0.0 }
 0x241   :  { %1934 = vst.msk [vmem:[%s4242_s3 + $0x508] sm:$0xff] %vm1772_vm1, %v1717_v51 }
 0x242   :  { %1988 = vst.msk [vmem:[%s4242_s3 + $0x6b8] sm:$0xff] %vm1772_vm1, %v1771_v52 }

// kernel: box_model_forward.5
= control target key start
LH: loop header
LB: loop body
LE: loop exit
PB: predicated region body
PF: predicated region fallthrough
CT: control target
= control target key end

     0   :  { %vm949_vm0 = vcmask 523264   ;;  %vm996_vm1 = vcmask 521216   ;;  %s2024_s1 = inlined_call_operand.vmem [shape: f32[512,64], index: 1, kind: input, shape index: {}]   ;;  %s2025_s0 = inlined_call_operand.vmem [shape: f32[374,512], index: 0, kind: input, shape index: {}]   ;;  %s2026_s2 = inlined_call_operand.vmem [shape: f32[1,64], index: 2, kind: input, shape index: {}]   ;;  %s2027_s3 = inlined_call_operand.vmem [shape: f32[374,64], index: 3, kind: output, shape index: {}]  }
   0x1   :  { %v249_v0 = vld [vmem:[%s2024_s1 + $0x178] sm:$0xff]  ;;  %v248_v2 = vld [vmem:[%s2024_s1 + $0x170] sm:$0xff]  ;;  %v247_v6 = vld [vmem:[%s2024_s1 + $0x168] sm:$0xff] }
   0x2   :  { %v217_v1 = vld [vmem:[%s2024_s1 + $0x78] sm:$0xff]  ;;  %586 = vmatpush.msra.mxu2 %v249_v0  ;;  %v216_v4 = vld [vmem:[%s2024_s1 + $0x70] sm:$0xff]  ;;  %v215_v8 = vld [vmem:[%s2024_s1 + $0x68] sm:$0xff] }
   0x3   :  { %270 = vmatpush.msra.mxu0 %v217_v1  ;;  %v265_v3 = vld [vmem:[%s2024_s1 + $0x1f8] sm:$0xff]  ;;  %v264_v7 = vld [vmem:[%s2024_s1 + $0x1f0] sm:$0xff]  ;;  %v263_v10 = vld [vmem:[%s2024_s1 + $0x1e8] sm:$0xff] }
   0x4   :  { %v233_v5 = vld [vmem:[%s2024_s1 + $0xf8] sm:$0xff]  ;;  %744 = vmatpush.msra.mxu3 %v265_v3  ;;  %587 = vmatpush.msra.mxu2 %v248_v2  ;;  %v232_v9 = vld [vmem:[%s2024_s1 + $0xf0] sm:$0xff]  ;;  %v246_v11 = vld [vmem:[%s2024_s1 + $0x160] sm:$0xff] }
   0x5   :  { %428 = vmatpush.msra.mxu1 %v233_v5  ;;  %271 = vmatpush.msra.mxu0 %v216_v4  ;;  %v214_v12 = vld [vmem:[%s2024_s1 + $0x60] sm:$0xff]  ;;  %v231_v13 = vld [vmem:[%s2024_s1 + $0xe8] sm:$0xff]  ;;  %v245_v16 = vld [vmem:[%s2024_s1 + $0x158] sm:$0xff] }
   0x6   :  { %745 = vmatpush.msra.mxu3 %v264_v7  ;;  %588 = vmatpush.msra.mxu2 %v247_v6  ;;  %v262_v14 = vld [vmem:[%s2024_s1 + $0x1e0] sm:$0xff]  ;;  %v213_v17 = vld [vmem:[%s2024_s1 + $0x58] sm:$0xff]  ;;  %v244_v20 = vld [vmem:[%s2024_s1 + $0x150] sm:$0xff] }
   0x7   :  { %429 = vmatpush.msra.mxu1 %v232_v9  ;;  %272 = vmatpush.msra.mxu0 %v215_v8  ;;  %v230_v15 = vld [vmem:[%s2024_s1 + $0xe0] sm:$0xff]  ;;  %v261_v18 = vld [vmem:[%s2024_s1 + $0x1d8] sm:$0xff]  ;;  %v212_v21 = vld [vmem:[%s2024_s1 + $0x50] sm:$0xff] }
   0x8   :  { %746 = vmatpush.msra.mxu3 %v263_v10  ;;  %589 = vmatpush.msra.mxu2 %v246_v11  ;;  %v229_v19 = vld [vmem:[%s2024_s1 + $0xd8] sm:$0xff]  ;;  %v260_v22 = vld [vmem:[%s2024_s1 + $0x1d0] sm:$0xff]  ;;  %v243_v24 = vld [vmem:[%s2024_s1 + $0x148] sm:$0xff] }
   0x9   :  { %430 = vmatpush.msra.mxu1 %v231_v13  ;;  %273 = vmatpush.msra.mxu0 %v214_v12  ;;  %v228_v23 = vld [vmem:[%s2024_s1 + $0xd0] sm:$0xff]  ;;  %v211_v25 = vld [vmem:[%s2024_s1 + $0x48] sm:$0xff]  ;;  %v242_v28 = vld [vmem:[%s2024_s1 + $0x140] sm:$0xff] }
   0xa   :  { %747 = vmatpush.msra.mxu3 %v262_v14  ;;  %590 = vmatpush.msra.mxu2 %v245_v16  ;;  %v259_v26 = vld [vmem:[%s2024_s1 + $0x1c8] sm:$0xff]  ;;  %v210_v29 = vld [vmem:[%s2024_s1 + $0x40] sm:$0xff]  ;;  %v241_v32 = vld [vmem:[%s2024_s1 + $0x138] sm:$0xff] }
   0xb   :  { %431 = vmatpush.msra.mxu1 %v230_v15  ;;  %274 = vmatpush.msra.mxu0 %v213_v17  ;;  %v227_v27 = vld [vmem:[%s2024_s1 + $0xc8] sm:$0xff]  ;;  %v258_v30 = vld [vmem:[%s2024_s1 + $0x1c0] sm:$0xff]  ;;  %v209_v33 = vld [vmem:[%s2024_s1 + $0x38] sm:$0xff] }
   0xc   :  { %748 = vmatpush.msra.mxu3 %v261_v18  ;;  %591 = vmatpush.msra.mxu2 %v244_v20  ;;  %v226_v31 = vld [vmem:[%s2024_s1 + $0xc0] sm:$0xff]  ;;  %v257_v34 = vld [vmem:[%s2024_s1 + $0x1b8] sm:$0xff]  ;;  %v240_v36 = vld [vmem:[%s2024_s1 + $0x130] sm:$0xff] }
   0xd   :  { %432 = vmatpush.msra.mxu1 %v229_v19  ;;  %275 = vmatpush.msra.mxu0 %v212_v21  ;;  %v225_v35 = vld [vmem:[%s2024_s1 + $0xb8] sm:$0xff]  ;;  %v208_v37 = vld [vmem:[%s2024_s1 + $0x30] sm:$0xff]  ;;  %v239_v40 = vld [vmem:[%s2024_s1 + $0x128] sm:$0xff] }
   0xe   :  { %749 = vmatpush.msra.mxu3 %v260_v22  ;;  %592 = vmatpush.msra.mxu2 %v243_v24  ;;  %v256_v38 = vld [vmem:[%s2024_s1 + $0x1b0] sm:$0xff]  ;;  %v207_v41 = vld [vmem:[%s2024_s1 + $0x28] sm:$0xff]  ;;  %v238_v44 = vld [vmem:[%s2024_s1 + $0x120] sm:$0xff] }
   0xf   :  { %433 = vmatpush.msra.mxu1 %v228_v23  ;;  %276 = vmatpush.msra.mxu0 %v211_v25  ;;  %v224_v39 = vld [vmem:[%s2024_s1 + $0xb0] sm:$0xff]  ;;  %v255_v42 = vld [vmem:[%s2024_s1 + $0x1a8] sm:$0xff]  ;;  %v206_v45 = vld [vmem:[%s2024_s1 + $0x20] sm:$0xff] }
  0x10   :  { %750 = vmatpush.msra.mxu3 %v259_v26  ;;  %593 = vmatpush.msra.mxu2 %v242_v28  ;;  %v223_v43 = vld [vmem:[%s2024_s1 + $0xa8] sm:$0xff]  ;;  %v254_v46 = vld [vmem:[%s2024_s1 + $0x1a0] sm:$0xff]  ;;  %v237_v48 = vld [vmem:[%s2024_s1 + $0x118] sm:$0xff] }
  0x11   :  { %434 = vmatpush.msra.mxu1 %v227_v27  ;;  %277 = vmatpush.msra.mxu0 %v210_v29  ;;  %v222_v47 = vld [vmem:[%s2024_s1 + $0xa0] sm:$0xff]  ;;  %v205_v49 = vld [vmem:[%s2024_s1 + $0x18] sm:$0xff]  ;;  %v236_v52 = vld [vmem:[%s2024_s1 + $0x110] sm:$0xff] }
  0x12   :  { %751 = vmatpush.msra.mxu3 %v258_v30  ;;  %594 = vmatpush.msra.mxu2 %v241_v32  ;;  %v253_v50 = vld [vmem:[%s2024_s1 + $0x198] sm:$0xff]  ;;  %v204_v53 = vld [vmem:[%s2024_s1 + $0x10] sm:$0xff]  ;;  %v235_v56 = vld [vmem:[%s2024_s1 + $0x108] sm:$0xff] }
  0x13   :  { %435 = vmatpush.msra.mxu1 %v226_v31  ;;  %278 = vmatpush.msra.mxu0 %v209_v33  ;;  %v221_v51 = vld [vmem:[%s2024_s1 + $0x98] sm:$0xff]  ;;  %v252_v54 = vld [vmem:[%s2024_s1 + $0x190] sm:$0xff]  ;;  %v203_v57 = vld [vmem:[%s2024_s1 + $0x8] sm:$0xff] }
  0x14   :  { %752 = vmatpush.msra.mxu3 %v257_v34  ;;  %595 = vmatpush.msra.mxu2 %v240_v36  ;;  %v220_v55 = vld [vmem:[%s2024_s1 + $0x90] sm:$0xff]  ;;  %v251_v58 = vld [vmem:[%s2024_s1 + $0x188] sm:$0xff]  ;;  %v234_v60 = vld [vmem:[%s2024_s1 + $0x100] sm:$0xff] }
  0x15   :  { %436 = vmatpush.msra.mxu1 %v225_v35  ;;  %279 = vmatpush.msra.mxu0 %v208_v37  ;;  %v219_v59 = vld [vmem:[%s2024_s1 + $0x88] sm:$0xff]  ;;  %v202_v61 = vld [vmem:[%s2024_s1] sm:$0xff]  ;;  %v16_v62 = vld [vmem:[%s2025_s0 + $0x10] sm:$0xff] }
  0x16   :  { %753 = vmatpush.msra.mxu3 %v256_v38  ;;  %596 = vmatpush.msra.mxu2 %v239_v40  ;;  %v250_v63 = vld [vmem:[%s2024_s1 + $0x180] sm:$0xff]  ;;  %v17_v1 = vld [vmem:[%s2025_s0 + $0x18] sm:$0xff]  ;;  %v15_v3 = vld [vmem:[%s2025_s0 + $0x8] sm:$0xff] }
  0x17   :  { %437 = vmatpush.msra.mxu1 %v224_v39  ;;  %280 = vmatpush.msra.mxu0 %v207_v41  ;;  %v14_v0 = vld [vmem:[%s2025_s0] sm:$0xff]  ;;  %v20_v4 = vld [vmem:[%s2025_s0 + $0x30] sm:$0xff]  ;;  %v21_v6 = vld [vmem:[%s2025_s0 + $0x38] sm:$0xff] }
  0x18   :  { %754 = vmatpush.msra.mxu3 %v255_v42  ;;  %597 = vmatpush.msra.mxu2 %v238_v44  ;;  %v218_v2 = vld [vmem:[%s2024_s1 + $0x80] sm:$0xff]  ;;  %v19_v7 = vld [vmem:[%s2025_s0 + $0x28] sm:$0xff]  ;;  %v24_v8 = vld [vmem:[%s2025_s0 + $0x50] sm:$0xff] }
  0x19   :  { %438 = vmatpush.msra.mxu1 %v223_v43  ;;  %281 = vmatpush.msra.mxu0 %v206_v45  ;;  %v18_v5 = vld [vmem:[%s2025_s0 + $0x20] sm:$0xff]  ;;  %v25_v10 = vld [vmem:[%s2025_s0 + $0x58] sm:$0xff]  ;;  %v23_v11 = vld [vmem:[%s2025_s0 + $0x48] sm:$0xff] }
  0x1a   :  { %755 = vmatpush.msra.mxu3 %v254_v46  ;;  %598 = vmatpush.msra.mxu2 %v237_v48  ;;  %v22_v9 = vld [vmem:[%s2025_s0 + $0x40] sm:$0xff]  ;;  %v28_v12 = vld [vmem:[%s2025_s0 + $0x70] sm:$0xff]  ;;  %v29_v14 = vld [vmem:[%s2025_s0 + $0x78] sm:$0xff] }
  0x1b   :  { %439 = vmatpush.msra.mxu1 %v222_v47  ;;  %282 = vmatpush.msra.mxu0 %v205_v49  ;;  %v26_v13 = vld [vmem:[%s2025_s0 + $0x60] sm:$0xff]  ;;  %v27_v15 = vld [vmem:[%s2025_s0 + $0x68] sm:$0xff]  ;;  %v32_v16 = vld [vmem:[%s2025_s0 + $0x90] sm:$0xff] }
  0x1c   :  { %756 = vmatpush.msra.mxu3 %v253_v50  ;;  %599 = vmatpush.msra.mxu2 %v236_v52  ;;  %v30_v17 = vld [vmem:[%s2025_s0 + $0x80] sm:$0xff]  ;;  %v33_v18 = vld [vmem:[%s2025_s0 + $0x98] sm:$0xff]  ;;  %v31_v19 = vld [vmem:[%s2025_s0 + $0x88] sm:$0xff] }
  0x1d   :  { %440 = vmatpush.msra.mxu1 %v221_v51  ;;  %283 = vmatpush.msra.mxu0 %v204_v53  ;;  %v36_v20 = vld [vmem:[%s2025_s0 + $0xb0] sm:$0xff]  ;;  %v34_v21 = vld [vmem:[%s2025_s0 + $0xa0] sm:$0xff]  ;;  %v37_v22 = vld [vmem:[%s2025_s0 + $0xb8] sm:$0xff] }
  0x1e   :  { %757 = vmatpush.msra.mxu3 %v252_v54  ;;  %600 = vmatpush.msra.mxu2 %v235_v56  ;;  %v35_v23 = vld [vmem:[%s2025_s0 + $0xa8] sm:$0xff]  ;;  %v40_v24 = vld [vmem:[%s2025_s0 + $0xd0] sm:$0xff]  ;;  %v38_v25 = vld [vmem:[%s2025_s0 + $0xc0] sm:$0xff] }
  0x1f   :  { %441 = vmatpush.msra.mxu1 %v220_v55  ;;  %284 = vmatpush.msra.mxu0 %v203_v57  ;;  %v41_v26 = vld [vmem:[%s2025_s0 + $0xd8] sm:$0xff]  ;;  %v39_v27 = vld [vmem:[%s2025_s0 + $0xc8] sm:$0xff]  ;;  %v44_v28 = vld [vmem:[%s2025_s0 + $0xf0] sm:$0xff] }
  0x20   :  { %758 = vmatpush.msra.mxu3 %v251_v58  ;;  %601 = vmatpush.msra.mxu2 %v234_v60  ;;  %v42_v29 = vld [vmem:[%s2025_s0 + $0xe0] sm:$0xff]  ;;  %v45_v30 = vld [vmem:[%s2025_s0 + $0xf8] sm:$0xff]  ;;  %v43_v31 = vld [vmem:[%s2025_s0 + $0xe8] sm:$0xff] }
  0x21   :  { %442 = vmatpush.msra.mxu1 %v219_v59  ;;  %285 = vmatpush.msra.mxu0 %v202_v61  ;;  %v48_v32 = vld [vmem:[%s2025_s0 + $0x110] sm:$0xff]  ;;  %v46_v33 = vld [vmem:[%s2025_s0 + $0x100] sm:$0xff]  ;;  %v49_v34 = vld [vmem:[%s2025_s0 + $0x118] sm:$0xff] }
  0x22   :  { %602 = vmatmul.f32.vlgmr.msra.gmra.mxu2 %v16_v62  ;;  %759 = vmatpush.msra.mxu3 %v250_v63  ;;  %v47_v35 = vld [vmem:[%s2025_s0 + $0x108] sm:$0xff]  ;;  %v52_v36 = vld [vmem:[%s2025_s0 + $0x130] sm:$0xff]  ;;  %v50_v37 = vld [vmem:[%s2025_s0 + $0x120] sm:$0xff] }
  0x23   :  { %286 = vmatmul.f32.vlgmr.msra.gmra.mxu0 %v14_v0  ;;  %760 = vmatmul.f32.vlgmr.msra.gmra.mxu3 %v17_v1  ;;  %v53_v38 = vld [vmem:[%s2025_s0 + $0x138] sm:$0xff]  ;;  %v51_v39 = vld [vmem:[%s2025_s0 + $0x128] sm:$0xff]  ;;  %v56_v40 = vld [vmem:[%s2025_s0 + $0x150] sm:$0xff] }
  0x24   :  { %443 = vmatpush.msra.mxu1 %v218_v2  ;;  %v54_v41 = vld [vmem:[%s2025_s0 + $0x140] sm:$0xff]  ;;  %v57_v42 = vld [vmem:[%s2025_s0 + $0x158] sm:$0xff]  ;;  %v55_v43 = vld [vmem:[%s2025_s0 + $0x148] sm:$0xff] }
  0x25   :  { %444 = vmatmul.f32.vlgmr.msra.gmra.mxu1 %v15_v3  ;;  %v60_v44 = vld [vmem:[%s2025_s0 + $0x170] sm:$0xff]  ;;  %v58_v45 = vld [vmem:[%s2025_s0 + $0x160] sm:$0xff]  ;;  %v61_v46 = vld [vmem:[%s2025_s0 + $0x178] sm:$0xff] }
  0x26   :  { %v59_v47 = vld [vmem:[%s2025_s0 + $0x168] sm:$0xff]  ;;  %v64_v48 = vld [vmem:[%s2025_s0 + $0x190] sm:$0xff]  ;;  %v62_v49 = vld [vmem:[%s2025_s0 + $0x180] sm:$0xff] }
  0x27   :  { %v65_v50 = vld [vmem:[%s2025_s0 + $0x198] sm:$0xff]  ;;  %v63_v51 = vld [vmem:[%s2025_s0 + $0x188] sm:$0xff]  ;;  %v68_v52 = vld [vmem:[%s2025_s0 + $0x1b0] sm:$0xff] }
  0x28   :  { %v66_v53 = vld [vmem:[%s2025_s0 + $0x1a0] sm:$0xff]  ;;  %v69_v54 = vld [vmem:[%s2025_s0 + $0x1b8] sm:$0xff]  ;;  %v67_v55 = vld [vmem:[%s2025_s0 + $0x1a8] sm:$0xff] }
  0x29   :  { %v72_v56 = vld [vmem:[%s2025_s0 + $0x1d0] sm:$0xff]  ;;  %v70_v57 = vld [vmem:[%s2025_s0 + $0x1c0] sm:$0xff]  ;;  %v73_v58 = vld [vmem:[%s2025_s0 + $0x1d8] sm:$0xff] }
  0x2a   :  { %605 = vmatmul.f32.gmra.mxu2 %v20_v4  ;;  %v71_v59 = vld [vmem:[%s2025_s0 + $0x1c8] sm:$0xff]  ;;  %v76_v60 = vld [vmem:[%s2025_s0 + $0x1f0] sm:$0xff]  ;;  %v74_v61 = vld [vmem:[%s2025_s0 + $0x1e0] sm:$0xff] }
  0x2b   :  { %289 = vmatmul.f32.gmra.mxu0 %v18_v5  ;;  %763 = vmatmul.f32.gmra.mxu3 %v21_v6  ;;  %v77_v62 = vld [vmem:[%s2025_s0 + $0x1f8] sm:$0xff]  ;;  %v75_v63 = vld [vmem:[%s2025_s0 + $0x1e8] sm:$0xff]  ;;  %v1411_v0 = vld [vmem:[%s2026_s2] ss:$0 sm:$0xff] }
  0x2c   :  { %v80_v1 = vld [vmem:[%s2025_s0 + $0x210] sm:$0xff]  ;;  %v78_v3 = vld [vmem:[%s2025_s0 + $0x200] sm:$0xff]  ;;  %v81_v4 = vld [vmem:[%s2025_s0 + $0x218] sm:$0xff] }
  0x2d   :  { %447 = vmatmul.f32.gmra.mxu1 %v19_v7  ;;  %v79_v7 = vld [vmem:[%s2025_s0 + $0x208] sm:$0xff] }
  0x32   :  { %608 = vmatmul.f32.gmra.mxu2 %v24_v8 }
  0x33   :  { %292 = vmatmul.f32.gmra.mxu0 %v22_v9  ;;  %766 = vmatmul.f32.gmra.mxu3 %v25_v10 }
  0x35   :  { %450 = vmatmul.f32.gmra.mxu1 %v23_v11 }
  0x3a   :  { %611 = vmatmul.f32.gmra.mxu2 %v28_v12  ;;  %v84_v12 = vld [vmem:[%s2025_s0 + $0x230] sm:$0xff] }
  0x3b   :  { %295 = vmatmul.f32.gmra.mxu0 %v26_v13  ;;  %769 = vmatmul.f32.gmra.mxu3 %v29_v14 }
  0x3d   :  { %453 = vmatmul.f32.gmra.mxu1 %v27_v15  ;;  %v82_v15 = vld [vmem:[%s2025_s0 + $0x220] sm:$0xff] }
  0x42   :  { %614 = vmatmul.f32.gmra.mxu2 %v32_v16  ;;  %v85_v16 = vld [vmem:[%s2025_s0 + $0x238] sm:$0xff] }
  0x43   :  { %298 = vmatmul.f32.gmra.mxu0 %v30_v17  ;;  %772 = vmatmul.f32.gmra.mxu3 %v33_v18 }
  0x45   :  { %456 = vmatmul.f32.gmra.mxu1 %v31_v19 }
  0x4a   :  { %617 = vmatmul.f32.gmra.mxu2 %v36_v20  ;;  %v83_v20 = vld [vmem:[%s2025_s0 + $0x228] sm:$0xff] }
  0x4b   :  { %301 = vmatmul.f32.gmra.mxu0 %v34_v21  ;;  %775 = vmatmul.f32.gmra.mxu3 %v37_v22 }
  0x4d   :  { %459 = vmatmul.f32.gmra.mxu1 %v35_v23 }
  0x52   :  { %620 = vmatmul.f32.gmra.mxu2 %v40_v24 }
  0x53   :  { %304 = vmatmul.f32.gmra.mxu0 %v38_v25  ;;  %778 = vmatmul.f32.gmra.mxu3 %v41_v26  ;;  %v88_v25 = vld [vmem:[%s2025_s0 + $0x250] sm:$0xff] }
  0x55   :  { %462 = vmatmul.f32.gmra.mxu1 %v39_v27 }
  0x5a   :  { %623 = vmatmul.f32.gmra.mxu2 %v44_v28  ;;  %v86_v28 = vld [vmem:[%s2025_s0 + $0x240] sm:$0xff] }
  0x5b   :  { %307 = vmatmul.f32.gmra.mxu0 %v42_v29  ;;  %781 = vmatmul.f32.gmra.mxu3 %v45_v30  ;;  %v89_v29 = vld [vmem:[%s2025_s0 + $0x258] sm:$0xff] }
  0x5d   :  { %465 = vmatmul.f32.gmra.mxu1 %v43_v31 }
  0x62   :  { %626 = vmatmul.f32.gmra.mxu2 %v48_v32 }
  0x63   :  { %310 = vmatmul.f32.gmra.mxu0 %v46_v33  ;;  %784 = vmatmul.f32.gmra.mxu3 %v49_v34  ;;  %v87_v33 = vld [vmem:[%s2025_s0 + $0x248] sm:$0xff] }
  0x65   :  { %468 = vmatmul.f32.gmra.mxu1 %v47_v35 }
  0x6a   :  { %629 = vmatmul.f32.gmra.mxu2 %v52_v36 }
  0x6b   :  { %313 = vmatmul.f32.gmra.mxu0 %v50_v37  ;;  %787 = vmatmul.f32.gmra.mxu3 %v53_v38  ;;  %v92_v38 = vld [vmem:[%s2025_s0 + $0x270] sm:$0xff] }
  0x6d   :  { %471 = vmatmul.f32.gmra.mxu1 %v51_v39 }
  0x72   :  { %632 = vmatmul.f32.gmra.mxu2 %v56_v40 }
  0x73   :  { %316 = vmatmul.f32.gmra.mxu0 %v54_v41  ;;  %790 = vmatmul.f32.gmra.mxu3 %v57_v42  ;;  %v90_v41 = vld [vmem:[%s2025_s0 + $0x260] sm:$0xff]  ;;  %v93_v42 = vld [vmem:[%s2025_s0 + $0x278] sm:$0xff] }
  0x75   :  { %474 = vmatmul.f32.gmra.mxu1 %v55_v43 }
  0x7a   :  { %635 = vmatmul.f32.gmra.mxu2 %v60_v44 }
  0x7b   :  { %319 = vmatmul.f32.gmra.mxu0 %v58_v45  ;;  %793 = vmatmul.f32.gmra.mxu3 %v61_v46  ;;  %v91_v46 = vld [vmem:[%s2025_s0 + $0x268] sm:$0xff] }
  0x7d   :  { %477 = vmatmul.f32.gmra.mxu1 %v59_v47 }
  0x82   :  { %638 = vmatmul.f32.gmra.mxu2 %v64_v48 }
  0x83   :  { %322 = vmatmul.f32.gmra.mxu0 %v62_v49  ;;  %796 = vmatmul.f32.gmra.mxu3 %v65_v50 }
  0x85   :  { %480 = vmatmul.f32.gmra.mxu1 %v63_v51  ;;  %v96_v51 = vld [vmem:[%s2025_s0 + $0x290] sm:$0xff] }
  0x8a   :  { %641 = vmatmul.f32.gmra.mxu2 %v68_v52 }
  0x8b   :  { %325 = vmatmul.f32.gmra.mxu0 %v66_v53  ;;  %799 = vmatmul.f32.gmra.mxu3 %v69_v54  ;;  %v94_v54 = vld [vmem:[%s2025_s0 + $0x280] sm:$0xff] }
  0x8d   :  { %483 = vmatmul.f32.gmra.mxu1 %v67_v55  ;;  %v97_v55 = vld [vmem:[%s2025_s0 + $0x298] sm:$0xff] }
  0x92   :  { %644 = vmatmul.f32.gmra.mxu2 %v72_v56 }
  0x93   :  { %328 = vmatmul.f32.gmra.mxu0 %v70_v57  ;;  %802 = vmatmul.f32.gmra.mxu3 %v73_v58 }
  0x95   :  { %486 = vmatmul.f32.gmra.mxu1 %v71_v59  ;;  %v95_v59 = vld [vmem:[%s2025_s0 + $0x288] sm:$0xff] }
  0x9a   :  { %647 = vmatmul.f32.gmra.mxu2 %v76_v60 }
  0x9b   :  { %331 = vmatmul.f32.gmra.mxu0 %v74_v61  ;;  %805 = vmatmul.f32.gmra.mxu3 %v77_v62 }
  0x9d   :  { %489 = vmatmul.f32.gmra.mxu1 %v75_v63 }
  0xa0   :  { %v287_v2 = vpop.f32.mrf.mxu0 }
  0xa1   :  { %v288_v5 = vadd.f32 %v1411_v0, %v287_v2 }
  0xa2   :  { %650 = vmatmul.f32.gmra.mxu2 %v80_v1  ;;  %v445_v6 = vpop.f32.mrf.mxu1  ;;  %v100_v1 = vld [vmem:[%s2025_s0 + $0x2b0] sm:$0xff] }
  0xa3   :  { %v446_v8 = vadd.f32 %v445_v6, %v288_v5  ;;  %334 = vmatmul.f32.gmra.mxu0 %v78_v3  ;;  %808 = vmatmul.f32.gmra.mxu3 %v81_v4  ;;  %v98_v4 = vld [vmem:[%s2025_s0 + $0x2a0] sm:$0xff]  ;;  %v101_v5 = vld [vmem:[%s2025_s0 + $0x2b8] sm:$0xff] }
  0xa5   :  { %v603_v9 = vpop.f32.mrf.mxu2  ;;  %492 = vmatmul.f32.gmra.mxu1 %v79_v7 }
  0xa6   :  { %v604_v10 = vadd.f32 %v603_v9, %v446_v8  ;;  %v761_v11 = vpop.f32.mrf.mxu3  ;;  %v99_v9 = vld [vmem:[%s2025_s0 + $0x2a8] sm:$0xff] }
  0xa8   :  { %v762_v13 = vadd.f32 %v761_v11, %v604_v10  ;;  %v290_v14 = vpop.f32.mrf.mxu0 }
  0xa9   :  { %v291_v17 = vadd.f32 %v1411_v0, %v290_v14  ;;  %v104_v14 = vld [vmem:[%s2025_s0 + $0x2d0] sm:$0xff] }
  0xaa   :  { %v902_v18 = vmax.f32 %v762_v13, 0.0  ;;  %653 = vmatmul.f32.gmra.mxu2 %v84_v12  ;;  %v448_v19 = vpop.f32.mrf.mxu1 }
  0xab   :  { %v449_v21 = vadd.f32 %v448_v19, %v291_v17  ;;  %337 = vmatmul.f32.gmra.mxu0 %v82_v15  ;;  %811 = vmatmul.f32.gmra.mxu3 %v85_v16  ;;  %v102_v17 = vld [vmem:[%s2025_s0 + $0x2c0] sm:$0xff] }
  0xac   :  { %950 = vst.msk [vmem:[%s2027_s3] sm:$0xff] %vm949_vm0, %v902_v18  ;;  %v105_v18 = vld [vmem:[%s2025_s0 + $0x2d8] sm:$0xff] }
  0xad   :  { %v606_v22 = vpop.f32.mrf.mxu2  ;;  %495 = vmatmul.f32.gmra.mxu1 %v83_v20 }
  0xae   :  { %v607_v23 = vadd.f32 %v606_v22, %v449_v21  ;;  %v764_v24 = vpop.f32.mrf.mxu3  ;;  %v103_v22 = vld [vmem:[%s2025_s0 + $0x2c8] sm:$0xff] }
  0xb0   :  { %v765_v26 = vadd.f32 %v764_v24, %v607_v23  ;;  %v293_v27 = vpop.f32.mrf.mxu0 }
  0xb1   :  { %v294_v30 = vadd.f32 %v1411_v0, %v293_v27  ;;  %v108_v27 = vld [vmem:[%s2025_s0 + $0x2f0] sm:$0xff] }
  0xb2   :  { %v903_v31 = vmax.f32 %v765_v26, 0.0  ;;  %656 = vmatmul.f32.gmra.mxu2 %v88_v25  ;;  %v451_v32 = vpop.f32.mrf.mxu1 }
  0xb3   :  { %v452_v34 = vadd.f32 %v451_v32, %v294_v30  ;;  %340 = vmatmul.f32.gmra.mxu0 %v86_v28  ;;  %814 = vmatmul.f32.gmra.mxu3 %v89_v29  ;;  %v106_v30 = vld [vmem:[%s2025_s0 + $0x2e0] sm:$0xff] }
  0xb4   :  { %951 = vst.msk [vmem:[%s2027_s3 + $0x8] sm:$0xff] %vm949_vm0, %v903_v31  ;;  %v109_v31 = vld [vmem:[%s2025_s0 + $0x2f8] sm:$0xff] }
  0xb5   :  { %v609_v35 = vpop.f32.mrf.mxu2  ;;  %498 = vmatmul.f32.gmra.mxu1 %v87_v33 }
  0xb6   :  { %v610_v36 = vadd.f32 %v609_v35, %v452_v34  ;;  %v767_v37 = vpop.f32.mrf.mxu3  ;;  %v107_v35 = vld [vmem:[%s2025_s0 + $0x2e8] sm:$0xff] }
  0xb8   :  { %v768_v39 = vadd.f32 %v767_v37, %v610_v36  ;;  %v296_v40 = vpop.f32.mrf.mxu0 }
  0xb9   :  { %v297_v43 = vadd.f32 %v1411_v0, %v296_v40  ;;  %v112_v40 = vld [vmem:[%s2025_s0 + $0x310] sm:$0xff] }
  0xba   :  { %v904_v44 = vmax.f32 %v768_v39, 0.0  ;;  %659 = vmatmul.f32.gmra.mxu2 %v92_v38  ;;  %v454_v45 = vpop.f32.mrf.mxu1 }
  0xbb   :  { %v455_v47 = vadd.f32 %v454_v45, %v297_v43  ;;  %343 = vmatmul.f32.gmra.mxu0 %v90_v41  ;;  %817 = vmatmul.f32.gmra.mxu3 %v93_v42  ;;  %v110_v43 = vld [vmem:[%s2025_s0 + $0x300] sm:$0xff] }
  0xbc   :  { %952 = vst.msk [vmem:[%s2027_s3 + $0x10] sm:$0xff] %vm949_vm0, %v904_v44  ;;  %v113_v44 = vld [vmem:[%s2025_s0 + $0x318] sm:$0xff] }
  0xbd   :  { %v612_v48 = vpop.f32.mrf.mxu2  ;;  %501 = vmatmul.f32.gmra.mxu1 %v91_v46 }
  0xbe   :  { %v613_v49 = vadd.f32 %v612_v48, %v455_v47  ;;  %v770_v50 = vpop.f32.mrf.mxu3  ;;  %v111_v48 = vld [vmem:[%s2025_s0 + $0x308] sm:$0xff] }
  0xc0   :  { %v771_v52 = vadd.f32 %v770_v50, %v613_v49  ;;  %v299_v53 = vpop.f32.mrf.mxu0 }
  0xc1   :  { %v300_v56 = vadd.f32 %v1411_v0, %v299_v53  ;;  %v116_v53 = vld [vmem:[%s2025_s0 + $0x330] sm:$0xff] }
  0xc2   :  { %v905_v57 = vmax.f32 %v771_v52, 0.0  ;;  %662 = vmatmul.f32.gmra.mxu2 %v96_v51  ;;  %v457_v58 = vpop.f32.mrf.mxu1 }
  0xc3   :  { %v458_v60 = vadd.f32 %v457_v58, %v300_v56  ;;  %346 = vmatmul.f32.gmra.mxu0 %v94_v54  ;;  %820 = vmatmul.f32.gmra.mxu3 %v97_v55  ;;  %v114_v56 = vld [vmem:[%s2025_s0 + $0x320] sm:$0xff] }
  0xc4   :  { %953 = vst.msk [vmem:[%s2027_s3 + $0x18] sm:$0xff] %vm949_vm0, %v905_v57  ;;  %v117_v57 = vld [vmem:[%s2025_s0 + $0x338] sm:$0xff] }
  0xc5   :  { %v615_v61 = vpop.f32.mrf.mxu2  ;;  %504 = vmatmul.f32.gmra.mxu1 %v95_v59 }
  0xc6   :  { %v616_v62 = vadd.f32 %v615_v61, %v458_v60  ;;  %v773_v63 = vpop.f32.mrf.mxu3  ;;  %v115_v61 = vld [vmem:[%s2025_s0 + $0x328] sm:$0xff] }
  0xc8   :  { %v774_v2 = vadd.f32 %v773_v63, %v616_v62  ;;  %v302_v3 = vpop.f32.mrf.mxu0 }
  0xc9   :  { %v303_v6 = vadd.f32 %v1411_v0, %v302_v3  ;;  %v120_v3 = vld [vmem:[%s2025_s0 + $0x350] sm:$0xff] }
  0xca   :  { %v906_v7 = vmax.f32 %v774_v2, 0.0  ;;  %665 = vmatmul.f32.gmra.mxu2 %v100_v1  ;;  %v460_v8 = vpop.f32.mrf.mxu1 }
  0xcb   :  { %v461_v10 = vadd.f32 %v460_v8, %v303_v6  ;;  %349 = vmatmul.f32.gmra.mxu0 %v98_v4  ;;  %823 = vmatmul.f32.gmra.mxu3 %v101_v5  ;;  %v118_v6 = vld [vmem:[%s2025_s0 + $0x340] sm:$0xff] }
  0xcc   :  { %954 = vst.msk [vmem:[%s2027_s3 + $0x20] sm:$0xff] %vm949_vm0, %v906_v7  ;;  %v121_v7 = vld [vmem:[%s2025_s0 + $0x358] sm:$0xff] }
  0xcd   :  { %v618_v11 = vpop.f32.mrf.mxu2  ;;  %507 = vmatmul.f32.gmra.mxu1 %v99_v9 }
  0xce   :  { %v619_v12 = vadd.f32 %v618_v11, %v461_v10  ;;  %v776_v13 = vpop.f32.mrf.mxu3  ;;  %v119_v11 = vld [vmem:[%s2025_s0 + $0x348] sm:$0xff] }
  0xd0   :  { %v777_v15 = vadd.f32 %v776_v13, %v619_v12  ;;  %v305_v16 = vpop.f32.mrf.mxu0 }
  0xd1   :  { %v306_v19 = vadd.f32 %v1411_v0, %v305_v16  ;;  %v124_v16 = vld [vmem:[%s2025_s0 + $0x370] sm:$0xff] }
  0xd2   :  { %v907_v20 = vmax.f32 %v777_v15, 0.0  ;;  %668 = vmatmul.f32.gmra.mxu2 %v104_v14  ;;  %v463_v21 = vpop.f32.mrf.mxu1 }
  0xd3   :  { %v464_v23 = vadd.f32 %v463_v21, %v306_v19  ;;  %352 = vmatmul.f32.gmra.mxu0 %v102_v17  ;;  %826 = vmatmul.f32.gmra.mxu3 %v105_v18  ;;  %v122_v19 = vld [vmem:[%s2025_s0 + $0x360] sm:$0xff] }
  0xd4   :  { %955 = vst.msk [vmem:[%s2027_s3 + $0x28] sm:$0xff] %vm949_vm0, %v907_v20  ;;  %v125_v20 = vld [vmem:[%s2025_s0 + $0x378] sm:$0xff] }
  0xd5   :  { %v621_v24 = vpop.f32.mrf.mxu2  ;;  %510 = vmatmul.f32.gmra.mxu1 %v103_v22 }
  0xd6   :  { %v622_v25 = vadd.f32 %v621_v24, %v464_v23  ;;  %v779_v26 = vpop.f32.mrf.mxu3  ;;  %v123_v24 = vld [vmem:[%s2025_s0 + $0x368] sm:$0xff] }
  0xd8   :  { %v780_v28 = vadd.f32 %v779_v26, %v622_v25  ;;  %v308_v29 = vpop.f32.mrf.mxu0 }
  0xd9   :  { %v309_v32 = vadd.f32 %v1411_v0, %v308_v29  ;;  %v128_v29 = vld [vmem:[%s2025_s0 + $0x390] sm:$0xff] }
  0xda   :  { %v908_v33 = vmax.f32 %v780_v28, 0.0  ;;  %671 = vmatmul.f32.gmra.mxu2 %v108_v27  ;;  %v466_v34 = vpop.f32.mrf.mxu1 }
  0xdb   :  { %v467_v36 = vadd.f32 %v466_v34, %v309_v32  ;;  %355 = vmatmul.f32.gmra.mxu0 %v106_v30  ;;  %829 = vmatmul.f32.gmra.mxu3 %v109_v31  ;;  %v126_v32 = vld [vmem:[%s2025_s0 + $0x380] sm:$0xff] }
  0xdc   :  { %956 = vst.msk [vmem:[%s2027_s3 + $0x30] sm:$0xff] %vm949_vm0, %v908_v33  ;;  %v129_v33 = vld [vmem:[%s2025_s0 + $0x398] sm:$0xff] }
  0xdd   :  { %v624_v37 = vpop.f32.mrf.mxu2  ;;  %513 = vmatmul.f32.gmra.mxu1 %v107_v35 }
  0xde   :  { %v625_v38 = vadd.f32 %v624_v37, %v467_v36  ;;  %v782_v39 = vpop.f32.mrf.mxu3  ;;  %v127_v37 = vld [vmem:[%s2025_s0 + $0x388] sm:$0xff] }
  0xe0   :  { %v783_v41 = vadd.f32 %v782_v39, %v625_v38  ;;  %v311_v42 = vpop.f32.mrf.mxu0 }
  0xe1   :  { %v312_v45 = vadd.f32 %v1411_v0, %v311_v42  ;;  %v132_v42 = vld [vmem:[%s2025_s0 + $0x3b0] sm:$0xff] }
  0xe2   :  { %v909_v46 = vmax.f32 %v783_v41, 0.0  ;;  %674 = vmatmul.f32.gmra.mxu2 %v112_v40  ;;  %v469_v47 = vpop.f32.mrf.mxu1 }
  0xe3   :  { %v470_v49 = vadd.f32 %v469_v47, %v312_v45  ;;  %358 = vmatmul.f32.gmra.mxu0 %v110_v43  ;;  %832 = vmatmul.f32.gmra.mxu3 %v113_v44  ;;  %v130_v45 = vld [vmem:[%s2025_s0 + $0x3a0] sm:$0xff] }
  0xe4   :  { %957 = vst.msk [vmem:[%s2027_s3 + $0x38] sm:$0xff] %vm949_vm0, %v909_v46  ;;  %v133_v46 = vld [vmem:[%s2025_s0 + $0x3b8] sm:$0xff] }
  0xe5   :  { %v627_v50 = vpop.f32.mrf.mxu2  ;;  %516 = vmatmul.f32.gmra.mxu1 %v111_v48 }
  0xe6   :  { %v628_v51 = vadd.f32 %v627_v50, %v470_v49  ;;  %v785_v52 = vpop.f32.mrf.mxu3  ;;  %v131_v50 = vld [vmem:[%s2025_s0 + $0x3a8] sm:$0xff] }
  0xe8   :  { %v786_v54 = vadd.f32 %v785_v52, %v628_v51  ;;  %v314_v55 = vpop.f32.mrf.mxu0 }
  0xe9   :  { %v315_v58 = vadd.f32 %v1411_v0, %v314_v55  ;;  %v136_v55 = vld [vmem:[%s2025_s0 + $0x3d0] sm:$0xff] }
  0xea   :  { %v910_v59 = vmax.f32 %v786_v54, 0.0  ;;  %677 = vmatmul.f32.gmra.mxu2 %v116_v53  ;;  %v472_v60 = vpop.f32.mrf.mxu1 }
  0xeb   :  { %v473_v62 = vadd.f32 %v472_v60, %v315_v58  ;;  %361 = vmatmul.f32.gmra.mxu0 %v114_v56  ;;  %835 = vmatmul.f32.gmra.mxu3 %v117_v57  ;;  %v134_v58 = vld [vmem:[%s2025_s0 + $0x3c0] sm:$0xff] }
  0xec   :  { %958 = vst.msk [vmem:[%s2027_s3 + $0x40] sm:$0xff] %vm949_vm0, %v910_v59  ;;  %v137_v59 = vld [vmem:[%s2025_s0 + $0x3d8] sm:$0xff] }
  0xed   :  { %v630_v63 = vpop.f32.mrf.mxu2  ;;  %519 = vmatmul.f32.gmra.mxu1 %v115_v61 }
  0xee   :  { %v631_v1 = vadd.f32 %v630_v63, %v473_v62  ;;  %v788_v2 = vpop.f32.mrf.mxu3  ;;  %v135_v63 = vld [vmem:[%s2025_s0 + $0x3c8] sm:$0xff] }
  0xf0   :  { %v789_v4 = vadd.f32 %v788_v2, %v631_v1  ;;  %v317_v5 = vpop.f32.mrf.mxu0 }
  0xf1   :  { %v318_v8 = vadd.f32 %v1411_v0, %v317_v5  ;;  %v140_v5 = vld [vmem:[%s2025_s0 + $0x3f0] sm:$0xff] }
  0xf2   :  { %v911_v9 = vmax.f32 %v789_v4, 0.0  ;;  %680 = vmatmul.f32.gmra.mxu2 %v120_v3  ;;  %v475_v10 = vpop.f32.mrf.mxu1 }
  0xf3   :  { %v476_v12 = vadd.f32 %v475_v10, %v318_v8  ;;  %364 = vmatmul.f32.gmra.mxu0 %v118_v6  ;;  %838 = vmatmul.f32.gmra.mxu3 %v121_v7  ;;  %v138_v8 = vld [vmem:[%s2025_s0 + $0x3e0] sm:$0xff] }
  0xf4   :  { %959 = vst.msk [vmem:[%s2027_s3 + $0x48] sm:$0xff] %vm949_vm0, %v911_v9  ;;  %v141_v9 = vld [vmem:[%s2025_s0 + $0x3f8] sm:$0xff] }
  0xf5   :  { %v633_v13 = vpop.f32.mrf.mxu2  ;;  %522 = vmatmul.f32.gmra.mxu1 %v119_v11 }
  0xf6   :  { %v634_v14 = vadd.f32 %v633_v13, %v476_v12  ;;  %v791_v15 = vpop.f32.mrf.mxu3  ;;  %v139_v13 = vld [vmem:[%s2025_s0 + $0x3e8] sm:$0xff] }
  0xf8   :  { %v792_v17 = vadd.f32 %v791_v15, %v634_v14  ;;  %v320_v18 = vpop.f32.mrf.mxu0 }
  0xf9   :  { %v321_v21 = vadd.f32 %v1411_v0, %v320_v18  ;;  %v144_v18 = vld [vmem:[%s2025_s0 + $0x410] sm:$0xff] }
  0xfa   :  { %v912_v22 = vmax.f32 %v792_v17, 0.0  ;;  %683 = vmatmul.f32.gmra.mxu2 %v124_v16  ;;  %v478_v23 = vpop.f32.mrf.mxu1 }
  0xfb   :  { %v479_v25 = vadd.f32 %v478_v23, %v321_v21  ;;  %367 = vmatmul.f32.gmra.mxu0 %v122_v19  ;;  %841 = vmatmul.f32.gmra.mxu3 %v125_v20  ;;  %v142_v21 = vld [vmem:[%s2025_s0 + $0x400] sm:$0xff] }
  0xfc   :  { %960 = vst.msk [vmem:[%s2027_s3 + $0x50] sm:$0xff] %vm949_vm0, %v912_v22  ;;  %v145_v22 = vld [vmem:[%s2025_s0 + $0x418] sm:$0xff] }
  0xfd   :  { %v636_v26 = vpop.f32.mrf.mxu2  ;;  %525 = vmatmul.f32.gmra.mxu1 %v123_v24 }
  0xfe   :  { %v637_v27 = vadd.f32 %v636_v26, %v479_v25  ;;  %v794_v28 = vpop.f32.mrf.mxu3  ;;  %v143_v26 = vld [vmem:[%s2025_s0 + $0x408] sm:$0xff] }
 0x100   :  { %v795_v30 = vadd.f32 %v794_v28, %v637_v27  ;;  %v323_v31 = vpop.f32.mrf.mxu0 }
 0x101   :  { %v324_v34 = vadd.f32 %v1411_v0, %v323_v31  ;;  %v148_v31 = vld [vmem:[%s2025_s0 + $0x430] sm:$0xff] }
 0x102   :  { %v913_v35 = vmax.f32 %v795_v30, 0.0  ;;  %686 = vmatmul.f32.gmra.mxu2 %v128_v29  ;;  %v481_v36 = vpop.f32.mrf.mxu1 }
 0x103   :  { %v482_v38 = vadd.f32 %v481_v36, %v324_v34  ;;  %370 = vmatmul.f32.gmra.mxu0 %v126_v32  ;;  %844 = vmatmul.f32.gmra.mxu3 %v129_v33  ;;  %v146_v34 = vld [vmem:[%s2025_s0 + $0x420] sm:$0xff] }
 0x104   :  { %961 = vst.msk [vmem:[%s2027_s3 + $0x58] sm:$0xff] %vm949_vm0, %v913_v35  ;;  %v149_v35 = vld [vmem:[%s2025_s0 + $0x438] sm:$0xff] }
 0x105   :  { %v639_v39 = vpop.f32.mrf.mxu2  ;;  %528 = vmatmul.f32.gmra.mxu1 %v127_v37 }
 0x106   :  { %v640_v40 = vadd.f32 %v639_v39, %v482_v38  ;;  %v797_v41 = vpop.f32.mrf.mxu3  ;;  %v147_v39 = vld [vmem:[%s2025_s0 + $0x428] sm:$0xff] }
 0x108   :  { %v798_v43 = vadd.f32 %v797_v41, %v640_v40  ;;  %v326_v44 = vpop.f32.mrf.mxu0 }
 0x109   :  { %v327_v47 = vadd.f32 %v1411_v0, %v326_v44  ;;  %v152_v44 = vld [vmem:[%s2025_s0 + $0x450] sm:$0xff] }
 0x10a   :  { %v914_v48 = vmax.f32 %v798_v43, 0.0  ;;  %689 = vmatmul.f32.gmra.mxu2 %v132_v42  ;;  %v484_v49 = vpop.f32.mrf.mxu1 }
 0x10b   :  { %v485_v51 = vadd.f32 %v484_v49, %v327_v47  ;;  %373 = vmatmul.f32.gmra.mxu0 %v130_v45  ;;  %847 = vmatmul.f32.gmra.mxu3 %v133_v46  ;;  %v150_v47 = vld [vmem:[%s2025_s0 + $0x440] sm:$0xff] }
 0x10c   :  { %962 = vst.msk [vmem:[%s2027_s3 + $0x60] sm:$0xff] %vm949_vm0, %v914_v48  ;;  %v153_v48 = vld [vmem:[%s2025_s0 + $0x458] sm:$0xff] }
 0x10d   :  { %v642_v52 = vpop.f32.mrf.mxu2  ;;  %531 = vmatmul.f32.gmra.mxu1 %v131_v50 }
 0x10e   :  { %v643_v53 = vadd.f32 %v642_v52, %v485_v51  ;;  %v800_v54 = vpop.f32.mrf.mxu3  ;;  %v151_v52 = vld [vmem:[%s2025_s0 + $0x448] sm:$0xff] }
 0x110   :  { %v801_v56 = vadd.f32 %v800_v54, %v643_v53  ;;  %v329_v57 = vpop.f32.mrf.mxu0 }
 0x111   :  { %v330_v60 = vadd.f32 %v1411_v0, %v329_v57  ;;  %v156_v57 = vld [vmem:[%s2025_s0 + $0x470] sm:$0xff] }
 0x112   :  { %v915_v61 = vmax.f32 %v801_v56, 0.0  ;;  %692 = vmatmul.f32.gmra.mxu2 %v136_v55  ;;  %v487_v62 = vpop.f32.mrf.mxu1 }
 0x113   :  { %v488_v1 = vadd.f32 %v487_v62, %v330_v60  ;;  %376 = vmatmul.f32.gmra.mxu0 %v134_v58  ;;  %850 = vmatmul.f32.gmra.mxu3 %v137_v59  ;;  %v154_v60 = vld [vmem:[%s2025_s0 + $0x460] sm:$0xff] }
 0x114   :  { %963 = vst.msk [vmem:[%s2027_s3 + $0x68] sm:$0xff] %vm949_vm0, %v915_v61  ;;  %v157_v61 = vld [vmem:[%s2025_s0 + $0x478] sm:$0xff] }
 0x115   :  { %v645_v2 = vpop.f32.mrf.mxu2  ;;  %534 = vmatmul.f32.gmra.mxu1 %v135_v63 }
 0x116   :  { %v646_v3 = vadd.f32 %v645_v2, %v488_v1  ;;  %v803_v4 = vpop.f32.mrf.mxu3  ;;  %v155_v2 = vld [vmem:[%s2025_s0 + $0x468] sm:$0xff] }
 0x118   :  { %v804_v6 = vadd.f32 %v803_v4, %v646_v3  ;;  %v332_v7 = vpop.f32.mrf.mxu0 }
 0x119   :  { %v333_v10 = vadd.f32 %v1411_v0, %v332_v7  ;;  %v160_v7 = vld [vmem:[%s2025_s0 + $0x490] sm:$0xff] }
 0x11a   :  { %v916_v11 = vmax.f32 %v804_v6, 0.0  ;;  %695 = vmatmul.f32.gmra.mxu2 %v140_v5  ;;  %v490_v12 = vpop.f32.mrf.mxu1 }
 0x11b   :  { %v491_v14 = vadd.f32 %v490_v12, %v333_v10  ;;  %379 = vmatmul.f32.gmra.mxu0 %v138_v8  ;;  %853 = vmatmul.f32.gmra.mxu3 %v141_v9  ;;  %v158_v10 = vld [vmem:[%s2025_s0 + $0x480] sm:$0xff] }
 0x11c   :  { %964 = vst.msk [vmem:[%s2027_s3 + $0x70] sm:$0xff] %vm949_vm0, %v916_v11  ;;  %v161_v11 = vld [vmem:[%s2025_s0 + $0x498] sm:$0xff] }
 0x11d   :  { %v648_v15 = vpop.f32.mrf.mxu2  ;;  %537 = vmatmul.f32.gmra.mxu1 %v139_v13 }
 0x11e   :  { %v649_v16 = vadd.f32 %v648_v15, %v491_v14  ;;  %v806_v17 = vpop.f32.mrf.mxu3  ;;  %v159_v15 = vld [vmem:[%s2025_s0 + $0x488] sm:$0xff] }
 0x120   :  { %v807_v19 = vadd.f32 %v806_v17, %v649_v16  ;;  %v335_v20 = vpop.f32.mrf.mxu0 }
 0x121   :  { %v336_v23 = vadd.f32 %v1411_v0, %v335_v20  ;;  %v164_v20 = vld [vmem:[%s2025_s0 + $0x4b0] sm:$0xff] }
 0x122   :  { %v917_v24 = vmax.f32 %v807_v19, 0.0  ;;  %698 = vmatmul.f32.gmra.mxu2 %v144_v18  ;;  %v493_v25 = vpop.f32.mrf.mxu1 }
 0x123   :  { %v494_v27 = vadd.f32 %v493_v25, %v336_v23  ;;  %382 = vmatmul.f32.gmra.mxu0 %v142_v21  ;;  %856 = vmatmul.f32.gmra.mxu3 %v145_v22  ;;  %v162_v23 = vld [vmem:[%s2025_s0 + $0x4a0] sm:$0xff] }
 0x124   :  { %965 = vst.msk [vmem:[%s2027_s3 + $0x78] sm:$0xff] %vm949_vm0, %v917_v24  ;;  %v165_v24 = vld [vmem:[%s2025_s0 + $0x4b8] sm:$0xff] }
 0x125   :  { %v651_v28 = vpop.f32.mrf.mxu2  ;;  %540 = vmatmul.f32.gmra.mxu1 %v143_v26 }
 0x126   :  { %v652_v29 = vadd.f32 %v651_v28, %v494_v27  ;;  %v809_v30 = vpop.f32.mrf.mxu3  ;;  %v163_v28 = vld [vmem:[%s2025_s0 + $0x4a8] sm:$0xff] }
 0x128   :  { %v810_v32 = vadd.f32 %v809_v30, %v652_v29  ;;  %v338_v33 = vpop.f32.mrf.mxu0 }
 0x129   :  { %v339_v36 = vadd.f32 %v1411_v0, %v338_v33  ;;  %v168_v33 = vld [vmem:[%s2025_s0 + $0x4d0] sm:$0xff] }
 0x12a   :  { %v918_v37 = vmax.f32 %v810_v32, 0.0  ;;  %701 = vmatmul.f32.gmra.mxu2 %v148_v31  ;;  %v496_v38 = vpop.f32.mrf.mxu1 }
 0x12b   :  { %v497_v40 = vadd.f32 %v496_v38, %v339_v36  ;;  %385 = vmatmul.f32.gmra.mxu0 %v146_v34  ;;  %859 = vmatmul.f32.gmra.mxu3 %v149_v35  ;;  %v166_v36 = vld [vmem:[%s2025_s0 + $0x4c0] sm:$0xff] }
 0x12c   :  { %966 = vst.msk [vmem:[%s2027_s3 + $0x80] sm:$0xff] %vm949_vm0, %v918_v37  ;;  %v169_v37 = vld [vmem:[%s2025_s0 + $0x4d8] sm:$0xff] }
 0x12d   :  { %v654_v41 = vpop.f32.mrf.mxu2  ;;  %543 = vmatmul.f32.gmra.mxu1 %v147_v39 }
 0x12e   :  { %v655_v42 = vadd.f32 %v654_v41, %v497_v40  ;;  %v812_v43 = vpop.f32.mrf.mxu3  ;;  %v167_v41 = vld [vmem:[%s2025_s0 + $0x4c8] sm:$0xff] }
 0x130   :  { %v813_v45 = vadd.f32 %v812_v43, %v655_v42  ;;  %v341_v46 = vpop.f32.mrf.mxu0 }
 0x131   :  { %v342_v49 = vadd.f32 %v1411_v0, %v341_v46  ;;  %v172_v46 = vld [vmem:[%s2025_s0 + $0x4f0] sm:$0xff] }
 0x132   :  { %v919_v50 = vmax.f32 %v813_v45, 0.0  ;;  %704 = vmatmul.f32.gmra.mxu2 %v152_v44  ;;  %v499_v51 = vpop.f32.mrf.mxu1 }
 0x133   :  { %v500_v53 = vadd.f32 %v499_v51, %v342_v49  ;;  %388 = vmatmul.f32.gmra.mxu0 %v150_v47  ;;  %862 = vmatmul.f32.gmra.mxu3 %v153_v48  ;;  %v170_v49 = vld [vmem:[%s2025_s0 + $0x4e0] sm:$0xff] }
 0x134   :  { %967 = vst.msk [vmem:[%s2027_s3 + $0x88] sm:$0xff] %vm949_vm0, %v919_v50  ;;  %v173_v50 = vld [vmem:[%s2025_s0 + $0x4f8] sm:$0xff] }
 0x135   :  { %v657_v54 = vpop.f32.mrf.mxu2  ;;  %546 = vmatmul.f32.gmra.mxu1 %v151_v52 }
 0x136   :  { %v658_v55 = vadd.f32 %v657_v54, %v500_v53  ;;  %v815_v56 = vpop.f32.mrf.mxu3  ;;  %v171_v54 = vld [vmem:[%s2025_s0 + $0x4e8] sm:$0xff] }
 0x138   :  { %v816_v58 = vadd.f32 %v815_v56, %v658_v55  ;;  %v344_v59 = vpop.f32.mrf.mxu0 }
 0x139   :  { %v345_v62 = vadd.f32 %v1411_v0, %v344_v59  ;;  %v176_v59 = vld [vmem:[%s2025_s0 + $0x510] sm:$0xff] }
 0x13a   :  { %v920_v63 = vmax.f32 %v816_v58, 0.0  ;;  %707 = vmatmul.f32.gmra.mxu2 %v156_v57  ;;  %v502_v1 = vpop.f32.mrf.mxu1 }
 0x13b   :  { %v503_v3 = vadd.f32 %v502_v1, %v345_v62  ;;  %391 = vmatmul.f32.gmra.mxu0 %v154_v60  ;;  %865 = vmatmul.f32.gmra.mxu3 %v157_v61  ;;  %v174_v62 = vld [vmem:[%s2025_s0 + $0x500] sm:$0xff] }
 0x13c   :  { %968 = vst.msk [vmem:[%s2027_s3 + $0x90] sm:$0xff] %vm949_vm0, %v920_v63  ;;  %v177_v63 = vld [vmem:[%s2025_s0 + $0x518] sm:$0xff] }
 0x13d   :  { %v660_v4 = vpop.f32.mrf.mxu2  ;;  %549 = vmatmul.f32.gmra.mxu1 %v155_v2 }
 0x13e   :  { %v661_v5 = vadd.f32 %v660_v4, %v503_v3  ;;  %v818_v6 = vpop.f32.mrf.mxu3  ;;  %v175_v4 = vld [vmem:[%s2025_s0 + $0x508] sm:$0xff] }
 0x140   :  { %v819_v8 = vadd.f32 %v818_v6, %v661_v5  ;;  %v347_v9 = vpop.f32.mrf.mxu0 }
 0x141   :  { %v348_v12 = vadd.f32 %v1411_v0, %v347_v9  ;;  %v180_v9 = vld [vmem:[%s2025_s0 + $0x530] sm:$0xff] }
 0x142   :  { %v921_v13 = vmax.f32 %v819_v8, 0.0  ;;  %710 = vmatmul.f32.gmra.mxu2 %v160_v7  ;;  %v505_v14 = vpop.f32.mrf.mxu1 }
 0x143   :  { %v506_v16 = vadd.f32 %v505_v14, %v348_v12  ;;  %394 = vmatmul.f32.gmra.mxu0 %v158_v10  ;;  %868 = vmatmul.f32.gmra.mxu3 %v161_v11  ;;  %v178_v12 = vld [vmem:[%s2025_s0 + $0x520] sm:$0xff] }
 0x144   :  { %969 = vst.msk [vmem:[%s2027_s3 + $0x98] sm:$0xff] %vm949_vm0, %v921_v13  ;;  %v181_v13 = vld [vmem:[%s2025_s0 + $0x538] sm:$0xff] }
 0x145   :  { %v663_v17 = vpop.f32.mrf.mxu2  ;;  %552 = vmatmul.f32.gmra.mxu1 %v159_v15 }
 0x146   :  { %v664_v18 = vadd.f32 %v663_v17, %v506_v16  ;;  %v821_v19 = vpop.f32.mrf.mxu3  ;;  %v179_v17 = vld [vmem:[%s2025_s0 + $0x528] sm:$0xff] }
 0x148   :  { %v822_v21 = vadd.f32 %v821_v19, %v664_v18  ;;  %v350_v22 = vpop.f32.mrf.mxu0 }
 0x149   :  { %v351_v25 = vadd.f32 %v1411_v0, %v350_v22  ;;  %v184_v22 = vld [vmem:[%s2025_s0 + $0x550] sm:$0xff] }
 0x14a   :  { %v922_v26 = vmax.f32 %v822_v21, 0.0  ;;  %713 = vmatmul.f32.gmra.mxu2 %v164_v20  ;;  %v508_v27 = vpop.f32.mrf.mxu1 }
 0x14b   :  { %v509_v29 = vadd.f32 %v508_v27, %v351_v25  ;;  %397 = vmatmul.f32.gmra.mxu0 %v162_v23  ;;  %871 = vmatmul.f32.gmra.mxu3 %v165_v24  ;;  %v182_v25 = vld [vmem:[%s2025_s0 + $0x540] sm:$0xff] }
 0x14c   :  { %970 = vst.msk [vmem:[%s2027_s3 + $0xa0] sm:$0xff] %vm949_vm0, %v922_v26  ;;  %v185_v26 = vld [vmem:[%s2025_s0 + $0x558] sm:$0xff] }
 0x14d   :  { %v666_v30 = vpop.f32.mrf.mxu2  ;;  %555 = vmatmul.f32.gmra.mxu1 %v163_v28 }
 0x14e   :  { %v667_v31 = vadd.f32 %v666_v30, %v509_v29  ;;  %v824_v32 = vpop.f32.mrf.mxu3  ;;  %v183_v30 = vld [vmem:[%s2025_s0 + $0x548] sm:$0xff] }
 0x150   :  { %v825_v34 = vadd.f32 %v824_v32, %v667_v31  ;;  %v353_v35 = vpop.f32.mrf.mxu0 }
 0x151   :  { %v354_v38 = vadd.f32 %v1411_v0, %v353_v35  ;;  %v188_v35 = vld [vmem:[%s2025_s0 + $0x570] sm:$0xff] }
 0x152   :  { %v923_v39 = vmax.f32 %v825_v34, 0.0  ;;  %716 = vmatmul.f32.gmra.mxu2 %v168_v33  ;;  %v511_v40 = vpop.f32.mrf.mxu1 }
 0x153   :  { %v512_v42 = vadd.f32 %v511_v40, %v354_v38  ;;  %400 = vmatmul.f32.gmra.mxu0 %v166_v36  ;;  %874 = vmatmul.f32.gmra.mxu3 %v169_v37  ;;  %v186_v38 = vld [vmem:[%s2025_s0 + $0x560] sm:$0xff] }
 0x154   :  { %971 = vst.msk [vmem:[%s2027_s3 + $0xa8] sm:$0xff] %vm949_vm0, %v923_v39  ;;  %v189_v39 = vld [vmem:[%s2025_s0 + $0x578] sm:$0xff] }
 0x155   :  { %v669_v43 = vpop.f32.mrf.mxu2  ;;  %558 = vmatmul.f32.gmra.mxu1 %v167_v41 }
 0x156   :  { %v670_v44 = vadd.f32 %v669_v43, %v512_v42  ;;  %v827_v45 = vpop.f32.mrf.mxu3  ;;  %v187_v43 = vld [vmem:[%s2025_s0 + $0x568] sm:$0xff] }
 0x158   :  { %v828_v47 = vadd.f32 %v827_v45, %v670_v44  ;;  %v356_v48 = vpop.f32.mrf.mxu0 }
 0x159   :  { %v357_v51 = vadd.f32 %v1411_v0, %v356_v48  ;;  %v192_v48 = vld [vmem:[%s2025_s0 + $0x590] sm:$0xff] }
 0x15a   :  { %v924_v52 = vmax.f32 %v828_v47, 0.0  ;;  %719 = vmatmul.f32.gmra.mxu2 %v172_v46  ;;  %v514_v53 = vpop.f32.mrf.mxu1 }
 0x15b   :  { %v515_v55 = vadd.f32 %v514_v53, %v357_v51  ;;  %403 = vmatmul.f32.gmra.mxu0 %v170_v49  ;;  %877 = vmatmul.f32.gmra.mxu3 %v173_v50  ;;  %v190_v51 = vld [vmem:[%s2025_s0 + $0x580] sm:$0xff] }
 0x15c   :  { %972 = vst.msk [vmem:[%s2027_s3 + $0xb0] sm:$0xff] %vm949_vm0, %v924_v52  ;;  %v193_v52 = vld [vmem:[%s2025_s0 + $0x598] sm:$0xff] }
 0x15d   :  { %v672_v56 = vpop.f32.mrf.mxu2  ;;  %561 = vmatmul.f32.gmra.mxu1 %v171_v54 }
 0x15e   :  { %v673_v57 = vadd.f32 %v672_v56, %v515_v55  ;;  %v830_v58 = vpop.f32.mrf.mxu3  ;;  %v191_v56 = vld [vmem:[%s2025_s0 + $0x588] sm:$0xff] }
 0x160   :  { %v831_v60 = vadd.f32 %v830_v58, %v673_v57  ;;  %v359_v61 = vpop.f32.mrf.mxu0 }
 0x161   :  { %v360_v1 = vadd.f32 %v1411_v0, %v359_v61 }
 0x162   :  { %v925_v2 = vmax.f32 %v831_v60, 0.0  ;;  %722 = vmatmul.f32.gmra.mxu2 %v176_v59  ;;  %v517_v3 = vpop.f32.mrf.mxu1 }
 0x163   :  { %v518_v5 = vadd.f32 %v517_v3, %v360_v1  ;;  %406 = vmatmul.f32.gmra.mxu0 %v174_v62  ;;  %880 = vmatmul.f32.gmra.mxu3 %v177_v63  ;;  %v194_v63 = vld [vmem:[%s2025_s0 + $0x5a0] sm:$0xff]  ;;  %v197_v1 = vld [vmem:[%s2025_s0 + $0x5b8] sm:$0xff] }
 0x164   :  { %973 = vst.msk [vmem:[%s2027_s3 + $0xb8] sm:$0xff] %vm949_vm0, %v925_v2  ;;  %v1914_v2 = vld [vmem:[%s2026_s2] ss:$0 sm:$0xff] }
 0x165   :  { %v675_v6 = vpop.f32.mrf.mxu2  ;;  %564 = vmatmul.f32.gmra.mxu1 %v175_v4 }
 0x166   :  { %v676_v7 = vadd.f32 %v675_v6, %v518_v5  ;;  %v833_v8 = vpop.f32.mrf.mxu3  ;;  %v195_v6 = vld [vmem:[%s2025_s0 + $0x5a8] sm:$0xff] }
 0x168   :  { %v834_v10 = vadd.f32 %v833_v8, %v676_v7  ;;  %v362_v11 = vpop.f32.mrf.mxu0 }
 0x169   :  { %v363_v14 = vadd.f32 %v1411_v0, %v362_v11  ;;  %v200_v11 = vld [vmem:[%s2025_s0 + $0x5d0] sm:$0x3f] }
 0x16a   :  { %v926_v15 = vmax.f32 %v834_v10, 0.0  ;;  %725 = vmatmul.f32.gmra.mxu2 %v180_v9  ;;  %v520_v16 = vpop.f32.mrf.mxu1 }
 0x16b   :  { %v521_v18 = vadd.f32 %v520_v16, %v363_v14  ;;  %409 = vmatmul.f32.gmra.mxu0 %v178_v12  ;;  %883 = vmatmul.f32.gmra.mxu3 %v181_v13  ;;  %v198_v14 = vld [vmem:[%s2025_s0 + $0x5c0] sm:$0x3f] }
 0x16c   :  { %974 = vst.msk [vmem:[%s2027_s3 + $0xc0] sm:$0xff] %vm949_vm0, %v926_v15  ;;  %v201_v15 = vld [vmem:[%s2025_s0 + $0x5d8] sm:$0x3f] }
 0x16d   :  { %v678_v19 = vpop.f32.mrf.mxu2  ;;  %567 = vmatmul.f32.gmra.mxu1 %v179_v17 }
 0x16e   :  { %v679_v20 = vadd.f32 %v678_v19, %v521_v18  ;;  %v836_v21 = vpop.f32.mrf.mxu3  ;;  %v199_v19 = vld [vmem:[%s2025_s0 + $0x5c8] sm:$0x3f] }
 0x170   :  { %v837_v23 = vadd.f32 %v836_v21, %v679_v20  ;;  %v365_v24 = vpop.f32.mrf.mxu0 }
 0x171   :  { %v366_v27 = vadd.f32 %v1411_v0, %v365_v24 }
 0x172   :  { %v927_v28 = vmax.f32 %v837_v23, 0.0  ;;  %728 = vmatmul.f32.gmra.mxu2 %v184_v22  ;;  %v523_v29 = vpop.f32.mrf.mxu1 }
 0x173   :  { %v524_v31 = vadd.f32 %v523_v29, %v366_v27  ;;  %412 = vmatmul.f32.gmra.mxu0 %v182_v25  ;;  %886 = vmatmul.f32.gmra.mxu3 %v185_v26 }
 0x174   :  { %975 = vst.msk [vmem:[%s2027_s3 + $0xc8] sm:$0xff] %vm949_vm0, %v927_v28 }
 0x175   :  { %v681_v32 = vpop.f32.mrf.mxu2  ;;  %570 = vmatmul.f32.gmra.mxu1 %v183_v30 }
 0x176   :  { %v682_v33 = vadd.f32 %v681_v32, %v524_v31  ;;  %v839_v34 = vpop.f32.mrf.mxu3 }
 0x178   :  { %v840_v36 = vadd.f32 %v839_v34, %v682_v33  ;;  %v368_v37 = vpop.f32.mrf.mxu0 }
 0x179   :  { %v369_v40 = vadd.f32 %v1411_v0, %v368_v37 }
 0x17a   :  { %v928_v41 = vmax.f32 %v840_v36, 0.0  ;;  %731 = vmatmul.f32.gmra.mxu2 %v188_v35  ;;  %v526_v42 = vpop.f32.mrf.mxu1 }
 0x17b   :  { %v527_v44 = vadd.f32 %v526_v42, %v369_v40  ;;  %415 = vmatmul.f32.gmra.mxu0 %v186_v38  ;;  %889 = vmatmul.f32.gmra.mxu3 %v189_v39 }
 0x17c   :  { %976 = vst.msk [vmem:[%s2027_s3 + $0xd0] sm:$0xff] %vm949_vm0, %v928_v41 }
 0x17d   :  { %v684_v45 = vpop.f32.mrf.mxu2  ;;  %573 = vmatmul.f32.gmra.mxu1 %v187_v43 }
 0x17e   :  { %v685_v46 = vadd.f32 %v684_v45, %v527_v44  ;;  %v842_v47 = vpop.f32.mrf.mxu3 }
 0x180   :  { %v843_v49 = vadd.f32 %v842_v47, %v685_v46  ;;  %v371_v50 = vpop.f32.mrf.mxu0 }
 0x181   :  { %v372_v53 = vadd.f32 %v1411_v0, %v371_v50  ;;  %v196_v0 = vld [vmem:[%s2025_s0 + $0x5b0] sm:$0xff] }
 0x182   :  { %v929_v54 = vmax.f32 %v843_v49, 0.0  ;;  %734 = vmatmul.f32.gmra.mxu2 %v192_v48  ;;  %v529_v55 = vpop.f32.mrf.mxu1 }
 0x183   :  { %v530_v57 = vadd.f32 %v529_v55, %v372_v53  ;;  %418 = vmatmul.f32.gmra.mxu0 %v190_v51  ;;  %892 = vmatmul.f32.gmra.mxu3 %v193_v52 }
 0x184   :  { %977 = vst.msk [vmem:[%s2027_s3 + $0xd8] sm:$0xff] %vm949_vm0, %v929_v54 }
 0x185   :  { %v687_v58 = vpop.f32.mrf.mxu2  ;;  %576 = vmatmul.f32.gmra.mxu1 %v191_v56 }
 0x186   :  { %v688_v59 = vadd.f32 %v687_v58, %v530_v57  ;;  %v845_v60 = vpop.f32.mrf.mxu3 }
 0x188   :  { %v846_v61 = vadd.f32 %v845_v60, %v688_v59  ;;  %v374_v62 = vpop.f32.mrf.mxu0 }
 0x189   :  { %v375_v3 = vadd.f32 %v1914_v2, %v374_v62 }
 0x18a   :  { %v930_v4 = vmax.f32 %v846_v61, 0.0  ;;  %737 = vmatmul.f32.gmra.mxu2 %v196_v0  ;;  %v532_v5 = vpop.f32.mrf.mxu1 }
 0x18b   :  { %v533_v7 = vadd.f32 %v532_v5, %v375_v3  ;;  %421 = vmatmul.f32.gmra.mxu0 %v194_v63  ;;  %895 = vmatmul.f32.gmra.mxu3 %v197_v1 }
 0x18c   :  { %978 = vst.msk [vmem:[%s2027_s3 + $0xe0] sm:$0xff] %vm949_vm0, %v930_v4 }
 0x18d   :  { %v690_v8 = vpop.f32.mrf.mxu2  ;;  %579 = vmatmul.f32.gmra.mxu1 %v195_v6 }
 0x18e   :  { %v691_v9 = vadd.f32 %v690_v8, %v533_v7  ;;  %v848_v10 = vpop.f32.mrf.mxu3 }
 0x190   :  { %v849_v12 = vadd.f32 %v848_v10, %v691_v9  ;;  %v377_v13 = vpop.f32.mrf.mxu0 }
 0x191   :  { %v378_v16 = vadd.f32 %v1914_v2, %v377_v13 }
 0x192   :  { %v931_v17 = vmax.f32 %v849_v12, 0.0  ;;  %740 = vmatmul.f32.gmra.mxu2 %v200_v11  ;;  %v535_v18 = vpop.f32.mrf.mxu1 }
 0x193   :  { %v536_v20 = vadd.f32 %v535_v18, %v378_v16  ;;  %424 = vmatmul.f32.gmra.mxu0 %v198_v14  ;;  %898 = vmatmul.f32.gmra.mxu3 %v201_v15 }
 0x194   :  { %979 = vst.msk [vmem:[%s2027_s3 + $0xe8] sm:$0xff] %vm949_vm0, %v931_v17 }
 0x195   :  { %v693_v21 = vpop.f32.mrf.mxu2  ;;  %582 = vmatmul.f32.gmra.mxu1 %v199_v19 }
 0x196   :  { %v694_v22 = vadd.f32 %v693_v21, %v536_v20  ;;  %v851_v23 = vpop.f32.mrf.mxu3 }
 0x198   :  { %v852_v24 = vadd.f32 %v851_v23, %v694_v22  ;;  %v380_v25 = vpop.f32.mrf.mxu0 }
 0x199   :  { %v381_v26 = vadd.f32 %v1914_v2, %v380_v25 }
 0x19a   :  { %v932_v27 = vmax.f32 %v852_v24, 0.0  ;;  %v538_v28 = vpop.f32.mrf.mxu1 }
 0x19b   :  { %v539_v29 = vadd.f32 %v538_v28, %v381_v26 }
 0x19c   :  { %980 = vst.msk [vmem:[%s2027_s3 + $0xf0] sm:$0xff] %vm949_vm0, %v932_v27 }
 0x19d   :  { %v696_v30 = vpop.f32.mrf.mxu2 }
 0x19e   :  { %v697_v31 = vadd.f32 %v696_v30, %v539_v29  ;;  %v854_v32 = vpop.f32.mrf.mxu3 }
 0x1a0   :  { %v855_v33 = vadd.f32 %v854_v32, %v697_v31  ;;  %v383_v34 = vpop.f32.mrf.mxu0 }
 0x1a1   :  { %v384_v35 = vadd.f32 %v1914_v2, %v383_v34 }
 0x1a2   :  { %v933_v36 = vmax.f32 %v855_v33, 0.0  ;;  %v541_v37 = vpop.f32.mrf.mxu1 }
 0x1a3   :  { %v542_v38 = vadd.f32 %v541_v37, %v384_v35 }
 0x1a4   :  { %981 = vst.msk [vmem:[%s2027_s3 + $0xf8] sm:$0xff] %vm949_vm0, %v933_v36 }
 0x1a5   :  { %v699_v39 = vpop.f32.mrf.mxu2 }
 0x1a6   :  { %v700_v40 = vadd.f32 %v699_v39, %v542_v38  ;;  %v857_v41 = vpop.f32.mrf.mxu3 }
 0x1a8   :  { %v858_v42 = vadd.f32 %v857_v41, %v700_v40  ;;  %v386_v43 = vpop.f32.mrf.mxu0 }
 0x1a9   :  { %v387_v44 = vadd.f32 %v1914_v2, %v386_v43 }
 0x1aa   :  { %v934_v45 = vmax.f32 %v858_v42, 0.0  ;;  %v544_v46 = vpop.f32.mrf.mxu1 }
 0x1ab   :  { %v545_v47 = vadd.f32 %v544_v46, %v387_v44 }
 0x1ac   :  { %982 = vst.msk [vmem:[%s2027_s3 + $0x100] sm:$0xff] %vm949_vm0, %v934_v45 }
 0x1ad   :  { %v702_v48 = vpop.f32.mrf.mxu2 }
 0x1ae   :  { %v703_v49 = vadd.f32 %v702_v48, %v545_v47  ;;  %v860_v50 = vpop.f32.mrf.mxu3 }
 0x1b0   :  { %v861_v51 = vadd.f32 %v860_v50, %v703_v49  ;;  %v389_v52 = vpop.f32.mrf.mxu0 }
 0x1b1   :  { %v390_v53 = vadd.f32 %v1914_v2, %v389_v52 }
 0x1b2   :  { %v935_v54 = vmax.f32 %v861_v51, 0.0  ;;  %v547_v55 = vpop.f32.mrf.mxu1 }
 0x1b3   :  { %v548_v56 = vadd.f32 %v547_v55, %v390_v53 }
 0x1b4   :  { %983 = vst.msk [vmem:[%s2027_s3 + $0x108] sm:$0xff] %vm949_vm0, %v935_v54 }
 0x1b5   :  { %v705_v57 = vpop.f32.mrf.mxu2 }
 0x1b6   :  { %v706_v58 = vadd.f32 %v705_v57, %v548_v56  ;;  %v863_v59 = vpop.f32.mrf.mxu3 }
 0x1b8   :  { %v864_v60 = vadd.f32 %v863_v59, %v706_v58  ;;  %v392_v0 = vpop.f32.mrf.mxu0 }
 0x1b9   :  { %v393_v61 = vadd.f32 %v1914_v2, %v392_v0 }
 0x1ba   :  { %v936_v62 = vmax.f32 %v864_v60, 0.0  ;;  %v550_v63 = vpop.f32.mrf.mxu1 }
 0x1bb   :  { %v551_v1 = vadd.f32 %v550_v63, %v393_v61 }
 0x1bc   :  { %984 = vst.msk [vmem:[%s2027_s3 + $0x110] sm:$0xff] %vm949_vm0, %v936_v62 }
 0x1bd   :  { %v708_v3 = vpop.f32.mrf.mxu2 }
 0x1be   :  { %v709_v4 = vadd.f32 %v708_v3, %v551_v1  ;;  %v866_v5 = vpop.f32.mrf.mxu3 }
 0x1c0   :  { %v867_v6 = vadd.f32 %v866_v5, %v709_v4  ;;  %v395_v7 = vpop.f32.mrf.mxu0 }
 0x1c1   :  { %v396_v8 = vadd.f32 %v1914_v2, %v395_v7 }
 0x1c2   :  { %v937_v9 = vmax.f32 %v867_v6, 0.0  ;;  %v553_v10 = vpop.f32.mrf.mxu1 }
 0x1c3   :  { %v554_v11 = vadd.f32 %v553_v10, %v396_v8 }
 0x1c4   :  { %985 = vst.msk [vmem:[%s2027_s3 + $0x118] sm:$0xff] %vm949_vm0, %v937_v9 }
 0x1c5   :  { %v711_v12 = vpop.f32.mrf.mxu2 }
 0x1c6   :  { %v712_v13 = vadd.f32 %v711_v12, %v554_v11  ;;  %v869_v14 = vpop.f32.mrf.mxu3 }
 0x1c8   :  { %v870_v15 = vadd.f32 %v869_v14, %v712_v13  ;;  %v398_v16 = vpop.f32.mrf.mxu0 }
 0x1c9   :  { %v399_v17 = vadd.f32 %v1914_v2, %v398_v16 }
 0x1ca   :  { %v938_v18 = vmax.f32 %v870_v15, 0.0  ;;  %v556_v19 = vpop.f32.mrf.mxu1 }
 0x1cb   :  { %v557_v20 = vadd.f32 %v556_v19, %v399_v17 }
 0x1cc   :  { %986 = vst.msk [vmem:[%s2027_s3 + $0x120] sm:$0xff] %vm949_vm0, %v938_v18 }
 0x1cd   :  { %v714_v21 = vpop.f32.mrf.mxu2 }
 0x1ce   :  { %v715_v22 = vadd.f32 %v714_v21, %v557_v20  ;;  %v872_v23 = vpop.f32.mrf.mxu3 }
 0x1d0   :  { %v873_v24 = vadd.f32 %v872_v23, %v715_v22  ;;  %v401_v25 = vpop.f32.mrf.mxu0 }
 0x1d1   :  { %v402_v26 = vadd.f32 %v1914_v2, %v401_v25 }
 0x1d2   :  { %v939_v27 = vmax.f32 %v873_v24, 0.0  ;;  %v559_v28 = vpop.f32.mrf.mxu1 }
 0x1d3   :  { %v560_v29 = vadd.f32 %v559_v28, %v402_v26 }
 0x1d4   :  { %987 = vst.msk [vmem:[%s2027_s3 + $0x128] sm:$0xff] %vm949_vm0, %v939_v27 }
 0x1d5   :  { %v717_v30 = vpop.f32.mrf.mxu2 }
 0x1d6   :  { %v718_v31 = vadd.f32 %v717_v30, %v560_v29  ;;  %v875_v32 = vpop.f32.mrf.mxu3 }
 0x1d8   :  { %v876_v33 = vadd.f32 %v875_v32, %v718_v31  ;;  %v404_v34 = vpop.f32.mrf.mxu0 }
 0x1d9   :  { %v405_v35 = vadd.f32 %v1914_v2, %v404_v34 }
 0x1da   :  { %v940_v36 = vmax.f32 %v876_v33, 0.0  ;;  %v562_v37 = vpop.f32.mrf.mxu1 }
 0x1db   :  { %v563_v38 = vadd.f32 %v562_v37, %v405_v35 }
 0x1dc   :  { %988 = vst.msk [vmem:[%s2027_s3 + $0x130] sm:$0xff] %vm949_vm0, %v940_v36 }
 0x1dd   :  { %v720_v39 = vpop.f32.mrf.mxu2 }
 0x1de   :  { %v721_v40 = vadd.f32 %v720_v39, %v563_v38  ;;  %v878_v41 = vpop.f32.mrf.mxu3 }
 0x1e0   :  { %v879_v42 = vadd.f32 %v878_v41, %v721_v40  ;;  %v407_v43 = vpop.f32.mrf.mxu0 }
 0x1e1   :  { %v408_v44 = vadd.f32 %v1914_v2, %v407_v43 }
 0x1e2   :  { %v941_v45 = vmax.f32 %v879_v42, 0.0  ;;  %v565_v46 = vpop.f32.mrf.mxu1 }
 0x1e3   :  { %v566_v47 = vadd.f32 %v565_v46, %v408_v44 }
 0x1e4   :  { %989 = vst.msk [vmem:[%s2027_s3 + $0x138] sm:$0xff] %vm949_vm0, %v941_v45 }
 0x1e5   :  { %v723_v48 = vpop.f32.mrf.mxu2 }
 0x1e6   :  { %v724_v49 = vadd.f32 %v723_v48, %v566_v47  ;;  %v881_v50 = vpop.f32.mrf.mxu3 }
 0x1e8   :  { %v882_v51 = vadd.f32 %v881_v50, %v724_v49  ;;  %v410_v52 = vpop.f32.mrf.mxu0 }
 0x1e9   :  { %v411_v53 = vadd.f32 %v1914_v2, %v410_v52 }
 0x1ea   :  { %v942_v54 = vmax.f32 %v882_v51, 0.0  ;;  %v568_v55 = vpop.f32.mrf.mxu1 }
 0x1eb   :  { %v569_v56 = vadd.f32 %v568_v55, %v411_v53 }
 0x1ec   :  { %990 = vst.msk [vmem:[%s2027_s3 + $0x140] sm:$0xff] %vm949_vm0, %v942_v54 }
 0x1ed   :  { %v726_v57 = vpop.f32.mrf.mxu2 }
 0x1ee   :  { %v727_v58 = vadd.f32 %v726_v57, %v569_v56  ;;  %v884_v59 = vpop.f32.mrf.mxu3 }
 0x1f0   :  { %v885_v60 = vadd.f32 %v884_v59, %v727_v58  ;;  %v413_v0 = vpop.f32.mrf.mxu0 }
 0x1f1   :  { %v414_v61 = vadd.f32 %v1914_v2, %v413_v0 }
 0x1f2   :  { %v943_v62 = vmax.f32 %v885_v60, 0.0  ;;  %v571_v63 = vpop.f32.mrf.mxu1 }
 0x1f3   :  { %v572_v1 = vadd.f32 %v571_v63, %v414_v61 }
 0x1f4   :  { %991 = vst.msk [vmem:[%s2027_s3 + $0x148] sm:$0xff] %vm949_vm0, %v943_v62 }
 0x1f5   :  { %v729_v3 = vpop.f32.mrf.mxu2 }
 0x1f6   :  { %v730_v4 = vadd.f32 %v729_v3, %v572_v1  ;;  %v887_v5 = vpop.f32.mrf.mxu3 }
 0x1f8   :  { %v888_v6 = vadd.f32 %v887_v5, %v730_v4  ;;  %v416_v7 = vpop.f32.mrf.mxu0 }
 0x1f9   :  { %v417_v8 = vadd.f32 %v1914_v2, %v416_v7 }
 0x1fa   :  { %v944_v9 = vmax.f32 %v888_v6, 0.0  ;;  %v574_v10 = vpop.f32.mrf.mxu1 }
 0x1fb   :  { %v575_v11 = vadd.f32 %v574_v10, %v417_v8 }
 0x1fc   :  { %992 = vst.msk [vmem:[%s2027_s3 + $0x150] sm:$0xff] %vm949_vm0, %v944_v9 }
 0x1fd   :  { %v732_v12 = vpop.f32.mrf.mxu2 }
 0x1fe   :  { %v733_v13 = vadd.f32 %v732_v12, %v575_v11  ;;  %v890_v14 = vpop.f32.mrf.mxu3 }
 0x200   :  { %v891_v15 = vadd.f32 %v890_v14, %v733_v13  ;;  %v419_v16 = vpop.f32.mrf.mxu0 }
 0x201   :  { %v420_v17 = vadd.f32 %v1914_v2, %v419_v16 }
 0x202   :  { %v945_v18 = vmax.f32 %v891_v15, 0.0  ;;  %v577_v19 = vpop.f32.mrf.mxu1 }
 0x203   :  { %v578_v20 = vadd.f32 %v577_v19, %v420_v17 }
 0x204   :  { %993 = vst.msk [vmem:[%s2027_s3 + $0x158] sm:$0xff] %vm949_vm0, %v945_v18 }
 0x205   :  { %v735_v21 = vpop.f32.mrf.mxu2 }
 0x206   :  { %v736_v22 = vadd.f32 %v735_v21, %v578_v20  ;;  %v893_v23 = vpop.f32.mrf.mxu3 }
 0x208   :  { %v894_v24 = vadd.f32 %v893_v23, %v736_v22  ;;  %v422_v25 = vpop.f32.mrf.mxu0 }
 0x209   :  { %v423_v26 = vadd.f32 %v1914_v2, %v422_v25 }
 0x20a   :  { %v946_v27 = vmax.f32 %v894_v24, 0.0  ;;  %v580_v28 = vpop.f32.mrf.mxu1 }
 0x20b   :  { %v581_v29 = vadd.f32 %v580_v28, %v423_v26 }
 0x20c   :  { %994 = vst.msk [vmem:[%s2027_s3 + $0x160] sm:$0xff] %vm949_vm0, %v946_v27 }
 0x20d   :  { %v738_v30 = vpop.f32.mrf.mxu2 }
 0x20e   :  { %v739_v31 = vadd.f32 %v738_v30, %v581_v29  ;;  %v896_v32 = vpop.f32.mrf.mxu3 }
 0x210   :  { %v897_v33 = vadd.f32 %v896_v32, %v739_v31  ;;  %v425_v34 = vpop.f32.mrf.mxu0 }
 0x211   :  { %v426_v35 = vadd.f32 %v1914_v2, %v425_v34 }
 0x212   :  { %v947_v36 = vmax.f32 %v897_v33, 0.0  ;;  %v583_v37 = vpop.f32.mrf.mxu1 }
 0x213   :  { %v584_v38 = vadd.f32 %v583_v37, %v426_v35 }
 0x214   :  { %995 = vst.msk [vmem:[%s2027_s3 + $0x168] sm:$0xff] %vm949_vm0, %v947_v36 }
 0x215   :  { %v741_v39 = vpop.f32.mrf.mxu2 }
 0x216   :  { %v742_v40 = vadd.f32 %v741_v39, %v584_v38  ;;  %v899_v41 = vpop.f32.mrf.mxu3 }
 0x218   :  { %v900_v42 = vadd.f32 %v899_v41, %v742_v40 }
 0x21a   :  { %v948_v43 = vmax.f32 %v900_v42, 0.0 }
 0x21c   :  { %997 = vst.msk [vmem:[%s2027_s3 + $0x170] sm:$0x3f] %vm996_vm1, %v948_v43 }

// kernel: box_model_forward.6
= control target key start
LH: loop header
LB: loop body
LE: loop exit
PB: predicated region body
PF: predicated region fallthrough
CT: control target
= control target key end

     0   :  { %vm260_vm0 = vcmask 523264   ;;  %vm1025_vm1 = vcmask 521216   ;;  %s2170_s1 = inlined_call_operand.vmem [shape: f32[576,64], index: 1, kind: input, shape index: {}]   ;;  %s2171_s0 = inlined_call_operand.vmem [shape: f32[270,576], index: 0, kind: input, shape index: {}]   ;;  %s2172_s2 = inlined_call_operand.vmem [shape: f32[1,64], index: 2, kind: input, shape index: {}]   ;;  %s2173_s3 = inlined_call_operand.vmem [shape: f32[270,64], index: 3, kind: output, shape index: {}]  }
   0x1   :  { %v199_v0 = vld [vmem:[%s2170_s1 + $0x78] sm:$0xff]  ;;  %v198_v1 = vld [vmem:[%s2170_s1 + $0x70] sm:$0xff]  ;;  %v197_v2 = vld [vmem:[%s2170_s1 + $0x68] sm:$0xff] }
   0x2   :  { %1065 = vmatpush.msra.mxu1 %v199_v0  ;;  %1066 = vmatpush.msra.mxu2 %v199_v0  ;;  %v196_v3 = vld [vmem:[%s2170_s1 + $0x60] sm:$0xff]  ;;  %v195_v4 = vld [vmem:[%s2170_s1 + $0x58] sm:$0xff]  ;;  %v194_v5 = vld [vmem:[%s2170_s1 + $0x50] sm:$0xff] }
   0x3   :  { %363 = vmatpush.msra.mxu0 %v199_v0  ;;  %1067 = vmatpush.msra.mxu3 %v199_v0  ;;  %v193_v6 = vld [vmem:[%s2170_s1 + $0x48] sm:$0xff]  ;;  %v192_v7 = vld [vmem:[%s2170_s1 + $0x40] sm:$0xff]  ;;  %v191_v8 = vld [vmem:[%s2170_s1 + $0x38] sm:$0xff] }
   0x4   :  { %1068 = vmatpush.msra.mxu1 %v198_v1  ;;  %1069 = vmatpush.msra.mxu2 %v198_v1  ;;  %v190_v9 = vld [vmem:[%s2170_s1 + $0x30] sm:$0xff]  ;;  %v189_v10 = vld [vmem:[%s2170_s1 + $0x28] sm:$0xff]  ;;  %v188_v11 = vld [vmem:[%s2170_s1 + $0x20] sm:$0xff] }
   0x5   :  { %364 = vmatpush.msra.mxu0 %v198_v1  ;;  %1070 = vmatpush.msra.mxu3 %v198_v1  ;;  %v187_v12 = vld [vmem:[%s2170_s1 + $0x18] sm:$0xff]  ;;  %v186_v13 = vld [vmem:[%s2170_s1 + $0x10] sm:$0xff]  ;;  %v185_v14 = vld [vmem:[%s2170_s1 + $0x8] sm:$0xff] }
   0x6   :  { %1071 = vmatpush.msra.mxu1 %v197_v2  ;;  %1072 = vmatpush.msra.mxu2 %v197_v2  ;;  %v184_v15 = vld [vmem:[%s2170_s1] sm:$0xff]  ;;  %v59_v16 = vld [vmem:[%s2171_s0 + $0x168] sm:$0xff]  ;;  %v104_v17 = vld [vmem:[%s2171_s0 + $0x2d0] sm:$0xff] }
   0x7   :  { %365 = vmatpush.msra.mxu0 %v197_v2  ;;  %1073 = vmatpush.msra.mxu3 %v197_v2  ;;  %v231_v18 = vld [vmem:[%s2170_s1 + $0x178] sm:$0xff]  ;;  %v230_v20 = vld [vmem:[%s2170_s1 + $0x170] sm:$0xff]  ;;  %v14_v22 = vld [vmem:[%s2171_s0] sm:$0xff] }
   0x8   :  { %1074 = vmatpush.msra.mxu1 %v196_v3  ;;  %1075 = vmatpush.msra.mxu2 %v196_v3  ;;  %v215_v19 = vld [vmem:[%s2170_s1 + $0xf8] sm:$0xff]  ;;  %v214_v21 = vld [vmem:[%s2170_s1 + $0xf0] sm:$0xff]  ;;  %v229_v24 = vld [vmem:[%s2170_s1 + $0x168] sm:$0xff] }
   0x9   :  { %366 = vmatpush.msra.mxu0 %v196_v3  ;;  %1076 = vmatpush.msra.mxu3 %v196_v3  ;;  %v149_v23 = vld [vmem:[%s2171_s0 + $0x438] sm:$0xff]  ;;  %v213_v26 = vld [vmem:[%s2170_s1 + $0xe8] sm:$0xff]  ;;  %v228_v28 = vld [vmem:[%s2170_s1 + $0x160] sm:$0xff] }
   0xa   :  { %1077 = vmatpush.msra.mxu1 %v195_v4  ;;  %1078 = vmatpush.msra.mxu2 %v195_v4  ;;  %v255_v25 = vld [vmem:[%s2170_s1 + $0x238] sm:$0xff]  ;;  %v254_v29 = vld [vmem:[%s2170_s1 + $0x230] sm:$0xff]  ;;  %v212_v32 = vld [vmem:[%s2170_s1 + $0xe0] sm:$0xff] }
   0xb   :  { %367 = vmatpush.msra.mxu0 %v195_v4  ;;  %1079 = vmatpush.msra.mxu3 %v195_v4  ;;  %v247_v27 = vld [vmem:[%s2170_s1 + $0x1f8] sm:$0xff]  ;;  %v64_v30 = vld [vmem:[%s2171_s0 + $0x190] sm:$0xff]  ;;  %v253_v35 = vld [vmem:[%s2170_s1 + $0x228] sm:$0xff] }
   0xc   :  { %1080 = vmatpush.msra.mxu1 %v194_v5  ;;  %1081 = vmatpush.msra.mxu2 %v194_v5  ;;  %v109_v31 = vld [vmem:[%s2171_s0 + $0x2f8] sm:$0xff]  ;;  %v246_v34 = vld [vmem:[%s2170_s1 + $0x1f0] sm:$0xff]  ;;  %v19_v38 = vld [vmem:[%s2171_s0 + $0x28] sm:$0xff] }
   0xd   :  { %368 = vmatpush.msra.mxu0 %v194_v5  ;;  %1082 = vmatpush.msra.mxu3 %v194_v5  ;;  %v227_v33 = vld [vmem:[%s2170_s1 + $0x158] sm:$0xff]  ;;  %v226_v37 = vld [vmem:[%s2170_s1 + $0x150] sm:$0xff]  ;;  %v245_v39 = vld [vmem:[%s2170_s1 + $0x1e8] sm:$0xff] }
   0xe   :  { %1083 = vmatpush.msra.mxu1 %v193_v6  ;;  %1084 = vmatpush.msra.mxu2 %v193_v6  ;;  %v211_v36 = vld [vmem:[%s2170_s1 + $0xd8] sm:$0xff]  ;;  %v154_v40 = vld [vmem:[%s2171_s0 + $0x460] sm:$0xff]  ;;  %v210_v41 = vld [vmem:[%s2170_s1 + $0xd0] sm:$0xff] }
   0xf   :  { %369 = vmatpush.msra.mxu0 %v193_v6  ;;  %1085 = vmatpush.msra.mxu3 %v193_v6  ;;  %v225_v42 = vld [vmem:[%s2170_s1 + $0x148] sm:$0xff]  ;;  %v244_v43 = vld [vmem:[%s2170_s1 + $0x1e0] sm:$0xff]  ;;  %v69_v46 = vld [vmem:[%s2171_s0 + $0x1b8] sm:$0xff] }
  0x10   :  { %1086 = vmatpush.msra.mxu1 %v192_v7  ;;  %1087 = vmatpush.msra.mxu2 %v192_v7  ;;  %v209_v44 = vld [vmem:[%s2170_s1 + $0xc8] sm:$0xff]  ;;  %v252_v45 = vld [vmem:[%s2170_s1 + $0x220] sm:$0xff]  ;;  %v243_v49 = vld [vmem:[%s2170_s1 + $0x1d8] sm:$0xff] }
  0x11   :  { %370 = vmatpush.msra.mxu0 %v192_v7  ;;  %1088 = vmatpush.msra.mxu3 %v192_v7  ;;  %v114_v47 = vld [vmem:[%s2171_s0 + $0x320] sm:$0xff]  ;;  %v251_v51 = vld [vmem:[%s2170_s1 + $0x218] sm:$0xff]  ;;  %v242_v53 = vld [vmem:[%s2170_s1 + $0x1d0] sm:$0xff] }
  0x12   :  { %1089 = vmatpush.msra.mxu1 %v191_v8  ;;  %1090 = vmatpush.msra.mxu2 %v191_v8  ;;  %v224_v48 = vld [vmem:[%s2170_s1 + $0x140] sm:$0xff]  ;;  %v223_v52 = vld [vmem:[%s2170_s1 + $0x138] sm:$0xff]  ;;  %v24_v54 = vld [vmem:[%s2171_s0 + $0x50] sm:$0xff] }
  0x13   :  { %371 = vmatpush.msra.mxu0 %v191_v8  ;;  %1091 = vmatpush.msra.mxu3 %v191_v8  ;;  %v208_v50 = vld [vmem:[%s2170_s1 + $0xc0] sm:$0xff]  ;;  %v207_v55 = vld [vmem:[%s2170_s1 + $0xb8] sm:$0xff]  ;;  %v159_v56 = vld [vmem:[%s2171_s0 + $0x488] sm:$0xff] }
  0x14   :  { %1092 = vmatpush.msra.mxu1 %v190_v9  ;;  %1093 = vmatpush.msra.mxu2 %v190_v9  ;;  %v222_v57 = vld [vmem:[%s2170_s1 + $0x130] sm:$0xff]  ;;  %v241_v58 = vld [vmem:[%s2170_s1 + $0x1c8] sm:$0xff]  ;;  %v74_v62 = vld [vmem:[%s2171_s0 + $0x1e0] sm:$0xff] }
  0x15   :  { %372 = vmatpush.msra.mxu0 %v190_v9  ;;  %1094 = vmatpush.msra.mxu3 %v190_v9  ;;  %v206_v59 = vld [vmem:[%s2170_s1 + $0xb0] sm:$0xff]  ;;  %v221_v60 = vld [vmem:[%s2170_s1 + $0x128] sm:$0xff]  ;;  %v240_v0 = vld [vmem:[%s2170_s1 + $0x1c0] sm:$0xff] }
  0x16   :  { %1095 = vmatpush.msra.mxu1 %v189_v10  ;;  %1096 = vmatpush.msra.mxu2 %v189_v10  ;;  %v250_v61 = vld [vmem:[%s2170_s1 + $0x210] sm:$0xff]  ;;  %v119_v63 = vld [vmem:[%s2171_s0 + $0x348] sm:$0xff]  ;;  %v220_v2 = vld [vmem:[%s2170_s1 + $0x120] sm:$0xff] }
  0x17   :  { %373 = vmatpush.msra.mxu0 %v189_v10  ;;  %1097 = vmatpush.msra.mxu3 %v189_v10  ;;  %v205_v1 = vld [vmem:[%s2170_s1 + $0xa8] sm:$0xff]  ;;  %v239_v3 = vld [vmem:[%s2170_s1 + $0x1b8] sm:$0xff]  ;;  %v204_v4 = vld [vmem:[%s2170_s1 + $0xa0] sm:$0xff] }
  0x18   :  { %1098 = vmatpush.msra.mxu1 %v188_v11  ;;  %1099 = vmatpush.msra.mxu2 %v188_v11  ;;  %v29_v5 = vld [vmem:[%s2171_s0 + $0x78] sm:$0xff]  ;;  %v164_v7 = vld [vmem:[%s2171_s0 + $0x4b0] sm:$0xff] }
  0x19   :  { %374 = vmatpush.msra.mxu0 %v188_v11  ;;  %1100 = vmatpush.msra.mxu3 %v188_v11  ;;  %v219_v6 = vld [vmem:[%s2170_s1 + $0x118] sm:$0xff]  ;;  %v238_v9 = vld [vmem:[%s2170_s1 + $0x1b0] sm:$0xff] }
  0x1a   :  { %1101 = vmatpush.msra.mxu1 %v187_v12  ;;  %1102 = vmatpush.msra.mxu2 %v187_v12  ;;  %v203_v8 = vld [vmem:[%s2170_s1 + $0x98] sm:$0xff]  ;;  %v218_v10 = vld [vmem:[%s2170_s1 + $0x110] sm:$0xff] }
  0x1b   :  { %375 = vmatpush.msra.mxu0 %v187_v12  ;;  %1103 = vmatpush.msra.mxu3 %v187_v12  ;;  %v202_v11 = vld [vmem:[%s2170_s1 + $0x90] sm:$0xff]  ;;  %v79_v12 = vld [vmem:[%s2171_s0 + $0x208] sm:$0xff] }
  0x1c   :  { %1104 = vmatpush.msra.mxu1 %v186_v13  ;;  %1105 = vmatpush.msra.mxu2 %v186_v13 }
  0x1d   :  { %376 = vmatpush.msra.mxu0 %v186_v13  ;;  %1106 = vmatpush.msra.mxu3 %v186_v13  ;;  %v124_v13 = vld [vmem:[%s2171_s0 + $0x370] sm:$0xff] }
  0x1e   :  { %1107 = vmatpush.msra.mxu1 %v185_v14  ;;  %1108 = vmatpush.msra.mxu2 %v185_v14 }
  0x1f   :  { %377 = vmatpush.msra.mxu0 %v185_v14  ;;  %1109 = vmatpush.msra.mxu3 %v185_v14  ;;  %v237_v14 = vld [vmem:[%s2170_s1 + $0x1a8] sm:$0xff] }
  0x20   :  { %1110 = vmatpush.msra.mxu1 %v184_v15  ;;  %1111 = vmatpush.msra.mxu2 %v184_v15 }
  0x21   :  { %406 = vmatmul.f32.vlgmr.msra.gmra.mxu1 %v59_v16  ;;  %433 = vmatmul.f32.vlgmr.msra.gmra.mxu2 %v104_v17  ;;  %v236_v16 = vld [vmem:[%s2170_s1 + $0x1a0] sm:$0xff]  ;;  %v249_v17 = vld [vmem:[%s2170_s1 + $0x208] sm:$0xff] }
  0x22   :  { %601 = vmatpush.msrb.mxu2 %v231_v18  ;;  %482 = vmatpush.msrb.mxu1 %v215_v19  ;;  %v34_v18 = vld [vmem:[%s2171_s0 + $0xa0] sm:$0xff]  ;;  %v201_v19 = vld [vmem:[%s2170_s1 + $0x88] sm:$0xff] }
  0x23   :  { %378 = vmatpush.msra.mxu0 %v184_v15  ;;  %1112 = vmatpush.msra.mxu3 %v184_v15  ;;  %v217_v15 = vld [vmem:[%s2170_s1 + $0x108] sm:$0xff] }
  0x24   :  { %602 = vmatpush.msrb.mxu2 %v230_v20  ;;  %483 = vmatpush.msrb.mxu1 %v214_v21  ;;  %v169_v20 = vld [vmem:[%s2171_s0 + $0x4d8] sm:$0xff]  ;;  %v216_v21 = vld [vmem:[%s2170_s1 + $0x100] sm:$0xff] }
  0x25   :  { %379 = vmatmul.f32.vlgmr.msra.gmra.mxu0 %v14_v22  ;;  %460 = vmatmul.f32.vlgmr.msra.gmra.mxu3 %v149_v23  ;;  %v200_v22 = vld [vmem:[%s2170_s1 + $0x80] sm:$0xff]  ;;  %v235_v23 = vld [vmem:[%s2170_s1 + $0x198] sm:$0xff] }
  0x26   :  { %603 = vmatpush.msrb.mxu2 %v229_v24  ;;  %847 = vmatpush.msrb.mxu0 %v255_v25  ;;  %v84_v24 = vld [vmem:[%s2171_s0 + $0x230] sm:$0xff]  ;;  %v129_v25 = vld [vmem:[%s2171_s0 + $0x398] sm:$0xff] }
  0x27   :  { %484 = vmatpush.msrb.mxu1 %v213_v26  ;;  %720 = vmatpush.msrb.mxu3 %v247_v27  ;;  %v234_v26 = vld [vmem:[%s2170_s1 + $0x190] sm:$0xff]  ;;  %v233_v27 = vld [vmem:[%s2170_s1 + $0x188] sm:$0xff] }
  0x28   :  { %604 = vmatpush.msrb.mxu2 %v228_v28  ;;  %848 = vmatpush.msrb.mxu0 %v254_v29  ;;  %v248_v28 = vld [vmem:[%s2170_s1 + $0x200] sm:$0xff]  ;;  %v39_v29 = vld [vmem:[%s2171_s0 + $0xc8] sm:$0xff] }
  0x29   :  { %409 = vmatmul.f32.gmra.mxu1 %v64_v30  ;;  %436 = vmatmul.f32.gmra.mxu2 %v109_v31  ;;  %v174_v30 = vld [vmem:[%s2171_s0 + $0x500] sm:$0xff] }
  0x2a   :  { %485 = vmatpush.msrb.mxu1 %v212_v32  ;;  %605 = vmatpush.msrb.mxu2 %v227_v33  ;;  %v232_v31 = vld [vmem:[%s2170_s1 + $0x180] sm:$0xff]  ;;  %v89_v32 = vld [vmem:[%s2171_s0 + $0x258] sm:$0xff] }
  0x2b   :  { %721 = vmatpush.msrb.mxu3 %v246_v34  ;;  %849 = vmatpush.msrb.mxu0 %v253_v35  ;;  %v134_v33 = vld [vmem:[%s2171_s0 + $0x3c0] sm:$0xff]  ;;  %v44_v34 = vld [vmem:[%s2171_s0 + $0xf0] sm:$0xff]  ;;  %v179_v35 = vld [vmem:[%s2171_s0 + $0x528] sm:$0x3f] }
  0x2c   :  { %486 = vmatpush.msrb.mxu1 %v211_v36  ;;  %606 = vmatpush.msrb.mxu2 %v226_v37  ;;  %v94_v36 = vld [vmem:[%s2171_s0 + $0x280] sm:$0xff]  ;;  %v139_v37 = vld [vmem:[%s2171_s0 + $0x3e8] sm:$0xff] }
  0x2d   :  { %382 = vmatmul.f32.gmra.mxu0 %v19_v38  ;;  %722 = vmatpush.msrb.mxu3 %v245_v39  ;;  %v49_v38 = vld [vmem:[%s2171_s0 + $0x118] sm:$0xff] }
  0x2e   :  { %463 = vmatmul.f32.gmra.mxu3 %v154_v40  ;;  %487 = vmatpush.msrb.mxu1 %v210_v41  ;;  %v17_v39 = vld [vmem:[%s2171_s0 + $0x18] sm:$0xff]  ;;  %v99_v40 = vld [vmem:[%s2171_s0 + $0x2a8] sm:$0xff]  ;;  %v144_v41 = vld [vmem:[%s2171_s0 + $0x410] sm:$0xff] }
  0x2f   :  { %607 = vmatpush.msrb.mxu2 %v225_v42  ;;  %723 = vmatpush.msrb.mxu3 %v244_v43  ;;  %v54_v42 = vld [vmem:[%s2171_s0 + $0x140] sm:$0xff] }
  0x30   :  { %488 = vmatpush.msrb.mxu1 %v209_v44  ;;  %850 = vmatpush.msrb.mxu0 %v252_v45  ;;  %v22_v43 = vld [vmem:[%s2171_s0 + $0x40] sm:$0xff]  ;;  %v15_v44 = vld [vmem:[%s2171_s0 + $0x8] sm:$0xff]  ;;  %v16_v45 = vld [vmem:[%s2171_s0 + $0x10] sm:$0xff] }
  0x31   :  { %412 = vmatmul.f32.gmra.mxu1 %v69_v46  ;;  %439 = vmatmul.f32.gmra.mxu2 %v114_v47  ;;  %v18_v46 = vld [vmem:[%s2171_s0 + $0x20] sm:$0xff]  ;;  %v27_v47 = vld [vmem:[%s2171_s0 + $0x68] sm:$0xff] }
  0x32   :  { %608 = vmatpush.msrb.mxu2 %v224_v48  ;;  %724 = vmatpush.msrb.mxu3 %v243_v49  ;;  %v20_v48 = vld [vmem:[%s2171_s0 + $0x30] sm:$0xff]  ;;  %v21_v49 = vld [vmem:[%s2171_s0 + $0x38] sm:$0xff] }
  0x33   :  { %489 = vmatpush.msrb.mxu1 %v208_v50  ;;  %851 = vmatpush.msrb.mxu0 %v251_v51  ;;  %v23_v50 = vld [vmem:[%s2171_s0 + $0x48] sm:$0xff]  ;;  %v32_v51 = vld [vmem:[%s2171_s0 + $0x90] sm:$0xff] }
  0x34   :  { %609 = vmatpush.msrb.mxu2 %v223_v52  ;;  %725 = vmatpush.msrb.mxu3 %v242_v53  ;;  %v25_v52 = vld [vmem:[%s2171_s0 + $0x58] sm:$0xff]  ;;  %v26_v53 = vld [vmem:[%s2171_s0 + $0x60] sm:$0xff] }
  0x35   :  { %385 = vmatmul.f32.gmra.mxu0 %v24_v54  ;;  %490 = vmatpush.msrb.mxu1 %v207_v55  ;;  %v28_v54 = vld [vmem:[%s2171_s0 + $0x70] sm:$0xff]  ;;  %v37_v55 = vld [vmem:[%s2171_s0 + $0xb8] sm:$0xff] }
  0x36   :  { %466 = vmatmul.f32.gmra.mxu3 %v159_v56  ;;  %610 = vmatpush.msrb.mxu2 %v222_v57  ;;  %v30_v56 = vld [vmem:[%s2171_s0 + $0x80] sm:$0xff]  ;;  %v31_v57 = vld [vmem:[%s2171_s0 + $0x88] sm:$0xff] }
  0x37   :  { %726 = vmatpush.msrb.mxu3 %v241_v58  ;;  %491 = vmatpush.msrb.mxu1 %v206_v59  ;;  %v33_v58 = vld [vmem:[%s2171_s0 + $0x98] sm:$0xff]  ;;  %v42_v59 = vld [vmem:[%s2171_s0 + $0xe0] sm:$0xff] }
  0x38   :  { %611 = vmatpush.msrb.mxu2 %v221_v60  ;;  %852 = vmatpush.msrb.mxu0 %v250_v61  ;;  %v35_v60 = vld [vmem:[%s2171_s0 + $0xa8] sm:$0xff]  ;;  %v36_v61 = vld [vmem:[%s2171_s0 + $0xb0] sm:$0xff] }
  0x39   :  { %415 = vmatmul.f32.gmra.mxu1 %v74_v62  ;;  %442 = vmatmul.f32.gmra.mxu2 %v119_v63  ;;  %v38_v62 = vld [vmem:[%s2171_s0 + $0xc0] sm:$0xff]  ;;  %v47_v63 = vld [vmem:[%s2171_s0 + $0x108] sm:$0xff] }
  0x3a   :  { %727 = vmatpush.msrb.mxu3 %v240_v0  ;;  %492 = vmatpush.msrb.mxu1 %v205_v1  ;;  %v40_v0 = vld [vmem:[%s2171_s0 + $0xd0] sm:$0xff]  ;;  %v41_v1 = vld [vmem:[%s2171_s0 + $0xd8] sm:$0xff] }
  0x3b   :  { %612 = vmatpush.msrb.mxu2 %v220_v2  ;;  %853 = vmatpush.msrb.mxu0 %v249_v17  ;;  %v43_v2 = vld [vmem:[%s2171_s0 + $0xe8] sm:$0xff]  ;;  %v56_v17 = vld [vmem:[%s2171_s0 + $0x150] sm:$0xff] }
  0x3c   :  { %728 = vmatpush.msrb.mxu3 %v239_v3  ;;  %493 = vmatpush.msrb.mxu1 %v204_v4  ;;  %v52_v3 = vld [vmem:[%s2171_s0 + $0x130] sm:$0xff]  ;;  %v45_v4 = vld [vmem:[%s2171_s0 + $0xf8] sm:$0xff] }
  0x3d   :  { %388 = vmatmul.f32.gmra.mxu0 %v29_v5  ;;  %613 = vmatpush.msrb.mxu2 %v219_v6  ;;  %v46_v5 = vld [vmem:[%s2171_s0 + $0x100] sm:$0xff]  ;;  %v48_v6 = vld [vmem:[%s2171_s0 + $0x110] sm:$0xff] }
  0x3e   :  { %469 = vmatmul.f32.gmra.mxu3 %v164_v7  ;;  %494 = vmatpush.msrb.mxu1 %v203_v8  ;;  %v57_v7 = vld [vmem:[%s2171_s0 + $0x158] sm:$0xff] }
  0x3f   :  { %729 = vmatpush.msrb.mxu3 %v238_v9  ;;  %614 = vmatpush.msrb.mxu2 %v218_v10  ;;  %v50_v9 = vld [vmem:[%s2171_s0 + $0x120] sm:$0xff]  ;;  %v51_v10 = vld [vmem:[%s2171_s0 + $0x128] sm:$0xff] }
  0x40   :  { %495 = vmatpush.msrb.mxu1 %v202_v11  ;;  %854 = vmatpush.msrb.mxu0 %v248_v28  ;;  %v63_v28 = vld [vmem:[%s2171_s0 + $0x188] sm:$0xff] }
  0x41   :  { %418 = vmatmul.f32.gmra.mxu1 %v79_v12  ;;  %445 = vmatmul.f32.gmra.mxu2 %v124_v13  ;;  %v53_v12 = vld [vmem:[%s2171_s0 + $0x138] sm:$0xff]  ;;  %v62_v13 = vld [vmem:[%s2171_s0 + $0x180] sm:$0xff] }
  0x42   :  { %730 = vmatpush.msrb.mxu3 %v237_v14  ;;  %615 = vmatpush.msrb.mxu2 %v217_v15 }
  0x43   :  { %496 = vmatpush.msrb.mxu1 %v201_v19 }
  0x44   :  { %731 = vmatpush.msrb.mxu3 %v236_v16  ;;  %616 = vmatpush.msrb.mxu2 %v216_v21  ;;  %v55_v16 = vld [vmem:[%s2171_s0 + $0x148] sm:$0xff] }
  0x45   :  { %391 = vmatmul.f32.gmra.mxu0 %v34_v18  ;;  %497 = vmatpush.msrb.mxu1 %v200_v22  ;;  %v67_v21 = vld [vmem:[%s2171_s0 + $0x1a8] sm:$0xff] }
  0x46   :  { %472 = vmatmul.f32.gmra.mxu3 %v169_v20  ;;  %v58_v20 = vld [vmem:[%s2171_s0 + $0x160] sm:$0xff] }
  0x47   :  { %732 = vmatpush.msrb.mxu3 %v235_v23 }
  0x49   :  { %421 = vmatmul.f32.gmra.mxu1 %v84_v24  ;;  %448 = vmatmul.f32.gmra.mxu2 %v129_v25  ;;  %v60_v24 = vld [vmem:[%s2171_s0 + $0x170] sm:$0xff]  ;;  %v61_v25 = vld [vmem:[%s2171_s0 + $0x178] sm:$0xff] }
  0x4a   :  { %733 = vmatpush.msrb.mxu3 %v234_v26 }
  0x4c   :  { %734 = vmatpush.msrb.mxu3 %v233_v27 }
  0x4d   :  { %394 = vmatmul.f32.gmra.mxu0 %v39_v29  ;;  %v72_v29 = vld [vmem:[%s2171_s0 + $0x1d0] sm:$0xff] }
  0x4e   :  { %475 = vmatmul.f32.gmra.mxu3 %v174_v30 }
  0x4f   :  { %735 = vmatpush.msrb.mxu3 %v232_v31 }
  0x51   :  { %424 = vmatmul.f32.gmra.mxu1 %v89_v32  ;;  %451 = vmatmul.f32.gmra.mxu2 %v134_v33  ;;  %v65_v32 = vld [vmem:[%s2171_s0 + $0x198] sm:$0xff]  ;;  %v66_v33 = vld [vmem:[%s2171_s0 + $0x1a0] sm:$0xff] }
  0x55   :  { %397 = vmatmul.f32.gmra.mxu0 %v44_v34 }
  0x56   :  { %478 = vmatmul.f32.gmra.mxu3 %v179_v35 }
  0x59   :  { %427 = vmatmul.f32.gmra.mxu1 %v94_v36  ;;  %454 = vmatmul.f32.gmra.mxu2 %v139_v37  ;;  %v68_v36 = vld [vmem:[%s2171_s0 + $0x1b0] sm:$0xff]  ;;  %v77_v37 = vld [vmem:[%s2171_s0 + $0x1f8] sm:$0xff] }
  0x5d   :  { %400 = vmatmul.f32.gmra.mxu0 %v49_v38 }
  0x5e   :  { %736 = vmatmul.f32.vlgmr.msrb.gmra.mxu3 %v17_v39 }
  0x61   :  { %430 = vmatmul.f32.gmra.mxu1 %v99_v40  ;;  %457 = vmatmul.f32.gmra.mxu2 %v144_v41  ;;  %v70_v40 = vld [vmem:[%s2171_s0 + $0x1c0] sm:$0xff]  ;;  %v71_v41 = vld [vmem:[%s2171_s0 + $0x1c8] sm:$0xff] }
  0x65   :  { %403 = vmatmul.f32.gmra.mxu0 %v54_v42 }
  0x66   :  { %739 = vmatmul.f32.gmra.mxu3 %v22_v43 }
  0x69   :  { %498 = vmatmul.f32.vlgmr.msrb.gmra.mxu1 %v15_v44  ;;  %617 = vmatmul.f32.vlgmr.msrb.gmra.mxu2 %v16_v45  ;;  %v73_v44 = vld [vmem:[%s2171_s0 + $0x1d8] sm:$0xff]  ;;  %v82_v45 = vld [vmem:[%s2171_s0 + $0x220] sm:$0xff] }
  0x6d   :  { %1031 = vmatmul.msk.f32.vlgmr.msrb.gmra.mxu0 %vm260_vm0, %v18_v46 }
  0x6e   :  { %742 = vmatmul.f32.gmra.mxu3 %v27_v47 }
  0x71   :  { %501 = vmatmul.f32.gmra.mxu1 %v20_v48  ;;  %620 = vmatmul.f32.gmra.mxu2 %v21_v49  ;;  %v75_v48 = vld [vmem:[%s2171_s0 + $0x1e8] sm:$0xff]  ;;  %v76_v49 = vld [vmem:[%s2171_s0 + $0x1f0] sm:$0xff] }
  0x75   :  { %1032 = vmatmul.msk.f32.gmra.mxu0 %vm260_vm0, %v23_v50 }
  0x76   :  { %745 = vmatmul.f32.gmra.mxu3 %v32_v51 }
  0x79   :  { %504 = vmatmul.f32.gmra.mxu1 %v25_v52  ;;  %623 = vmatmul.f32.gmra.mxu2 %v26_v53  ;;  %v78_v52 = vld [vmem:[%s2171_s0 + $0x200] sm:$0xff]  ;;  %v87_v53 = vld [vmem:[%s2171_s0 + $0x248] sm:$0xff] }
  0x7d   :  { %1033 = vmatmul.msk.f32.gmra.mxu0 %vm260_vm0, %v28_v54 }
  0x7e   :  { %748 = vmatmul.f32.gmra.mxu3 %v37_v55 }
  0x81   :  { %507 = vmatmul.f32.gmra.mxu1 %v30_v56  ;;  %626 = vmatmul.f32.gmra.mxu2 %v31_v57  ;;  %v80_v56 = vld [vmem:[%s2171_s0 + $0x210] sm:$0xff]  ;;  %v81_v57 = vld [vmem:[%s2171_s0 + $0x218] sm:$0xff] }
  0x85   :  { %1034 = vmatmul.msk.f32.gmra.mxu0 %vm260_vm0, %v33_v58 }
  0x86   :  { %751 = vmatmul.f32.gmra.mxu3 %v42_v59 }
  0x89   :  { %510 = vmatmul.f32.gmra.mxu1 %v35_v60  ;;  %629 = vmatmul.f32.gmra.mxu2 %v36_v61  ;;  %v83_v60 = vld [vmem:[%s2171_s0 + $0x228] sm:$0xff]  ;;  %v92_v61 = vld [vmem:[%s2171_s0 + $0x270] sm:$0xff] }
  0x8d   :  { %1035 = vmatmul.msk.f32.gmra.mxu0 %vm260_vm0, %v38_v62 }
  0x8e   :  { %754 = vmatmul.f32.gmra.mxu3 %v47_v63 }
  0x91   :  { %513 = vmatmul.f32.gmra.mxu1 %v40_v0  ;;  %632 = vmatmul.f32.gmra.mxu2 %v41_v1  ;;  %v85_v0 = vld [vmem:[%s2171_s0 + $0x238] sm:$0xff]  ;;  %v86_v1 = vld [vmem:[%s2171_s0 + $0x240] sm:$0xff] }
  0x95   :  { %1036 = vmatmul.msk.f32.gmra.mxu0 %vm260_vm0, %v43_v2 }
  0x96   :  { %757 = vmatmul.f32.gmra.mxu3 %v52_v3 }
  0x99   :  { %516 = vmatmul.f32.gmra.mxu1 %v45_v4  ;;  %635 = vmatmul.f32.gmra.mxu2 %v46_v5  ;;  %v88_v4 = vld [vmem:[%s2171_s0 + $0x250] sm:$0xff]  ;;  %v97_v5 = vld [vmem:[%s2171_s0 + $0x298] sm:$0xff] }
  0x9d   :  { %1037 = vmatmul.msk.f32.gmra.mxu0 %vm260_vm0, %v48_v6 }
  0x9e   :  { %v1549_v8 = vpop.f32.mrf.mxu1  ;;  %760 = vmatmul.f32.gmra.mxu3 %v57_v7 }
  0xa1   :  { %519 = vmatmul.f32.gmra.mxu1 %v50_v9  ;;  %638 = vmatmul.f32.gmra.mxu2 %v51_v10  ;;  %v90_v9 = vld [vmem:[%s2171_s0 + $0x260] sm:$0xff]  ;;  %v91_v10 = vld [vmem:[%s2171_s0 + $0x268] sm:$0xff] }
  0xa2   :  { %v1557_v11 = vpop.f32.mrf.mxu0 }
  0xa4   :  { %v1565_v14 = vpop.f32.mrf.mxu2 }
  0xa5   :  { %1038 = vmatmul.msk.f32.gmra.mxu0 %vm260_vm0, %v53_v12 }
  0xa6   :  { %v1568_v15 = vpop.f32.mrf.mxu1  ;;  %763 = vmatmul.f32.gmra.mxu3 %v62_v13 }
  0xa8   :  { %v1576_v18 = vpop.f32.mrf.mxu3 }
  0xa9   :  { %522 = vmatmul.f32.gmra.mxu1 %v55_v16  ;;  %641 = vmatmul.f32.gmra.mxu2 %v56_v17  ;;  %v93_v16 = vld [vmem:[%s2171_s0 + $0x278] sm:$0xff]  ;;  %v102_v17 = vld [vmem:[%s2171_s0 + $0x2c0] sm:$0xff] }
  0xaa   :  { %v1578_v19 = vpop.f32.mrf.mxu0 }
  0xac   :  { %v1586_v22 = vpop.f32.mrf.mxu2 }
  0xad   :  { %1039 = vmatmul.msk.f32.gmra.mxu0 %vm260_vm0, %v58_v20 }
  0xae   :  { %v1589_v23 = vpop.f32.mrf.mxu1  ;;  %766 = vmatmul.f32.gmra.mxu3 %v67_v21 }
  0xb1   :  { %525 = vmatmul.f32.gmra.mxu1 %v60_v24  ;;  %644 = vmatmul.f32.gmra.mxu2 %v61_v25  ;;  %v1597_v26 = vpop.f32.mrf.mxu3  ;;  %v95_v24 = vld [vmem:[%s2171_s0 + $0x288] sm:$0xff]  ;;  %v96_v25 = vld [vmem:[%s2171_s0 + $0x290] sm:$0xff] }
  0xb2   :  { %v1599_v27 = vpop.f32.mrf.mxu0 }
  0xb4   :  { %v1607_v30 = vpop.f32.mrf.mxu2 }
  0xb5   :  { %1040 = vmatmul.msk.f32.gmra.mxu0 %vm260_vm0, %v63_v28  ;;  %v1743_v28 = vld [vmem:[%s2172_s2] ss:$0 sm:$0xff] }
  0xb6   :  { %v1610_v31 = vpop.f32.mrf.mxu1  ;;  %769 = vmatmul.f32.gmra.mxu3 %v72_v29  ;;  %v381_v29 = vadd.f32 %v1743_v28, %v1557_v11  ;;  %v100_v11 = vld [vmem:[%s2171_s0 + $0x2b0] sm:$0xff] }
  0xb9   :  { %528 = vmatmul.f32.gmra.mxu1 %v65_v32  ;;  %647 = vmatmul.f32.gmra.mxu2 %v66_v33  ;;  %v1618_v34 = vpop.f32.mrf.mxu3 }
  0xba   :  { %v1620_v35 = vpop.f32.mrf.mxu0 }
  0xbc   :  { %v1628_v38 = vpop.f32.mrf.mxu2 }
  0xbd   :  { %1041 = vmatmul.msk.f32.gmra.mxu0 %vm260_vm0, %v68_v36  ;;  %v98_v36 = vld [vmem:[%s2171_s0 + $0x2a0] sm:$0xff] }
  0xbe   :  { %v1631_v39 = vpop.f32.mrf.mxu1  ;;  %772 = vmatmul.f32.gmra.mxu3 %v77_v37 }
  0xc1   :  { %531 = vmatmul.f32.gmra.mxu1 %v70_v40  ;;  %650 = vmatmul.f32.gmra.mxu2 %v71_v41  ;;  %v1639_v42 = vpop.f32.mrf.mxu3  ;;  %v107_v40 = vld [vmem:[%s2171_s0 + $0x2e8] sm:$0xff] }
  0xc2   :  { %v1641_v43 = vpop.f32.mrf.mxu0 }
  0xc4   :  { %v1649_v46 = vpop.f32.mrf.mxu2 }
  0xc5   :  { %1042 = vmatmul.msk.f32.gmra.mxu0 %vm260_vm0, %v73_v44 }
  0xc6   :  { %v1652_v47 = vpop.f32.mrf.mxu1  ;;  %775 = vmatmul.f32.gmra.mxu3 %v82_v45 }
  0xc9   :  { %534 = vmatmul.f32.gmra.mxu1 %v75_v48  ;;  %653 = vmatmul.f32.gmra.mxu2 %v76_v49  ;;  %v1660_v50 = vpop.f32.mrf.mxu3  ;;  %v101_v48 = vld [vmem:[%s2171_s0 + $0x2b8] sm:$0xff] }
  0xca   :  { %v1662_v51 = vpop.f32.mrf.mxu0 }
  0xcc   :  { %v1670_v54 = vpop.f32.mrf.mxu2 }
  0xcd   :  { %1043 = vmatmul.msk.f32.gmra.mxu0 %vm260_vm0, %v78_v52  ;;  %v384_v52 = vadd.f32 %v1743_v28, %v1578_v19 }
  0xce   :  { %v1673_v55 = vpop.f32.mrf.mxu1  ;;  %778 = vmatmul.f32.gmra.mxu3 %v87_v53 }
  0xd1   :  { %537 = vmatmul.f32.gmra.mxu1 %v80_v56  ;;  %656 = vmatmul.f32.gmra.mxu2 %v81_v57  ;;  %v1681_v58 = vpop.f32.mrf.mxu3 }
  0xd2   :  { %v1683_v59 = vpop.f32.mrf.mxu0 }
  0xd4   :  { %v1691_v62 = vpop.f32.mrf.mxu2 }
  0xd5   :  { %1044 = vmatmul.msk.f32.gmra.mxu0 %vm260_vm0, %v83_v60  ;;  %v103_v60 = vld [vmem:[%s2171_s0 + $0x2c8] sm:$0xff] }
  0xd6   :  { %v1694_v63 = vpop.f32.mrf.mxu1  ;;  %781 = vmatmul.f32.gmra.mxu3 %v92_v61 }
  0xd9   :  { %540 = vmatmul.f32.gmra.mxu1 %v85_v0  ;;  %659 = vmatmul.f32.gmra.mxu2 %v86_v1  ;;  %v1702_v2 = vpop.f32.mrf.mxu3  ;;  %v112_v1 = vld [vmem:[%s2171_s0 + $0x310] sm:$0xff] }
  0xda   :  { %v1704_v3 = vpop.f32.mrf.mxu0 }
  0xdc   :  { %v1712_v6 = vpop.f32.mrf.mxu2 }
  0xdd   :  { %1045 = vmatmul.msk.f32.gmra.mxu0 %vm260_vm0, %v88_v4 }
  0xde   :  { %v1715_v7 = vpop.f32.mrf.mxu1  ;;  %784 = vmatmul.f32.gmra.mxu3 %v97_v5 }
  0xe1   :  { %543 = vmatmul.f32.gmra.mxu1 %v90_v9  ;;  %662 = vmatmul.f32.gmra.mxu2 %v91_v10  ;;  %v737_v12 = vpop.f32.mrf.mxu3  ;;  %v105_v9 = vld [vmem:[%s2171_s0 + $0x2d8] sm:$0xff]  ;;  %v106_v10 = vld [vmem:[%s2171_s0 + $0x2e0] sm:$0xff] }
  0xe2   :  { %v1723_v13 = vpop.f32.mrf.mxu0 }
  0xe4   :  { %v1731_v20 = vpop.f32.mrf.mxu2 }
  0xe5   :  { %1046 = vmatmul.msk.f32.gmra.mxu0 %vm260_vm0, %v93_v16  ;;  %v387_v16 = vadd.f32 %v1743_v28, %v1599_v27 }
  0xe6   :  { %v499_v21 = vpop.f32.mrf.mxu1  ;;  %787 = vmatmul.f32.gmra.mxu3 %v102_v17 }
  0xe7   :  { %v500_v37 = vadd.f32 %v499_v21, %v381_v29 }
  0xe9   :  { %546 = vmatmul.f32.gmra.mxu1 %v95_v24  ;;  %665 = vmatmul.f32.gmra.mxu2 %v96_v25  ;;  %v740_v32 = vpop.f32.mrf.mxu3  ;;  %v108_v25 = vld [vmem:[%s2171_s0 + $0x2f0] sm:$0xff] }
  0xea   :  { %v856_v33 = vpop.f32.mrf.mxu0 }
  0xec   :  { %v618_v41 = vpop.f32.mrf.mxu2 }
  0xed   :  { %v619_v44 = vadd.f32 %v618_v41, %v500_v37  ;;  %1047 = vmatmul.msk.f32.gmra.mxu0 %vm260_vm0, %v98_v36  ;;  %v117_v36 = vld [vmem:[%s2171_s0 + $0x338] sm:$0xff]  ;;  %v111_v41 = vld [vmem:[%s2171_s0 + $0x308] sm:$0xff] }
  0xee   :  { %v502_v45 = vpop.f32.mrf.mxu1  ;;  %790 = vmatmul.f32.gmra.mxu3 %v107_v40  ;;  %v110_v40 = vld [vmem:[%s2171_s0 + $0x300] sm:$0xff] }
  0xef   :  { %v738_v49 = vadd.f32 %v737_v12, %v619_v44  ;;  %v503_v61 = vadd.f32 %v502_v45, %v384_v52  ;;  %v390_v45 = vadd.f32 %v1743_v28, %v1620_v35  ;;  %v113_v52 = vld [vmem:[%s2171_s0 + $0x318] sm:$0xff] }
  0xf1   :  { %v857_v53 = vadd.f32 %v856_v33, %v738_v49  ;;  %549 = vmatmul.f32.gmra.mxu1 %v100_v11  ;;  %668 = vmatmul.f32.gmra.mxu2 %v101_v48  ;;  %v743_v56 = vpop.f32.mrf.mxu3 }
  0xf2   :  { %v859_v57 = vpop.f32.mrf.mxu0 }
  0xf3   :  { %v958_v0 = vmax.f32 %v857_v53, 0.0 }
  0xf4   :  { %v621_v4 = vpop.f32.mrf.mxu2 }
  0xf5   :  { %992 = vst.msk [vmem:[%s2173_s3] sm:$0xff] %vm260_vm0, %v958_v0  ;;  %v622_v19 = vadd.f32 %v621_v4, %v503_v61  ;;  %1048 = vmatmul.msk.f32.gmra.mxu0 %vm260_vm0, %v103_v60  ;;  %v122_v60 = vld [vmem:[%s2171_s0 + $0x360] sm:$0xff]  ;;  %v115_v0 = vld [vmem:[%s2171_s0 + $0x328] sm:$0xff] }
  0xf6   :  { %v505_v5 = vpop.f32.mrf.mxu1  ;;  %793 = vmatmul.f32.gmra.mxu3 %v112_v1  ;;  %v116_v1 = vld [vmem:[%s2171_s0 + $0x330] sm:$0xff] }
  0xf7   :  { %v741_v12 = vadd.f32 %v740_v32, %v622_v19  ;;  %v506_v29 = vadd.f32 %v505_v5, %v387_v16  ;;  %v393_v19 = vadd.f32 %v1743_v28, %v1641_v43 }
  0xf9   :  { %v860_v17 = vadd.f32 %v859_v57, %v741_v12  ;;  %552 = vmatmul.f32.gmra.mxu1 %v105_v9  ;;  %671 = vmatmul.f32.gmra.mxu2 %v106_v10  ;;  %v746_v21 = vpop.f32.mrf.mxu3  ;;  %v118_v12 = vld [vmem:[%s2171_s0 + $0x340] sm:$0xff] }
  0xfa   :  { %v862_v24 = vpop.f32.mrf.mxu0 }
  0xfb   :  { %v959_v33 = vmax.f32 %v860_v17, 0.0 }
  0xfc   :  { %v624_v37 = vpop.f32.mrf.mxu2 }
  0xfd   :  { %993 = vst.msk [vmem:[%s2173_s3 + $0x8] sm:$0xff] %vm260_vm0, %v959_v33  ;;  %v625_v27 = vadd.f32 %v624_v37, %v506_v29  ;;  %1049 = vmatmul.msk.f32.gmra.mxu0 %vm260_vm0, %v108_v25  ;;  %v120_v29 = vld [vmem:[%s2171_s0 + $0x350] sm:$0xff]  ;;  %v121_v33 = vld [vmem:[%s2171_s0 + $0x358] sm:$0xff]  ;;  %v396_v37 = vadd.f32 %v1743_v28, %v1662_v51 }
  0xfe   :  { %v508_v32 = vpop.f32.mrf.mxu1  ;;  %796 = vmatmul.f32.gmra.mxu3 %v117_v36 }
  0xff   :  { %v744_v44 = vadd.f32 %v743_v56, %v625_v27  ;;  %v509_v53 = vadd.f32 %v508_v32, %v390_v45 }
 0x101   :  { %v863_v11 = vadd.f32 %v862_v24, %v744_v44  ;;  %555 = vmatmul.f32.gmra.mxu1 %v110_v40  ;;  %674 = vmatmul.f32.gmra.mxu2 %v111_v41  ;;  %v749_v48 = vpop.f32.mrf.mxu3  ;;  %v127_v24 = vld [vmem:[%s2171_s0 + $0x388] sm:$0xff] }
 0x102   :  { %v865_v49 = vpop.f32.mrf.mxu0  ;;  %v123_v41 = vld [vmem:[%s2171_s0 + $0x368] sm:$0xff] }
 0x103   :  { %v960_v57 = vmax.f32 %v863_v11, 0.0  ;;  %v132_v11 = vld [vmem:[%s2171_s0 + $0x3b0] sm:$0xff] }
 0x104   :  { %v627_v61 = vpop.f32.mrf.mxu2 }
 0x105   :  { %994 = vst.msk [vmem:[%s2173_s3 + $0x10] sm:$0xff] %vm260_vm0, %v960_v57  ;;  %v628_v35 = vadd.f32 %v627_v61, %v509_v53  ;;  %1050 = vmatmul.msk.f32.gmra.mxu0 %vm260_vm0, %v113_v52  ;;  %v125_v52 = vld [vmem:[%s2171_s0 + $0x378] sm:$0xff]  ;;  %v126_v53 = vld [vmem:[%s2171_s0 + $0x380] sm:$0xff] }
 0x106   :  { %v511_v56 = vpop.f32.mrf.mxu1  ;;  %799 = vmatmul.f32.gmra.mxu3 %v122_v60  ;;  %v399_v60 = vadd.f32 %v1743_v28, %v1683_v59 }
 0x107   :  { %v747_v4 = vadd.f32 %v746_v21, %v628_v35  ;;  %v512_v16 = vadd.f32 %v511_v56, %v393_v19  ;;  %v137_v19 = vld [vmem:[%s2171_s0 + $0x3d8] sm:$0xff] }
 0x109   :  { %v866_v5 = vadd.f32 %v865_v49, %v747_v4  ;;  %558 = vmatmul.f32.gmra.mxu1 %v115_v0  ;;  %677 = vmatmul.f32.gmra.mxu2 %v116_v1  ;;  %v752_v9 = vpop.f32.mrf.mxu3  ;;  %v128_v0 = vld [vmem:[%s2171_s0 + $0x390] sm:$0xff] }
 0x10a   :  { %v868_v10 = vpop.f32.mrf.mxu0 }
 0x10b   :  { %v961_v17 = vmax.f32 %v866_v5, 0.0 }
 0x10c   :  { %v630_v25 = vpop.f32.mrf.mxu2 }
 0x10d   :  { %995 = vst.msk [vmem:[%s2173_s3 + $0x18] sm:$0xff] %vm260_vm0, %v961_v17  ;;  %v631_v43 = vadd.f32 %v630_v25, %v512_v16  ;;  %1051 = vmatmul.msk.f32.gmra.mxu0 %vm260_vm0, %v118_v12  ;;  %v131_v12 = vld [vmem:[%s2171_s0 + $0x3a8] sm:$0xff]  ;;  %v402_v17 = vadd.f32 %v1743_v28, %v1704_v3 }
 0x10e   :  { %v514_v21 = vpop.f32.mrf.mxu1  ;;  %802 = vmatmul.f32.gmra.mxu3 %v127_v24 }
 0x10f   :  { %v750_v36 = vadd.f32 %v749_v48, %v631_v43  ;;  %v515_v44 = vadd.f32 %v514_v21, %v396_v37  ;;  %v133_v21 = vld [vmem:[%s2171_s0 + $0x3b8] sm:$0xff] }
 0x111   :  { %v869_v27 = vadd.f32 %v868_v10, %v750_v36  ;;  %561 = vmatmul.f32.gmra.mxu1 %v120_v29  ;;  %680 = vmatmul.f32.gmra.mxu2 %v121_v33  ;;  %v755_v32 = vpop.f32.mrf.mxu3  ;;  %v130_v10 = vld [vmem:[%s2171_s0 + $0x3a0] sm:$0xff] }
 0x112   :  { %v871_v40 = vpop.f32.mrf.mxu0  ;;  %v142_v36 = vld [vmem:[%s2171_s0 + $0x400] sm:$0xff] }
 0x113   :  { %v962_v45 = vmax.f32 %v869_v27, 0.0 }
 0x114   :  { %v633_v49 = vpop.f32.mrf.mxu2 }
 0x115   :  { %996 = vst.msk [vmem:[%s2173_s3 + $0x20] sm:$0xff] %vm260_vm0, %v962_v45  ;;  %v634_v51 = vadd.f32 %v633_v49, %v515_v44  ;;  %1052 = vmatmul.msk.f32.gmra.mxu0 %vm260_vm0, %v123_v41  ;;  %v405_v44 = vadd.f32 %v1743_v28, %v1723_v13 }
 0x116   :  { %v517_v48 = vpop.f32.mrf.mxu1  ;;  %805 = vmatmul.f32.gmra.mxu3 %v132_v11 }
 0x117   :  { %v753_v57 = vadd.f32 %v752_v9, %v634_v51  ;;  %v518_v1 = vadd.f32 %v517_v48, %v399_v60  ;;  %v138_v51 = vld [vmem:[%s2171_s0 + $0x3e0] sm:$0xff] }
 0x119   :  { %v872_v61 = vadd.f32 %v871_v40, %v753_v57  ;;  %564 = vmatmul.f32.gmra.mxu1 %v125_v52  ;;  %683 = vmatmul.f32.gmra.mxu2 %v126_v53  ;;  %v758_v35 = vpop.f32.mrf.mxu3  ;;  %v136_v40 = vld [vmem:[%s2171_s0 + $0x3d0] sm:$0xff]  ;;  %v147_v53 = vld [vmem:[%s2171_s0 + $0x428] sm:$0xff] }
 0x11a   :  { %v874_v56 = vpop.f32.mrf.mxu0 }
 0x11b   :  { %v963_v4 = vmax.f32 %v872_v61, 0.0  ;;  %v140_v61 = vld [vmem:[%s2171_s0 + $0x3f0] sm:$0xff] }
 0x11c   :  { %v636_v5 = vpop.f32.mrf.mxu2 }
 0x11d   :  { %997 = vst.msk [vmem:[%s2173_s3 + $0x28] sm:$0xff] %vm260_vm0, %v963_v4  ;;  %v637_v59 = vadd.f32 %v636_v5, %v518_v1  ;;  %1053 = vmatmul.msk.f32.gmra.mxu0 %vm260_vm0, %v128_v0  ;;  %v408_v0 = vadd.f32 %v1743_v28, %v1549_v8  ;;  %v143_v5 = vld [vmem:[%s2171_s0 + $0x408] sm:$0xff] }
 0x11e   :  { %v520_v9 = vpop.f32.mrf.mxu1  ;;  %808 = vmatmul.f32.gmra.mxu3 %v137_v19 }
 0x11f   :  { %v756_v16 = vadd.f32 %v755_v32, %v637_v59  ;;  %v521_v29 = vadd.f32 %v520_v9, %v402_v17  ;;  %v135_v32 = vld [vmem:[%s2171_s0 + $0x3c8] sm:$0xff]  ;;  %v145_v17 = vld [vmem:[%s2171_s0 + $0x418] sm:$0xff] }
 0x121   :  { %v875_v24 = vadd.f32 %v874_v56, %v756_v16  ;;  %567 = vmatmul.f32.gmra.mxu1 %v130_v10  ;;  %686 = vmatmul.f32.gmra.mxu2 %v131_v12  ;;  %v761_v25 = vpop.f32.mrf.mxu3  ;;  %v152_v10 = vld [vmem:[%s2171_s0 + $0x450] sm:$0xff] }
 0x122   :  { %v877_v43 = vpop.f32.mrf.mxu0 }
 0x123   :  { %v964_v33 = vmax.f32 %v875_v24, 0.0  ;;  %v146_v24 = vld [vmem:[%s2171_s0 + $0x420] sm:$0xff] }
 0x124   :  { %v639_v37 = vpop.f32.mrf.mxu2 }
 0x125   :  { %998 = vst.msk [vmem:[%s2173_s3 + $0x30] sm:$0xff] %vm260_vm0, %v964_v33  ;;  %v640_v3 = vadd.f32 %v639_v37, %v521_v29  ;;  %1054 = vmatmul.msk.f32.gmra.mxu0 %vm260_vm0, %v133_v21 }
 0x126   :  { %v523_v27 = vpop.f32.mrf.mxu1  ;;  %811 = vmatmul.f32.gmra.mxu3 %v142_v36  ;;  %v148_v36 = vld [vmem:[%s2171_s0 + $0x430] sm:$0xff] }
 0x127   :  { %v759_v41 = vadd.f32 %v758_v35, %v640_v3  ;;  %v524_v48 = vadd.f32 %v523_v27, %v405_v44  ;;  %v141_v35 = vld [vmem:[%s2171_s0 + $0x3f8] sm:$0xff]  ;;  %v151_v44 = vld [vmem:[%s2171_s0 + $0x448] sm:$0xff] }
 0x128   :  { %v157_v27 = vld [vmem:[%s2171_s0 + $0x478] sm:$0xff] }
 0x129   :  { %v878_v45 = vadd.f32 %v877_v43, %v759_v41  ;;  %570 = vmatmul.f32.gmra.mxu1 %v135_v32  ;;  %689 = vmatmul.f32.gmra.mxu2 %v136_v40  ;;  %v764_v11 = vpop.f32.mrf.mxu3  ;;  %v411_v43 = vadd.f32 %v1743_v28, %v1568_v15  ;;  %v150_v41 = vld [vmem:[%s2171_s0 + $0x440] sm:$0xff] }
 0x12a   :  { %v880_v49 = vpop.f32.mrf.mxu0 }
 0x12b   :  { %v965_v52 = vmax.f32 %v878_v45, 0.0 }
 0x12c   :  { %v642_v57 = vpop.f32.mrf.mxu2 }
 0x12d   :  { %999 = vst.msk [vmem:[%s2173_s3 + $0x38] sm:$0xff] %vm260_vm0, %v965_v52  ;;  %v643_v13 = vadd.f32 %v642_v57, %v524_v48  ;;  %1055 = vmatmul.msk.f32.gmra.mxu0 %vm260_vm0, %v138_v51  ;;  %v153_v52 = vld [vmem:[%s2171_s0 + $0x458] sm:$0xff] }
 0x12e   :  { %v526_v60 = vpop.f32.mrf.mxu1  ;;  %814 = vmatmul.f32.gmra.mxu3 %v147_v53 }
 0x12f   :  { %v762_v56 = vadd.f32 %v761_v25, %v643_v13  ;;  %v527_v59 = vadd.f32 %v526_v60, %v408_v0  ;;  %v162_v13 = vld [vmem:[%s2171_s0 + $0x4a0] sm:$0xff] }
 0x131   :  { %v881_v1 = vadd.f32 %v880_v49, %v762_v56  ;;  %573 = vmatmul.f32.gmra.mxu1 %v140_v61  ;;  %692 = vmatmul.f32.gmra.mxu2 %v141_v35  ;;  %v767_v4 = vpop.f32.mrf.mxu3  ;;  %v155_v35 = vld [vmem:[%s2171_s0 + $0x468] sm:$0xff]  ;;  %v156_v56 = vld [vmem:[%s2171_s0 + $0x470] sm:$0xff] }
 0x132   :  { %v883_v19 = vpop.f32.mrf.mxu0 }
 0x133   :  { %v966_v9 = vmax.f32 %v881_v1, 0.0  ;;  %v417_v1 = vadd.f32 %v1743_v28, %v1610_v31 }
 0x134   :  { %v645_v12 = vpop.f32.mrf.mxu2 }
 0x135   :  { %1000 = vst.msk [vmem:[%s2173_s3 + $0x40] sm:$0xff] %vm260_vm0, %v966_v9  ;;  %v646_v8 = vadd.f32 %v645_v12, %v527_v59  ;;  %1056 = vmatmul.msk.f32.gmra.mxu0 %vm260_vm0, %v143_v5  ;;  %v158_v59 = vld [vmem:[%s2171_s0 + $0x480] sm:$0xff]  ;;  %v167_v12 = vld [vmem:[%s2171_s0 + $0x4c8] sm:$0xff] }
 0x136   :  { %v529_v16 = vpop.f32.mrf.mxu1  ;;  %817 = vmatmul.f32.gmra.mxu3 %v152_v10 }
 0x137   :  { %v765_v25 = vadd.f32 %v764_v11, %v646_v8  ;;  %v530_v37 = vadd.f32 %v529_v16, %v411_v43  ;;  %v414_v11 = vadd.f32 %v1743_v28, %v1589_v23  ;;  %v420_v43 = vadd.f32 %v1743_v28, %v1631_v39 }
 0x139   :  { %v884_v21 = vadd.f32 %v883_v19, %v765_v25  ;;  %576 = vmatmul.f32.gmra.mxu1 %v145_v17  ;;  %695 = vmatmul.f32.gmra.mxu2 %v146_v24  ;;  %v770_v29 = vpop.f32.mrf.mxu3  ;;  %v160_v17 = vld [vmem:[%s2171_s0 + $0x490] sm:$0xff]  ;;  %v161_v24 = vld [vmem:[%s2171_s0 + $0x498] sm:$0xff] }
 0x13a   :  { %v886_v33 = vpop.f32.mrf.mxu0 }
 0x13b   :  { %v967_v3 = vmax.f32 %v884_v21, 0.0 }
 0x13c   :  { %v648_v32 = vpop.f32.mrf.mxu2 }
 0x13d   :  { %1001 = vst.msk [vmem:[%s2173_s3 + $0x48] sm:$0xff] %vm260_vm0, %v967_v3  ;;  %v649_v15 = vadd.f32 %v648_v32, %v530_v37  ;;  %1057 = vmatmul.msk.f32.gmra.mxu0 %vm260_vm0, %v148_v36  ;;  %v163_v36 = vld [vmem:[%s2171_s0 + $0x4a8] sm:$0xff] }
 0x13e   :  { %v532_v40 = vpop.f32.mrf.mxu1  ;;  %820 = vmatmul.f32.gmra.mxu3 %v157_v27  ;;  %v172_v27 = vld [vmem:[%s2171_s0 + $0x4f0] sm:$0xff] }
 0x13f   :  { %v768_v45 = vadd.f32 %v767_v4, %v649_v15  ;;  %v533_v53 = vadd.f32 %v532_v40, %v414_v11  ;;  %v165_v40 = vld [vmem:[%s2171_s0 + $0x4b8] sm:$0xff] }
 0x141   :  { %v887_v49 = vadd.f32 %v886_v33, %v768_v45  ;;  %579 = vmatmul.f32.gmra.mxu1 %v150_v41  ;;  %698 = vmatmul.f32.gmra.mxu2 %v151_v44  ;;  %v773_v51 = vpop.f32.mrf.mxu3  ;;  %v166_v41 = vld [vmem:[%s2171_s0 + $0x4c0] sm:$0xff]  ;;  %v423_v45 = vadd.f32 %v1743_v28, %v1652_v47 }
 0x142   :  { %v889_v48 = vpop.f32.mrf.mxu0 }
 0x143   :  { %v968_v57 = vmax.f32 %v887_v49, 0.0 }
 0x144   :  { %v651_v60 = vpop.f32.mrf.mxu2 }
 0x145   :  { %1002 = vst.msk [vmem:[%s2173_s3 + $0x50] sm:$0xff] %vm260_vm0, %v968_v57  ;;  %v652_v23 = vadd.f32 %v651_v60, %v533_v53  ;;  %1058 = vmatmul.msk.f32.gmra.mxu0 %vm260_vm0, %v153_v52  ;;  %v177_v57 = vld [vmem:[%s2171_s0 + $0x518] sm:$0xff] }
 0x146   :  { %v535_v61 = vpop.f32.mrf.mxu1  ;;  %823 = vmatmul.f32.gmra.mxu3 %v162_v13 }
 0x147   :  { %v771_v0 = vadd.f32 %v770_v29, %v652_v23  ;;  %v536_v9 = vadd.f32 %v535_v61, %v417_v1  ;;  %v170_v23 = vld [vmem:[%s2171_s0 + $0x4e0] sm:$0xff]  ;;  %v171_v61 = vld [vmem:[%s2171_s0 + $0x4e8] sm:$0xff] }
 0x149   :  { %v890_v4 = vadd.f32 %v889_v48, %v771_v0  ;;  %582 = vmatmul.f32.gmra.mxu1 %v155_v35  ;;  %701 = vmatmul.f32.gmra.mxu2 %v156_v56  ;;  %v776_v19 = vpop.f32.mrf.mxu3  ;;  %v168_v48 = vld [vmem:[%s2171_s0 + $0x4d0] sm:$0xff]  ;;  %v426_v56 = vadd.f32 %v1743_v28, %v1673_v55 }
 0x14a   :  { %v892_v5 = vpop.f32.mrf.mxu0 }
 0x14b   :  { %v969_v10 = vmax.f32 %v890_v4, 0.0 }
 0x14c   :  { %v654_v8 = vpop.f32.mrf.mxu2 }
 0x14d   :  { %1003 = vst.msk [vmem:[%s2173_s3 + $0x58] sm:$0xff] %vm260_vm0, %v969_v10  ;;  %v655_v31 = vadd.f32 %v654_v8, %v536_v9  ;;  %1059 = vmatmul.msk.f32.gmra.mxu0 %vm260_vm0, %v158_v59  ;;  %v182_v9 = vld [vmem:[%s2171_s0 + $0x540] sm:$0x3f]  ;;  %v175_v8 = vld [vmem:[%s2171_s0 + $0x508] sm:$0xff] }
 0x14e   :  { %v538_v16 = vpop.f32.mrf.mxu1  ;;  %826 = vmatmul.f32.gmra.mxu3 %v167_v12 }
 0x14f   :  { %v774_v25 = vadd.f32 %v773_v51, %v655_v31  ;;  %v539_v37 = vadd.f32 %v538_v16, %v420_v43  ;;  %v176_v31 = vld [vmem:[%s2171_s0 + $0x510] sm:$0xff] }
 0x151   :  { %v893_v21 = vadd.f32 %v892_v5, %v774_v25  ;;  %585 = vmatmul.f32.gmra.mxu1 %v160_v17  ;;  %704 = vmatmul.f32.gmra.mxu2 %v161_v24  ;;  %v779_v29 = vpop.f32.mrf.mxu3  ;;  %v429_v17 = vadd.f32 %v1743_v28, %v1694_v63 }
 0x152   :  { %v895_v33 = vpop.f32.mrf.mxu0 }
 0x153   :  { %v970_v3 = vmax.f32 %v893_v21, 0.0  ;;  %v178_v21 = vld [vmem:[%s2171_s0 + $0x520] sm:$0xff] }
 0x154   :  { %v657_v32 = vpop.f32.mrf.mxu2 }
 0x155   :  { %1004 = vst.msk [vmem:[%s2173_s3 + $0x60] sm:$0xff] %vm260_vm0, %v970_v3  ;;  %v658_v39 = vadd.f32 %v657_v32, %v539_v37  ;;  %1060 = vmatmul.msk.f32.gmra.mxu0 %vm260_vm0, %v163_v36  ;;  %v180_v3 = vld [vmem:[%s2171_s0 + $0x530] sm:$0x3f] }
 0x156   :  { %v541_v15 = vpop.f32.mrf.mxu1  ;;  %829 = vmatmul.f32.gmra.mxu3 %v172_v27  ;;  %v181_v27 = vld [vmem:[%s2171_s0 + $0x538] sm:$0x3f] }
 0x157   :  { %v777_v44 = vadd.f32 %v776_v19, %v658_v39  ;;  %v542_v52 = vadd.f32 %v541_v15, %v423_v45  ;;  %v173_v19 = vld [vmem:[%s2171_s0 + $0x4f8] sm:$0xff]  ;;  %v432_v39 = vadd.f32 %v1743_v28, %v1715_v7 }
 0x159   :  { %v896_v11 = vadd.f32 %v895_v33, %v777_v44  ;;  %588 = vmatmul.f32.gmra.mxu1 %v165_v40  ;;  %707 = vmatmul.f32.gmra.mxu2 %v166_v41  ;;  %v782_v49 = vpop.f32.mrf.mxu3  ;;  %v183_v44 = vld [vmem:[%s2171_s0 + $0x548] sm:$0x3f] }
 0x15a   :  { %v898_v51 = vpop.f32.mrf.mxu0 }
 0x15b   :  { %v971_v53 = vmax.f32 %v896_v11, 0.0 }
 0x15c   :  { %v660_v13 = vpop.f32.mrf.mxu2 }
 0x15d   :  { %1005 = vst.msk [vmem:[%s2173_s3 + $0x68] sm:$0xff] %vm260_vm0, %v971_v53  ;;  %v661_v47 = vadd.f32 %v660_v13, %v542_v52  ;;  %1061 = vmatmul.msk.f32.gmra.mxu0 %vm260_vm0, %v168_v48  ;;  %v435_v52 = vadd.f32 %v1743_v28, %v1565_v14 }
 0x15e   :  { %v544_v60 = vpop.f32.mrf.mxu1  ;;  %832 = vmatmul.f32.gmra.mxu3 %v177_v57 }
 0x15f   :  { %v780_v35 = vadd.f32 %v779_v29, %v661_v47  ;;  %v545_v5 = vadd.f32 %v544_v60, %v426_v56 }
 0x161   :  { %v899_v0 = vadd.f32 %v898_v51, %v780_v35  ;;  %591 = vmatmul.f32.gmra.mxu1 %v170_v23  ;;  %710 = vmatmul.f32.gmra.mxu2 %v171_v61  ;;  %v785_v1 = vpop.f32.mrf.mxu3 }
 0x162   :  { %v901_v4 = vpop.f32.mrf.mxu0 }
 0x163   :  { %v972_v59 = vmax.f32 %v899_v0, 0.0  ;;  %v438_v0 = vadd.f32 %v1743_v28, %v1586_v22 }
 0x164   :  { %v663_v10 = vpop.f32.mrf.mxu2 }
 0x165   :  { %1006 = vst.msk [vmem:[%s2173_s3 + $0x70] sm:$0xff] %vm260_vm0, %v972_v59  ;;  %v664_v55 = vadd.f32 %v663_v10, %v545_v5  ;;  %1062 = vmatmul.msk.f32.gmra.mxu0 %vm260_vm0, %v173_v19 }
 0x166   :  { %v547_v12 = vpop.f32.mrf.mxu1  ;;  %835 = vmatmul.f32.gmra.mxu3 %v182_v9 }
 0x167   :  { %v783_v16 = vadd.f32 %v782_v49, %v664_v55  ;;  %v548_v29 = vadd.f32 %v547_v12, %v429_v17  ;;  %v441_v12 = vadd.f32 %v1743_v28, %v1607_v30 }
 0x169   :  { %v902_v24 = vadd.f32 %v901_v4, %v783_v16  ;;  %594 = vmatmul.f32.gmra.mxu1 %v175_v8  ;;  %713 = vmatmul.f32.gmra.mxu2 %v176_v31  ;;  %v788_v25 = vpop.f32.mrf.mxu3 }
 0x16a   :  { %v904_v43 = vpop.f32.mrf.mxu0 }
 0x16b   :  { %v973_v33 = vmax.f32 %v902_v24, 0.0 }
 0x16c   :  { %v666_v36 = vpop.f32.mrf.mxu2 }
 0x16d   :  { %1007 = vst.msk [vmem:[%s2173_s3 + $0x78] sm:$0xff] %vm260_vm0, %v973_v33  ;;  %v667_v37 = vadd.f32 %v666_v36, %v548_v29  ;;  %1063 = vmatmul.msk.f32.gmra.mxu0 %vm260_vm0, %v178_v21  ;;  %v444_v29 = vadd.f32 %v1743_v28, %v1628_v38 }
 0x16e   :  { %v550_v63 = vpop.f32.mrf.mxu1 }
 0x16f   :  { %v786_v32 = vadd.f32 %v785_v1, %v667_v37  ;;  %v551_v45 = vadd.f32 %v550_v63, %v432_v39 }
 0x171   :  { %v905_v15 = vadd.f32 %v904_v43, %v786_v32  ;;  %597 = vmatmul.f32.gmra.mxu1 %v180_v3  ;;  %716 = vmatmul.f32.gmra.mxu2 %v181_v27  ;;  %v791_v40 = vpop.f32.mrf.mxu3 }
 0x172   :  { %v907_v41 = vpop.f32.mrf.mxu0 }
 0x173   :  { %v974_v11 = vmax.f32 %v905_v15, 0.0  ;;  %v447_v15 = vadd.f32 %v1743_v28, %v1649_v46 }
 0x174   :  { %v669_v49 = vpop.f32.mrf.mxu2 }
 0x175   :  { %1008 = vst.msk [vmem:[%s2173_s3 + $0x80] sm:$0xff] %vm260_vm0, %v974_v11  ;;  %v670_v51 = vadd.f32 %v669_v49, %v551_v45  ;;  %1064 = vmatmul.msk.f32.gmra.mxu0 %vm260_vm0, %v183_v44 }
 0x176   :  { %v553_v7 = vpop.f32.mrf.mxu1 }
 0x177   :  { %v789_v48 = vadd.f32 %v788_v25, %v670_v51  ;;  %v554_v47 = vadd.f32 %v553_v7, %v435_v52 }
 0x179   :  { %v908_v53 = vadd.f32 %v907_v41, %v789_v48  ;;  %v794_v57 = vpop.f32.mrf.mxu3  ;;  %v450_v48 = vadd.f32 %v1743_v28, %v1670_v54 }
 0x17a   :  { %v910_v13 = vpop.f32.mrf.mxu0 }
 0x17b   :  { %v975_v60 = vmax.f32 %v908_v53, 0.0 }
 0x17c   :  { %v672_v23 = vpop.f32.mrf.mxu2 }
 0x17d   :  { %1009 = vst.msk [vmem:[%s2173_s3 + $0x88] sm:$0xff] %vm260_vm0, %v975_v60  ;;  %v673_v61 = vadd.f32 %v672_v23, %v554_v47 }
 0x17e   :  { %v556_v35 = vpop.f32.mrf.mxu1 }
 0x17f   :  { %v792_v56 = vadd.f32 %v791_v40, %v673_v61  ;;  %v557_v19 = vadd.f32 %v556_v35, %v438_v0  ;;  %v453_v35 = vadd.f32 %v1743_v28, %v1691_v62 }
 0x181   :  { %v911_v1 = vadd.f32 %v910_v13, %v792_v56  ;;  %v797_v4 = vpop.f32.mrf.mxu3 }
 0x182   :  { %v913_v14 = vpop.f32.mrf.mxu0 }
 0x183   :  { %v976_v5 = vmax.f32 %v911_v1, 0.0 }
 0x184   :  { %v675_v59 = vpop.f32.mrf.mxu2 }
 0x185   :  { %1010 = vst.msk [vmem:[%s2173_s3 + $0x90] sm:$0xff] %vm260_vm0, %v976_v5  ;;  %v676_v9 = vadd.f32 %v675_v59, %v557_v19 }
 0x186   :  { %v559_v10 = vpop.f32.mrf.mxu1 }
 0x187   :  { %v795_v55 = vadd.f32 %v794_v57, %v676_v9  ;;  %v560_v16 = vadd.f32 %v559_v10, %v441_v12  ;;  %v456_v9 = vadd.f32 %v1743_v28, %v1712_v6 }
 0x189   :  { %v914_v8 = vadd.f32 %v913_v14, %v795_v55  ;;  %v800_v31 = vpop.f32.mrf.mxu3 }
 0x18a   :  { %v916_v22 = vpop.f32.mrf.mxu0 }
 0x18b   :  { %v977_v17 = vmax.f32 %v914_v8, 0.0 }
 0x18c   :  { %v678_v24 = vpop.f32.mrf.mxu2 }
 0x18d   :  { %1011 = vst.msk [vmem:[%s2173_s3 + $0x98] sm:$0xff] %vm260_vm0, %v977_v17  ;;  %v679_v25 = vadd.f32 %v678_v24, %v560_v16  ;;  %v459_v24 = vadd.f32 %v1743_v28, %v1731_v20 }
 0x18e   :  { %v562_v43 = vpop.f32.mrf.mxu1 }
 0x18f   :  { %v798_v21 = vadd.f32 %v797_v4, %v679_v25  ;;  %v563_v37 = vadd.f32 %v562_v43, %v444_v29 }
 0x191   :  { %v917_v33 = vadd.f32 %v916_v22, %v798_v21  ;;  %v803_v36 = vpop.f32.mrf.mxu3 }
 0x192   :  { %v919_v30 = vpop.f32.mrf.mxu0 }
 0x193   :  { %v978_v63 = vmax.f32 %v917_v33, 0.0 }
 0x194   :  { %v681_v3 = vpop.f32.mrf.mxu2 }
 0x195   :  { %1012 = vst.msk [vmem:[%s2173_s3 + $0xa0] sm:$0xff] %vm260_vm0, %v978_v63  ;;  %v682_v27 = vadd.f32 %v681_v3, %v563_v37  ;;  %v462_v63 = vadd.f32 %v1743_v28, %v1576_v18 }
 0x196   :  { %v565_v32 = vpop.f32.mrf.mxu1 }
 0x197   :  { %v801_v39 = vadd.f32 %v800_v31, %v682_v27  ;;  %v566_v44 = vadd.f32 %v565_v32, %v447_v15 }
 0x199   :  { %v920_v40 = vadd.f32 %v919_v30, %v801_v39  ;;  %v806_v41 = vpop.f32.mrf.mxu3 }
 0x19a   :  { %v922_v38 = vpop.f32.mrf.mxu0 }
 0x19b   :  { %v979_v45 = vmax.f32 %v920_v40, 0.0 }
 0x19c   :  { %v684_v11 = vpop.f32.mrf.mxu2 }
 0x19d   :  { %1013 = vst.msk [vmem:[%s2173_s3 + $0xa8] sm:$0xff] %vm260_vm0, %v979_v45  ;;  %v685_v49 = vadd.f32 %v684_v11, %v566_v44  ;;  %v465_v44 = vadd.f32 %v1743_v28, %v1597_v26 }
 0x19e   :  { %v568_v51 = vpop.f32.mrf.mxu1 }
 0x19f   :  { %v804_v7 = vadd.f32 %v803_v36, %v685_v49  ;;  %v569_v57 = vadd.f32 %v568_v51, %v450_v48 }
 0x1a1   :  { %v923_v52 = vadd.f32 %v922_v38, %v804_v7  ;;  %v809_v53 = vpop.f32.mrf.mxu3 }
 0x1a2   :  { %v925_v46 = vpop.f32.mrf.mxu0 }
 0x1a3   :  { %v980_v13 = vmax.f32 %v923_v52, 0.0 }
 0x1a4   :  { %v687_v47 = vpop.f32.mrf.mxu2 }
 0x1a5   :  { %1014 = vst.msk [vmem:[%s2173_s3 + $0xb0] sm:$0xff] %vm260_vm0, %v980_v13  ;;  %v688_v60 = vadd.f32 %v687_v47, %v569_v57 }
 0x1a6   :  { %v571_v23 = vpop.f32.mrf.mxu1 }
 0x1a7   :  { %v807_v61 = vadd.f32 %v806_v41, %v688_v60  ;;  %v572_v1 = vadd.f32 %v571_v23, %v453_v35 }
 0x1a9   :  { %v926_v56 = vadd.f32 %v925_v46, %v807_v61  ;;  %v812_v0 = vpop.f32.mrf.mxu3  ;;  %v468_v46 = vadd.f32 %v1743_v28, %v1618_v34 }
 0x1aa   :  { %v928_v54 = vpop.f32.mrf.mxu0 }
 0x1ab   :  { %v981_v4 = vmax.f32 %v926_v56, 0.0 }
 0x1ac   :  { %v690_v14 = vpop.f32.mrf.mxu2 }
 0x1ad   :  { %1015 = vst.msk [vmem:[%s2173_s3 + $0xb8] sm:$0xff] %vm260_vm0, %v981_v4  ;;  %v691_v19 = vadd.f32 %v690_v14, %v572_v1 }
 0x1ae   :  { %v574_v5 = vpop.f32.mrf.mxu1 }
 0x1af   :  { %v810_v59 = vadd.f32 %v809_v53, %v691_v19  ;;  %v575_v12 = vadd.f32 %v574_v5, %v456_v9 }
 0x1b1   :  { %v929_v10 = vadd.f32 %v928_v54, %v810_v59  ;;  %v815_v55 = vpop.f32.mrf.mxu3 }
 0x1b2   :  { %v931_v62 = vpop.f32.mrf.mxu0 }
 0x1b3   :  { %v982_v8 = vmax.f32 %v929_v10, 0.0  ;;  %v474_v10 = vadd.f32 %v1743_v28, %v1660_v50 }
 0x1b4   :  { %v693_v31 = vpop.f32.mrf.mxu2 }
 0x1b5   :  { %1016 = vst.msk [vmem:[%s2173_s3 + $0xc0] sm:$0xff] %vm260_vm0, %v982_v8  ;;  %v694_v22 = vadd.f32 %v693_v31, %v575_v12 }
 0x1b6   :  { %v577_v16 = vpop.f32.mrf.mxu1 }
 0x1b7   :  { %v813_v17 = vadd.f32 %v812_v0, %v694_v22  ;;  %v578_v21 = vadd.f32 %v577_v16, %v459_v24  ;;  %v471_v0 = vadd.f32 %v1743_v28, %v1639_v42 }
 0x1b9   :  { %v932_v25 = vadd.f32 %v931_v62, %v813_v17  ;;  %v818_v43 = vpop.f32.mrf.mxu3  ;;  %v477_v17 = vadd.f32 %v1743_v28, %v1681_v58 }
 0x1ba   :  { %v934_v6 = vpop.f32.mrf.mxu0 }
 0x1bb   :  { %v983_v29 = vmax.f32 %v932_v25, 0.0 }
 0x1bc   :  { %v696_v33 = vpop.f32.mrf.mxu2 }
 0x1bd   :  { %1017 = vst.msk [vmem:[%s2173_s3 + $0xc8] sm:$0xff] %vm260_vm0, %v983_v29  ;;  %v697_v36 = vadd.f32 %v696_v33, %v578_v21 }
 0x1be   :  { %v580_v30 = vpop.f32.mrf.mxu1 }
 0x1bf   :  { %v816_v37 = vadd.f32 %v815_v55, %v697_v36  ;;  %v581_v32 = vadd.f32 %v580_v30, %v462_v63  ;;  %v480_v30 = vadd.f32 %v1743_v28, %v1702_v2 }
 0x1c1   :  { %v935_v3 = vadd.f32 %v934_v6, %v816_v37  ;;  %v821_v20 = vpop.f32.mrf.mxu3 }
 0x1c2   :  { %v937_v27 = vpop.f32.mrf.mxu0 }
 0x1c3   :  { %v984_v39 = vmax.f32 %v935_v3, 0.0 }
 0x1c4   :  { %v699_v15 = vpop.f32.mrf.mxu2 }
 0x1c5   :  { %1018 = vst.msk [vmem:[%s2173_s3 + $0xd0] sm:$0xff] %vm260_vm0, %v984_v39  ;;  %v700_v40 = vadd.f32 %v699_v15, %v581_v32 }
 0x1c6   :  { %v583_v41 = vpop.f32.mrf.mxu1 }
 0x1c7   :  { %v819_v38 = vadd.f32 %v818_v43, %v700_v40  ;;  %v584_v18 = vadd.f32 %v583_v41, %v465_v44 }
 0x1c9   :  { %v938_v45 = vadd.f32 %v937_v27, %v819_v38  ;;  %v824_v7 = vpop.f32.mrf.mxu3 }
 0x1ca   :  { %v940_v11 = vpop.f32.mrf.mxu0 }
 0x1cb   :  { %v985_v49 = vmax.f32 %v938_v45, 0.0 }
 0x1cc   :  { %v702_v51 = vpop.f32.mrf.mxu2 }
 0x1cd   :  { %1019 = vst.msk [vmem:[%s2173_s3 + $0xd8] sm:$0xff] %vm260_vm0, %v985_v49  ;;  %v703_v48 = vadd.f32 %v702_v51, %v584_v18 }
 0x1ce   :  { %v586_v52 = vpop.f32.mrf.mxu1 }
 0x1cf   :  { %v822_v53 = vadd.f32 %v821_v20, %v703_v48  ;;  %v587_v26 = vadd.f32 %v586_v52, %v468_v46 }
 0x1d1   :  { %v941_v57 = vadd.f32 %v940_v11, %v822_v53  ;;  %v827_v35 = vpop.f32.mrf.mxu3 }
 0x1d2   :  { %v943_v13 = vpop.f32.mrf.mxu0 }
 0x1d3   :  { %v986_v47 = vmax.f32 %v941_v57, 0.0 }
 0x1d4   :  { %v705_v60 = vpop.f32.mrf.mxu2 }
 0x1d5   :  { %1020 = vst.msk [vmem:[%s2173_s3 + $0xe0] sm:$0xff] %vm260_vm0, %v986_v47  ;;  %v706_v23 = vadd.f32 %v705_v60, %v587_v26 }
 0x1d6   :  { %v589_v61 = vpop.f32.mrf.mxu1 }
 0x1d7   :  { %v825_v56 = vadd.f32 %v824_v7, %v706_v23  ;;  %v590_v34 = vadd.f32 %v589_v61, %v471_v0 }
 0x1d9   :  { %v944_v54 = vadd.f32 %v943_v13, %v825_v56  ;;  %v830_v9 = vpop.f32.mrf.mxu3 }
 0x1da   :  { %v946_v1 = vpop.f32.mrf.mxu0 }
 0x1db   :  { %v987_v4 = vmax.f32 %v944_v54, 0.0 }
 0x1dc   :  { %v708_v14 = vpop.f32.mrf.mxu2 }
 0x1dd   :  { %1021 = vst.msk [vmem:[%s2173_s3 + $0xe8] sm:$0xff] %vm260_vm0, %v987_v4  ;;  %v709_v19 = vadd.f32 %v708_v14, %v590_v34 }
 0x1de   :  { %v592_v5 = vpop.f32.mrf.mxu1 }
 0x1df   :  { %v828_v59 = vadd.f32 %v827_v35, %v709_v19  ;;  %v593_v42 = vadd.f32 %v592_v5, %v474_v10 }
 0x1e1   :  { %v947_v55 = vadd.f32 %v946_v1, %v828_v59  ;;  %v833_v25 = vpop.f32.mrf.mxu3 }
 0x1e2   :  { %v949_v62 = vpop.f32.mrf.mxu0 }
 0x1e3   :  { %v988_v12 = vmax.f32 %v947_v55, 0.0 }
 0x1e4   :  { %v711_v8 = vpop.f32.mrf.mxu2 }
 0x1e5   :  { %1022 = vst.msk [vmem:[%s2173_s3 + $0xf0] sm:$0xff] %vm260_vm0, %v988_v12  ;;  %v712_v31 = vadd.f32 %v711_v8, %v593_v42 }
 0x1e6   :  { %v595_v22 = vpop.f32.mrf.mxu1 }
 0x1e7   :  { %v831_v16 = vadd.f32 %v830_v9, %v712_v31  ;;  %v596_v43 = vadd.f32 %v595_v22, %v477_v17 }
 0x1e9   :  { %v950_v24 = vadd.f32 %v949_v62, %v831_v16  ;;  %v836_v27 = vpop.f32.mrf.mxu3 }
 0x1ea   :  { %v952_v21 = vpop.f32.mrf.mxu0 }
 0x1eb   :  { %v989_v50 = vmax.f32 %v950_v24, 0.0 }
 0x1ec   :  { %v714_v6 = vpop.f32.mrf.mxu2 }
 0x1ed   :  { %1023 = vst.msk [vmem:[%s2173_s3 + $0xf8] sm:$0xff] %vm260_vm0, %v989_v50  ;;  %v715_v29 = vadd.f32 %v714_v6, %v596_v43 }
 0x1ee   :  { %v598_v36 = vpop.f32.mrf.mxu1 }
 0x1ef   :  { %v834_v33 = vadd.f32 %v833_v25, %v715_v29  ;;  %v599_v63 = vadd.f32 %v598_v36, %v480_v30 }
 0x1f1   :  { %v953_v37 = vadd.f32 %v952_v21, %v834_v33 }
 0x1f2   :  { %v955_v32 = vpop.f32.mrf.mxu0 }
 0x1f3   :  { %v990_v58 = vmax.f32 %v953_v37, 0.0 }
 0x1f4   :  { %v717_v3 = vpop.f32.mrf.mxu2 }
 0x1f5   :  { %1024 = vst.msk [vmem:[%s2173_s3 + $0x100] sm:$0xff] %vm260_vm0, %v990_v58  ;;  %v718_v20 = vadd.f32 %v717_v3, %v599_v63 }
 0x1f7   :  { %v837_v39 = vadd.f32 %v836_v27, %v718_v20 }
 0x1f9   :  { %v956_v15 = vadd.f32 %v955_v32, %v837_v39 }
 0x1fb   :  { %v991_v40 = vmax.f32 %v956_v15, 0.0 }
 0x1fd   :  { %1026 = vst.msk [vmem:[%s2173_s3 + $0x108] sm:$0x3f] %vm1025_vm1, %v991_v40 }

// kernel: box_model_forward.7
= control target key start
LH: loop header
LB: loop body
LE: loop exit
PB: predicated region body
PF: predicated region fallthrough
CT: control target
= control target key end

     0   :  { %s7435_s18 = smov 0   ;;  %s8957_s0 = inlined_call_operand.vmem [shape: f32[8,8704], index: 0, kind: input, shape index: {}]   ;;  %s8958_s1 = inlined_call_operand.vmem [shape: bf16[8704,512], index: 1, kind: input, shape index: {}]   ;;  %s8959_s2 = inlined_call_operand.vmem [shape: f32[1,512], index: 2, kind: input, shape index: {}]   ;;  %s8960_s3 = inlined_call_operand.vmem [shape: f32[512,128], index: 3, kind: input, shape index: {}]   ;;  %s8961_s4 = inlined_call_operand.vmem [shape: f32[1,128], index: 4, kind: input, shape index: {}]   ;;  %s8962_s5 = inlined_call_operand.vmem [shape: f32[8,128], index: 5, kind: output, shape index: {}]  }
   0x1 LB: > { %s7441_s19 = sadd.s32 4294967295, %s7402_s18   ;;  %p4657_p0 = scmp.ge.s32.totalorder %s7402_s18, 1  ;;  %s7402_s18 = sphi %s7435_s18, %s15_s18  }
   0x2   : > { %p195_p1 = scmp.lt.s32.totalorder %s7402_s18, 5 }
   0x4   : > { %p196_p2 = pnand %p4657_p0, %p195_p1 }
   0x5   : > { %s224_s20 = smul.u32 (!%p196_p2), 17, %s7441_s19  ;;  %p4661_p5 = scmp.ne.s32.totalorder (!%p196_p2), %s7441_s19, 0 }
   0x6   : > { %199 = sbr.rel (%p196_p2) target bundleno = 886 (0x376), region = 40 }
   0x7   : > { %s230_s21 = smul.u32 (!%p196_p2), 272, %s7441_s19  ;;  %p225_p3 = scmp.lt.s32.totalorder (!%p196_p2), %s224_s20, 67 }
   0x9   : > { %p231_p4 = scmp.lt.s32.totalorder (!%p196_p2), %s230_s21, 1087 }
   0xb   : > { %s8964_s20 = smov (!%p225_p3, %s224_s20), 67  ;;  %s8966_s21 = smov (!%p231_p4, %s230_s21), 1087 }
   0xc   : > { %s4658_s22 = sshll.u32 %s8964_s20, 3  ;;  %s6841_s26 = sshll.u32 %s8966_s21, 4 }
   0xd   : > { %s7450_s25 = scalar_lea.vmem %s8957_s0, %s4658_s22  ;;  %s7455_s29 = scalar_lea.vmem %s8958_s1, %s6841_s26 }
   0xe   : > { %240 = sbr.rel (%p4661_p5) target bundleno = 24 (0x18), region = 44 }
  0x13   : > { %v7404_v0 = vmov 0.0  }
  0x14   : > { %241 = vst [vmem:[#allocation2 + $0x10] sm:$0xff] %v7404_v0 }
  0x15   : > { %242 = vst [vmem:[#allocation2] sm:$0xff] %v7404_v0 }
  0x16   : > { %243 = vst [vmem:[#allocation2 + $0x18] sm:$0xff] %v7404_v0 }
  0x17   : > { %244 = vst [vmem:[#allocation2 + $0x8] sm:$0xff] %v7404_v0 }
  0x18 PF: > { %v4776_v1 = vld [vmem:[%s7455_s29 + $0xe0] sm:$0xf]  ;;  %v6872_v2 = vld [vmem:[%s7455_s29 + $0xec] sm:$0xf0]  ;;  %p6838_p6 = scmp.ne.s32.totalorder %s7441_s19, 3 }
  0x19   : > { %v4904_v3 = vld [vmem:[%s7455_s29 + $0x1e0] sm:$0xf]  ;;  %v4777_v4 = vor.u32 %v6872_v2, %v4776_v1  ;;  %v6904_v5 = vld [vmem:[%s7455_s29 + $0x1ec] sm:$0xf0] }
  0x1a   : > { %v5032_v6 = vld [vmem:[%s7455_s29 + $0x2e0] sm:$0xf]  ;;  %v6936_v7 = vld [vmem:[%s7455_s29 + $0x2ec] sm:$0xf0]  ;;  %v4905_v8 = vor.u32 %v6904_v5, %v4904_v3 }
  0x1b   : > { %v5033_v9 = vor.u32 %v6936_v7, %v5032_v6  ;;  %v5160_v10 = vld [vmem:[%s7455_s29 + $0x3e0] sm:$0xf]  ;;  %v6968_v11 = vld [vmem:[%s7455_s29 + $0x3ec] sm:$0xf0]  ;;  %3547 = vmatpush.bf16.msra.mxu0 %v4777_v4 }
  0x1c   : > { %v4760_v12 = vld [vmem:[%s7455_s29 + $0xc0] sm:$0xf]  ;;  %v5161_v13 = vor.u32 %v6968_v11, %v5160_v10  ;;  %v6868_v14 = vld [vmem:[%s7455_s29 + $0xcc] sm:$0xf0]  ;;  %3560 = vmatpush.bf16.msra.mxu1 %v4905_v8 }
  0x1d   : > { %v4888_v15 = vld [vmem:[%s7455_s29 + $0x1c0] sm:$0xf]  ;;  %v6900_v16 = vld [vmem:[%s7455_s29 + $0x1cc] sm:$0xf0]  ;;  %3573 = vmatpush.bf16.msra.mxu2 %v5033_v9  ;;  %v4761_v17 = vor.u32 %v6868_v14, %v4760_v12 }
  0x1e   : > { %v4889_v18 = vor.u32 %v6900_v16, %v4888_v15  ;;  %v5016_v19 = vld [vmem:[%s7455_s29 + $0x2c0] sm:$0xf]  ;;  %v6932_v20 = vld [vmem:[%s7455_s29 + $0x2cc] sm:$0xf0]  ;;  %3586 = vmatpush.bf16.msra.mxu3 %v5161_v13 }
  0x1f   : > { %v5144_v21 = vld [vmem:[%s7455_s29 + $0x3c0] sm:$0xf]  ;;  %v5017_v22 = vor.u32 %v6932_v20, %v5016_v19  ;;  %v6964_v23 = vld [vmem:[%s7455_s29 + $0x3cc] sm:$0xf0]  ;;  %3548 = vmatpush.bf16.msra.mxu0 %v4761_v17 }
  0x20   : > { %v4744_v24 = vld [vmem:[%s7455_s29 + $0xa0] sm:$0xf]  ;;  %v6864_v25 = vld [vmem:[%s7455_s29 + $0xac] sm:$0xf0]  ;;  %v5145_v26 = vor.u32 %v6964_v23, %v5144_v21  ;;  %3561 = vmatpush.bf16.msra.mxu1 %v4889_v18 }
  0x21   : > { %v4872_v27 = vld [vmem:[%s7455_s29 + $0x1a0] sm:$0xf]  ;;  %v6896_v28 = vld [vmem:[%s7455_s29 + $0x1ac] sm:$0xf0]  ;;  %v4745_v30 = vor.u32 %v6864_v25, %v4744_v24  ;;  %3574 = vmatpush.bf16.msra.mxu2 %v5017_v22 }
  0x22   : > { %v5000_v29 = vld [vmem:[%s7455_s29 + $0x2a0] sm:$0xf]  ;;  %v6928_v31 = vld [vmem:[%s7455_s29 + $0x2ac] sm:$0xf0]  ;;  %v4873_v34 = vor.u32 %v6896_v28, %v4872_v27  ;;  %3587 = vmatpush.bf16.msra.mxu3 %v5145_v26 }
  0x23   : > { %v5128_v32 = vld [vmem:[%s7455_s29 + $0x3a0] sm:$0xf]  ;;  %v6960_v33 = vld [vmem:[%s7455_s29 + $0x3ac] sm:$0xf0]  ;;  %v5001_v35 = vor.u32 %v6928_v31, %v5000_v29  ;;  %3549 = vmatpush.bf16.msra.mxu0 %v4745_v30 }
  0x24   : > { %v4728_v36 = vld [vmem:[%s7455_s29 + $0x80] sm:$0xf]  ;;  %v6860_v37 = vld [vmem:[%s7455_s29 + $0x8c] sm:$0xf0]  ;;  %v5129_v39 = vor.u32 %v6960_v33, %v5128_v32  ;;  %3562 = vmatpush.bf16.msra.mxu1 %v4873_v34 }
  0x25   : > { %v4856_v38 = vld [vmem:[%s7455_s29 + $0x180] sm:$0xf]  ;;  %v6892_v40 = vld [vmem:[%s7455_s29 + $0x18c] sm:$0xf0]  ;;  %v4729_v45 = vor.u32 %v6860_v37, %v4728_v36  ;;  %3575 = vmatpush.bf16.msra.mxu2 %v5001_v35 }
  0x26   : > { %v4984_v41 = vld [vmem:[%s7455_s29 + $0x280] sm:$0xf]  ;;  %v6924_v42 = vld [vmem:[%s7455_s29 + $0x28c] sm:$0xf0]  ;;  %v4857_v46 = vor.u32 %v6892_v40, %v4856_v38  ;;  %3588 = vmatpush.bf16.msra.mxu3 %v5129_v39 }
  0x27   : > { %v5112_v43 = vld [vmem:[%s7455_s29 + $0x380] sm:$0xf]  ;;  %v6956_v44 = vld [vmem:[%s7455_s29 + $0x38c] sm:$0xf0]  ;;  %v4985_v47 = vor.u32 %v6924_v42, %v4984_v41  ;;  %3550 = vmatpush.bf16.msra.mxu0 %v4729_v45 }
  0x28   : > { %v4712_v48 = vld [vmem:[%s7455_s29 + $0x60] sm:$0xf]  ;;  %v6856_v49 = vld [vmem:[%s7455_s29 + $0x6c] sm:$0xf0]  ;;  %v5113_v51 = vor.u32 %v6956_v44, %v5112_v43  ;;  %3563 = vmatpush.bf16.msra.mxu1 %v4857_v46 }
  0x29   : > { %v4840_v50 = vld [vmem:[%s7455_s29 + $0x160] sm:$0xf]  ;;  %v6888_v52 = vld [vmem:[%s7455_s29 + $0x16c] sm:$0xf0]  ;;  %v4713_v57 = vor.u32 %v6856_v49, %v4712_v48  ;;  %3576 = vmatpush.bf16.msra.mxu2 %v4985_v47 }
  0x2a   : > { %v4968_v53 = vld [vmem:[%s7455_s29 + $0x260] sm:$0xf]  ;;  %v6920_v54 = vld [vmem:[%s7455_s29 + $0x26c] sm:$0xf0]  ;;  %v4841_v58 = vor.u32 %v6888_v52, %v4840_v50  ;;  %3589 = vmatpush.bf16.msra.mxu3 %v5113_v51 }
  0x2b   : > { %v5096_v55 = vld [vmem:[%s7455_s29 + $0x360] sm:$0xf]  ;;  %v6952_v56 = vld [vmem:[%s7455_s29 + $0x36c] sm:$0xf0]  ;;  %v4969_v59 = vor.u32 %v6920_v54, %v4968_v53  ;;  %3551 = vmatpush.bf16.msra.mxu0 %v4713_v57 }
  0x2c   : > { %v4696_v60 = vld [vmem:[%s7455_s29 + $0x40] sm:$0xf]  ;;  %v6852_v61 = vld [vmem:[%s7455_s29 + $0x4c] sm:$0xf0]  ;;  %v5097_v63 = vor.u32 %v6952_v56, %v5096_v55  ;;  %3564 = vmatpush.bf16.msra.mxu1 %v4841_v58 }
  0x2d   : > { %v4824_v62 = vld [vmem:[%s7455_s29 + $0x140] sm:$0xf]  ;;  %v6884_v0 = vld [vmem:[%s7455_s29 + $0x14c] sm:$0xf0]  ;;  %v4697_v5 = vor.u32 %v6852_v61, %v4696_v60  ;;  %3577 = vmatpush.bf16.msra.mxu2 %v4969_v59 }
  0x2e   : > { %v4952_v1 = vld [vmem:[%s7455_s29 + $0x240] sm:$0xf]  ;;  %v6916_v2 = vld [vmem:[%s7455_s29 + $0x24c] sm:$0xf0]  ;;  %v4825_v6 = vor.u32 %v6884_v0, %v4824_v62  ;;  %3590 = vmatpush.bf16.msra.mxu3 %v5097_v63 }
  0x2f   : > { %v5080_v3 = vld [vmem:[%s7455_s29 + $0x340] sm:$0xf]  ;;  %v6948_v4 = vld [vmem:[%s7455_s29 + $0x34c] sm:$0xf0]  ;;  %v4953_v7 = vor.u32 %v6916_v2, %v4952_v1  ;;  %3552 = vmatpush.bf16.msra.mxu0 %v4697_v5 }
  0x30   : > { %v4680_v8 = vld [vmem:[%s7455_s29 + $0x20] sm:$0xf]  ;;  %v6848_v9 = vld [vmem:[%s7455_s29 + $0x2c] sm:$0xf0]  ;;  %v5081_v11 = vor.u32 %v6948_v4, %v5080_v3  ;;  %3565 = vmatpush.bf16.msra.mxu1 %v4825_v6 }
  0x31   : > { %v4808_v10 = vld [vmem:[%s7455_s29 + $0x120] sm:$0xf]  ;;  %v6880_v12 = vld [vmem:[%s7455_s29 + $0x12c] sm:$0xf0]  ;;  %v4681_v17 = vor.u32 %v6848_v9, %v4680_v8  ;;  %3578 = vmatpush.bf16.msra.mxu2 %v4953_v7 }
  0x32   : > { %v4936_v13 = vld [vmem:[%s7455_s29 + $0x220] sm:$0xf]  ;;  %v6912_v14 = vld [vmem:[%s7455_s29 + $0x22c] sm:$0xf0]  ;;  %v4809_v20 = vor.u32 %v6880_v12, %v4808_v10  ;;  %3591 = vmatpush.bf16.msra.mxu3 %v5081_v11  ;;  %v252_v11 = vld [vmem:[%s7450_s25 + $0x18] sm:$0xff] }
  0x33   : > { %v5064_v15 = vld [vmem:[%s7455_s29 + $0x320] sm:$0xf]  ;;  %v6944_v16 = vld [vmem:[%s7455_s29 + $0x32c] sm:$0xf0]  ;;  %v4937_v21 = vor.u32 %v6912_v14, %v4936_v13  ;;  %3553 = vmatpush.bf16.msra.mxu0 %v4681_v17  ;;  %v250_v12 = vld [vmem:[%s7450_s25 + $0x8] sm:$0xff]  ;;  %v7561_v17 = vpack.c.bf16 %v252_v11, %v252_v11 }
  0x34   : > { %v4664_v18 = vld [vmem:[%s7455_s29] sm:$0xf]  ;;  %v6844_v19 = vld [vmem:[%s7455_s29 + $0xc] sm:$0xf0]  ;;  %v5065_v25 = vor.u32 %v6944_v16, %v5064_v15  ;;  %3566 = vmatpush.bf16.msra.mxu1 %v4809_v20 }
  0x35   : > { %v4792_v22 = vld [vmem:[%s7455_s29 + $0x100] sm:$0xf]  ;;  %v6876_v23 = vld [vmem:[%s7455_s29 + $0x10c] sm:$0xf0]  ;;  %v4665_v32 = vor.u32 %v6844_v19, %v4664_v18  ;;  %3579 = vmatpush.bf16.msra.mxu2 %v4937_v21  ;;  %v7563_v18 = vpack.c.bf16 %v250_v12, %v250_v12 }
  0x36   : > { %v4920_v24 = vld [vmem:[%s7455_s29 + $0x200] sm:$0xf]  ;;  %v6908_v26 = vld [vmem:[%s7455_s29 + $0x20c] sm:$0xf0]  ;;  %v4793_v36 = vor.u32 %v6876_v23, %v4792_v22  ;;  %3592 = vmatpush.bf16.msra.mxu3 %v5065_v25 }
  0x37   : > { %v5048_v27 = vld [vmem:[%s7455_s29 + $0x300] sm:$0xf]  ;;  %v6940_v28 = vld [vmem:[%s7455_s29 + $0x30c] sm:$0xf0]  ;;  %v4921_v37 = vor.u32 %v6908_v26, %v4920_v24  ;;  %3554 = vmatpush.bf16.msra.mxu0 %v4665_v32 }
  0x38   : > { %v5288_v29 = vld [vmem:[%s7455_s29 + $0x4e0] sm:$0xf]  ;;  %v7000_v30 = vld [vmem:[%s7455_s29 + $0x4ec] sm:$0xf0]  ;;  %v5049_v40 = vor.u32 %v6940_v28, %v5048_v27  ;;  %3567 = vmatpush.bf16.msra.mxu1 %v4793_v36 }
  0x39   : > { %v5416_v31 = vld [vmem:[%s7455_s29 + $0x5e0] sm:$0xf]  ;;  %v7032_v33 = vld [vmem:[%s7455_s29 + $0x5ec] sm:$0xf0]  ;;  %v5289_v41 = vor.u32 %v7000_v30, %v5288_v29  ;;  %3580 = vmatpush.bf16.msra.mxu2 %v4921_v37 }
  0x3a   : > { %v5544_v34 = vld [vmem:[%s7455_s29 + $0x6e0] sm:$0xf]  ;;  %v7064_v35 = vld [vmem:[%s7455_s29 + $0x6ec] sm:$0xf0]  ;;  %v5417_v42 = vor.u32 %v7032_v33, %v5416_v31  ;;  %3593 = vmatpush.bf16.msra.mxu3 %v5049_v40 }
  0x3b   : > { %v5672_v38 = vld [vmem:[%s7455_s29 + $0x7e0] sm:$0xf]  ;;  %v7096_v39 = vld [vmem:[%s7455_s29 + $0x7ec] sm:$0xf0]  ;;  %v5545_v43 = vor.u32 %v7064_v35, %v5544_v34  ;;  %3599 = vmatpush.bf16.msrb.mxu0 %v5289_v41  ;;  %3568 = vmatmul.bf16.vlgmr.msra.gmra.mxu1 %v7563_v18 }
  0x3c   : > { %v5272_v44 = vld [vmem:[%s7455_s29 + $0x4c0] sm:$0xf]  ;;  %v6996_v45 = vld [vmem:[%s7455_s29 + $0x4cc] sm:$0xf0]  ;;  %v5673_v47 = vor.u32 %v7096_v39, %v5672_v38  ;;  %3612 = vmatpush.bf16.msrb.mxu1 %v5417_v42 }
  0x3d   : > { %v5400_v46 = vld [vmem:[%s7455_s29 + $0x5c0] sm:$0xf]  ;;  %v7028_v48 = vld [vmem:[%s7455_s29 + $0x5cc] sm:$0xf0]  ;;  %v5273_v53 = vor.u32 %v6996_v45, %v5272_v44  ;;  %3625 = vmatpush.bf16.msrb.mxu2 %v5545_v43  ;;  %3594 = vmatmul.bf16.vlgmr.msra.gmra.mxu3 %v7561_v17 }
  0x3e   : > { %v5528_v49 = vld [vmem:[%s7455_s29 + $0x6c0] sm:$0xf]  ;;  %v7060_v50 = vld [vmem:[%s7455_s29 + $0x6cc] sm:$0xf0]  ;;  %v5401_v55 = vor.u32 %v7028_v48, %v5400_v46  ;;  %3638 = vmatpush.bf16.msrb.mxu3 %v5673_v47 }
  0x3f   : > { %v5656_v51 = vld [vmem:[%s7455_s29 + $0x7c0] sm:$0xf]  ;;  %v7092_v52 = vld [vmem:[%s7455_s29 + $0x7cc] sm:$0xf0]  ;;  %v5529_v56 = vor.u32 %v7060_v50, %v5528_v49  ;;  %3600 = vmatpush.bf16.msrb.mxu0 %v5273_v53 }
  0x40   : > { %v5256_v54 = vld [vmem:[%s7455_s29 + $0x4a0] sm:$0xf]  ;;  %v6992_v57 = vld [vmem:[%s7455_s29 + $0x4ac] sm:$0xf0]  ;;  %v5657_v60 = vor.u32 %v7092_v52, %v5656_v51  ;;  %3613 = vmatpush.bf16.msrb.mxu1 %v5401_v55 }
  0x41   : > { %v5384_v58 = vld [vmem:[%s7455_s29 + $0x5a0] sm:$0xf]  ;;  %v251_v59 = vld [vmem:[%s7450_s25 + $0x10] sm:$0xff]  ;;  %v5257_v3 = vor.u32 %v6992_v57, %v5256_v54  ;;  %3626 = vmatpush.bf16.msrb.mxu2 %v5529_v56 }
  0x42   : > { %v7024_v61 = vld [vmem:[%s7455_s29 + $0x5ac] sm:$0xf0]  ;;  %v5512_v62 = vld [vmem:[%s7455_s29 + $0x6a0] sm:$0xf]  ;;  %v7545_v0 = vpack.c.bf16 %v251_v59, %v251_v59  ;;  %3639 = vmatpush.bf16.msrb.mxu3 %v5657_v60 }
  0x43   : > { %v7056_v63 = vld [vmem:[%s7455_s29 + $0x6ac] sm:$0xf0]  ;;  %v5640_v1 = vld [vmem:[%s7455_s29 + $0x7a0] sm:$0xf]  ;;  %v5385_v7 = vor.u32 %v7024_v61, %v5384_v58  ;;  %3601 = vmatpush.bf16.msrb.mxu0 %v5257_v3 }
  0x44   : > { %v7088_v2 = vld [vmem:[%s7455_s29 + $0x7ac] sm:$0xf0]  ;;  %v5240_v4 = vld [vmem:[%s7455_s29 + $0x480] sm:$0xf]  ;;  %3581 = vmatmul.bf16.vlgmr.msra.gmra.mxu2 %v7545_v0  ;;  %v5513_v8 = vor.u32 %v7056_v63, %v5512_v62 }
  0x45   : > { %v6988_v5 = vld [vmem:[%s7455_s29 + $0x48c] sm:$0xf0]  ;;  %v249_v6 = vld [vmem:[%s7450_s25] sm:$0xff]  ;;  %v5641_v13 = vor.u32 %v7088_v2, %v5640_v1  ;;  %3614 = vmatpush.bf16.msrb.mxu1 %v5385_v7 }
  0x46   : > { %v5368_v9 = vld [vmem:[%s7455_s29 + $0x580] sm:$0xf]  ;;  %v7554_v10 = vpack.c.bf16 %v249_v6, %v249_v6  ;;  %v7020_v14 = vld [vmem:[%s7455_s29 + $0x58c] sm:$0xf0]  ;;  %v5241_v21 = vor.u32 %v6988_v5, %v5240_v4  ;;  %3627 = vmatpush.bf16.msrb.mxu2 %v5513_v8 }
  0x47   : > { %v5496_v15 = vld [vmem:[%s7455_s29 + $0x680] sm:$0xf]  ;;  %v7052_v16 = vld [vmem:[%s7455_s29 + $0x68c] sm:$0xf0]  ;;  %v5369_v22 = vor.u32 %v7020_v14, %v5368_v9  ;;  %3640 = vmatpush.bf16.msrb.mxu3 %v5641_v13 }
  0x48   : > { %v5624_v19 = vld [vmem:[%s7455_s29 + $0x780] sm:$0xf]  ;;  %v7084_v20 = vld [vmem:[%s7455_s29 + $0x78c] sm:$0xf0]  ;;  %3555 = vmatmul.bf16.vlgmr.msra.gmra.mxu0 %v7554_v10  ;;  %v5497_v23 = vor.u32 %v7052_v16, %v5496_v15 }
  0x49   : > { %v5224_v24 = vld [vmem:[%s7455_s29 + $0x460] sm:$0xf]  ;;  %v6984_v25 = vld [vmem:[%s7455_s29 + $0x46c] sm:$0xf0]  ;;  %v5625_v27 = vor.u32 %v7084_v20, %v5624_v19  ;;  %3602 = vmatpush.bf16.msrb.mxu0 %v5241_v21  ;;  %3615 = vmatpush.bf16.msrb.mxu1 %v5369_v22 }
  0x4a   : > { %v5352_v26 = vld [vmem:[%s7455_s29 + $0x560] sm:$0xf]  ;;  %v7016_v28 = vld [vmem:[%s7455_s29 + $0x56c] sm:$0xf0]  ;;  %v5225_v33 = vor.u32 %v6984_v25, %v5224_v24  ;;  %3628 = vmatpush.bf16.msrb.mxu2 %v5497_v23  ;;  %v256_v25 = vld [vmem:[%s7450_s25 + $0x38] sm:$0xff] }
  0x4b   : > { %v5480_v29 = vld [vmem:[%s7455_s29 + $0x660] sm:$0xf]  ;;  %v7048_v30 = vld [vmem:[%s7455_s29 + $0x66c] sm:$0xf0]  ;;  %v5353_v34 = vor.u32 %v7016_v28, %v5352_v26  ;;  %3641 = vmatpush.bf16.msrb.mxu3 %v5625_v27 }
  0x4c   : > { %v5608_v31 = vld [vmem:[%s7455_s29 + $0x760] sm:$0xf]  ;;  %v7080_v32 = vld [vmem:[%s7455_s29 + $0x76c] sm:$0xf0]  ;;  %v5481_v35 = vor.u32 %v7048_v30, %v5480_v29  ;;  %v254_v30 = vld [vmem:[%s7450_s25 + $0x28] sm:$0xff] }
  0x4d   : > { %v5208_v36 = vld [vmem:[%s7455_s29 + $0x440] sm:$0xf]  ;;  %v6980_v37 = vld [vmem:[%s7455_s29 + $0x44c] sm:$0xf0]  ;;  %v5609_v39 = vor.u32 %v7080_v32, %v5608_v31  ;;  %3603 = vmatpush.bf16.msrb.mxu0 %v5225_v33  ;;  %3616 = vmatpush.bf16.msrb.mxu1 %v5353_v34 }
  0x4e   : > { %v5336_v38 = vld [vmem:[%s7455_s29 + $0x540] sm:$0xf]  ;;  %v7012_v40 = vld [vmem:[%s7455_s29 + $0x54c] sm:$0xf0]  ;;  %v5209_v45 = vor.u32 %v6980_v37, %v5208_v36  ;;  %3629 = vmatpush.bf16.msrb.mxu2 %v5481_v35 }
  0x4f   : > { %v5464_v41 = vld [vmem:[%s7455_s29 + $0x640] sm:$0xf]  ;;  %v7044_v42 = vld [vmem:[%s7455_s29 + $0x64c] sm:$0xf0]  ;;  %v5337_v46 = vor.u32 %v7012_v40, %v5336_v38  ;;  %3642 = vmatpush.bf16.msrb.mxu3 %v5609_v39  ;;  %v7626_v39 = vpack.c.bf16 %v256_v25, %v256_v25 }
  0x50   : > { %v5592_v43 = vld [vmem:[%s7455_s29 + $0x740] sm:$0xf]  ;;  %v7076_v44 = vld [vmem:[%s7455_s29 + $0x74c] sm:$0xf0]  ;;  %v5465_v47 = vor.u32 %v7044_v42, %v5464_v41  ;;  %v7628_v41 = vpack.c.bf16 %v254_v30, %v254_v30 }
  0x51   : > { %v5192_v48 = vld [vmem:[%s7455_s29 + $0x420] sm:$0xf]  ;;  %v6976_v49 = vld [vmem:[%s7455_s29 + $0x42c] sm:$0xf0]  ;;  %v5593_v51 = vor.u32 %v7076_v44, %v5592_v43  ;;  %3604 = vmatpush.bf16.msrb.mxu0 %v5209_v45  ;;  %3617 = vmatpush.bf16.msrb.mxu1 %v5337_v46 }
  0x52   : > { %v5320_v50 = vld [vmem:[%s7455_s29 + $0x520] sm:$0xf]  ;;  %v7008_v52 = vld [vmem:[%s7455_s29 + $0x52c] sm:$0xf0]  ;;  %v5193_v57 = vor.u32 %v6976_v49, %v5192_v48  ;;  %3630 = vmatpush.bf16.msrb.mxu2 %v5465_v47 }
  0x53   : > { %v5448_v53 = vld [vmem:[%s7455_s29 + $0x620] sm:$0xf]  ;;  %v7040_v54 = vld [vmem:[%s7455_s29 + $0x62c] sm:$0xf0]  ;;  %v5321_v60 = vor.u32 %v7008_v52, %v5320_v50  ;;  %3643 = vmatpush.bf16.msrb.mxu3 %v5593_v51 }
  0x54   : > { %v5576_v55 = vld [vmem:[%s7455_s29 + $0x720] sm:$0xf]  ;;  %v7072_v56 = vld [vmem:[%s7455_s29 + $0x72c] sm:$0xf0]  ;;  %v5449_v61 = vor.u32 %v7040_v54, %v5448_v53 }
  0x55   : > { %v5176_v58 = vld [vmem:[%s7455_s29 + $0x400] sm:$0xf]  ;;  %v6972_v59 = vld [vmem:[%s7455_s29 + $0x40c] sm:$0xf0]  ;;  %v5577_v2 = vor.u32 %v7072_v56, %v5576_v55  ;;  %3605 = vmatpush.bf16.msrb.mxu0 %v5193_v57  ;;  %3618 = vmatpush.bf16.msrb.mxu1 %v5321_v60 }
  0x56   : > { %v5304_v62 = vld [vmem:[%s7455_s29 + $0x500] sm:$0xf]  ;;  %v7004_v63 = vld [vmem:[%s7455_s29 + $0x50c] sm:$0xf0]  ;;  %v5177_v9 = vor.u32 %v6972_v59, %v5176_v58  ;;  %3631 = vmatpush.bf16.msrb.mxu2 %v5449_v61 }
  0x57   : > { %v5432_v1 = vld [vmem:[%s7455_s29 + $0x600] sm:$0xf]  ;;  %v7036_v3 = vld [vmem:[%s7455_s29 + $0x60c] sm:$0xf0]  ;;  %v5305_v14 = vor.u32 %v7004_v63, %v5304_v62  ;;  %3644 = vmatpush.bf16.msrb.mxu3 %v5577_v2 }
  0x58   : > { %v5560_v4 = vld [vmem:[%s7455_s29 + $0x700] sm:$0xf]  ;;  %v7068_v5 = vld [vmem:[%s7455_s29 + $0x70c] sm:$0xf0]  ;;  %v5433_v15 = vor.u32 %v7036_v3, %v5432_v1 }
  0x59   : > { %v5800_v6 = vld [vmem:[%s7455_s29 + $0x8e0] sm:$0xf]  ;;  %v7128_v7 = vld [vmem:[%s7455_s29 + $0x8ec] sm:$0xf0]  ;;  %v5561_v21 = vor.u32 %v7068_v5, %v5560_v4  ;;  %3606 = vmatpush.bf16.msrb.mxu0 %v5177_v9  ;;  %3619 = vmatpush.bf16.msrb.mxu1 %v5305_v14 }
  0x5a   : > { %v5928_v8 = vld [vmem:[%s7455_s29 + $0x9e0] sm:$0xf]  ;;  %v7160_v11 = vld [vmem:[%s7455_s29 + $0x9ec] sm:$0xf0]  ;;  %v5801_v22 = vor.u32 %v7128_v7, %v5800_v6  ;;  %3632 = vmatpush.bf16.msrb.mxu2 %v5433_v15 }
  0x5b   : > { %v6056_v12 = vld [vmem:[%s7455_s29 + $0xae0] sm:$0xf]  ;;  %v7192_v13 = vld [vmem:[%s7455_s29 + $0xaec] sm:$0xf0]  ;;  %v5929_v26 = vor.u32 %v7160_v11, %v5928_v8  ;;  %3645 = vmatpush.bf16.msrb.mxu3 %v5561_v21 }
  0x5c   : > { %v6184_v16 = vld [vmem:[%s7455_s29 + $0xbe0] sm:$0xf]  ;;  %v7224_v19 = vld [vmem:[%s7455_s29 + $0xbec] sm:$0xf0]  ;;  %v6057_v27 = vor.u32 %v7192_v13, %v6056_v12  ;;  %3620 = vmatmul.bf16.vlgmr.msrb.gmra.mxu1 %v7628_v41 }
  0x5d   : > { %v255_v20 = vld [vmem:[%s7450_s25 + $0x30] sm:$0xff]  ;;  %v5784_v23 = vld [vmem:[%s7455_s29 + $0x8c0] sm:$0xf]  ;;  %v6185_v31 = vor.u32 %v7224_v19, %v6184_v16  ;;  %3651 = vmatpush.bf16.msra.mxu0 %v5801_v22  ;;  %3664 = vmatpush.bf16.msra.mxu1 %v5929_v26 }
  0x5e   : > { %v253_v24 = vld [vmem:[%s7450_s25 + $0x20] sm:$0xff]  ;;  %v7124_v28 = vld [vmem:[%s7455_s29 + $0x8cc] sm:$0xf0]  ;;  %v7620_v35 = vpack.c.bf16 %v255_v20, %v255_v20  ;;  %3677 = vmatpush.bf16.msra.mxu2 %v6057_v27  ;;  %3646 = vmatmul.bf16.vlgmr.msrb.gmra.mxu3 %v7626_v39 }
  0x5f   : > { %v5912_v29 = vld [vmem:[%s7455_s29 + $0x9c0] sm:$0xf]  ;;  %v7156_v32 = vld [vmem:[%s7455_s29 + $0x9cc] sm:$0xf0]  ;;  %v7624_v38 = vpack.c.bf16 %v253_v24, %v253_v24  ;;  %v5785_v40 = vor.u32 %v7124_v28, %v5784_v23  ;;  %3690 = vmatpush.bf16.msra.mxu3 %v6185_v31 }
  0x60   : > { %v6040_v33 = vld [vmem:[%s7455_s29 + $0xac0] sm:$0xf]  ;;  %v7188_v34 = vld [vmem:[%s7455_s29 + $0xacc] sm:$0xf0]  ;;  %v5913_v42 = vor.u32 %v7156_v32, %v5912_v29  ;;  %3633 = vmatmul.bf16.vlgmr.msrb.gmra.mxu2 %v7620_v35 }
  0x61   : > { %v6168_v36 = vld [vmem:[%s7455_s29 + $0xbc0] sm:$0xf]  ;;  %v7220_v37 = vld [vmem:[%s7455_s29 + $0xbcc] sm:$0xf0]  ;;  %v6041_v43 = vor.u32 %v7188_v34, %v6040_v33  ;;  %3607 = vmatmul.bf16.vlgmr.msrb.gmra.mxu0 %v7624_v38 }
  0x62   : > { %v5768_v44 = vld [vmem:[%s7455_s29 + $0x8a0] sm:$0xf]  ;;  %v7120_v45 = vld [vmem:[%s7455_s29 + $0x8ac] sm:$0xf0]  ;;  %v6169_v47 = vor.u32 %v7220_v37, %v6168_v36  ;;  %3652 = vmatpush.bf16.msra.mxu0 %v5785_v40  ;;  %3665 = vmatpush.bf16.msra.mxu1 %v5913_v42 }
  0x63   : > { %v5896_v46 = vld [vmem:[%s7455_s29 + $0x9a0] sm:$0xf]  ;;  %v7152_v48 = vld [vmem:[%s7455_s29 + $0x9ac] sm:$0xf0]  ;;  %v5769_v53 = vor.u32 %v7120_v45, %v5768_v44  ;;  %3678 = vmatpush.bf16.msra.mxu2 %v6041_v43 }
  0x64   : > { %v6024_v49 = vld [vmem:[%s7455_s29 + $0xaa0] sm:$0xf]  ;;  %v7184_v50 = vld [vmem:[%s7455_s29 + $0xaac] sm:$0xf0]  ;;  %v5897_v54 = vor.u32 %v7152_v48, %v5896_v46  ;;  %3691 = vmatpush.bf16.msra.mxu3 %v6169_v47 }
  0x65   : > { %v6152_v51 = vld [vmem:[%s7455_s29 + $0xba0] sm:$0xf]  ;;  %v7216_v52 = vld [vmem:[%s7455_s29 + $0xbac] sm:$0xf0]  ;;  %v6025_v55 = vor.u32 %v7184_v50, %v6024_v49 }
  0x66   : > { %v5752_v56 = vld [vmem:[%s7455_s29 + $0x880] sm:$0xf]  ;;  %v7116_v57 = vld [vmem:[%s7455_s29 + $0x88c] sm:$0xf0]  ;;  %v6153_v59 = vor.u32 %v7216_v52, %v6152_v51  ;;  %3653 = vmatpush.bf16.msra.mxu0 %v5769_v53  ;;  %3666 = vmatpush.bf16.msra.mxu1 %v5897_v54 }
  0x67   : > { %v5880_v58 = vld [vmem:[%s7455_s29 + $0x980] sm:$0xf]  ;;  %v7148_v60 = vld [vmem:[%s7455_s29 + $0x98c] sm:$0xf0]  ;;  %v5753_v2 = vor.u32 %v7116_v57, %v5752_v56  ;;  %3679 = vmatpush.bf16.msra.mxu2 %v6025_v55 }
  0x68   : > { %v6008_v61 = vld [vmem:[%s7455_s29 + $0xa80] sm:$0xf]  ;;  %v7180_v62 = vld [vmem:[%s7455_s29 + $0xa8c] sm:$0xf0]  ;;  %v5881_v3 = vor.u32 %v7148_v60, %v5880_v58  ;;  %3692 = vmatpush.bf16.msra.mxu3 %v6153_v59 }
  0x69   : > { %v6136_v63 = vld [vmem:[%s7455_s29 + $0xb80] sm:$0xf]  ;;  %v7212_v1 = vld [vmem:[%s7455_s29 + $0xb8c] sm:$0xf0]  ;;  %v6009_v4 = vor.u32 %v7180_v62, %v6008_v61 }
  0x6a   : > { %v5736_v5 = vld [vmem:[%s7455_s29 + $0x860] sm:$0xf]  ;;  %v7112_v6 = vld [vmem:[%s7455_s29 + $0x86c] sm:$0xf0]  ;;  %v6137_v8 = vor.u32 %v7212_v1, %v6136_v63  ;;  %3654 = vmatpush.bf16.msra.mxu0 %v5753_v2  ;;  %3667 = vmatpush.bf16.msra.mxu1 %v5881_v3 }
  0x6b   : > { %v5864_v7 = vld [vmem:[%s7455_s29 + $0x960] sm:$0xf]  ;;  %v7144_v9 = vld [vmem:[%s7455_s29 + $0x96c] sm:$0xf0]  ;;  %v5737_v15 = vor.u32 %v7112_v6, %v5736_v5  ;;  %3680 = vmatpush.bf16.msra.mxu2 %v6009_v4 }
  0x6c   : > { %v5992_v11 = vld [vmem:[%s7455_s29 + $0xa60] sm:$0xf]  ;;  %v7176_v12 = vld [vmem:[%s7455_s29 + $0xa6c] sm:$0xf0]  ;;  %v5865_v16 = vor.u32 %v7144_v9, %v5864_v7  ;;  %3693 = vmatpush.bf16.msra.mxu3 %v6137_v8  ;;  %v258_v9 = vld [vmem:[%s7450_s25 + $0x48] sm:$0xff] }
  0x6d   : > { %v6120_v13 = vld [vmem:[%s7455_s29 + $0xb60] sm:$0xf]  ;;  %v7208_v14 = vld [vmem:[%s7455_s29 + $0xb6c] sm:$0xf0]  ;;  %v5993_v19 = vor.u32 %v7176_v12, %v5992_v11  ;;  %v260_v11 = vld [vmem:[%s7450_s25 + $0x58] sm:$0xff] }
  0x6e   : > { %v5720_v20 = vld [vmem:[%s7455_s29 + $0x840] sm:$0xf]  ;;  %v7108_v21 = vld [vmem:[%s7455_s29 + $0x84c] sm:$0xf0]  ;;  %v6121_v23 = vor.u32 %v7208_v14, %v6120_v13  ;;  %3655 = vmatpush.bf16.msra.mxu0 %v5737_v15  ;;  %3668 = vmatpush.bf16.msra.mxu1 %v5865_v16 }
  0x6f   : > { %v5848_v22 = vld [vmem:[%s7455_s29 + $0x940] sm:$0xf]  ;;  %v7140_v24 = vld [vmem:[%s7455_s29 + $0x94c] sm:$0xf0]  ;;  %v5721_v29 = vor.u32 %v7108_v21, %v5720_v20  ;;  %3681 = vmatpush.bf16.msra.mxu2 %v5993_v19 }
  0x70   : > { %v5976_v25 = vld [vmem:[%s7455_s29 + $0xa40] sm:$0xf]  ;;  %v7172_v26 = vld [vmem:[%s7455_s29 + $0xa4c] sm:$0xf0]  ;;  %v5849_v30 = vor.u32 %v7140_v24, %v5848_v22  ;;  %3694 = vmatpush.bf16.msra.mxu3 %v6121_v23 }
  0x71   : > { %v6104_v27 = vld [vmem:[%s7455_s29 + $0xb40] sm:$0xf]  ;;  %v7204_v28 = vld [vmem:[%s7455_s29 + $0xb4c] sm:$0xf0]  ;;  %v5977_v31 = vor.u32 %v7172_v26, %v5976_v25  ;;  %v7704_v25 = vpack.c.bf16 %v258_v9, %v258_v9 }
  0x72   : > { %v5704_v32 = vld [vmem:[%s7455_s29 + $0x820] sm:$0xf]  ;;  %v7104_v33 = vld [vmem:[%s7455_s29 + $0x82c] sm:$0xf0]  ;;  %v6105_v36 = vor.u32 %v7204_v28, %v6104_v27  ;;  %3656 = vmatpush.bf16.msra.mxu0 %v5721_v29  ;;  %3669 = vmatpush.bf16.msra.mxu1 %v5849_v30  ;;  %v7708_v28 = vpack.c.bf16 %v260_v11, %v260_v11 }
  0x73   : > { %v5832_v34 = vld [vmem:[%s7455_s29 + $0x920] sm:$0xf]  ;;  %v7136_v37 = vld [vmem:[%s7455_s29 + $0x92c] sm:$0xf0]  ;;  %v5705_v45 = vor.u32 %v7104_v33, %v5704_v32  ;;  %3682 = vmatpush.bf16.msra.mxu2 %v5977_v31 }
  0x74   : > { %v5960_v40 = vld [vmem:[%s7455_s29 + $0xa20] sm:$0xf]  ;;  %v7168_v42 = vld [vmem:[%s7455_s29 + $0xa2c] sm:$0xf0]  ;;  %v5833_v48 = vor.u32 %v7136_v37, %v5832_v34  ;;  %3695 = vmatpush.bf16.msra.mxu3 %v6105_v36 }
  0x75   : > { %v6088_v43 = vld [vmem:[%s7455_s29 + $0xb20] sm:$0xf]  ;;  %v7200_v44 = vld [vmem:[%s7455_s29 + $0xb2c] sm:$0xf0]  ;;  %v5961_v49 = vor.u32 %v7168_v42, %v5960_v40 }
  0x76   : > { %v5688_v46 = vld [vmem:[%s7455_s29 + $0x800] sm:$0xf]  ;;  %v7100_v47 = vld [vmem:[%s7455_s29 + $0x80c] sm:$0xf0]  ;;  %v6089_v53 = vor.u32 %v7200_v44, %v6088_v43  ;;  %3657 = vmatpush.bf16.msra.mxu0 %v5705_v45  ;;  %3670 = vmatpush.bf16.msra.mxu1 %v5833_v48 }
  0x77   : > { %v5816_v50 = vld [vmem:[%s7455_s29 + $0x900] sm:$0xf]  ;;  %v7132_v51 = vld [vmem:[%s7455_s29 + $0x90c] sm:$0xf0]  ;;  %v5689_v60 = vor.u32 %v7100_v47, %v5688_v46  ;;  %3683 = vmatpush.bf16.msra.mxu2 %v5961_v49 }
  0x78   : > { %v5944_v52 = vld [vmem:[%s7455_s29 + $0xa00] sm:$0xf]  ;;  %v7164_v54 = vld [vmem:[%s7455_s29 + $0xa0c] sm:$0xf0]  ;;  %v5817_v1 = vor.u32 %v7132_v51, %v5816_v50  ;;  %3696 = vmatpush.bf16.msra.mxu3 %v6089_v53 }
  0x79   : > { %v6072_v55 = vld [vmem:[%s7455_s29 + $0xb00] sm:$0xf]  ;;  %v7196_v56 = vld [vmem:[%s7455_s29 + $0xb0c] sm:$0xf0]  ;;  %v5945_v2 = vor.u32 %v7164_v54, %v5944_v52 }
  0x7a   : > { %v6312_v57 = vld [vmem:[%s7455_s29 + $0xce0] sm:$0xf]  ;;  %v7256_v58 = vld [vmem:[%s7455_s29 + $0xcec] sm:$0xf0]  ;;  %v6073_v6 = vor.u32 %v7196_v56, %v6072_v55  ;;  %3658 = vmatpush.bf16.msra.mxu0 %v5689_v60  ;;  %3671 = vmatpush.bf16.msra.mxu1 %v5817_v1 }
  0x7b   : > { %v6440_v59 = vld [vmem:[%s7455_s29 + $0xde0] sm:$0xf]  ;;  %v7288_v61 = vld [vmem:[%s7455_s29 + $0xdec] sm:$0xf0]  ;;  %v6313_v7 = vor.u32 %v7256_v58, %v6312_v57  ;;  %3684 = vmatpush.bf16.msra.mxu2 %v5945_v2 }
  0x7c   : > { %v6568_v62 = vld [vmem:[%s7455_s29 + $0xee0] sm:$0xf]  ;;  %v7320_v63 = vld [vmem:[%s7455_s29 + $0xeec] sm:$0xf0]  ;;  %v6441_v12 = vor.u32 %v7288_v61, %v6440_v59  ;;  %3697 = vmatpush.bf16.msra.mxu3 %v6073_v6 }
  0x7d   : > { %v6696_v3 = vld [vmem:[%s7455_s29 + $0xfe0] sm:$0xf]  ;;  %v7352_v4 = vld [vmem:[%s7455_s29 + $0xfec] sm:$0xf0]  ;;  %v6569_v13 = vor.u32 %v7320_v63, %v6568_v62  ;;  %3672 = vmatmul.bf16.vlgmr.msra.gmra.mxu1 %v7704_v25 }
  0x7e   : > { %v257_v5 = vld [vmem:[%s7450_s25 + $0x40] sm:$0xff]  ;;  %v259_v8 = vld [vmem:[%s7450_s25 + $0x50] sm:$0xff]  ;;  %v6697_v19 = vor.u32 %v7352_v4, %v6696_v3  ;;  %3703 = vmatpush.bf16.msrb.mxu0 %v6313_v7  ;;  %3716 = vmatpush.bf16.msrb.mxu1 %v6441_v12 }
  0x7f   : > { %v6296_v14 = vld [vmem:[%s7455_s29 + $0xcc0] sm:$0xf]  ;;  %v7252_v15 = vld [vmem:[%s7455_s29 + $0xccc] sm:$0xf0]  ;;  %v7697_v20 = vpack.c.bf16 %v257_v5, %v257_v5  ;;  %v7702_v24 = vpack.c.bf16 %v259_v8, %v259_v8  ;;  %3729 = vmatpush.bf16.msrb.mxu2 %v6569_v13  ;;  %3698 = vmatmul.bf16.vlgmr.msra.gmra.mxu3 %v7708_v28 }
  0x80   : > { %v6424_v16 = vld [vmem:[%s7455_s29 + $0xdc0] sm:$0xf]  ;;  %v7284_v21 = vld [vmem:[%s7455_s29 + $0xdcc] sm:$0xf0]  ;;  %v6297_v29 = vor.u32 %v7252_v15, %v6296_v14  ;;  %3742 = vmatpush.bf16.msrb.mxu3 %v6697_v19 }
  0x81   : > { %v6552_v22 = vld [vmem:[%s7455_s29 + $0xec0] sm:$0xf]  ;;  %v7316_v23 = vld [vmem:[%s7455_s29 + $0xecc] sm:$0xf0]  ;;  %v6425_v30 = vor.u32 %v7284_v21, %v6424_v16  ;;  %3659 = vmatmul.bf16.vlgmr.msra.gmra.mxu0 %v7697_v20  ;;  %3685 = vmatmul.bf16.vlgmr.msra.gmra.mxu2 %v7702_v24 }
  0x82   : > { %v6680_v26 = vld [vmem:[%s7455_s29 + $0xfc0] sm:$0xf]  ;;  %v7348_v27 = vld [vmem:[%s7455_s29 + $0xfcc] sm:$0xf0]  ;;  %v6553_v31 = vor.u32 %v7316_v23, %v6552_v22  ;;  %3704 = vmatpush.bf16.msrb.mxu0 %v6297_v29 }
  0x83   : > { %v6280_v32 = vld [vmem:[%s7455_s29 + $0xca0] sm:$0xf]  ;;  %v7248_v33 = vld [vmem:[%s7455_s29 + $0xcac] sm:$0xf0]  ;;  %v6681_v36 = vor.u32 %v7348_v27, %v6680_v26  ;;  %3717 = vmatpush.bf16.msrb.mxu1 %v6425_v30 }
  0x84   : > { %v6408_v34 = vld [vmem:[%s7455_s29 + $0xda0] sm:$0xf]  ;;  %v7280_v37 = vld [vmem:[%s7455_s29 + $0xdac] sm:$0xf0]  ;;  %v6281_v45 = vor.u32 %v7248_v33, %v6280_v32  ;;  %3730 = vmatpush.bf16.msrb.mxu2 %v6553_v31 }
  0x85   : > { %v6536_v40 = vld [vmem:[%s7455_s29 + $0xea0] sm:$0xf]  ;;  %v7312_v42 = vld [vmem:[%s7455_s29 + $0xeac] sm:$0xf0]  ;;  %v6409_v46 = vor.u32 %v7280_v37, %v6408_v34  ;;  %3743 = vmatpush.bf16.msrb.mxu3 %v6681_v36 }
  0x86   : > { %v6664_v43 = vld [vmem:[%s7455_s29 + $0xfa0] sm:$0xf]  ;;  %v7344_v44 = vld [vmem:[%s7455_s29 + $0xfac] sm:$0xf0]  ;;  %v6537_v47 = vor.u32 %v7312_v42, %v6536_v40  ;;  %3705 = vmatpush.bf16.msrb.mxu0 %v6281_v45 }
  0x87   : > { %v6264_v48 = vld [vmem:[%s7455_s29 + $0xc80] sm:$0xf]  ;;  %v7244_v49 = vld [vmem:[%s7455_s29 + $0xc8c] sm:$0xf0]  ;;  %v6665_v51 = vor.u32 %v7344_v44, %v6664_v43  ;;  %3718 = vmatpush.bf16.msrb.mxu1 %v6409_v46 }
  0x88   : > { %v6392_v50 = vld [vmem:[%s7455_s29 + $0xd80] sm:$0xf]  ;;  %v7276_v52 = vld [vmem:[%s7455_s29 + $0xd8c] sm:$0xf0]  ;;  %v6265_v57 = vor.u32 %v7244_v49, %v6264_v48  ;;  %3731 = vmatpush.bf16.msrb.mxu2 %v6537_v47 }
  0x89   : > { %v6520_v53 = vld [vmem:[%s7455_s29 + $0xe80] sm:$0xf]  ;;  %v7308_v54 = vld [vmem:[%s7455_s29 + $0xe8c] sm:$0xf0]  ;;  %v6393_v58 = vor.u32 %v7276_v52, %v6392_v50  ;;  %3744 = vmatpush.bf16.msrb.mxu3 %v6665_v51 }
  0x8a   : > { %v6648_v55 = vld [vmem:[%s7455_s29 + $0xf80] sm:$0xf]  ;;  %v7340_v56 = vld [vmem:[%s7455_s29 + $0xf8c] sm:$0xf0]  ;;  %v6521_v59 = vor.u32 %v7308_v54, %v6520_v53  ;;  %3706 = vmatpush.bf16.msrb.mxu0 %v6265_v57  ;;  %v4778_v57 = vld [vmem:[%s7455_s29 + $0xf0] sm:$0xf0] }
  0x8b   : > { %v6248_v60 = vld [vmem:[%s7455_s29 + $0xc60] sm:$0xf]  ;;  %v7240_v61 = vld [vmem:[%s7455_s29 + $0xc6c] sm:$0xf0]  ;;  %v6649_v63 = vor.u32 %v7340_v56, %v6648_v55  ;;  %3719 = vmatpush.bf16.msrb.mxu1 %v6393_v58  ;;  %v6870_v55 = vld [vmem:[%s7455_s29 + $0xe4] sm:$0xf] }
  0x8c   : > { %v6376_v62 = vld [vmem:[%s7455_s29 + $0xd60] sm:$0xf]  ;;  %v7272_v1 = vld [vmem:[%s7455_s29 + $0xd6c] sm:$0xf0]  ;;  %v6249_v6 = vor.u32 %v7240_v61, %v6248_v60  ;;  %3732 = vmatpush.bf16.msrb.mxu2 %v6521_v59  ;;  %v6902_v58 = vld [vmem:[%s7455_s29 + $0x1e4] sm:$0xf] }
  0x8d   : > { %v6504_v2 = vld [vmem:[%s7455_s29 + $0xe60] sm:$0xf]  ;;  %v7304_v3 = vld [vmem:[%s7455_s29 + $0xe6c] sm:$0xf0]  ;;  %v6377_v7 = vor.u32 %v7272_v1, %v6376_v62  ;;  %3745 = vmatpush.bf16.msrb.mxu3 %v6649_v63  ;;  %v4906_v59 = vld [vmem:[%s7455_s29 + $0x1f0] sm:$0xf0] }
  0x8e   : > { %v6632_v4 = vld [vmem:[%s7455_s29 + $0xf60] sm:$0xf]  ;;  %v7336_v5 = vld [vmem:[%s7455_s29 + $0xf6c] sm:$0xf0]  ;;  %v6505_v8 = vor.u32 %v7304_v3, %v6504_v2  ;;  %3707 = vmatpush.bf16.msrb.mxu0 %v6249_v6  ;;  %v6934_v62 = vld [vmem:[%s7455_s29 + $0x2e4] sm:$0xf] }
  0x8f   : > { %v6232_v9 = vld [vmem:[%s7455_s29 + $0xc40] sm:$0xf]  ;;  %v7236_v11 = vld [vmem:[%s7455_s29 + $0xc4c] sm:$0xf0]  ;;  %v6633_v13 = vor.u32 %v7336_v5, %v6632_v4  ;;  %3720 = vmatpush.bf16.msrb.mxu1 %v6377_v7  ;;  %v5034_v63 = vld [vmem:[%s7455_s29 + $0x2f0] sm:$0xf0]  ;;  %v4781_v7 = vor.u32 %v6870_v55, %v4778_v57 }
  0x90   : > { %v6360_v12 = vld [vmem:[%s7455_s29 + $0xd40] sm:$0xf]  ;;  %v7268_v14 = vld [vmem:[%s7455_s29 + $0xd4c] sm:$0xf0]  ;;  %v6233_v22 = vor.u32 %v7236_v11, %v6232_v9  ;;  %3733 = vmatpush.bf16.msrb.mxu2 %v6505_v8  ;;  %v262_v5 = vld [vmem:[%s7450_s25 + $0x68] sm:$0xff]  ;;  %v4909_v8 = vor.u32 %v6902_v58, %v4906_v59 }
  0x91   : > { %v6488_v15 = vld [vmem:[%s7455_s29 + $0xe40] sm:$0xf]  ;;  %v7300_v16 = vld [vmem:[%s7455_s29 + $0xe4c] sm:$0xf0]  ;;  %v6361_v23 = vor.u32 %v7268_v14, %v6360_v12  ;;  %3746 = vmatpush.bf16.msrb.mxu3 %v6633_v13  ;;  %v264_v6 = vld [vmem:[%s7450_s25 + $0x78] sm:$0xff]  ;;  %v5037_v13 = vor.u32 %v6934_v62, %v5034_v63 }
  0x92   : > { %v6616_v19 = vld [vmem:[%s7455_s29 + $0xf40] sm:$0xf]  ;;  %v7332_v21 = vld [vmem:[%s7455_s29 + $0xf4c] sm:$0xf0]  ;;  %v6489_v26 = vor.u32 %v7300_v16, %v6488_v15  ;;  %3708 = vmatpush.bf16.msrb.mxu0 %v6233_v22  ;;  %v6866_v12 = vld [vmem:[%s7455_s29 + $0xc4] sm:$0xf]  ;;  %v7784_v22 = vpack.c.bf16 %v262_v5, %v262_v5 }
  0x93   : > { %v6216_v27 = vld [vmem:[%s7455_s29 + $0xc20] sm:$0xf]  ;;  %v7232_v29 = vld [vmem:[%s7455_s29 + $0xc2c] sm:$0xf0]  ;;  %v6617_v31 = vor.u32 %v7332_v21, %v6616_v19  ;;  %3721 = vmatpush.bf16.msrb.mxu1 %v6361_v23  ;;  %v4762_v15 = vld [vmem:[%s7455_s29 + $0xd0] sm:$0xf0] }
  0x94   : > { %v6344_v30 = vld [vmem:[%s7455_s29 + $0xd20] sm:$0xf]  ;;  %v7264_v32 = vld [vmem:[%s7455_s29 + $0xd2c] sm:$0xf0]  ;;  %v6217_v40 = vor.u32 %v7232_v29, %v6216_v27  ;;  %3734 = vmatpush.bf16.msrb.mxu2 %v6489_v26  ;;  %v6898_v16 = vld [vmem:[%s7455_s29 + $0x1c4] sm:$0xf]  ;;  %v7788_v27 = vpack.c.bf16 %v264_v6, %v264_v6 }
  0x95   : > { %v6472_v33 = vld [vmem:[%s7455_s29 + $0xe20] sm:$0xf]  ;;  %v7296_v34 = vld [vmem:[%s7455_s29 + $0xe2c] sm:$0xf0]  ;;  %v6345_v44 = vor.u32 %v7264_v32, %v6344_v30  ;;  %3747 = vmatpush.bf16.msrb.mxu3 %v6617_v31  ;;  %v4890_v19 = vld [vmem:[%s7455_s29 + $0x1d0] sm:$0xf0]  ;;  %v4765_v30 = vor.u32 %v6866_v12, %v4762_v15 }
  0x96   : > { %v6600_v36 = vld [vmem:[%s7455_s29 + $0xf20] sm:$0xf]  ;;  %v7328_v37 = vld [vmem:[%s7455_s29 + $0xf2c] sm:$0xf0]  ;;  %v6473_v45 = vor.u32 %v7296_v34, %v6472_v33  ;;  %3709 = vmatpush.bf16.msrb.mxu0 %v6217_v40  ;;  %v6930_v23 = vld [vmem:[%s7455_s29 + $0x2c4] sm:$0xf]  ;;  %v4893_v31 = vor.u32 %v6898_v16, %v4890_v19 }
  0x97   : > { %v6200_v42 = vld [vmem:[%s7455_s29 + $0xc00] sm:$0xf]  ;;  %v7228_v43 = vld [vmem:[%s7455_s29 + $0xc0c] sm:$0xf0]  ;;  %v6601_v49 = vor.u32 %v7328_v37, %v6600_v36  ;;  %3722 = vmatpush.bf16.msrb.mxu1 %v6345_v44  ;;  %v5018_v26 = vld [vmem:[%s7455_s29 + $0x2d0] sm:$0xf0] }
  0x98   : > { %v6328_v46 = vld [vmem:[%s7455_s29 + $0xd00] sm:$0xf]  ;;  %v7260_v47 = vld [vmem:[%s7455_s29 + $0xd0c] sm:$0xf0]  ;;  %v6201_v56 = vor.u32 %v7228_v43, %v6200_v42  ;;  %3735 = vmatpush.bf16.msrb.mxu2 %v6473_v45  ;;  %v6862_v34 = vld [vmem:[%s7455_s29 + $0xa4] sm:$0xf]  ;;  %v5021_v36 = vor.u32 %v6930_v23, %v5018_v26 }
  0x99   : > { %v6456_v48 = vld [vmem:[%s7455_s29 + $0xe00] sm:$0xf]  ;;  %v7292_v50 = vld [vmem:[%s7455_s29 + $0xe0c] sm:$0xf0]  ;;  %v6329_v60 = vor.u32 %v7260_v47, %v6328_v46  ;;  %3748 = vmatpush.bf16.msrb.mxu3 %v6601_v49  ;;  %v4746_v37 = vld [vmem:[%s7455_s29 + $0xb0] sm:$0xf0] }
  0x9a   : > { %v6584_v51 = vld [vmem:[%s7455_s29 + $0xf00] sm:$0xf]  ;;  %v7324_v52 = vld [vmem:[%s7455_s29 + $0xf0c] sm:$0xf0]  ;;  %v6457_v61 = vor.u32 %v7292_v50, %v6456_v48  ;;  %3710 = vmatpush.bf16.msrb.mxu0 %v6201_v56  ;;  %v6894_v40 = vld [vmem:[%s7455_s29 + $0x1a4] sm:$0xf]  ;;  %v4749_v46 = vor.u32 %v6862_v34, %v4746_v37 }
  0x9b   : > { %v6824_v53 = vld [vmem:[%s7455_s29 + $0x10e0] sm:$0xf]  ;;  %v7384_v54 = vld [vmem:[%s7455_s29 + $0x10ec] sm:$0xf0]  ;;  %v6585_v2 = vor.u32 %v7324_v52, %v6584_v51  ;;  %3723 = vmatpush.bf16.msrb.mxu1 %v6329_v60  ;;  %v4874_v42 = vld [vmem:[%s7455_s29 + $0x1b0] sm:$0xf0] }
  0x9c   : > { %v261_v1 = vld [vmem:[%s7450_s25 + $0x60] sm:$0xff]  ;;  %v6825_v3 = vor.u32 %v7384_v54, %v6824_v53  ;;  %v263_v4 = vld [vmem:[%s7450_s25 + $0x70] sm:$0xff]  ;;  %3736 = vmatpush.bf16.msrb.mxu2 %v6457_v61  ;;  %v4877_v47 = vor.u32 %v6894_v40, %v4874_v42 }
  0x9d   : > { %v6808_v9 = vld [vmem:[%s7455_s29 + $0x10c0] sm:$0xf]  ;;  %v7380_v11 = vld [vmem:[%s7455_s29 + $0x10cc] sm:$0xf0]  ;;  %v7777_v14 = vpack.c.bf16 %v261_v1, %v261_v1  ;;  %v7782_v21 = vpack.c.bf16 %v263_v4, %v263_v4  ;;  %3749 = vmatpush.bf16.msrb.mxu3 %v6585_v2  ;;  %v6926_v43 = vld [vmem:[%s7455_s29 + $0x2a4] sm:$0xf] }
  0x9e   : > { %3755 = vmatpush.bf16.msra.mxu0 %v6825_v3  ;;  %v6809_v29 = vor.u32 %v7380_v11, %v6808_v9  ;;  %v6792_v32 = vld [vmem:[%s7455_s29 + $0x10a0] sm:$0xf]  ;;  %v7376_v33 = vld [vmem:[%s7455_s29 + $0x10ac] sm:$0xf0]  ;;  %3724 = vmatmul.bf16.vlgmr.msrb.gmra.mxu1 %v7784_v22  ;;  %v5002_v44 = vld [vmem:[%s7455_s29 + $0x2b0] sm:$0xf0] }
  0x9f   : > { %3768 = vmatpush.bf16.msra.mxu1 %v4781_v7  ;;  %3711 = vmatmul.bf16.vlgmr.msrb.gmra.mxu0 %v7777_v14  ;;  %v6793_v45 = vor.u32 %v7376_v33, %v6792_v32  ;;  %v6776_v48 = vld [vmem:[%s7455_s29 + $0x1080] sm:$0xf]  ;;  %v7372_v49 = vld [vmem:[%s7455_s29 + $0x108c] sm:$0xf0]  ;;  %v6858_v50 = vld [vmem:[%s7455_s29 + $0x84] sm:$0xf]  ;;  %v5005_v51 = vor.u32 %v6926_v43, %v5002_v44 }
  0xa0   : > { %3781 = vmatpush.bf16.msra.mxu2 %v4909_v8  ;;  %3750 = vmatmul.bf16.vlgmr.msrb.gmra.mxu3 %v7788_v27  ;;  %v4730_v52 = vld [vmem:[%s7455_s29 + $0x90] sm:$0xf0]  ;;  %v6890_v53 = vld [vmem:[%s7455_s29 + $0x184] sm:$0xf]  ;;  %v6777_v57 = vor.u32 %v7372_v49, %v6776_v48  ;;  %v6760_v60 = vld [vmem:[%s7455_s29 + $0x1060] sm:$0xf] }
  0xa1   : > { %3794 = vmatpush.bf16.msra.mxu3 %v5037_v13  ;;  %3737 = vmatmul.bf16.vlgmr.msrb.gmra.mxu2 %v7782_v21  ;;  %v4858_v54 = vld [vmem:[%s7455_s29 + $0x190] sm:$0xf0]  ;;  %v6922_v55 = vld [vmem:[%s7455_s29 + $0x284] sm:$0xf]  ;;  %v4733_v58 = vor.u32 %v6858_v50, %v4730_v52  ;;  %v7368_v61 = vld [vmem:[%s7455_s29 + $0x106c] sm:$0xf0] }
  0xa2   : > { %3756 = vmatpush.bf16.msra.mxu0 %v6809_v29  ;;  %v4986_v56 = vld [vmem:[%s7455_s29 + $0x290] sm:$0xf0]  ;;  %v4861_v59 = vor.u32 %v6890_v53, %v4858_v54  ;;  %v6854_v62 = vld [vmem:[%s7455_s29 + $0x64] sm:$0xf]  ;;  %v6761_v6 = vor.u32 %v7368_v61, %v6760_v60  ;;  %v6744_v9 = vld [vmem:[%s7455_s29 + $0x1040] sm:$0xf] }
  0xa3   : > { %3769 = vmatpush.bf16.msra.mxu1 %v4765_v30  ;;  %v4989_v63 = vor.u32 %v6922_v55, %v4986_v56  ;;  %v4714_v1 = vld [vmem:[%s7455_s29 + $0x70] sm:$0xf0]  ;;  %v6886_v2 = vld [vmem:[%s7455_s29 + $0x164] sm:$0xf]  ;;  %v7364_v11 = vld [vmem:[%s7455_s29 + $0x104c] sm:$0xf0] }
  0xa4   : > { %3782 = vmatpush.bf16.msra.mxu2 %v4893_v31  ;;  %v4842_v3 = vld [vmem:[%s7455_s29 + $0x170] sm:$0xf0]  ;;  %v6918_v4 = vld [vmem:[%s7455_s29 + $0x264] sm:$0xf]  ;;  %v4717_v7 = vor.u32 %v6854_v62, %v4714_v1  ;;  %v6745_v29 = vor.u32 %v7364_v11, %v6744_v9  ;;  %v6728_v32 = vld [vmem:[%s7455_s29 + $0x1020] sm:$0xf] }
  0xa5   : > { %3795 = vmatpush.bf16.msra.mxu3 %v5021_v36  ;;  %v4970_v5 = vld [vmem:[%s7455_s29 + $0x270] sm:$0xf0]  ;;  %v4845_v8 = vor.u32 %v6886_v2, %v4842_v3  ;;  %v6850_v12 = vld [vmem:[%s7455_s29 + $0x44] sm:$0xf]  ;;  %v7360_v33 = vld [vmem:[%s7455_s29 + $0x102c] sm:$0xf0] }
  0xa6   : > { %3757 = vmatpush.bf16.msra.mxu0 %v6793_v45  ;;  %v4973_v13 = vor.u32 %v6918_v4, %v4970_v5  ;;  %v4698_v15 = vld [vmem:[%s7455_s29 + $0x50] sm:$0xf0]  ;;  %v6882_v16 = vld [vmem:[%s7455_s29 + $0x144] sm:$0xf]  ;;  %v6729_v45 = vor.u32 %v7360_v33, %v6728_v32 }
  0xa7   : > { %3770 = vmatpush.bf16.msra.mxu1 %v4749_v46  ;;  %v4826_v19 = vld [vmem:[%s7455_s29 + $0x150] sm:$0xf0]  ;;  %v6914_v23 = vld [vmem:[%s7455_s29 + $0x244] sm:$0xf]  ;;  %v4701_v30 = vor.u32 %v6850_v12, %v4698_v15  ;;  %v6712_v46 = vld [vmem:[%s7455_s29 + $0x1000] sm:$0xf] }
  0xa8   : > { %3783 = vmatpush.bf16.msra.mxu2 %v4877_v47  ;;  %v4954_v26 = vld [vmem:[%s7455_s29 + $0x250] sm:$0xf0]  ;;  %v4829_v31 = vor.u32 %v6882_v16, %v4826_v19  ;;  %v6846_v34 = vld [vmem:[%s7455_s29 + $0x24] sm:$0xf]  ;;  %v7356_v47 = vld [vmem:[%s7455_s29 + $0x100c] sm:$0xf0] }
  0xa9   : > { %3796 = vmatpush.bf16.msra.mxu3 %v5005_v51  ;;  %v4957_v36 = vor.u32 %v6914_v23, %v4954_v26  ;;  %v4682_v37 = vld [vmem:[%s7455_s29 + $0x30] sm:$0xf0]  ;;  %v6878_v40 = vld [vmem:[%s7455_s29 + $0x124] sm:$0xf]  ;;  %v6713_v60 = vor.u32 %v7356_v47, %v6712_v46 }
  0xaa   : > { %3758 = vmatpush.bf16.msra.mxu0 %v6777_v57  ;;  %v4810_v42 = vld [vmem:[%s7455_s29 + $0x130] sm:$0xf0]  ;;  %v6910_v43 = vld [vmem:[%s7455_s29 + $0x224] sm:$0xf]  ;;  %v4685_v48 = vor.u32 %v6846_v34, %v4682_v37 }
  0xab   : > { %3771 = vmatpush.bf16.msra.mxu1 %v4733_v58  ;;  %v4938_v44 = vld [vmem:[%s7455_s29 + $0x230] sm:$0xf0]  ;;  %v4813_v49 = vor.u32 %v6878_v40, %v4810_v42  ;;  %v6842_v50 = vld [vmem:[%s7455_s29 + $0x4] sm:$0xf] }
  0xac   : > { %3784 = vmatpush.bf16.msra.mxu2 %v4861_v59  ;;  %v4666_v51 = vld [vmem:[%s7455_s29 + $0x10] sm:$0xf0]  ;;  %v6874_v52 = vld [vmem:[%s7455_s29 + $0x104] sm:$0xf]  ;;  %v4941_v53 = vor.u32 %v6910_v43, %v4938_v44 }
  0xad   : > { %3797 = vmatpush.bf16.msra.mxu3 %v4989_v63  ;;  %v4794_v54 = vld [vmem:[%s7455_s29 + $0x110] sm:$0xf0]  ;;  %v6906_v55 = vld [vmem:[%s7455_s29 + $0x204] sm:$0xf]  ;;  %v4669_v1 = vor.u32 %v6842_v50, %v4666_v51 }
  0xae   : > { %3759 = vmatpush.bf16.msra.mxu0 %v6761_v6  ;;  %v4922_v56 = vld [vmem:[%s7455_s29 + $0x210] sm:$0xf0]  ;;  %v6966_v57 = vld [vmem:[%s7455_s29 + $0x3e4] sm:$0xf]  ;;  %v4797_v2 = vor.u32 %v6874_v52, %v4794_v54 }
  0xaf   : > { %3772 = vmatpush.bf16.msra.mxu1 %v4717_v7  ;;  %v5162_v58 = vld [vmem:[%s7455_s29 + $0x3f0] sm:$0xf0]  ;;  %v6998_v59 = vld [vmem:[%s7455_s29 + $0x4e4] sm:$0xf]  ;;  %v4925_v6 = vor.u32 %v6906_v55, %v4922_v56 }
  0xb0   : > { %3785 = vmatpush.bf16.msra.mxu2 %v4845_v8  ;;  %v5290_v61 = vld [vmem:[%s7455_s29 + $0x4f0] sm:$0xf0]  ;;  %v7030_v62 = vld [vmem:[%s7455_s29 + $0x5e4] sm:$0xf]  ;;  %v5165_v7 = vor.u32 %v6966_v57, %v5162_v58 }
  0xb1   : > { %3798 = vmatpush.bf16.msra.mxu3 %v4973_v13  ;;  %v5418_v63 = vld [vmem:[%s7455_s29 + $0x5f0] sm:$0xf0]  ;;  %v7062_v3 = vld [vmem:[%s7455_s29 + $0x6e4] sm:$0xf]  ;;  %v5293_v8 = vor.u32 %v6998_v59, %v5290_v61 }
  0xb2   : > { %3760 = vmatpush.bf16.msra.mxu0 %v6745_v29  ;;  %v5546_v4 = vld [vmem:[%s7455_s29 + $0x6f0] sm:$0xf0]  ;;  %v265_v5 = vld [vmem:[%s7450_s25 + $0x80] sm:$0xff]  ;;  %v5421_v9 = vor.u32 %v7030_v62, %v5418_v63 }
  0xb3   : > { %3773 = vmatpush.bf16.msra.mxu1 %v4701_v30  ;;  %v6962_v11 = vld [vmem:[%s7455_s29 + $0x3c4] sm:$0xf]  ;;  %v5146_v12 = vld [vmem:[%s7455_s29 + $0x3d0] sm:$0xf0]  ;;  %v5549_v15 = vor.u32 %v7062_v3, %v5546_v4  ;;  %v7854_v16 = vpack.c.bf16 %v265_v5, %v265_v5 }
  0xb4   : > { %3786 = vmatpush.bf16.msra.mxu2 %v4829_v31  ;;  %v6994_v13 = vld [vmem:[%s7455_s29 + $0x4c4] sm:$0xf]  ;;  %v5274_v19 = vld [vmem:[%s7455_s29 + $0x4d0] sm:$0xf0]  ;;  %v5149_v31 = vor.u32 %v6962_v11, %v5146_v12 }
  0xb5   : > { %3799 = vmatpush.bf16.msra.mxu3 %v4957_v36  ;;  %v7026_v23 = vld [vmem:[%s7455_s29 + $0x5c4] sm:$0xf]  ;;  %v5402_v26 = vld [vmem:[%s7455_s29 + $0x5d0] sm:$0xf0]  ;;  %v5277_v32 = vor.u32 %v6994_v13, %v5274_v19 }
  0xb6   : > { %3761 = vmatpush.bf16.msra.mxu0 %v6729_v45  ;;  %v7058_v29 = vld [vmem:[%s7455_s29 + $0x6c4] sm:$0xf]  ;;  %v5530_v30 = vld [vmem:[%s7455_s29 + $0x6d0] sm:$0xf0]  ;;  %v5405_v33 = vor.u32 %v7026_v23, %v5402_v26 }
  0xb7   : > { %3774 = vmatpush.bf16.msra.mxu1 %v4685_v48  ;;  %v6958_v34 = vld [vmem:[%s7455_s29 + $0x3a4] sm:$0xf]  ;;  %v5130_v36 = vld [vmem:[%s7455_s29 + $0x3b0] sm:$0xf0]  ;;  %v5533_v40 = vor.u32 %v7058_v29, %v5530_v30 }
  0xb8   : > { %3787 = vmatpush.bf16.msra.mxu2 %v4813_v49  ;;  %v6990_v37 = vld [vmem:[%s7455_s29 + $0x4a4] sm:$0xf]  ;;  %v5258_v42 = vld [vmem:[%s7455_s29 + $0x4b0] sm:$0xf0]  ;;  %v5133_v47 = vor.u32 %v6958_v34, %v5130_v36 }
  0xb9   : > { %3800 = vmatpush.bf16.msra.mxu3 %v4941_v53  ;;  %v7022_v43 = vld [vmem:[%s7455_s29 + $0x5a4] sm:$0xf]  ;;  %v5386_v44 = vld [vmem:[%s7455_s29 + $0x5b0] sm:$0xf0]  ;;  %v5261_v48 = vor.u32 %v6990_v37, %v5258_v42 }
  0xba   : > { %3762 = vmatpush.bf16.msra.mxu0 %v6713_v60  ;;  %v7054_v45 = vld [vmem:[%s7455_s29 + $0x6a4] sm:$0xf]  ;;  %v5514_v46 = vld [vmem:[%s7455_s29 + $0x6b0] sm:$0xf0]  ;;  %v5389_v49 = vor.u32 %v7022_v43, %v5386_v44 }
  0xbb   : > { %3775 = vmatpush.bf16.msra.mxu1 %v4669_v1  ;;  %v6954_v50 = vld [vmem:[%s7455_s29 + $0x384] sm:$0xf]  ;;  %v5114_v51 = vld [vmem:[%s7455_s29 + $0x390] sm:$0xf0]  ;;  %v5517_v53 = vor.u32 %v7054_v45, %v5514_v46 }
  0xbc   : > { %3788 = vmatpush.bf16.msra.mxu2 %v4797_v2  ;;  %v6986_v52 = vld [vmem:[%s7455_s29 + $0x484] sm:$0xf]  ;;  %v5242_v54 = vld [vmem:[%s7455_s29 + $0x490] sm:$0xf0]  ;;  %v5117_v59 = vor.u32 %v6954_v50, %v5114_v51 }
  0xbd   : > { %3801 = vmatpush.bf16.msra.mxu3 %v4925_v6  ;;  %3763 = vmatmul.bf16.vlgmr.msra.gmra.mxu0 %v7854_v16  ;;  %v7018_v55 = vld [vmem:[%s7455_s29 + $0x584] sm:$0xf]  ;;  %v5370_v56 = vld [vmem:[%s7455_s29 + $0x590] sm:$0xf0]  ;;  %v5245_v60 = vor.u32 %v6986_v52, %v5242_v54 }
  0xbe   : > { %3807 = vmatpush.bf16.msrb.mxu0 %v5165_v7  ;;  %3776 = vmatmul.bf16.vlgmr.msra.gmra.mxu1 %v7554_v10  ;;  %v7050_v57 = vld [vmem:[%s7455_s29 + $0x684] sm:$0xf]  ;;  %v5498_v58 = vld [vmem:[%s7455_s29 + $0x690] sm:$0xf0]  ;;  %v5373_v61 = vor.u32 %v7018_v55, %v5370_v56 }
  0xbf   : > { %3820 = vmatpush.bf16.msrb.mxu1 %v5293_v8  ;;  %3789 = vmatmul.bf16.vlgmr.msra.gmra.mxu2 %v7563_v18  ;;  %v6950_v62 = vld [vmem:[%s7455_s29 + $0x364] sm:$0xf]  ;;  %v5098_v63 = vld [vmem:[%s7455_s29 + $0x370] sm:$0xf0]  ;;  %v5501_v2 = vor.u32 %v7050_v57, %v5498_v58 }
  0xc0   : > { %3833 = vmatpush.bf16.msrb.mxu2 %v5421_v9  ;;  %3802 = vmatmul.bf16.vlgmr.msra.gmra.mxu3 %v7545_v0  ;;  %v6982_v1 = vld [vmem:[%s7455_s29 + $0x464] sm:$0xf]  ;;  %v5226_v3 = vld [vmem:[%s7455_s29 + $0x470] sm:$0xf0]  ;;  %v5101_v8 = vor.u32 %v6950_v62, %v5098_v63 }
  0xc1   : > { %3846 = vmatpush.bf16.msrb.mxu3 %v5549_v15  ;;  %v7014_v4 = vld [vmem:[%s7455_s29 + $0x564] sm:$0xf]  ;;  %v5354_v5 = vld [vmem:[%s7455_s29 + $0x570] sm:$0xf0]  ;;  %v5229_v11 = vor.u32 %v6982_v1, %v5226_v3 }
  0xc2   : > { %3808 = vmatpush.bf16.msrb.mxu0 %v5149_v31  ;;  %v7046_v6 = vld [vmem:[%s7455_s29 + $0x664] sm:$0xf]  ;;  %v5482_v7 = vld [vmem:[%s7455_s29 + $0x670] sm:$0xf0]  ;;  %v5357_v12 = vor.u32 %v7014_v4, %v5354_v5 }
  0xc3   : > { %3821 = vmatpush.bf16.msrb.mxu1 %v5277_v32  ;;  %v6946_v13 = vld [vmem:[%s7455_s29 + $0x344] sm:$0xf]  ;;  %v5082_v15 = vld [vmem:[%s7455_s29 + $0x350] sm:$0xf0]  ;;  %v5485_v23 = vor.u32 %v7046_v6, %v5482_v7 }
  0xc4   : > { %3834 = vmatpush.bf16.msrb.mxu2 %v5405_v33  ;;  %v6978_v19 = vld [vmem:[%s7455_s29 + $0x444] sm:$0xf]  ;;  %v5210_v26 = vld [vmem:[%s7455_s29 + $0x450] sm:$0xf0]  ;;  %v3569_v33 = vpop.f32.mrf.mxu1  ;;  %v5085_v36 = vor.u32 %v6946_v13, %v5082_v15 }
  0xc5   : > { %3847 = vmatpush.bf16.msrb.mxu3 %v5533_v40  ;;  %v3556_v9 = vpop.f32.mrf.mxu0  ;;  %v7010_v29 = vld [vmem:[%s7455_s29 + $0x544] sm:$0xf]  ;;  %v5338_v30 = vld [vmem:[%s7455_s29 + $0x550] sm:$0xf0]  ;;  %v5213_v40 = vor.u32 %v6978_v19, %v5210_v26 }
  0xc6   : > { %3809 = vmatpush.bf16.msrb.mxu0 %v5133_v47  ;;  %v7042_v31 = vld [vmem:[%s7455_s29 + $0x644] sm:$0xf]  ;;  %v5466_v32 = vld [vmem:[%s7455_s29 + $0x650] sm:$0xf0]  ;;  %v3570_v37 = vadd.f32 %v3569_v33, %v3556_v9  ;;  %v5341_v42 = vor.u32 %v7010_v29, %v5338_v30 }
  0xc7   : > { %3822 = vmatpush.bf16.msrb.mxu1 %v5261_v48  ;;  %v3582_v34 = vpop.f32.mrf.mxu2  ;;  %v6942_v43 = vld [vmem:[%s7455_s29 + $0x324] sm:$0xf]  ;;  %v5066_v44 = vld [vmem:[%s7455_s29 + $0x330] sm:$0xf0]  ;;  %v5469_v46 = vor.u32 %v7042_v31, %v5466_v32 }
  0xc8   : > { %3835 = vmatpush.bf16.msrb.mxu2 %v5389_v49  ;;  %v6974_v45 = vld [vmem:[%s7455_s29 + $0x424] sm:$0xf]  ;;  %v5194_v47 = vld [vmem:[%s7455_s29 + $0x430] sm:$0xf0]  ;;  %v3583_v50 = vadd.f32 %v3582_v34, %v3570_v37  ;;  %v5069_v54 = vor.u32 %v6942_v43, %v5066_v44 }
  0xc9   : > { %3848 = vmatpush.bf16.msrb.mxu3 %v5517_v53  ;;  %v7006_v48 = vld [vmem:[%s7455_s29 + $0x524] sm:$0xf]  ;;  %v5322_v49 = vld [vmem:[%s7455_s29 + $0x530] sm:$0xf0]  ;;  %v3595_v53 = vpop.f32.mrf.mxu3 }
  0xca   : > { %3810 = vmatpush.bf16.msrb.mxu0 %v5117_v59  ;;  %v7038_v51 = vld [vmem:[%s7455_s29 + $0x624] sm:$0xf]  ;;  %v5450_v52 = vld [vmem:[%s7455_s29 + $0x630] sm:$0xf0]  ;;  %v7907_v57 = vadd.f32 %v3595_v53, %v3583_v50  ;;  %v5197_v59 = vor.u32 %v6974_v45, %v5194_v47 }
  0xcb   : > { %3823 = vmatpush.bf16.msrb.mxu1 %v5245_v60  ;;  %v6938_v55 = vld [vmem:[%s7455_s29 + $0x304] sm:$0xf]  ;;  %v5050_v56 = vld [vmem:[%s7455_s29 + $0x310] sm:$0xf0]  ;;  %v5325_v60 = vor.u32 %v7006_v48, %v5322_v49  ;;  %v5453_v1 = vor.u32 %v7038_v51, %v5450_v52 }
  0xcc   : > { %3836 = vmatpush.bf16.msrb.mxu2 %v5373_v61  ;;  %v6970_v61 = vld [vmem:[%s7455_s29 + $0x404] sm:$0xf]  ;;  %v5178_v62 = vld [vmem:[%s7455_s29 + $0x410] sm:$0xf0] }
  0xcd   : > { %3849 = vmatpush.bf16.msrb.mxu3 %v5501_v2  ;;  %v3558_v58 = vpop.f32.mrf.mxu0  ;;  %v7002_v63 = vld [vmem:[%s7455_s29 + $0x504] sm:$0xf]  ;;  %v5306_v2 = vld [vmem:[%s7455_s29 + $0x510] sm:$0xf0]  ;;  %v5181_v19 = vor.u32 %v6970_v61, %v5178_v62 }
  0xce   : > { %3811 = vmatpush.bf16.msrb.mxu0 %v5101_v8  ;;  %v7034_v3 = vld [vmem:[%s7455_s29 + $0x604] sm:$0xf]  ;;  %v5434_v4 = vld [vmem:[%s7455_s29 + $0x610] sm:$0xf0]  ;;  %v3571_v8 = vpop.f32.mrf.mxu1 }
  0xcf   : > { %3824 = vmatpush.bf16.msrb.mxu1 %v5229_v11  ;;  %v7094_v5 = vld [vmem:[%s7455_s29 + $0x7e4] sm:$0xf]  ;;  %v5674_v6 = vld [vmem:[%s7455_s29 + $0x7f0] sm:$0xf0]  ;;  %v3584_v9 = vpop.f32.mrf.mxu2  ;;  %v5053_v11 = vor.u32 %v6938_v55, %v5050_v56  ;;  %v5437_v30 = vor.u32 %v7034_v3, %v5434_v4 }
  0xd0   : > { %3837 = vmatpush.bf16.msrb.mxu2 %v5357_v12  ;;  %v7126_v7 = vld [vmem:[%s7455_s29 + $0x8e4] sm:$0xf]  ;;  %v5802_v12 = vld [vmem:[%s7455_s29 + $0x8f0] sm:$0xf0]  ;;  %v5677_v31 = vor.u32 %v7094_v5, %v5674_v6 }
  0xd1   : > { %3850 = vmatpush.bf16.msrb.mxu3 %v5485_v23  ;;  %v7158_v13 = vld [vmem:[%s7455_s29 + $0x9e4] sm:$0xf]  ;;  %v5930_v15 = vld [vmem:[%s7455_s29 + $0x9f0] sm:$0xf0]  ;;  %v5309_v23 = vor.u32 %v7002_v63, %v5306_v2  ;;  %v5805_v32 = vor.u32 %v7126_v7, %v5802_v12 }
  0xd2   : > { %3812 = vmatpush.bf16.msrb.mxu0 %v5085_v36  ;;  %v7190_v26 = vld [vmem:[%s7455_s29 + $0xae4] sm:$0xf]  ;;  %v6058_v29 = vld [vmem:[%s7455_s29 + $0xaf0] sm:$0xf0]  ;;  %v5933_v33 = vor.u32 %v7158_v13, %v5930_v15 }
  0xd3   : > { %3825 = vmatpush.bf16.msrb.mxu1 %v5213_v40  ;;  %v7090_v34 = vld [vmem:[%s7455_s29 + $0x7c4] sm:$0xf]  ;;  %v5658_v36 = vld [vmem:[%s7455_s29 + $0x7d0] sm:$0xf0]  ;;  %v3597_v40 = vpop.f32.mrf.mxu3 }
  0xd4   : > { %3838 = vmatpush.bf16.msrb.mxu2 %v5341_v42  ;;  %v7122_v37 = vld [vmem:[%s7455_s29 + $0x8c4] sm:$0xf]  ;;  %v6061_v42 = vor.u32 %v7190_v26, %v6058_v29  ;;  %v5786_v43 = vld [vmem:[%s7455_s29 + $0x8d0] sm:$0xf0]  ;;  %v5661_v48 = vor.u32 %v7090_v34, %v5658_v36 }
  0xd5   : > { %3851 = vmatpush.bf16.msrb.mxu3 %v5469_v46  ;;  %v7154_v44 = vld [vmem:[%s7455_s29 + $0x9c4] sm:$0xf]  ;;  %v5914_v45 = vld [vmem:[%s7455_s29 + $0x9d0] sm:$0xf0]  ;;  %v5789_v49 = vor.u32 %v7122_v37, %v5786_v43 }
  0xd6   : > { %3813 = vmatpush.bf16.msrb.mxu0 %v5069_v54  ;;  %v7186_v46 = vld [vmem:[%s7455_s29 + $0xac4] sm:$0xf]  ;;  %v6042_v47 = vld [vmem:[%s7455_s29 + $0xad0] sm:$0xf0]  ;;  %v5917_v50 = vor.u32 %v7154_v44, %v5914_v45 }
  0xd7   : > { %3826 = vmatpush.bf16.msrb.mxu1 %v5197_v59  ;;  %v7086_v51 = vld [vmem:[%s7455_s29 + $0x7a4] sm:$0xf]  ;;  %v5642_v52 = vld [vmem:[%s7455_s29 + $0x7b0] sm:$0xf0]  ;;  %v6045_v54 = vor.u32 %v7186_v46, %v6042_v47 }
  0xd8   : > { %3839 = vmatpush.bf16.msrb.mxu2 %v5325_v60  ;;  %v7118_v53 = vld [vmem:[%s7455_s29 + $0x8a4] sm:$0xf]  ;;  %v5770_v55 = vld [vmem:[%s7455_s29 + $0x8b0] sm:$0xf0]  ;;  %v5645_v61 = vor.u32 %v7086_v51, %v5642_v52 }
  0xd9   : > { %3852 = vmatpush.bf16.msrb.mxu3 %v5453_v1  ;;  %v7150_v56 = vld [vmem:[%s7455_s29 + $0x9a4] sm:$0xf]  ;;  %v5898_v58 = vld [vmem:[%s7455_s29 + $0x9b0] sm:$0xf0]  ;;  %v5773_v62 = vor.u32 %v7118_v53, %v5770_v55 }
  0xda   : > { %3814 = vmatpush.bf16.msrb.mxu0 %v5053_v11  ;;  %v7182_v59 = vld [vmem:[%s7455_s29 + $0xaa4] sm:$0xf]  ;;  %v6026_v60 = vld [vmem:[%s7455_s29 + $0xab0] sm:$0xf0]  ;;  %v5901_v63 = vor.u32 %v7150_v56, %v5898_v58 }
  0xdb   : > { %3827 = vmatpush.bf16.msrb.mxu1 %v5181_v19  ;;  %v7082_v1 = vld [vmem:[%s7455_s29 + $0x784] sm:$0xf]  ;;  %v5626_v2 = vld [vmem:[%s7455_s29 + $0x790] sm:$0xf0]  ;;  %v6029_v4 = vor.u32 %v7182_v59, %v6026_v60 }
  0xdc   : > { %3840 = vmatpush.bf16.msrb.mxu2 %v5309_v23  ;;  %v7114_v3 = vld [vmem:[%s7455_s29 + $0x884] sm:$0xf]  ;;  %v5754_v5 = vld [vmem:[%s7455_s29 + $0x890] sm:$0xf0]  ;;  %v5629_v11 = vor.u32 %v7082_v1, %v5626_v2 }
  0xdd   : > { %3853 = vmatpush.bf16.msrb.mxu3 %v5437_v30  ;;  %3815 = vmatmul.bf16.vlgmr.msrb.gmra.mxu0 %v7561_v17  ;;  %v7146_v6 = vld [vmem:[%s7455_s29 + $0x984] sm:$0xf]  ;;  %v5882_v7 = vld [vmem:[%s7455_s29 + $0x990] sm:$0xf0]  ;;  %v5757_v13 = vor.u32 %v7114_v3, %v5754_v5  ;;  %v3621_v30 = vpop.f32.mrf.mxu1 }
  0xde   : > { %3859 = vmatpush.bf16.msra.mxu0 %v5677_v31  ;;  %3828 = vmatmul.bf16.vlgmr.msrb.gmra.mxu1 %v7624_v38  ;;  %v7178_v8 = vld [vmem:[%s7455_s29 + $0xa84] sm:$0xf]  ;;  %v6010_v9 = vld [vmem:[%s7455_s29 + $0xa90] sm:$0xf0]  ;;  %v3608_v12 = vpop.f32.mrf.mxu0  ;;  %v5885_v15 = vor.u32 %v7146_v6, %v5882_v7 }
  0xdf   : > { %3872 = vmatpush.bf16.msra.mxu1 %v5805_v32  ;;  %3841 = vmatmul.bf16.vlgmr.msrb.gmra.mxu2 %v7628_v41  ;;  %v7078_v19 = vld [vmem:[%s7455_s29 + $0x764] sm:$0xf]  ;;  %v5610_v23 = vld [vmem:[%s7455_s29 + $0x770] sm:$0xf0]  ;;  %v3609_v29 = vadd.f32 %v3608_v12, %v7907_v57  ;;  %v6013_v31 = vor.u32 %v7178_v8, %v6010_v9 }
  0xe0   : > { %3885 = vmatpush.bf16.msra.mxu2 %v5933_v33  ;;  %3854 = vmatmul.bf16.vlgmr.msrb.gmra.mxu3 %v7620_v35  ;;  %v7110_v26 = vld [vmem:[%s7455_s29 + $0x864] sm:$0xf]  ;;  %v5738_v32 = vld [vmem:[%s7455_s29 + $0x870] sm:$0xf0] }
  0xe1   : > { %3898 = vmatpush.bf16.msra.mxu3 %v6061_v42  ;;  %v7142_v33 = vld [vmem:[%s7455_s29 + $0x964] sm:$0xf]  ;;  %v5866_v34 = vld [vmem:[%s7455_s29 + $0x970] sm:$0xf0]  ;;  %v3622_v40 = vadd.f32 %v3621_v30, %v3609_v29  ;;  %v5613_v42 = vor.u32 %v7078_v19, %v5610_v23  ;;  %v5741_v57 = vor.u32 %v7110_v26, %v5738_v32  ;;  %v3647_v53 = vpop.f32.mrf.mxu3 }
  0xe2   : > { %3860 = vmatpush.bf16.msra.mxu0 %v5661_v48  ;;  %v7174_v36 = vld [vmem:[%s7455_s29 + $0xa64] sm:$0xf]  ;;  %v5994_v37 = vld [vmem:[%s7455_s29 + $0xa70] sm:$0xf0]  ;;  %v5869_v43 = vor.u32 %v7142_v33, %v5866_v34 }
  0xe3   : > { %3873 = vmatpush.bf16.msra.mxu1 %v5789_v49  ;;  %v7074_v44 = vld [vmem:[%s7455_s29 + $0x744] sm:$0xf]  ;;  %v5594_v45 = vld [vmem:[%s7455_s29 + $0x750] sm:$0xf0]  ;;  %v3634_v47 = vpop.f32.mrf.mxu2  ;;  %v5997_v48 = vor.u32 %v7174_v36, %v5994_v37 }
  0xe4   : > { %3886 = vmatpush.bf16.msra.mxu2 %v5917_v50  ;;  %v7106_v46 = vld [vmem:[%s7455_s29 + $0x844] sm:$0xf]  ;;  %v5722_v49 = vld [vmem:[%s7455_s29 + $0x850] sm:$0xf0]  ;;  %v3635_v52 = vadd.f32 %v3634_v47, %v3622_v40  ;;  %v5597_v56 = vor.u32 %v7074_v44, %v5594_v45 }
  0xe5   : > { %3899 = vmatpush.bf16.msra.mxu3 %v6045_v54  ;;  %v7138_v50 = vld [vmem:[%s7455_s29 + $0x944] sm:$0xf]  ;;  %v5850_v51 = vld [vmem:[%s7455_s29 + $0x950] sm:$0xf0]  ;;  %v5725_v60 = vor.u32 %v7106_v46, %v5722_v49  ;;  %v3623_v2 = vpop.f32.mrf.mxu1 }
  0xe6   : > { %3861 = vmatpush.bf16.msra.mxu0 %v5645_v61  ;;  %v7170_v54 = vld [vmem:[%s7455_s29 + $0xa44] sm:$0xf]  ;;  %v5978_v55 = vld [vmem:[%s7455_s29 + $0xa50] sm:$0xf0]  ;;  %v7968_v58 = vadd.f32 %v3647_v53, %v3635_v52  ;;  %v3610_v59 = vpop.f32.mrf.mxu0  ;;  %v5853_v61 = vor.u32 %v7138_v50, %v5850_v51 }
  0xe7   : > { %3874 = vmatpush.bf16.msra.mxu1 %v5773_v62  ;;  %v7070_v62 = vld [vmem:[%s7455_s29 + $0x724] sm:$0xf]  ;;  %v5981_v3 = vor.u32 %v7170_v54, %v5978_v55  ;;  %v5834_v6 = vld [vmem:[%s7455_s29 + $0x930] sm:$0xf0] }
  0xe8   : > { %3887 = vmatpush.bf16.msra.mxu2 %v5901_v63  ;;  %v5578_v63 = vld [vmem:[%s7455_s29 + $0x730] sm:$0xf0]  ;;  %v7102_v1 = vld [vmem:[%s7455_s29 + $0x824] sm:$0xf] }
  0xe9   : > { %3900 = vmatpush.bf16.msra.mxu3 %v6029_v4  ;;  %v5706_v4 = vld [vmem:[%s7455_s29 + $0x830] sm:$0xf0]  ;;  %v7134_v5 = vld [vmem:[%s7455_s29 + $0x924] sm:$0xf]  ;;  %v5581_v9 = vor.u32 %v7070_v62, %v5578_v63  ;;  %v3649_v34 = vpop.f32.mrf.mxu3 }
  0xea   : > { %3862 = vmatpush.bf16.msra.mxu0 %v5629_v11  ;;  %v7166_v7 = vld [vmem:[%s7455_s29 + $0xa24] sm:$0xf]  ;;  %v5962_v8 = vld [vmem:[%s7455_s29 + $0xa30] sm:$0xf0] }
  0xeb   : > { %3875 = vmatpush.bf16.msra.mxu1 %v5757_v13  ;;  %v7066_v11 = vld [vmem:[%s7455_s29 + $0x704] sm:$0xf]  ;;  %v5562_v12 = vld [vmem:[%s7455_s29 + $0x710] sm:$0xf0]  ;;  %v5709_v13 = vor.u32 %v7102_v1, %v5706_v4  ;;  %v3636_v29 = vpop.f32.mrf.mxu2  ;;  %v5965_v30 = vor.u32 %v7166_v7, %v5962_v8 }
  0xec   : > { %3888 = vmatpush.bf16.msra.mxu2 %v5885_v15  ;;  %v5837_v15 = vor.u32 %v7134_v5, %v5834_v6  ;;  %v7098_v19 = vld [vmem:[%s7455_s29 + $0x804] sm:$0xf]  ;;  %v5690_v23 = vld [vmem:[%s7455_s29 + $0x810] sm:$0xf0] }
  0xed   : > { %3901 = vmatpush.bf16.msra.mxu3 %v6013_v31  ;;  %v7130_v26 = vld [vmem:[%s7455_s29 + $0x904] sm:$0xf]  ;;  %v5818_v31 = vld [vmem:[%s7455_s29 + $0x910] sm:$0xf0]  ;;  %v5693_v45 = vor.u32 %v7098_v19, %v5690_v23 }
  0xee   : > { %3863 = vmatpush.bf16.msra.mxu0 %v5613_v42  ;;  %v7162_v32 = vld [vmem:[%s7455_s29 + $0xa04] sm:$0xf]  ;;  %v5946_v33 = vld [vmem:[%s7455_s29 + $0xa10] sm:$0xf0]  ;;  %v5565_v42 = vor.u32 %v7066_v11, %v5562_v12  ;;  %v5821_v46 = vor.u32 %v7130_v26, %v5818_v31 }
  0xef   : > { %3876 = vmatpush.bf16.msra.mxu1 %v5741_v57  ;;  %v7222_v36 = vld [vmem:[%s7455_s29 + $0xbe4] sm:$0xf]  ;;  %v6186_v37 = vld [vmem:[%s7455_s29 + $0xbf0] sm:$0xf0]  ;;  %v5949_v49 = vor.u32 %v7162_v32, %v5946_v33 }
  0xf0   : > { %3889 = vmatpush.bf16.msra.mxu2 %v5869_v43  ;;  %v7254_v40 = vld [vmem:[%s7455_s29 + $0xce4] sm:$0xf]  ;;  %v6314_v57 = vld [vmem:[%s7455_s29 + $0xcf0] sm:$0xf0]  ;;  %v6189_v50 = vor.u32 %v7222_v36, %v6186_v37 }
  0xf1   : > { %3902 = vmatpush.bf16.msra.mxu3 %v5997_v48  ;;  %v7286_v43 = vld [vmem:[%s7455_s29 + $0xde4] sm:$0xf]  ;;  %v6442_v44 = vld [vmem:[%s7455_s29 + $0xdf0] sm:$0xf0]  ;;  %v6317_v51 = vor.u32 %v7254_v40, %v6314_v57 }
  0xf2   : > { %3864 = vmatpush.bf16.msra.mxu0 %v5597_v56  ;;  %v7318_v47 = vld [vmem:[%s7455_s29 + $0xee4] sm:$0xf]  ;;  %v6570_v48 = vld [vmem:[%s7455_s29 + $0xef0] sm:$0xf0]  ;;  %v6445_v52 = vor.u32 %v7286_v43, %v6442_v44 }
  0xf3   : > { %3877 = vmatpush.bf16.msra.mxu1 %v5725_v60  ;;  %v7218_v53 = vld [vmem:[%s7455_s29 + $0xbc4] sm:$0xf]  ;;  %v6170_v54 = vld [vmem:[%s7455_s29 + $0xbd0] sm:$0xf0]  ;;  %v6573_v56 = vor.u32 %v7318_v47, %v6570_v48 }
  0xf4   : > { %3890 = vmatpush.bf16.msra.mxu2 %v5853_v61  ;;  %v7250_v55 = vld [vmem:[%s7455_s29 + $0xcc4] sm:$0xf]  ;;  %v6298_v59 = vld [vmem:[%s7455_s29 + $0xcd0] sm:$0xf0]  ;;  %v6173_v1 = vor.u32 %v7218_v53, %v6170_v54 }
  0xf5   : > { %3903 = vmatpush.bf16.msra.mxu3 %v5981_v3  ;;  %v7282_v60 = vld [vmem:[%s7455_s29 + $0xdc4] sm:$0xf]  ;;  %v6426_v61 = vld [vmem:[%s7455_s29 + $0xdd0] sm:$0xf0]  ;;  %v6301_v2 = vor.u32 %v7250_v55, %v6298_v59 }
  0xf6   : > { %3865 = vmatpush.bf16.msra.mxu0 %v5581_v9  ;;  %v7314_v62 = vld [vmem:[%s7455_s29 + $0xec4] sm:$0xf]  ;;  %v6554_v63 = vld [vmem:[%s7455_s29 + $0xed0] sm:$0xf0]  ;;  %v6429_v3 = vor.u32 %v7282_v60, %v6426_v61 }
  0xf7   : > { %3878 = vmatpush.bf16.msra.mxu1 %v5709_v13  ;;  %v7214_v4 = vld [vmem:[%s7455_s29 + $0xba4] sm:$0xf]  ;;  %v6154_v5 = vld [vmem:[%s7455_s29 + $0xbb0] sm:$0xf0]  ;;  %v6557_v7 = vor.u32 %v7314_v62, %v6554_v63 }
  0xf8   : > { %3891 = vmatpush.bf16.msra.mxu2 %v5837_v15  ;;  %v7246_v6 = vld [vmem:[%s7455_s29 + $0xca4] sm:$0xf]  ;;  %v6282_v8 = vld [vmem:[%s7455_s29 + $0xcb0] sm:$0xf0]  ;;  %v6157_v15 = vor.u32 %v7214_v4, %v6154_v5 }
  0xf9   : > { %3904 = vmatpush.bf16.msra.mxu3 %v5965_v30  ;;  %v7278_v9 = vld [vmem:[%s7455_s29 + $0xda4] sm:$0xf]  ;;  %v6410_v11 = vld [vmem:[%s7455_s29 + $0xdb0] sm:$0xf0]  ;;  %v6285_v19 = vor.u32 %v7246_v6, %v6282_v8 }
  0xfa   : > { %3866 = vmatpush.bf16.msra.mxu0 %v5565_v42  ;;  %v7310_v12 = vld [vmem:[%s7455_s29 + $0xea4] sm:$0xf]  ;;  %v6538_v13 = vld [vmem:[%s7455_s29 + $0xeb0] sm:$0xf0]  ;;  %v6413_v23 = vor.u32 %v7278_v9, %v6410_v11  ;;  %v8024_v57 = vpop.f32.mrf.mxu1 }
  0xfb   : > { %3879 = vmatpush.bf16.msra.mxu1 %v5693_v45  ;;  %v7210_v26 = vld [vmem:[%s7455_s29 + $0xb84] sm:$0xf]  ;;  %v6138_v29 = vld [vmem:[%s7455_s29 + $0xb90] sm:$0xf0]  ;;  %v6541_v31 = vor.u32 %v7310_v12, %v6538_v13 }
  0xfc   : > { %3892 = vmatpush.bf16.msra.mxu2 %v5821_v46  ;;  %v7242_v30 = vld [vmem:[%s7455_s29 + $0xc84] sm:$0xf]  ;;  %v6266_v32 = vld [vmem:[%s7455_s29 + $0xc90] sm:$0xf0]  ;;  %v6141_v42 = vor.u32 %v7210_v26, %v6138_v29 }
  0xfd   : > { %3905 = vmatpush.bf16.msra.mxu3 %v5949_v49  ;;  %3867 = vmatmul.bf16.vlgmr.msra.gmra.mxu0 %v7626_v39  ;;  %v7274_v33 = vld [vmem:[%s7455_s29 + $0xd84] sm:$0xf]  ;;  %v6394_v34 = vld [vmem:[%s7455_s29 + $0xd90] sm:$0xf0]  ;;  %v6269_v43 = vor.u32 %v7242_v30, %v6266_v32 }
  0xfe   : > { %3911 = vmatpush.bf16.msrb.mxu0 %v6189_v50  ;;  %3880 = vmatmul.bf16.vlgmr.msra.gmra.mxu1 %v7697_v20  ;;  %v8020_v36 = vpop.f32.mrf.mxu0  ;;  %v7306_v37 = vld [vmem:[%s7455_s29 + $0xe84] sm:$0xf]  ;;  %v6522_v40 = vld [vmem:[%s7455_s29 + $0xe90] sm:$0xf0]  ;;  %v6397_v44 = vor.u32 %v7274_v33, %v6394_v34 }
  0xff   : > { %3924 = vmatpush.bf16.msrb.mxu1 %v6317_v51  ;;  %3893 = vmatmul.bf16.vlgmr.msra.gmra.mxu2 %v7704_v25  ;;  %v7206_v45 = vld [vmem:[%s7455_s29 + $0xb64] sm:$0xf]  ;;  %v6122_v46 = vld [vmem:[%s7455_s29 + $0xb70] sm:$0xf0]  ;;  %v6525_v48 = vor.u32 %v7306_v37, %v6522_v40 }
 0x100   : > { %3937 = vmatpush.bf16.msrb.mxu2 %v6445_v52  ;;  %3906 = vmatmul.bf16.vlgmr.msra.gmra.mxu3 %v7702_v24  ;;  %v7238_v47 = vld [vmem:[%s7455_s29 + $0xc64] sm:$0xf]  ;;  %v6250_v49 = vld [vmem:[%s7455_s29 + $0xc70] sm:$0xf0]  ;;  %v6125_v54 = vor.u32 %v7206_v45, %v6122_v46 }
 0x101   : > { %3950 = vmatpush.bf16.msrb.mxu3 %v6573_v56  ;;  %v7270_v50 = vld [vmem:[%s7455_s29 + $0xd64] sm:$0xf]  ;;  %v6378_v51 = vld [vmem:[%s7455_s29 + $0xd70] sm:$0xf0]  ;;  %v6253_v55 = vor.u32 %v7238_v47, %v6250_v49 }
 0x102   : > { %3912 = vmatpush.bf16.msrb.mxu0 %v6173_v1  ;;  %v7302_v52 = vld [vmem:[%s7455_s29 + $0xe64] sm:$0xf]  ;;  %v6506_v53 = vld [vmem:[%s7455_s29 + $0xe70] sm:$0xf0]  ;;  %v6381_v56 = vor.u32 %v7270_v50, %v6378_v51  ;;  %v8042_v4 = vpop.f32.mrf.mxu3  ;;  %v3675_v9 = vpop.f32.mrf.mxu1 }
 0x103   : > { %3925 = vmatpush.bf16.msrb.mxu1 %v6301_v2  ;;  %v7202_v59 = vld [vmem:[%s7455_s29 + $0xb44] sm:$0xf]  ;;  %v6106_v60 = vld [vmem:[%s7455_s29 + $0xb50] sm:$0xf0]  ;;  %v6509_v62 = vor.u32 %v7302_v52, %v6506_v53 }
 0x104   : > { %3938 = vmatpush.bf16.msrb.mxu2 %v6429_v3  ;;  %v7234_v61 = vld [vmem:[%s7455_s29 + $0xc44] sm:$0xf]  ;;  %v8037_v63 = vpop.f32.mrf.mxu2  ;;  %v6234_v1 = vld [vmem:[%s7455_s29 + $0xc50] sm:$0xf0]  ;;  %v6109_v8 = vor.u32 %v7202_v59, %v6106_v60  ;;  %v4784_v59 = vld [vmem:[%s7455_s29 + $0xe8] sm:$0xf] }
 0x105   : > { %3951 = vmatpush.bf16.msrb.mxu3 %v6557_v7  ;;  %v7266_v2 = vld [vmem:[%s7455_s29 + $0xd44] sm:$0xf]  ;;  %v6362_v3 = vld [vmem:[%s7455_s29 + $0xd50] sm:$0xf0]  ;;  %v6237_v11 = vor.u32 %v7234_v61, %v6234_v1  ;;  %v6873_v60 = vld [vmem:[%s7455_s29 + $0xf4] sm:$0xf0] }
 0x106   : > { %3913 = vmatpush.bf16.msrb.mxu0 %v6157_v15  ;;  %v7298_v5 = vld [vmem:[%s7455_s29 + $0xe44] sm:$0xf]  ;;  %v6490_v6 = vld [vmem:[%s7455_s29 + $0xe50] sm:$0xf0]  ;;  %v3662_v7 = vpop.f32.mrf.mxu0  ;;  %v6365_v12 = vor.u32 %v7266_v2, %v6362_v3  ;;  %v4912_v1 = vld [vmem:[%s7455_s29 + $0x1e8] sm:$0xf] }
 0x107   : > { %3926 = vmatpush.bf16.msrb.mxu1 %v6285_v19  ;;  %v7198_v13 = vld [vmem:[%s7455_s29 + $0xb24] sm:$0xf]  ;;  %v6090_v15 = vld [vmem:[%s7455_s29 + $0xb30] sm:$0xf0]  ;;  %v6905_v2 = vld [vmem:[%s7455_s29 + $0x1f4] sm:$0xf0]  ;;  %v4785_v7 = vor.u32 %v6873_v60, %v4784_v59 }
 0x108   : > { %3939 = vmatpush.bf16.msrb.mxu2 %v6413_v23  ;;  %v7230_v19 = vld [vmem:[%s7455_s29 + $0xc24] sm:$0xf]  ;;  %v6493_v23 = vor.u32 %v7298_v5, %v6490_v6  ;;  %v6218_v26 = vld [vmem:[%s7455_s29 + $0xc30] sm:$0xf0]  ;;  %v6093_v33 = vor.u32 %v7198_v13, %v6090_v15  ;;  %v4768_v15 = vld [vmem:[%s7455_s29 + $0xc8] sm:$0xf] }
 0x109   : > { %3952 = vmatpush.bf16.msrb.mxu3 %v6541_v31  ;;  %v7262_v29 = vld [vmem:[%s7455_s29 + $0xd24] sm:$0xf]  ;;  %v6346_v30 = vld [vmem:[%s7455_s29 + $0xd30] sm:$0xf0]  ;;  %v6221_v40 = vor.u32 %v7230_v19, %v6218_v26  ;;  %v6869_v19 = vld [vmem:[%s7455_s29 + $0xd4] sm:$0xf0] }
 0x10a   : > { %3914 = vmatpush.bf16.msrb.mxu0 %v6141_v42  ;;  %v7294_v31 = vld [vmem:[%s7455_s29 + $0xe24] sm:$0xf]  ;;  %v6474_v32 = vld [vmem:[%s7455_s29 + $0xe30] sm:$0xf0]  ;;  %v6349_v42 = vor.u32 %v7262_v29, %v6346_v30  ;;  %v6901_v26 = vld [vmem:[%s7455_s29 + $0x1d4] sm:$0xf0] }
 0x10b   : > { %3927 = vmatpush.bf16.msrb.mxu1 %v6269_v43  ;;  %v7194_v34 = vld [vmem:[%s7455_s29 + $0xb04] sm:$0xf]  ;;  %v6074_v37 = vld [vmem:[%s7455_s29 + $0xb10] sm:$0xf0]  ;;  %v6477_v46 = vor.u32 %v7294_v31, %v6474_v32  ;;  %v4769_v31 = vor.u32 %v6869_v19, %v4768_v15  ;;  %v4864_v59 = vld [vmem:[%s7455_s29 + $0x188] sm:$0xf] }
 0x10c   : > { %3940 = vmatpush.bf16.msrb.mxu2 %v6397_v44  ;;  %v7226_v43 = vld [vmem:[%s7455_s29 + $0xc04] sm:$0xf]  ;;  %v6202_v44 = vld [vmem:[%s7455_s29 + $0xc10] sm:$0xf0]  ;;  %v3688_v50 = vpop.f32.mrf.mxu2  ;;  %v6893_v60 = vld [vmem:[%s7455_s29 + $0x194] sm:$0xf0] }
 0x10d   : > { %3953 = vmatpush.bf16.msrb.mxu3 %v6525_v48  ;;  %v7258_v45 = vld [vmem:[%s7455_s29 + $0xd04] sm:$0xf]  ;;  %v6330_v47 = vld [vmem:[%s7455_s29 + $0xd10] sm:$0xf0]  ;;  %v6205_v61 = vor.u32 %v7226_v43, %v6202_v44  ;;  %v6865_v43 = vld [vmem:[%s7455_s29 + $0xb4] sm:$0xf0] }
 0x10e   : > { %3915 = vmatpush.bf16.msrb.mxu0 %v6125_v54  ;;  %v7290_v48 = vld [vmem:[%s7455_s29 + $0xe04] sm:$0xf]  ;;  %v6458_v49 = vld [vmem:[%s7455_s29 + $0xe10] sm:$0xf0]  ;;  %v3701_v54 = vpop.f32.mrf.mxu3  ;;  %v4880_v44 = vld [vmem:[%s7455_s29 + $0x1a8] sm:$0xf] }
 0x10f   : > { %3928 = vmatpush.bf16.msrb.mxu1 %v6253_v55  ;;  %v7350_v51 = vld [vmem:[%s7455_s29 + $0xfe4] sm:$0xf]  ;;  %v6698_v52 = vld [vmem:[%s7455_s29 + $0xff0] sm:$0xf0]  ;;  %v6077_v55 = vor.u32 %v7194_v34, %v6074_v37  ;;  %v6461_v3 = vor.u32 %v7290_v48, %v6458_v49  ;;  %v4736_v54 = vld [vmem:[%s7455_s29 + $0x88] sm:$0xf] }
 0x110   : > { %3941 = vmatpush.bf16.msrb.mxu2 %v6381_v56  ;;  %v7382_v53 = vld [vmem:[%s7455_s29 + $0x10e4] sm:$0xf]  ;;  %v6826_v56 = vld [vmem:[%s7455_s29 + $0x10f0] sm:$0xf0]  ;;  %v6701_v5 = vor.u32 %v7350_v51, %v6698_v52 }
 0x111   : > { %3954 = vmatpush.bf16.msrb.mxu3 %v6509_v62  ;;  %v6333_v62 = vor.u32 %v7258_v45, %v6330_v47  ;;  %v6829_v6 = vor.u32 %v7382_v53, %v6826_v56  ;;  %v6682_v9 = vld [vmem:[%s7455_s29 + $0xfd0] sm:$0xf0]  ;;  %v7342_v32 = vld [vmem:[%s7455_s29 + $0xfa4] sm:$0xf]  ;;  %v6897_v45 = vld [vmem:[%s7455_s29 + $0x1b4] sm:$0xf0] }
 0x112   : > { %3916 = vmatpush.bf16.msrb.mxu0 %v6109_v8  ;;  %v7346_v8 = vld [vmem:[%s7455_s29 + $0xfc4] sm:$0xf]  ;;  %v6810_v13 = vld [vmem:[%s7455_s29 + $0x10d0] sm:$0xf0]  ;;  %v4881_v52 = vor.u32 %v6897_v45, %v4880_v44  ;;  %v6885_v44 = vld [vmem:[%s7455_s29 + $0x154] sm:$0xf0] }
 0x113   : > { %3929 = vmatpush.bf16.msrb.mxu1 %v6237_v11  ;;  %v7378_v11 = vld [vmem:[%s7455_s29 + $0x10c4] sm:$0xf]  ;;  %v6685_v29 = vor.u32 %v7346_v8, %v6682_v9  ;;  %v6650_v50 = vld [vmem:[%s7455_s29 + $0xf90] sm:$0xf0]  ;;  %v4720_v9 = vld [vmem:[%s7455_s29 + $0x68] sm:$0xf] }
 0x114   : > { %3942 = vmatpush.bf16.msrb.mxu2 %v6365_v12  ;;  %v4913_v12 = vor.u32 %v6905_v2, %v4912_v1  ;;  %v6813_v30 = vor.u32 %v7378_v11, %v6810_v13  ;;  %v7374_v34 = vld [vmem:[%s7455_s29 + $0x10a4] sm:$0xf]  ;;  %v6778_v53 = vld [vmem:[%s7455_s29 + $0x1090] sm:$0xf0]  ;;  %v6857_v11 = vld [vmem:[%s7455_s29 + $0x74] sm:$0xf0] }
 0x115   : > { %3955 = vmatpush.bf16.msrb.mxu3 %v6493_v23  ;;  %v4896_v23 = vld [vmem:[%s7455_s29 + $0x1c8] sm:$0xf]  ;;  %v7338_v49 = vld [vmem:[%s7455_s29 + $0xf84] sm:$0xf]  ;;  %v6762_v8 = vld [vmem:[%s7455_s29 + $0x1070] sm:$0xf0] }
 0x116   : > { %3917 = vmatpush.bf16.msrb.mxu0 %v6093_v33  ;;  %v6666_v33 = vld [vmem:[%s7455_s29 + $0xfb0] sm:$0xf0]  ;;  %v4897_v37 = vor.u32 %v6901_v26, %v4896_v23  ;;  %v7370_v51 = vld [vmem:[%s7455_s29 + $0x1084] sm:$0xf]  ;;  %v6889_v13 = vld [vmem:[%s7455_s29 + $0x174] sm:$0xf0]  ;;  %v4721_v23 = vor.u32 %v6857_v11, %v4720_v9 }
 0x117   : > { %3930 = vmatpush.bf16.msrb.mxu1 %v6221_v40  ;;  %v6794_v40 = vld [vmem:[%s7455_s29 + $0x10b0] sm:$0xf0]  ;;  %v6781_v1 = vor.u32 %v7370_v51, %v6778_v53  ;;  %v7330_v26 = vld [vmem:[%s7455_s29 + $0xf44] sm:$0xf]  ;;  %v6845_v9 = vld [vmem:[%s7455_s29 + $0x14] sm:$0xf0] }
 0x118   : > { %3943 = vmatpush.bf16.msrb.mxu2 %v6349_v42  ;;  %v4752_v42 = vld [vmem:[%s7455_s29 + $0xa8] sm:$0xf]  ;;  %v6797_v47 = vor.u32 %v7374_v34, %v6794_v40  ;;  %v6746_v34 = vld [vmem:[%s7455_s29 + $0x1050] sm:$0xf0]  ;;  %v6853_v40 = vld [vmem:[%s7455_s29 + $0x54] sm:$0xf0] }
 0x119   : > { %3956 = vmatpush.bf16.msrb.mxu3 %v6477_v46  ;;  %v6669_v46 = vor.u32 %v7342_v32, %v6666_v33  ;;  %v4753_v48 = vor.u32 %v6865_v43, %v4752_v42  ;;  %v4832_v43 = vld [vmem:[%s7455_s29 + $0x148] sm:$0xf]  ;;  %v6730_v53 = vld [vmem:[%s7455_s29 + $0x1030] sm:$0xf0] }
 0x11a   : > { %3918 = vmatpush.bf16.msrb.mxu0 %v6077_v55  ;;  %v6861_v55 = vld [vmem:[%s7455_s29 + $0x94] sm:$0xf0]  ;;  %v4800_v11 = vld [vmem:[%s7455_s29 + $0x108] sm:$0xf] }
 0x11b   : > { %3931 = vmatpush.bf16.msrb.mxu1 %v6205_v61  ;;  %v6653_v61 = vor.u32 %v7338_v49, %v6650_v50  ;;  %v4737_v2 = vor.u32 %v6861_v55, %v4736_v54  ;;  %v6602_v49 = vld [vmem:[%s7455_s29 + $0xf30] sm:$0xf0]  ;;  %v7358_v50 = vld [vmem:[%s7455_s29 + $0x1024] sm:$0xf]  ;;  %v4688_v54 = vld [vmem:[%s7455_s29 + $0x28] sm:$0xf] }
 0x11c   : > { %3944 = vmatpush.bf16.msrb.mxu2 %v6333_v62  ;;  %v8096_v56 = vpop.f32.mrf.mxu0  ;;  %v8100_v62 = vpop.f32.mrf.mxu1  ;;  %v6849_v55 = vld [vmem:[%s7455_s29 + $0x34] sm:$0xf0] }
 0x11d   : > { %3957 = vmatpush.bf16.msrb.mxu3 %v6461_v3  ;;  %3919 = vmatmul.bf16.vlgmr.msrb.gmra.mxu0 %v7708_v28  ;;  %v7334_v3 = vld [vmem:[%s7455_s29 + $0xf64] sm:$0xf] }
 0x11e   : > { %3963 = vmatpush.bf16.msra.mxu0 %v6701_v5  ;;  %3932 = vmatmul.bf16.vlgmr.msrb.gmra.mxu1 %v7777_v14  ;;  %v6634_v5 = vld [vmem:[%s7455_s29 + $0xf70] sm:$0xf0] }
 0x11f   : > { %3976 = vmatpush.bf16.msra.mxu1 %v6829_v6  ;;  %3945 = vmatmul.bf16.vlgmr.msrb.gmra.mxu2 %v7784_v22  ;;  %v7366_v6 = vld [vmem:[%s7455_s29 + $0x1064] sm:$0xf]  ;;  %v6637_v15 = vor.u32 %v7334_v3, %v6634_v5  ;;  %v6733_v3 = vor.u32 %v7358_v50, %v6730_v53  ;;  %v4689_v5 = vor.u32 %v6849_v55, %v4688_v54  ;;  %v6997_v53 = vld [vmem:[%s7455_s29 + $0x4d4] sm:$0xf0] }
 0x120   : > { %3989 = vmatpush.bf16.msra.mxu2 %v4785_v7  ;;  %3958 = vmatmul.bf16.vlgmr.msrb.gmra.mxu3 %v7782_v21  ;;  %v4865_v7 = vor.u32 %v6893_v60, %v4864_v59  ;;  %v6765_v19 = vor.u32 %v7366_v6, %v6762_v8  ;;  %v4816_v59 = vld [vmem:[%s7455_s29 + $0x128] sm:$0xf]  ;;  %v6881_v60 = vld [vmem:[%s7455_s29 + $0x134] sm:$0xf0]  ;;  %v7354_v6 = vld [vmem:[%s7455_s29 + $0x1004] sm:$0xf] }
 0x121   : > { %4002 = vmatpush.bf16.msra.mxu3 %v4913_v12  ;;  %v4848_v12 = vld [vmem:[%s7455_s29 + $0x168] sm:$0xf]  ;;  %v7029_v54 = vld [vmem:[%s7455_s29 + $0x5d4] sm:$0xf0] }
 0x122   : > { %3964 = vmatpush.bf16.msra.mxu0 %v6685_v29  ;;  %v6618_v29 = vld [vmem:[%s7455_s29 + $0xf50] sm:$0xf0]  ;;  %v4849_v32 = vor.u32 %v6889_v13, %v4848_v12  ;;  %v4672_v8 = vld [vmem:[%s7455_s29 + $0x8] sm:$0xf]  ;;  %v6877_v12 = vld [vmem:[%s7455_s29 + $0x114] sm:$0xf0] }
 0x123   : > { %3977 = vmatpush.bf16.msra.mxu1 %v6813_v30  ;;  %v7362_v30 = vld [vmem:[%s7455_s29 + $0x1044] sm:$0xf]  ;;  %v8120_v42 = vpop.f32.mrf.mxu3 }
 0x124   : > { %3990 = vmatpush.bf16.msra.mxu2 %v4769_v31  ;;  %v3661_v31 = vadd.f32 %v8020_v36, %v7968_v58  ;;  %v8115_v33 = vpop.f32.mrf.mxu2  ;;  %v3714_v45 = vpop.f32.mrf.mxu0  ;;  %v6621_v58 = vor.u32 %v7330_v26, %v6618_v29 }
 0x125   : > { %4003 = vmatpush.bf16.msra.mxu3 %v4897_v37  ;;  %v4704_v37 = vld [vmem:[%s7455_s29 + $0x48] sm:$0xf]  ;;  %v3727_v36 = vpop.f32.mrf.mxu1 }
 0x126   : > { %3965 = vmatpush.bf16.msra.mxu0 %v6669_v46  ;;  %v6749_v46 = vor.u32 %v7362_v30, %v6746_v34  ;;  %v3674_v51 = vadd.f32 %v8024_v57, %v3661_v31  ;;  %v6586_v57 = vld [vmem:[%s7455_s29 + $0xf10] sm:$0xf0]  ;;  %v6969_v31 = vld [vmem:[%s7455_s29 + $0x3f4] sm:$0xf0] }
 0x127   : > { %3978 = vmatpush.bf16.msra.mxu1 %v6797_v47  ;;  %v4705_v47 = vor.u32 %v6853_v40, %v4704_v37  ;;  %v7001_v34 = vld [vmem:[%s7455_s29 + $0x4f4] sm:$0xf0]  ;;  %v4673_v40 = vor.u32 %v6845_v9, %v4672_v8  ;;  %v5392_v8 = vld [vmem:[%s7455_s29 + $0x5a8] sm:$0xf] }
 0x128   : > { %3991 = vmatpush.bf16.msra.mxu2 %v4753_v48  ;;  %v7326_v48 = vld [vmem:[%s7455_s29 + $0xf24] sm:$0xf] }
 0x129   : > { %4004 = vmatpush.bf16.msra.mxu3 %v4881_v52  ;;  %v4833_v52 = vor.u32 %v6885_v44, %v4832_v43  ;;  %v5424_v43 = vld [vmem:[%s7455_s29 + $0x5e8] sm:$0xf]  ;;  %v7033_v44 = vld [vmem:[%s7455_s29 + $0x5f4] sm:$0xf0] }
 0x12a   : > { %3966 = vmatpush.bf16.msra.mxu0 %v6653_v61  ;;  %v3687_v61 = vadd.f32 %v8037_v63, %v3674_v51  ;;  %v4817_v63 = vor.u32 %v6881_v60, %v4816_v59  ;;  %v5425_v50 = vor.u32 %v7033_v44, %v5424_v43  ;;  %v6965_v51 = vld [vmem:[%s7455_s29 + $0x3d4] sm:$0xf0] }
 0x12b   : > { %3979 = vmatpush.bf16.msra.mxu1 %v6781_v1  ;;  %v6605_v1 = vor.u32 %v7326_v48, %v6602_v49  ;;  %v3753_v26 = vpop.f32.mrf.mxu3  ;;  %v6933_v48 = vld [vmem:[%s7455_s29 + $0x2d4] sm:$0xf0]  ;;  %v5152_v49 = vld [vmem:[%s7455_s29 + $0x3c8] sm:$0xf] }
 0x12c   : > { %3992 = vmatpush.bf16.msra.mxu2 %v4737_v2  ;;  %v7322_v2 = vld [vmem:[%s7455_s29 + $0xf04] sm:$0xf]  ;;  %v3740_v13 = vpop.f32.mrf.mxu2  ;;  %v3700_v29 = vadd.f32 %v8042_v4, %v3687_v61  ;;  %v4801_v4 = vor.u32 %v6877_v12, %v4800_v11  ;;  %v5153_v60 = vor.u32 %v6965_v51, %v5152_v49  ;;  %v4992_v12 = vld [vmem:[%s7455_s29 + $0x288] sm:$0xf]  ;;  %v6957_v26 = vld [vmem:[%s7455_s29 + $0x394] sm:$0xf0] }
 0x12d   : > { %4005 = vmatpush.bf16.msra.mxu3 %v4865_v7  ;;  %v6714_v7 = vld [vmem:[%s7455_s29 + $0x1010] sm:$0xf0]  ;;  %v6589_v30 = vor.u32 %v7322_v2, %v6586_v57  ;;  %v6929_v2 = vld [vmem:[%s7455_s29 + $0x2b4] sm:$0xf0]  ;;  %v5136_v57 = vld [vmem:[%s7455_s29 + $0x3a8] sm:$0xf] }
 0x12e   : > { %3967 = vmatpush.bf16.msra.mxu0 %v6637_v15  ;;  %v5040_v15 = vld [vmem:[%s7455_s29 + $0x2e8] sm:$0xf]  ;;  %v6717_v37 = vor.u32 %v7354_v6, %v6714_v7  ;;  %v3713_v45 = vadd.f32 %v8096_v56, %v3700_v29  ;;  %v6993_v7 = vld [vmem:[%s7455_s29 + $0x4b4] sm:$0xf0] }
 0x12f   : > { %3980 = vmatpush.bf16.msra.mxu1 %v6765_v19  ;;  %v6937_v19 = vld [vmem:[%s7455_s29 + $0x2f4] sm:$0xf0]  ;;  %v5408_v56 = vld [vmem:[%s7455_s29 + $0x5c8] sm:$0xf] }
 0x130   : > { %3993 = vmatpush.bf16.msra.mxu2 %v4721_v23  ;;  %v5168_v23 = vld [vmem:[%s7455_s29 + $0x3e8] sm:$0xf]  ;;  %v3726_v55 = vadd.f32 %v8100_v62, %v3713_v45  ;;  %v5409_v62 = vor.u32 %v7029_v54, %v5408_v56  ;;  %v6925_v13 = vld [vmem:[%s7455_s29 + $0x294] sm:$0xf0] }
 0x131   : > { %4006 = vmatpush.bf16.msra.mxu3 %v4849_v32  ;;  %v5296_v32 = vld [vmem:[%s7455_s29 + $0x4e8] sm:$0xf]  ;;  %v5169_v36 = vor.u32 %v6969_v31, %v5168_v23  ;;  %v245_v31 = vld [vmem:[#allocation2 + $0x10] sm:$0xff]  ;;  %v4993_v43 = vor.u32 %v6925_v13, %v4992_v12  ;;  %v6913_v12 = vld [vmem:[%s7455_s29 + $0x234] sm:$0xf0] }
 0x132   : > { %3968 = vmatpush.bf16.msra.mxu0 %v6621_v58  ;;  %v5041_v58 = vor.u32 %v6937_v19, %v5040_v15  ;;  %v5264_v6 = vld [vmem:[%s7455_s29 + $0x4a8] sm:$0xf] }
 0x133   : > { %3981 = vmatpush.bf16.msra.mxu1 %v6749_v46  ;;  %v5297_v46 = vor.u32 %v7001_v34, %v5296_v32  ;;  %v5265_v11 = vor.u32 %v6993_v7, %v5264_v6  ;;  %v5120_v15 = vld [vmem:[%s7455_s29 + $0x388] sm:$0xf]  ;;  %v7013_v6 = vld [vmem:[%s7455_s29 + $0x554] sm:$0xf0] }
 0x134   : > { %3994 = vmatpush.bf16.msra.mxu2 %v4705_v47  ;;  %v5024_v47 = vld [vmem:[%s7455_s29 + $0x2c8] sm:$0xf] }
 0x135   : > { %4007 = vmatpush.bf16.msra.mxu3 %v4833_v52  ;;  %v5280_v52 = vld [vmem:[%s7455_s29 + $0x4c8] sm:$0xf]  ;;  %v5025_v59 = vor.u32 %v6933_v48, %v5024_v47  ;;  %v6953_v48 = vld [vmem:[%s7455_s29 + $0x374] sm:$0xf0] }
 0x136   : > { %3969 = vmatpush.bf16.msra.mxu0 %v6605_v1  ;;  %v5281_v61 = vor.u32 %v6997_v53, %v5280_v52  ;;  %v5008_v1 = vld [vmem:[%s7455_s29 + $0x2a8] sm:$0xf]  ;;  %v7017_v52 = vld [vmem:[%s7455_s29 + $0x574] sm:$0xf0] }
 0x137   : > { %3982 = vmatpush.bf16.msra.mxu1 %v6733_v3  ;;  %v3739_v3 = vadd.f32 %v8115_v33, %v3726_v55  ;;  %v5009_v33 = vor.u32 %v6929_v2, %v5008_v1  ;;  %v5248_v29 = vld [vmem:[%s7455_s29 + $0x488] sm:$0xf]  ;;  %v6949_v1 = vld [vmem:[%s7455_s29 + $0x354] sm:$0xf0] }
 0x138   : > { %3995 = vmatpush.bf16.msra.mxu2 %v4689_v5  ;;  %v6961_v5 = vld [vmem:[%s7455_s29 + $0x3b4] sm:$0xf0]  ;;  %v5376_v34 = vld [vmem:[%s7455_s29 + $0x588] sm:$0xf] }
 0x139   : > { %4008 = vmatpush.bf16.msra.mxu3 %v4817_v63  ;;  %v7025_v63 = vld [vmem:[%s7455_s29 + $0x5b4] sm:$0xf0]  ;;  %v5137_v9 = vor.u32 %v6961_v5, %v5136_v57  ;;  %v3752_v19 = vadd.f32 %v8120_v42, %v3739_v3  ;;  %v5121_v42 = vor.u32 %v6957_v26, %v5120_v15  ;;  %v4976_v45 = vld [vmem:[%s7455_s29 + $0x268] sm:$0xf] }
 0x13a   : > { %3970 = vmatpush.bf16.msra.mxu0 %v6589_v30  ;;  %v5393_v23 = vor.u32 %v7025_v63, %v5392_v8  ;;  %v6989_v30 = vld [vmem:[%s7455_s29 + $0x494] sm:$0xf0]  ;;  %v3764_v32 = vpop.f32.mrf.mxu0  ;;  %v5232_v49 = vld [vmem:[%s7455_s29 + $0x468] sm:$0xf] }
 0x13b   : > { %3983 = vmatpush.bf16.msra.mxu1 %v6717_v37  ;;  %v7021_v37 = vld [vmem:[%s7455_s29 + $0x594] sm:$0xf0]  ;;  %v5249_v44 = vor.u32 %v6989_v30, %v5248_v29  ;;  %v5360_v51 = vld [vmem:[%s7455_s29 + $0x568] sm:$0xf] }
 0x13c   : > { %3996 = vmatpush.bf16.msra.mxu2 %v4673_v40  ;;  %v3765_v40 = vadd.f32 %v3764_v32, %v3752_v19  ;;  %v5377_v47 = vor.u32 %v7021_v37, %v5376_v34  ;;  %v4960_v55 = vld [vmem:[%s7455_s29 + $0x248] sm:$0xf]  ;;  %v6981_v57 = vld [vmem:[%s7455_s29 + $0x454] sm:$0xf0] }
 0x13d   : > { %4009 = vmatpush.bf16.msra.mxu3 %v4801_v4  ;;  %3971 = vmatmul.bf16.vlgmr.msra.gmra.mxu0 %v7788_v27  ;;  %v6921_v4 = vld [vmem:[%s7455_s29 + $0x274] sm:$0xf0]  ;;  %v5216_v2 = vld [vmem:[%s7455_s29 + $0x448] sm:$0xf] }
 0x13e   : > { %4015 = vmatpush.bf16.msrb.mxu0 %v5041_v58  ;;  %3984 = vmatmul.bf16.vlgmr.msra.gmra.mxu1 %v7854_v16  ;;  %v5104_v58 = vld [vmem:[%s7455_s29 + $0x368] sm:$0xf]  ;;  %v4977_v53 = vor.u32 %v6921_v4, %v4976_v45  ;;  %v6945_v26 = vld [vmem:[%s7455_s29 + $0x334] sm:$0xf0] }
 0x13f   : > { %4028 = vmatpush.bf16.msrb.mxu1 %v5169_v36  ;;  %3997 = vmatmul.bf16.vlgmr.msra.gmra.mxu2 %v7554_v10  ;;  %v3777_v36 = vpop.f32.mrf.mxu1  ;;  %v5105_v56 = vor.u32 %v6953_v48, %v5104_v58  ;;  %v5344_v5 = vld [vmem:[%s7455_s29 + $0x548] sm:$0xf]  ;;  %v6977_v30 = vld [vmem:[%s7455_s29 + $0x434] sm:$0xf0] }
 0x140   : > { %4041 = vmatpush.bf16.msrb.mxu2 %v5297_v46  ;;  %4010 = vmatmul.bf16.vlgmr.msra.gmra.mxu3 %v7563_v18  ;;  %v4431_v46 = vadd.f32 %v3765_v40, %v245_v31  ;;  %v5072_v13 = vld [vmem:[%s7455_s29 + $0x328] sm:$0xf]  ;;  %v7009_v32 = vld [vmem:[%s7455_s29 + $0x534] sm:$0xf0] }
 0x141   : > { %4054 = vmatpush.bf16.msrb.mxu3 %v5425_v50  ;;  %v6985_v50 = vld [vmem:[%s7455_s29 + $0x474] sm:$0xf0]  ;;  %v5200_v29 = vld [vmem:[%s7455_s29 + $0x428] sm:$0xf] }
 0x142   : > { %4016 = vmatpush.bf16.msrb.mxu0 %v5025_v59  ;;  %4435 = vst [vmem:[#allocation2 + $0x10] sm:$0xff] %v4431_v46  ;;  %v5233_v54 = vor.u32 %v6985_v50, %v5232_v49  ;;  %v6917_v59 = vld [vmem:[%s7455_s29 + $0x254] sm:$0xf0]  ;;  %v3790_v3 = vpop.f32.mrf.mxu2  ;;  %v3766_v8 = vpop.f32.mrf.mxu0  ;;  %v5328_v31 = vld [vmem:[%s7455_s29 + $0x528] sm:$0xf] }
 0x143   : > { %4029 = vmatpush.bf16.msrb.mxu1 %v5153_v60  ;;  %v5088_v60 = vld [vmem:[%s7455_s29 + $0x348] sm:$0xf]  ;;  %v3791_v7 = vadd.f32 %v3790_v3, %v3777_v36  ;;  %v4961_v63 = vor.u32 %v6917_v59, %v4960_v55  ;;  %v6909_v40 = vld [vmem:[%s7455_s29 + $0x214] sm:$0xf0]  ;;  %v5329_v58 = vor.u32 %v7009_v32, %v5328_v31 }
 0x144   : > { %4042 = vmatpush.bf16.msrb.mxu2 %v5281_v61  ;;  %v5361_v61 = vor.u32 %v7017_v52, %v5360_v51  ;;  %v4928_v37 = vld [vmem:[%s7455_s29 + $0x208] sm:$0xf]  ;;  %v6941_v45 = vld [vmem:[%s7455_s29 + $0x314] sm:$0xf0] }
 0x145   : > { %4055 = vmatpush.bf16.msrb.mxu3 %v5409_v62  ;;  %v3803_v62 = vpop.f32.mrf.mxu3  ;;  %v5184_v4 = vld [vmem:[%s7455_s29 + $0x408] sm:$0xf]  ;;  %v6973_v36 = vld [vmem:[%s7455_s29 + $0x414] sm:$0xf0] }
 0x146   : > { %4017 = vmatpush.bf16.msrb.mxu0 %v5009_v33  ;;  %v5089_v33 = vor.u32 %v6949_v1, %v5088_v60  ;;  %v8202_v15 = vadd.f32 %v3803_v62, %v3791_v7  ;;  %v5312_v46 = vld [vmem:[%s7455_s29 + $0x508] sm:$0xf]  ;;  %v7065_v51 = vld [vmem:[%s7455_s29 + $0x6f4] sm:$0xf0]  ;;  %v5185_v60 = vor.u32 %v6973_v36, %v5184_v4 }
 0x147   : > { %4030 = vmatpush.bf16.msrb.mxu1 %v5137_v9  ;;  %v5217_v9 = vor.u32 %v6981_v57, %v5216_v2  ;;  %v3779_v19 = vpop.f32.mrf.mxu1  ;;  %v5552_v50 = vld [vmem:[%s7455_s29 + $0x6e8] sm:$0xf]  ;;  %v7129_v55 = vld [vmem:[%s7455_s29 + $0x8f4] sm:$0xf0] }
 0x148   : > { %4043 = vmatpush.bf16.msrb.mxu2 %v5265_v11  ;;  %v4944_v11 = vld [vmem:[%s7455_s29 + $0x228] sm:$0xf]  ;;  %v7161_v1 = vld [vmem:[%s7455_s29 + $0x9f4] sm:$0xf0]  ;;  %v5553_v57 = vor.u32 %v7065_v51, %v5552_v50 }
 0x149   : > { %4056 = vmatpush.bf16.msrb.mxu3 %v5393_v23  ;;  %v5345_v23 = vor.u32 %v7013_v6, %v5344_v5  ;;  %v4945_v34 = vor.u32 %v6913_v12, %v4944_v11  ;;  %v5680_v52 = vld [vmem:[%s7455_s29 + $0x7e8] sm:$0xf]  ;;  %v7061_v6 = vld [vmem:[%s7455_s29 + $0x6d4] sm:$0xf0] }
 0x14a   : > { %4018 = vmatpush.bf16.msrb.mxu0 %v4993_v43  ;;  %v5073_v43 = vor.u32 %v6945_v26, %v5072_v13  ;;  %v3792_v48 = vpop.f32.mrf.mxu2  ;;  %v5536_v5 = vld [vmem:[%s7455_s29 + $0x6c8] sm:$0xf]  ;;  %v7157_v12 = vld [vmem:[%s7455_s29 + $0x9d4] sm:$0xf0] }
 0x14b   : > { %4031 = vmatpush.bf16.msrb.mxu1 %v5121_v42  ;;  %v5201_v42 = vor.u32 %v6977_v30, %v5200_v29  ;;  %v5664_v7 = vld [vmem:[%s7455_s29 + $0x7c8] sm:$0xf]  ;;  %v5537_v13 = vor.u32 %v7061_v6, %v5536_v5  ;;  %v7057_v29 = vld [vmem:[%s7455_s29 + $0x6b4] sm:$0xf0] }
 0x14c   : > { %4044 = vmatpush.bf16.msrb.mxu2 %v5249_v44  ;;  %v5056_v44 = vld [vmem:[%s7455_s29 + $0x308] sm:$0xf]  ;;  %v7089_v32 = vld [vmem:[%s7455_s29 + $0x7b4] sm:$0xf0] }
 0x14d   : > { %4057 = vmatpush.bf16.msrb.mxu3 %v5377_v47  ;;  %v7005_v47 = vld [vmem:[%s7455_s29 + $0x514] sm:$0xf0]  ;;  %v3805_v49 = vpop.f32.mrf.mxu3  ;;  %v5057_v59 = vor.u32 %v6941_v45, %v5056_v44  ;;  %v5920_v11 = vld [vmem:[%s7455_s29 + $0x9c8] sm:$0xf] }
 0x14e   : > { %4019 = vmatpush.bf16.msrb.mxu0 %v4977_v53  ;;  %v4929_v53 = vor.u32 %v6909_v40, %v4928_v37  ;;  %v5313_v2 = vor.u32 %v7005_v47, %v5312_v46  ;;  %v5520_v26 = vld [vmem:[%s7455_s29 + $0x6a8] sm:$0xf]  ;;  %v5921_v31 = vor.u32 %v7157_v12, %v5920_v11  ;;  %v7121_v37 = vld [vmem:[%s7455_s29 + $0x8b4] sm:$0xf0] }
 0x14f   : > { %4032 = vmatpush.bf16.msrb.mxu1 %v5105_v56  ;;  %v7097_v56 = vld [vmem:[%s7455_s29 + $0x7f4] sm:$0xf0]  ;;  %v5648_v30 = vld [vmem:[%s7455_s29 + $0x7a8] sm:$0xf] }
 0x150   : > { %4045 = vmatpush.bf16.msrb.mxu2 %v5233_v54  ;;  %v5808_v54 = vld [vmem:[%s7455_s29 + $0x8e8] sm:$0xf]  ;;  %v5681_v3 = vor.u32 %v7097_v56, %v5680_v52  ;;  %v5649_v44 = vor.u32 %v7089_v32, %v5648_v30  ;;  %v7085_v47 = vld [vmem:[%s7455_s29 + $0x794] sm:$0xf0] }
 0x151   : > { %4058 = vmatpush.bf16.msrb.mxu3 %v5361_v61  ;;  %v5936_v61 = vld [vmem:[%s7455_s29 + $0x9e8] sm:$0xf]  ;;  %v5809_v62 = vor.u32 %v7129_v55, %v5808_v54  ;;  %v7117_v49 = vld [vmem:[%s7455_s29 + $0x894] sm:$0xf0] }
 0x152   : > { %4020 = vmatpush.bf16.msrb.mxu0 %v4961_v63  ;;  %v5937_v8 = vor.u32 %v7161_v1, %v5936_v61  ;;  %v7093_v63 = vld [vmem:[%s7455_s29 + $0x7d4] sm:$0xf0]  ;;  %v5904_v40 = vld [vmem:[%s7455_s29 + $0x9a8] sm:$0xf] }
 0x153   : > { %4033 = vmatpush.bf16.msrb.mxu1 %v5089_v33  ;;  %v5792_v33 = vld [vmem:[%s7455_s29 + $0x8c8] sm:$0xf]  ;;  %v5665_v19 = vor.u32 %v7093_v63, %v5664_v7  ;;  %v7149_v51 = vld [vmem:[%s7455_s29 + $0x994] sm:$0xf0] }
 0x154   : > { %4046 = vmatpush.bf16.msrb.mxu2 %v5217_v9  ;;  %v7125_v9 = vld [vmem:[%s7455_s29 + $0x8d4] sm:$0xf0]  ;;  %v5504_v4 = vld [vmem:[%s7455_s29 + $0x688] sm:$0xf] }
 0x155   : > { %4059 = vmatpush.bf16.msrb.mxu3 %v5345_v23  ;;  %v5793_v23 = vor.u32 %v7125_v9, %v5792_v33  ;;  %v5632_v36 = vld [vmem:[%s7455_s29 + $0x788] sm:$0xf]  ;;  %v7145_v6 = vld [vmem:[%s7455_s29 + $0x974] sm:$0xf0] }
 0x156   : > { %4021 = vmatpush.bf16.msrb.mxu0 %v4945_v34  ;;  %v5776_v34 = vld [vmem:[%s7455_s29 + $0x8a8] sm:$0xf]  ;;  %v5633_v56 = vor.u32 %v7085_v47, %v5632_v36  ;;  %v7045_v9 = vld [vmem:[%s7455_s29 + $0x654] sm:$0xf0] }
 0x157   : > { %4034 = vmatpush.bf16.msrb.mxu1 %v5073_v43  ;;  %v7153_v43 = vld [vmem:[%s7455_s29 + $0x9b4] sm:$0xf0]  ;;  %v5777_v45 = vor.u32 %v7121_v37, %v5776_v34  ;;  %v5760_v48 = vld [vmem:[%s7455_s29 + $0x888] sm:$0xf] }
 0x158   : > { %4047 = vmatpush.bf16.msrb.mxu2 %v5201_v42  ;;  %v5521_v42 = vor.u32 %v7057_v29, %v5520_v26  ;;  %v5905_v46 = vor.u32 %v7153_v43, %v5904_v40  ;;  %v5888_v50 = vld [vmem:[%s7455_s29 + $0x988] sm:$0xf]  ;;  %v5761_v54 = vor.u32 %v7117_v49, %v5760_v48  ;;  %v7109_v26 = vld [vmem:[%s7455_s29 + $0x854] sm:$0xf0] }
 0x159   : > { %4060 = vmatpush.bf16.msrb.mxu3 %v5329_v58  ;;  %v7053_v58 = vld [vmem:[%s7455_s29 + $0x694] sm:$0xf0]  ;;  %v5488_v55 = vld [vmem:[%s7455_s29 + $0x668] sm:$0xf] }
 0x15a   : > { %4022 = vmatpush.bf16.msrb.mxu0 %v4929_v53  ;;  %v5505_v52 = vor.u32 %v7053_v58, %v5504_v4  ;;  %v3816_v53 = vpop.f32.mrf.mxu0  ;;  %v5872_v5 = vld [vmem:[%s7455_s29 + $0x968] sm:$0xf]  ;;  %v7141_v32 = vld [vmem:[%s7455_s29 + $0x954] sm:$0xf0] }
 0x15b   : > { %4035 = vmatpush.bf16.msrb.mxu1 %v5057_v59  ;;  %v7049_v59 = vld [vmem:[%s7455_s29 + $0x674] sm:$0xf0]  ;;  %v3817_v61 = vadd.f32 %v3816_v53, %v8202_v15  ;;  %v3829_v1 = vpop.f32.mrf.mxu1  ;;  %v5472_v33 = vld [vmem:[%s7455_s29 + $0x648] sm:$0xf] }
 0x15c   : > { %4048 = vmatpush.bf16.msrb.mxu2 %v5185_v60  ;;  %v5616_v60 = vld [vmem:[%s7455_s29 + $0x768] sm:$0xf]  ;;  %v5473_v34 = vor.u32 %v7045_v9, %v5472_v33  ;;  %v7105_v48 = vld [vmem:[%s7455_s29 + $0x834] sm:$0xf0] }
 0x15d   : > { %4061 = vmatpush.bf16.msrb.mxu3 %v5313_v2  ;;  %4023 = vmatmul.bf16.vlgmr.msrb.gmra.mxu0 %v7545_v0  ;;  %v5889_v2 = vor.u32 %v7149_v51, %v5888_v50  ;;  %v3830_v7 = vadd.f32 %v3829_v1, %v3817_v61  ;;  %v5600_v11 = vld [vmem:[%s7455_s29 + $0x748] sm:$0xf]  ;;  %v7137_v50 = vld [vmem:[%s7455_s29 + $0x934] sm:$0xf0] }
 0x15e   : > { %4067 = vmatpush.bf16.msra.mxu0 %v5553_v57  ;;  %4036 = vmatmul.bf16.vlgmr.msrb.gmra.mxu1 %v7561_v17  ;;  %v7081_v57 = vld [vmem:[%s7455_s29 + $0x774] sm:$0xf0]  ;;  %v5584_v4 = vld [vmem:[%s7455_s29 + $0x728] sm:$0xf] }
 0x15f   : > { %4080 = vmatpush.bf16.msra.mxu1 %v5681_v3  ;;  %4049 = vmatmul.bf16.vlgmr.msrb.gmra.mxu2 %v7624_v38  ;;  %v5744_v3 = vld [vmem:[%s7455_s29 + $0x868] sm:$0xf]  ;;  %v5617_v15 = vor.u32 %v7081_v57, %v5616_v60  ;;  %v7037_v53 = vld [vmem:[%s7455_s29 + $0x614] sm:$0xf0] }
 0x160   : > { %4093 = vmatpush.bf16.msra.mxu2 %v5809_v62  ;;  %4062 = vmatmul.bf16.vlgmr.msrb.gmra.mxu3 %v7628_v41  ;;  %v7113_v62 = vld [vmem:[%s7455_s29 + $0x874] sm:$0xf0]  ;;  %v5712_v47 = vld [vmem:[%s7455_s29 + $0x828] sm:$0xf] }
 0x161   : > { %4106 = vmatpush.bf16.msra.mxu3 %v5937_v8  ;;  %v5489_v8 = vor.u32 %v7049_v59, %v5488_v55  ;;  %v5745_v63 = vor.u32 %v7113_v62, %v5744_v3  ;;  %v5840_v49 = vld [vmem:[%s7455_s29 + $0x928] sm:$0xf]  ;;  %v7069_v59 = vld [vmem:[%s7455_s29 + $0x714] sm:$0xf0] }
 0x162   : > { %4068 = vmatpush.bf16.msra.mxu0 %v5537_v13  ;;  %v3842_v12 = vpop.f32.mrf.mxu2  ;;  %v5873_v13 = vor.u32 %v7145_v6, %v5872_v5  ;;  %v3818_v40 = vpop.f32.mrf.mxu0  ;;  %v5568_v55 = vld [vmem:[%s7455_s29 + $0x708] sm:$0xf]  ;;  %v5841_v1 = vor.u32 %v7137_v50, %v5840_v49  ;;  %v7133_v3 = vld [vmem:[%s7455_s29 + $0x914] sm:$0xf0] }
 0x163   : > { %4081 = vmatpush.bf16.msra.mxu1 %v5665_v19  ;;  %v7077_v19 = vld [vmem:[%s7455_s29 + $0x754] sm:$0xf0]  ;;  %v3843_v29 = vadd.f32 %v3842_v12, %v3830_v7  ;;  %v3855_v30 = vpop.f32.mrf.mxu3  ;;  %v3831_v58 = vpop.f32.mrf.mxu1  ;;  %v5696_v60 = vld [vmem:[%s7455_s29 + $0x808] sm:$0xf]  ;;  %v5569_v9 = vor.u32 %v7069_v59, %v5568_v55 }
 0x164   : > { %4094 = vmatpush.bf16.msra.mxu2 %v5793_v23  ;;  %v5728_v23 = vld [vmem:[%s7455_s29 + $0x848] sm:$0xf]  ;;  %v5601_v43 = vor.u32 %v7077_v19, %v5600_v11  ;;  %v7193_v6 = vld [vmem:[%s7455_s29 + $0xaf4] sm:$0xf0] }
 0x165   : > { %4107 = vmatpush.bf16.msra.mxu3 %v5921_v31  ;;  %v5856_v31 = vld [vmem:[%s7455_s29 + $0x948] sm:$0xf]  ;;  %v8270_v37 = vadd.f32 %v3855_v30, %v3843_v29  ;;  %v7257_v33 = vld [vmem:[%s7455_s29 + $0xcf4] sm:$0xf0] }
 0x166   : > { %4069 = vmatpush.bf16.msra.mxu0 %v5521_v42  ;;  %v5729_v42 = vor.u32 %v7109_v26, %v5728_v23  ;;  %v5857_v36 = vor.u32 %v7141_v32, %v5856_v31  ;;  %v5824_v57 = vld [vmem:[%s7455_s29 + $0x908] sm:$0xf]  ;;  %v7189_v31 = vld [vmem:[%s7455_s29 + $0xad4] sm:$0xf0] }
 0x167   : > { %4082 = vmatpush.bf16.msra.mxu1 %v5649_v44  ;;  %v5456_v44 = vld [vmem:[%s7455_s29 + $0x628] sm:$0xf]  ;;  %v5825_v19 = vor.u32 %v7133_v3, %v5824_v57  ;;  %v7221_v40 = vld [vmem:[%s7455_s29 + $0xbd4] sm:$0xf0] }
 0x168   : > { %4095 = vmatpush.bf16.msra.mxu2 %v5777_v45  ;;  %v7041_v45 = vld [vmem:[%s7455_s29 + $0x634] sm:$0xf0]  ;;  %v6064_v5 = vld [vmem:[%s7455_s29 + $0xae8] sm:$0xf] }
 0x169   : > { %4108 = vmatpush.bf16.msra.mxu3 %v5905_v46  ;;  %v7073_v46 = vld [vmem:[%s7455_s29 + $0x734] sm:$0xf0]  ;;  %v5457_v51 = vor.u32 %v7041_v45, %v5456_v44  ;;  %v6192_v7 = vld [vmem:[%s7455_s29 + $0xbe8] sm:$0xf]  ;;  %v6065_v23 = vor.u32 %v7193_v6, %v6064_v5 }
 0x16a   : > { %4070 = vmatpush.bf16.msra.mxu0 %v5505_v52  ;;  %v5440_v52 = vld [vmem:[%s7455_s29 + $0x608] sm:$0xf]  ;;  %v3844_v61 = vpop.f32.mrf.mxu2  ;;  %v7285_v45 = vld [vmem:[%s7455_s29 + $0xdd4] sm:$0xf0] }
 0x16b   : > { %4083 = vmatpush.bf16.msra.mxu1 %v5633_v56  ;;  %v5585_v56 = vor.u32 %v7073_v46, %v5584_v4  ;;  %v3857_v62 = vpop.f32.mrf.mxu3  ;;  %v6448_v12 = vld [vmem:[%s7455_s29 + $0xde8] sm:$0xf]  ;;  %v7217_v50 = vld [vmem:[%s7455_s29 + $0xbb4] sm:$0xf0] }
 0x16c   : > { %4096 = vmatpush.bf16.msra.mxu2 %v5761_v54  ;;  %v5713_v54 = vor.u32 %v7105_v48, %v5712_v47  ;;  %v6048_v30 = vld [vmem:[%s7455_s29 + $0xac8] sm:$0xf]  ;;  %v7185_v47 = vld [vmem:[%s7455_s29 + $0xab4] sm:$0xf0] }
 0x16d   : > { %4109 = vmatpush.bf16.msra.mxu3 %v5889_v2  ;;  %v7101_v2 = vld [vmem:[%s7455_s29 + $0x814] sm:$0xf0]  ;;  %v6176_v32 = vld [vmem:[%s7455_s29 + $0xbc8] sm:$0xf]  ;;  %v6049_v4 = vor.u32 %v7189_v31, %v6048_v30 }
 0x16e   : > { %4071 = vmatpush.bf16.msra.mxu0 %v5489_v8  ;;  %v5441_v8 = vor.u32 %v7037_v53, %v5440_v52  ;;  %v5697_v11 = vor.u32 %v7101_v2, %v5696_v60  ;;  %v6432_v44 = vld [vmem:[%s7455_s29 + $0xdc8] sm:$0xf]  ;;  %v6177_v58 = vor.u32 %v7221_v40, %v6176_v32  ;;  %v7249_v52 = vld [vmem:[%s7455_s29 + $0xcb4] sm:$0xf0] }
 0x16f   : > { %4084 = vmatpush.bf16.msra.mxu1 %v5617_v15  ;;  %v7225_v15 = vld [vmem:[%s7455_s29 + $0xbf4] sm:$0xf0]  ;;  %v6032_v46 = vld [vmem:[%s7455_s29 + $0xaa8] sm:$0xf]  ;;  %v6433_v49 = vor.u32 %v7285_v45, %v6432_v44 }
 0x170   : > { %4097 = vmatpush.bf16.msra.mxu2 %v5745_v63  ;;  %v6320_v63 = vld [vmem:[%s7455_s29 + $0xce8] sm:$0xf]  ;;  %v6193_v26 = vor.u32 %v7225_v15, %v6192_v7  ;;  %v7181_v61 = vld [vmem:[%s7455_s29 + $0xa94] sm:$0xf0] }
 0x171   : > { %4110 = vmatpush.bf16.msra.mxu3 %v5873_v13  ;;  %v7289_v13 = vld [vmem:[%s7455_s29 + $0xdf4] sm:$0xf0]  ;;  %v6321_v29 = vor.u32 %v7257_v33, %v6320_v63  ;;  %v6160_v48 = vld [vmem:[%s7455_s29 + $0xba8] sm:$0xf] }
 0x172   : > { %4072 = vmatpush.bf16.msra.mxu0 %v5473_v34  ;;  %v6449_v34 = vor.u32 %v7289_v13, %v6448_v12  ;;  %v6416_v53 = vld [vmem:[%s7455_s29 + $0xda8] sm:$0xf]  ;;  %v6161_v55 = vor.u32 %v7217_v50, %v6160_v48  ;;  %v7213_v57 = vld [vmem:[%s7455_s29 + $0xb94] sm:$0xf0] }
 0x173   : > { %4085 = vmatpush.bf16.msra.mxu1 %v5601_v43  ;;  %v6304_v43 = vld [vmem:[%s7455_s29 + $0xcc8] sm:$0xf]  ;;  %v7245_v62 = vld [vmem:[%s7455_s29 + $0xc94] sm:$0xf0] }
 0x174   : > { %4098 = vmatpush.bf16.msra.mxu2 %v5729_v42  ;;  %v7253_v42 = vld [vmem:[%s7455_s29 + $0xcd4] sm:$0xf0]  ;;  %v6016_v60 = vld [vmem:[%s7455_s29 + $0xa88] sm:$0xf] }
 0x175   : > { %4111 = vmatpush.bf16.msra.mxu3 %v5857_v36  ;;  %v6305_v36 = vor.u32 %v7253_v42, %v6304_v43  ;;  %v6272_v3 = vld [vmem:[%s7455_s29 + $0xc88] sm:$0xf]  ;;  %v7277_v7 = vld [vmem:[%s7455_s29 + $0xd94] sm:$0xf0] }
 0x176   : > { %4073 = vmatpush.bf16.msra.mxu0 %v5457_v51  ;;  %v6288_v51 = vld [vmem:[%s7455_s29 + $0xca8] sm:$0xf]  ;;  %v6273_v33 = vor.u32 %v7245_v62, %v6272_v3  ;;  %v7273_v30 = vld [vmem:[%s7455_s29 + $0xd74] sm:$0xf0] }
 0x177   : > { %4086 = vmatpush.bf16.msra.mxu1 %v5585_v56  ;;  %v7281_v56 = vld [vmem:[%s7455_s29 + $0xdb4] sm:$0xf0]  ;;  %v6289_v59 = vor.u32 %v7249_v52, %v6288_v51  ;;  %v6400_v6 = vld [vmem:[%s7455_s29 + $0xd88] sm:$0xf] }
 0x178   : > { %4099 = vmatpush.bf16.msra.mxu2 %v5713_v54  ;;  %v6033_v54 = vor.u32 %v7185_v47, %v6032_v46  ;;  %v6417_v2 = vor.u32 %v7281_v56, %v6416_v53  ;;  %v6128_v12 = vld [vmem:[%s7455_s29 + $0xb68] sm:$0xf]  ;;  %v6401_v13 = vor.u32 %v7277_v7, %v6400_v6  ;;  %v7173_v43 = vld [vmem:[%s7455_s29 + $0xa54] sm:$0xf0] }
 0x179   : > { %4112 = vmatpush.bf16.msra.mxu3 %v5841_v1  ;;  %v6144_v1 = vld [vmem:[%s7455_s29 + $0xb88] sm:$0xf]  ;;  %v7269_v48 = vld [vmem:[%s7455_s29 + $0xd54] sm:$0xf0] }
 0x17a   : > { %4074 = vmatpush.bf16.msra.mxu0 %v5441_v8  ;;  %v8322_v5 = vpop.f32.mrf.mxu0  ;;  %v6017_v8 = vor.u32 %v7181_v61, %v6016_v60  ;;  %v6145_v63 = vor.u32 %v7213_v57, %v6144_v1  ;;  %v5984_v40 = vld [vmem:[%s7455_s29 + $0xa48] sm:$0xf]  ;;  %v7201_v60 = vld [vmem:[%s7455_s29 + $0xb34] sm:$0xf0] }
 0x17b   : > { %4087 = vmatpush.bf16.msra.mxu1 %v5569_v9  ;;  %v8326_v15 = vpop.f32.mrf.mxu1  ;;  %v6000_v9 = vld [vmem:[%s7455_s29 + $0xa68] sm:$0xf]  ;;  %v5985_v50 = vor.u32 %v7173_v43, %v5984_v40  ;;  %v7233_v1 = vld [vmem:[%s7455_s29 + $0xc34] sm:$0xf0] }
 0x17c   : > { %4100 = vmatpush.bf16.msra.mxu2 %v5697_v11  ;;  %v7177_v11 = vld [vmem:[%s7455_s29 + $0xa74] sm:$0xf0]  ;;  %v6112_v42 = vld [vmem:[%s7455_s29 + $0xb48] sm:$0xf] }
 0x17d   : > { %4113 = vmatpush.bf16.msra.mxu3 %v5825_v19  ;;  %4075 = vmatmul.bf16.vlgmr.msra.gmra.mxu0 %v7620_v35  ;;  %v7209_v19 = vld [vmem:[%s7455_s29 + $0xb74] sm:$0xf0]  ;;  %v6001_v31 = vor.u32 %v7177_v11, %v6000_v9  ;;  %v6368_v47 = vld [vmem:[%s7455_s29 + $0xd48] sm:$0xf] }
 0x17e   : > { %4119 = vmatpush.bf16.msrb.mxu0 %v6065_v23  ;;  %4088 = vmatmul.bf16.vlgmr.msra.gmra.mxu1 %v7626_v39  ;;  %v6256_v23 = vld [vmem:[%s7455_s29 + $0xc68] sm:$0xf]  ;;  %v6129_v32 = vor.u32 %v7209_v19, %v6128_v12  ;;  %v7265_v57 = vld [vmem:[%s7455_s29 + $0xd34] sm:$0xf0] }
 0x17f   : > { %4132 = vmatpush.bf16.msrb.mxu1 %v6193_v26  ;;  %4101 = vmatmul.bf16.vlgmr.msra.gmra.mxu2 %v7697_v20  ;;  %v7241_v26 = vld [vmem:[%s7455_s29 + $0xc74] sm:$0xf0]  ;;  %v5968_v56 = vld [vmem:[%s7455_s29 + $0xa28] sm:$0xf] }
 0x180   : > { %4145 = vmatpush.bf16.msrb.mxu2 %v6321_v29  ;;  %4114 = vmatmul.bf16.vlgmr.msra.gmra.mxu3 %v7704_v25  ;;  %v6384_v29 = vld [vmem:[%s7455_s29 + $0xd68] sm:$0xf]  ;;  %v7165_v6 = vld [vmem:[%s7455_s29 + $0xa14] sm:$0xf0] }
 0x181   : > { %4158 = vmatpush.bf16.msrb.mxu3 %v6449_v34  ;;  %v6257_v34 = vor.u32 %v7241_v26, %v6256_v23  ;;  %v6385_v44 = vor.u32 %v7273_v30, %v6384_v29  ;;  %v6224_v61 = vld [vmem:[%s7455_s29 + $0xc28] sm:$0xf]  ;;  %v7229_v12 = vld [vmem:[%s7455_s29 + $0xc14] sm:$0xf0] }
 0x182   : > { %4120 = vmatpush.bf16.msrb.mxu0 %v6049_v4  ;;  %v8339_v45 = vpop.f32.mrf.mxu2  ;;  %v7205_v4 = vld [vmem:[%s7455_s29 + $0xb54] sm:$0xf0]  ;;  %v5952_v62 = vld [vmem:[%s7455_s29 + $0xa08] sm:$0xf] }
 0x183   : > { %4133 = vmatpush.bf16.msrb.mxu1 %v6177_v58  ;;  %v6240_v58 = vld [vmem:[%s7455_s29 + $0xc48] sm:$0xf]  ;;  %v8344_v46 = vpop.f32.mrf.mxu3  ;;  %v3883_v51 = vpop.f32.mrf.mxu1  ;;  %v6113_v52 = vor.u32 %v7205_v4, %v6112_v42  ;;  %v7261_v19 = vld [vmem:[%s7455_s29 + $0xd14] sm:$0xf0]  ;;  %v6871_v4 = vld [vmem:[%s7455_s29 + $0xec] sm:$0xf] }
 0x184   : > { %4146 = vmatpush.bf16.msrb.mxu2 %v6305_v36  ;;  %v7237_v36 = vld [vmem:[%s7455_s29 + $0xc54] sm:$0xf0]  ;;  %v6208_v9 = vld [vmem:[%s7455_s29 + $0xc08] sm:$0xf] }
 0x185   : > { %4159 = vmatpush.bf16.msrb.mxu3 %v6433_v49  ;;  %v3870_v49 = vpop.f32.mrf.mxu0  ;;  %v6241_v53 = vor.u32 %v7237_v36, %v6240_v58  ;;  %v6576_v26 = vld [vmem:[%s7455_s29 + $0xee8] sm:$0xf]  ;;  %v7321_v29 = vld [vmem:[%s7455_s29 + $0xef4] sm:$0xf0]  ;;  %v4786_v58 = vld [vmem:[%s7455_s29 + $0xf8] sm:$0xf0] }
 0x186   : > { %4121 = vmatpush.bf16.msrb.mxu0 %v6033_v54  ;;  %v7169_v54 = vld [vmem:[%s7455_s29 + $0xa34] sm:$0xf0]  ;;  %v6704_v30 = vld [vmem:[%s7455_s29 + $0xfe8] sm:$0xf] }
 0x187   : > { %4134 = vmatpush.bf16.msrb.mxu1 %v6161_v55  ;;  %v6096_v55 = vld [vmem:[%s7455_s29 + $0xb28] sm:$0xf]  ;;  %v5969_v3 = vor.u32 %v7169_v54, %v5968_v56  ;;  %v7385_v43 = vld [vmem:[%s7455_s29 + $0x10f4] sm:$0xf0] }
 0x188   : > { %4147 = vmatpush.bf16.msrb.mxu2 %v6289_v59  ;;  %v6369_v59 = vor.u32 %v7269_v48, %v6368_v47  ;;  %v6097_v7 = vor.u32 %v7201_v60, %v6096_v55  ;;  %v6832_v40 = vld [vmem:[%s7455_s29 + $0x10e8] sm:$0xf]  ;;  %v6577_v47 = vor.u32 %v7321_v29, %v6576_v26  ;;  %v7317_v51 = vld [vmem:[%s7455_s29 + $0xed4] sm:$0xf0]  ;;  %v4770_v60 = vld [vmem:[%s7455_s29 + $0xd8] sm:$0xf0] }
 0x189   : > { %4160 = vmatpush.bf16.msrb.mxu3 %v6417_v2  ;;  %v6352_v2 = vld [vmem:[%s7455_s29 + $0xd28] sm:$0xf]  ;;  %v6833_v49 = vor.u32 %v7385_v43, %v6832_v40  ;;  %v7349_v56 = vld [vmem:[%s7455_s29 + $0xfd4] sm:$0xf0]  ;;  %v6859_v40 = vld [vmem:[%s7455_s29 + $0x8c] sm:$0xf] }
 0x18a   : > { %4122 = vmatpush.bf16.msrb.mxu0 %v6017_v8  ;;  %v6225_v8 = vor.u32 %v7233_v1, %v6224_v61  ;;  %v6353_v11 = vor.u32 %v7265_v57, %v6352_v2  ;;  %v3896_v23 = vpop.f32.mrf.mxu2  ;;  %v6816_v54 = vld [vmem:[%s7455_s29 + $0x10c8] sm:$0xf]  ;;  %v7381_v55 = vld [vmem:[%s7455_s29 + $0x10d4] sm:$0xf0]  ;;  %v4738_v43 = vld [vmem:[%s7455_s29 + $0x98] sm:$0xf0] }
 0x18b   : > { %4135 = vmatpush.bf16.msrb.mxu1 %v6145_v63  ;;  %v6080_v63 = vld [vmem:[%s7455_s29 + $0xb08] sm:$0xf]  ;;  %v6817_v2 = vor.u32 %v7381_v55, %v6816_v54  ;;  %v7309_v23 = vld [vmem:[%s7455_s29 + $0xe94] sm:$0xf0] }
 0x18c   : > { %4148 = vmatpush.bf16.msrb.mxu2 %v6273_v33  ;;  %v7197_v33 = vld [vmem:[%s7455_s29 + $0xb14] sm:$0xf0]  ;;  %v6544_v57 = vld [vmem:[%s7455_s29 + $0xea8] sm:$0xf] }
 0x18d   : > { %4161 = vmatpush.bf16.msrb.mxu3 %v6401_v13  ;;  %v6336_v13 = vld [vmem:[%s7455_s29 + $0xd08] sm:$0xf]  ;;  %v6081_v42 = vor.u32 %v7197_v33, %v6080_v63  ;;  %v7377_v63 = vld [vmem:[%s7455_s29 + $0x10b4] sm:$0xf0]  ;;  %v6863_v33 = vld [vmem:[%s7455_s29 + $0xac] sm:$0xf] }
 0x18e   : > { %4123 = vmatpush.bf16.msrb.mxu0 %v6001_v31  ;;  %v3909_v31 = vpop.f32.mrf.mxu3  ;;  %v6337_v36 = vor.u32 %v7261_v19, %v6336_v13  ;;  %v6528_v19 = vld [vmem:[%s7455_s29 + $0xe88] sm:$0xf] }
 0x18f   : > { %4136 = vmatpush.bf16.msrb.mxu1 %v6129_v32  ;;  %v5953_v32 = vor.u32 %v7165_v6, %v5952_v62  ;;  %v6672_v62 = vld [vmem:[%s7455_s29 + $0xfa8] sm:$0xf] }
 0x190   : > { %4149 = vmatpush.bf16.msrb.mxu2 %v6257_v34  ;;  %v7353_v34 = vld [vmem:[%s7455_s29 + $0xff4] sm:$0xf0]  ;;  %v6656_v26 = vld [vmem:[%s7455_s29 + $0xf88] sm:$0xf] }
 0x191   : > { %4162 = vmatpush.bf16.msrb.mxu3 %v6385_v44  ;;  %v6209_v44 = vor.u32 %v7229_v12, %v6208_v9  ;;  %v6705_v48 = vor.u32 %v7353_v34, %v6704_v30  ;;  %v4754_v9 = vld [vmem:[%s7455_s29 + $0xb8] sm:$0xf0]  ;;  %v7341_v30 = vld [vmem:[%s7455_s29 + $0xf94] sm:$0xf0]  ;;  %v6784_v31 = vld [vmem:[%s7455_s29 + $0x1088] sm:$0xf] }
 0x192   : > { %4124 = vmatpush.bf16.msrb.mxu0 %v5985_v50  ;;  %v6560_v50 = vld [vmem:[%s7455_s29 + $0xec8] sm:$0xf]  ;;  %v4757_v29 = vor.u32 %v6863_v33, %v4754_v9  ;;  %v4706_v33 = vld [vmem:[%s7455_s29 + $0x58] sm:$0xf0] }
 0x193   : > { %4137 = vmatpush.bf16.msrb.mxu1 %v6113_v52  ;;  %v6688_v52 = vld [vmem:[%s7455_s29 + $0xfc8] sm:$0xf]  ;;  %v6561_v61 = vor.u32 %v7317_v51, %v6560_v50  ;;  %v7337_v50 = vld [vmem:[%s7455_s29 + $0xf74] sm:$0xf0] }
 0x194   : > { %4150 = vmatpush.bf16.msrb.mxu2 %v6241_v53  ;;  %v4789_v53 = vor.u32 %v6871_v4, %v4786_v58  ;;  %v6689_v1 = vor.u32 %v7349_v56, %v6688_v52  ;;  %v6657_v4 = vor.u32 %v7341_v30, %v6656_v26  ;;  %v6768_v51 = vld [vmem:[%s7455_s29 + $0x1068] sm:$0xf]  ;;  %v7369_v52 = vld [vmem:[%s7455_s29 + $0x1074] sm:$0xf0]  ;;  %v4722_v56 = vld [vmem:[%s7455_s29 + $0x78] sm:$0xf0] }
 0x195   : > { %4163 = vmatpush.bf16.msrb.mxu3 %v6369_v59  ;;  %v6867_v59 = vld [vmem:[%s7455_s29 + $0xcc] sm:$0xf]  ;;  %v7329_v30 = vld [vmem:[%s7455_s29 + $0xf34] sm:$0xf0] }
 0x196   : > { %4125 = vmatpush.bf16.msrb.mxu0 %v5969_v3  ;;  %v7313_v3 = vld [vmem:[%s7455_s29 + $0xeb4] sm:$0xf0]  ;;  %v4773_v6 = vor.u32 %v6867_v59, %v4770_v60  ;;  %v6769_v59 = vor.u32 %v7369_v52, %v6768_v51  ;;  %v6496_v60 = vld [vmem:[%s7455_s29 + $0xe48] sm:$0xf]  ;;  %v6843_v52 = vld [vmem:[%s7455_s29 + $0xc] sm:$0xf] }
 0x197   : > { %4138 = vmatpush.bf16.msrb.mxu1 %v6097_v7  ;;  %v7345_v7 = vld [vmem:[%s7455_s29 + $0xfb4] sm:$0xf0] }
 0x198   : > { %4151 = vmatpush.bf16.msrb.mxu2 %v6225_v8  ;;  %v6800_v8 = vld [vmem:[%s7455_s29 + $0x10a8] sm:$0xf]  ;;  %v6673_v12 = vor.u32 %v7345_v7, %v6672_v62  ;;  %v7333_v62 = vld [vmem:[%s7455_s29 + $0xf54] sm:$0xf0] }
 0x199   : > { %4164 = vmatpush.bf16.msrb.mxu3 %v6353_v11  ;;  %v6545_v11 = vor.u32 %v7313_v3, %v6544_v57  ;;  %v6801_v13 = vor.u32 %v7377_v63, %v6800_v8  ;;  %v7365_v7 = vld [vmem:[%s7455_s29 + $0x1054] sm:$0xf0]  ;;  %v6851_v63 = vld [vmem:[%s7455_s29 + $0x4c] sm:$0xf] }
 0x19a   : > { %4126 = vmatpush.bf16.msrb.mxu0 %v5953_v32  ;;  %v7373_v32 = vld [vmem:[%s7455_s29 + $0x1094] sm:$0xf0]  ;;  %v8398_v34 = vpop.f32.mrf.mxu0 }
 0x19b   : > { %4139 = vmatpush.bf16.msrb.mxu1 %v6081_v42  ;;  %v6529_v42 = vor.u32 %v7309_v23, %v6528_v19  ;;  %v6785_v58 = vor.u32 %v7373_v32, %v6784_v31  ;;  %v7297_v19 = vld [vmem:[%s7455_s29 + $0xe34] sm:$0xf0]  ;;  %v6608_v23 = vld [vmem:[%s7455_s29 + $0xf28] sm:$0xf] }
 0x19c   : > { %4152 = vmatpush.bf16.msrb.mxu2 %v6209_v44  ;;  %v8402_v44 = vpop.f32.mrf.mxu1  ;;  %v6736_v31 = vld [vmem:[%s7455_s29 + $0x1028] sm:$0xf]  ;;  %v7361_v32 = vld [vmem:[%s7455_s29 + $0x1034] sm:$0xf0] }
 0x19d   : > { %4165 = vmatpush.bf16.msrb.mxu3 %v6337_v36  ;;  %4127 = vmatmul.bf16.vlgmr.msrb.gmra.mxu0 %v7702_v24  ;;  %v6512_v36 = vld [vmem:[%s7455_s29 + $0xe68] sm:$0xf]  ;;  %v7357_v51 = vld [vmem:[%s7455_s29 + $0x1014] sm:$0xf0] }
 0x19e   : > { %4171 = vmatpush.bf16.msra.mxu0 %v6577_v47  ;;  %4140 = vmatmul.bf16.vlgmr.msrb.gmra.mxu1 %v7708_v28  ;;  %v7305_v47 = vld [vmem:[%s7455_s29 + $0xe74] sm:$0xf0] }
 0x19f   : > { %4184 = vmatpush.bf16.msra.mxu1 %v6705_v48  ;;  %4153 = vmatmul.bf16.vlgmr.msrb.gmra.mxu2 %v7777_v14  ;;  %v6640_v48 = vld [vmem:[%s7455_s29 + $0xf68] sm:$0xf]  ;;  %v6513_v54 = vor.u32 %v7305_v47, %v6512_v36  ;;  %v6609_v36 = vor.u32 %v7329_v30, %v6608_v23  ;;  %v6737_v47 = vor.u32 %v7361_v32, %v6736_v31  ;;  %v5154_v30 = vld [vmem:[%s7455_s29 + $0x3d8] sm:$0xf0] }
 0x1a0   : > { %4197 = vmatpush.bf16.msra.mxu2 %v6833_v49  ;;  %4166 = vmatmul.bf16.vlgmr.msrb.gmra.mxu3 %v7784_v22  ;;  %v4741_v49 = vor.u32 %v6859_v40, %v4738_v43  ;;  %v6641_v55 = vor.u32 %v7337_v50, %v6640_v48  ;;  %v6847_v40 = vld [vmem:[%s7455_s29 + $0x2c] sm:$0xf]  ;;  %v4690_v43 = vld [vmem:[%s7455_s29 + $0x38] sm:$0xf0]  ;;  %v6592_v48 = vld [vmem:[%s7455_s29 + $0xf08] sm:$0xf] }
 0x1a1   : > { %4210 = vmatpush.bf16.msra.mxu3 %v4789_v53  ;;  %v6855_v53 = vld [vmem:[%s7455_s29 + $0x6c] sm:$0xf]  ;;  %v6720_v50 = vld [vmem:[%s7455_s29 + $0x1008] sm:$0xf]  ;;  %v5282_v31 = vld [vmem:[%s7455_s29 + $0x4d8] sm:$0xf0] }
 0x1a2   : > { %4172 = vmatpush.bf16.msra.mxu0 %v6561_v61  ;;  %v7301_v61 = vld [vmem:[%s7455_s29 + $0xe54] sm:$0xf0]  ;;  %v4725_v57 = vor.u32 %v6855_v53, %v4722_v56  ;;  %v8417_v3 = vpop.f32.mrf.mxu2  ;;  %v3922_v9 = vpop.f32.mrf.mxu0  ;;  %v4674_v53 = vld [vmem:[%s7455_s29 + $0x18] sm:$0xf0] }
 0x1a3   : > { %4185 = vmatpush.bf16.msra.mxu1 %v6689_v1  ;;  %v6624_v1 = vld [vmem:[%s7455_s29 + $0xf48] sm:$0xf]  ;;  %v8422_v8 = vpop.f32.mrf.mxu3 }
 0x1a4   : > { %4198 = vmatpush.bf16.msra.mxu2 %v6817_v2  ;;  %v3869_v2 = vadd.f32 %v8322_v5, %v8270_v37  ;;  %v6497_v37 = vor.u32 %v7301_v61, %v6496_v60  ;;  %v3935_v5 = vpop.f32.mrf.mxu1 }
 0x1a5   : > { %4211 = vmatpush.bf16.msra.mxu3 %v4773_v6  ;;  %v6752_v6 = vld [vmem:[%s7455_s29 + $0x1048] sm:$0xf] }
 0x1a6   : > { %4173 = vmatpush.bf16.msra.mxu0 %v6545_v11  ;;  %v6625_v11 = vor.u32 %v7333_v62, %v6624_v1  ;;  %v3882_v26 = vadd.f32 %v8326_v15, %v3869_v2  ;;  %v7293_v15 = vld [vmem:[%s7455_s29 + $0xe14] sm:$0xf0]  ;;  %v5042_v2 = vld [vmem:[%s7455_s29 + $0x2f8] sm:$0xf0] }
 0x1a7   : > { %4186 = vmatpush.bf16.msra.mxu1 %v6673_v12  ;;  %v6753_v12 = vor.u32 %v7365_v7, %v6752_v6  ;;  %v5170_v62 = vld [vmem:[%s7455_s29 + $0x3f8] sm:$0xf0]  ;;  %v6721_v7 = vor.u32 %v7357_v51, %v6720_v50  ;;  %v6991_v50 = vld [vmem:[%s7455_s29 + $0x4ac] sm:$0xf] }
 0x1a8   : > { %4199 = vmatpush.bf16.msra.mxu2 %v6801_v13  ;;  %v6480_v13 = vld [vmem:[%s7455_s29 + $0xe28] sm:$0xf] }
 0x1a9   : > { %4212 = vmatpush.bf16.msra.mxu3 %v4757_v29  ;;  %v4709_v29 = vor.u32 %v6851_v63, %v4706_v33  ;;  %v6999_v63 = vld [vmem:[%s7455_s29 + $0x4ec] sm:$0xf]  ;;  %v5298_v33 = vld [vmem:[%s7455_s29 + $0x4f8] sm:$0xf0] }
 0x1aa   : > { %4174 = vmatpush.bf16.msra.mxu0 %v6529_v42  ;;  %v3895_v42 = vadd.f32 %v8339_v45, %v3882_v26  ;;  %v4693_v45 = vor.u32 %v6847_v40, %v4690_v43  ;;  %v3948_v56 = vpop.f32.mrf.mxu2  ;;  %v5301_v23 = vor.u32 %v6999_v63, %v5298_v33  ;;  %v5026_v26 = vld [vmem:[%s7455_s29 + $0x2d8] sm:$0xf0] }
 0x1ab   : > { %4187 = vmatpush.bf16.msra.mxu1 %v6657_v4  ;;  %v6481_v4 = vor.u32 %v7297_v19, %v6480_v13  ;;  %v3961_v60 = vpop.f32.mrf.mxu3  ;;  %v4898_v13 = vld [vmem:[%s7455_s29 + $0x1d8] sm:$0xf0]  ;;  %v6931_v19 = vld [vmem:[%s7455_s29 + $0x2cc] sm:$0xf] }
 0x1ac   : > { %4200 = vmatpush.bf16.msra.mxu2 %v6785_v58  ;;  %v6464_v58 = vld [vmem:[%s7455_s29 + $0xe08] sm:$0xf]  ;;  %v3908_v61 = vadd.f32 %v8344_v46, %v3895_v42  ;;  %v4677_v46 = vor.u32 %v6843_v52, %v4674_v53  ;;  %v5029_v43 = vor.u32 %v6931_v19, %v5026_v26  ;;  %v6891_v53 = vld [vmem:[%s7455_s29 + $0x18c] sm:$0xf]  ;;  %v4866_v56 = vld [vmem:[%s7455_s29 + $0x198] sm:$0xf0] }
 0x1ad   : > { %4213 = vmatpush.bf16.msra.mxu3 %v4741_v49  ;;  %v7325_v49 = vld [vmem:[%s7455_s29 + $0xf14] sm:$0xf0]  ;;  %v6465_v1 = vor.u32 %v7293_v15, %v6464_v58  ;;  %v4882_v58 = vld [vmem:[%s7455_s29 + $0x1b8] sm:$0xf0]  ;;  %v6927_v15 = vld [vmem:[%s7455_s29 + $0x2ac] sm:$0xf] }
 0x1ae   : > { %4175 = vmatpush.bf16.msra.mxu0 %v6513_v54  ;;  %v6903_v54 = vld [vmem:[%s7455_s29 + $0x1ec] sm:$0xf]  ;;  %v6593_v6 = vor.u32 %v7325_v49, %v6592_v48  ;;  %v3921_v9 = vadd.f32 %v8398_v34, %v3908_v61  ;;  %v5138_v49 = vld [vmem:[%s7455_s29 + $0x3b8] sm:$0xf0] }
 0x1af   : > { %4188 = vmatpush.bf16.msra.mxu1 %v6641_v55  ;;  %v4914_v55 = vld [vmem:[%s7455_s29 + $0x1f8] sm:$0xf0]  ;;  %v6995_v34 = vld [vmem:[%s7455_s29 + $0x4cc] sm:$0xf] }
 0x1b0   : > { %4201 = vmatpush.bf16.msra.mxu2 %v6769_v59  ;;  %v6935_v59 = vld [vmem:[%s7455_s29 + $0x2ec] sm:$0xf]  ;;  %v3934_v32 = vadd.f32 %v8402_v44, %v3921_v9  ;;  %v5285_v44 = vor.u32 %v6995_v34, %v5282_v31  ;;  %v4994_v60 = vld [vmem:[%s7455_s29 + $0x298] sm:$0xf0] }
 0x1b1   : > { %4214 = vmatpush.bf16.msra.mxu3 %v4725_v57  ;;  %v6967_v57 = vld [vmem:[%s7455_s29 + $0x3ec] sm:$0xf]  ;;  %v5045_v5 = vor.u32 %v6935_v59, %v5042_v2  ;;  %v5106_v19 = vld [vmem:[%s7455_s29 + $0x378] sm:$0xf0] }
 0x1b2   : > { %4176 = vmatpush.bf16.msra.mxu0 %v6497_v37  ;;  %v4917_v37 = vor.u32 %v6903_v54, %v4914_v55  ;;  %v6959_v48 = vld [vmem:[%s7455_s29 + $0x3ac] sm:$0xf]  ;;  %v5234_v26 = vld [vmem:[%s7455_s29 + $0x478] sm:$0xf0] }
 0x1b3   : > { %4189 = vmatpush.bf16.msra.mxu1 %v6625_v11  ;;  %v5173_v11 = vor.u32 %v6967_v57, %v5170_v62  ;;  %v5141_v52 = vor.u32 %v6959_v48, %v5138_v49  ;;  %v6923_v54 = vld [vmem:[%s7455_s29 + $0x28c] sm:$0xf]  ;;  %v5250_v57 = vld [vmem:[%s7455_s29 + $0x498] sm:$0xf0] }
 0x1b4   : > { %4202 = vmatpush.bf16.msra.mxu2 %v6753_v12  ;;  %v6899_v12 = vld [vmem:[%s7455_s29 + $0x1cc] sm:$0xf]  ;;  %v4997_v63 = vor.u32 %v6923_v54, %v4994_v60 }
 0x1b5   : > { %4215 = vmatpush.bf16.msra.mxu3 %v4709_v29  ;;  %v6963_v29 = vld [vmem:[%s7455_s29 + $0x3cc] sm:$0xf]  ;;  %v4901_v40 = vor.u32 %v6899_v12, %v4898_v13  ;;  %v4978_v12 = vld [vmem:[%s7455_s29 + $0x278] sm:$0xf0] }
 0x1b6   : > { %4177 = vmatpush.bf16.msra.mxu0 %v6481_v4  ;;  %v5157_v42 = vor.u32 %v6963_v29, %v5154_v30  ;;  %v6895_v4 = vld [vmem:[%s7455_s29 + $0x1ac] sm:$0xf] }
 0x1b7   : > { %4190 = vmatpush.bf16.msra.mxu1 %v6609_v36  ;;  %v3947_v36 = vadd.f32 %v8417_v3, %v3934_v32  ;;  %v4885_v3 = vor.u32 %v6895_v4, %v4882_v58  ;;  %v6955_v61 = vld [vmem:[%s7455_s29 + $0x38c] sm:$0xf] }
 0x1b8   : > { %4203 = vmatpush.bf16.msra.mxu2 %v6737_v47  ;;  %v5010_v47 = vld [vmem:[%s7455_s29 + $0x2b8] sm:$0xf0]  ;;  %v6887_v9 = vld [vmem:[%s7455_s29 + $0x16c] sm:$0xf] }
 0x1b9   : > { %4216 = vmatpush.bf16.msra.mxu3 %v4693_v45  ;;  %v5266_v45 = vld [vmem:[%s7455_s29 + $0x4b8] sm:$0xf0]  ;;  %v5013_v51 = vor.u32 %v6927_v15, %v5010_v47  ;;  %v3960_v55 = vadd.f32 %v8422_v8, %v3947_v36  ;;  %v6951_v13 = vld [vmem:[%s7455_s29 + $0x36c] sm:$0xf] }
 0x1ba   : > { %4178 = vmatpush.bf16.msra.mxu0 %v6465_v1  ;;  %v5269_v59 = vor.u32 %v6991_v50, %v5266_v45  ;;  %v5122_v1 = vld [vmem:[%s7455_s29 + $0x398] sm:$0xf0]  ;;  %v3972_v2 = vpop.f32.mrf.mxu0  ;;  %v6883_v34 = vld [vmem:[%s7455_s29 + $0x14c] sm:$0xf]  ;;  %v5109_v32 = vor.u32 %v6951_v13, %v5106_v19 }
 0x1bb   : > { %4191 = vmatpush.bf16.msra.mxu1 %v6593_v6  ;;  %v3973_v62 = vadd.f32 %v3972_v2, %v3960_v55  ;;  %v4869_v6 = vor.u32 %v6891_v53, %v4866_v56  ;;  %v3985_v8 = vpop.f32.mrf.mxu1  ;;  %v5125_v33 = vor.u32 %v6955_v61, %v5122_v1  ;;  %v6947_v58 = vld [vmem:[%s7455_s29 + $0x34c] sm:$0xf]  ;;  %v5090_v15 = vld [vmem:[%s7455_s29 + $0x358] sm:$0xf0] }
 0x1bc   : > { %4204 = vmatpush.bf16.msra.mxu2 %v6721_v7  ;;  %v246_v7 = vld [vmem:[#allocation2] sm:$0xff]  ;;  %v5218_v47 = vld [vmem:[%s7455_s29 + $0x458] sm:$0xf0]  ;;  %v6879_v53 = vld [vmem:[%s7455_s29 + $0x12c] sm:$0xf] }
 0x1bd   : > { %4217 = vmatpush.bf16.msra.mxu3 %v4677_v46  ;;  %4179 = vmatmul.bf16.vlgmr.msra.gmra.mxu0 %v7782_v21  ;;  %v4850_v46 = vld [vmem:[%s7455_s29 + $0x178] sm:$0xf0]  ;;  %v6911_v54 = vld [vmem:[%s7455_s29 + $0x22c] sm:$0xf] }
 0x1be   : > { %4223 = vmatpush.bf16.msrb.mxu0 %v4917_v37  ;;  %4192 = vmatmul.bf16.vlgmr.msra.gmra.mxu1 %v7788_v27  ;;  %v6919_v37 = vld [vmem:[%s7455_s29 + $0x26c] sm:$0xf]  ;;  %v4853_v30 = vor.u32 %v6887_v9, %v4850_v46  ;;  %v4818_v56 = vld [vmem:[%s7455_s29 + $0x138] sm:$0xf0] }
 0x1bf   : > { %4236 = vmatpush.bf16.msrb.mxu1 %v5045_v5  ;;  %4205 = vmatmul.bf16.vlgmr.msra.gmra.mxu2 %v7854_v16  ;;  %v4981_v31 = vor.u32 %v6919_v37, %v4978_v12  ;;  %v6943_v60 = vld [vmem:[%s7455_s29 + $0x32c] sm:$0xf]  ;;  %v5074_v61 = vld [vmem:[%s7455_s29 + $0x338] sm:$0xf0] }
 0x1c0   : > { %4249 = vmatpush.bf16.msrb.mxu2 %v5173_v11  ;;  %4218 = vmatmul.bf16.vlgmr.msra.gmra.mxu3 %v7554_v10  ;;  %v6987_v10 = vld [vmem:[%s7455_s29 + $0x48c] sm:$0xf]  ;;  %v3986_v11 = vadd.f32 %v3985_v8, %v3973_v62  ;;  %v5202_v2 = vld [vmem:[%s7455_s29 + $0x438] sm:$0xf0] }
 0x1c1   : > { %4262 = vmatpush.bf16.msrb.mxu3 %v5301_v23  ;;  %v5253_v5 = vor.u32 %v6987_v10, %v5250_v57  ;;  %v6983_v23 = vld [vmem:[%s7455_s29 + $0x46c] sm:$0xf]  ;;  %v4821_v10 = vor.u32 %v6879_v53, %v4818_v56  ;;  %v4802_v62 = vld [vmem:[%s7455_s29 + $0x118] sm:$0xf0] }
 0x1c2   : > { %4224 = vmatpush.bf16.msrb.mxu0 %v4901_v40  ;;  %v4432_v29 = vadd.f32 %v3986_v11, %v246_v7  ;;  %v4834_v40 = vld [vmem:[%s7455_s29 + $0x158] sm:$0xf0]  ;;  %v5237_v4 = vor.u32 %v6983_v23, %v5234_v26  ;;  %v3998_v36 = vpop.f32.mrf.mxu2  ;;  %v3974_v49 = vpop.f32.mrf.mxu0  ;;  %v6975_v1 = vld [vmem:[%s7455_s29 + $0x42c] sm:$0xf]  ;;  %v5077_v7 = vor.u32 %v6943_v60, %v5074_v61 }
 0x1c3   : > { %4237 = vmatpush.bf16.msrb.mxu1 %v5029_v43  ;;  %v6915_v43 = vld [vmem:[%s7455_s29 + $0x24c] sm:$0xf]  ;;  %v4011_v48 = vpop.f32.mrf.mxu3  ;;  %v4837_v50 = vor.u32 %v6883_v34, %v4834_v40  ;;  %v5205_v9 = vor.u32 %v6975_v1, %v5202_v2  ;;  %v5058_v46 = vld [vmem:[%s7455_s29 + $0x318] sm:$0xf0] }
 0x1c4   : > { %4250 = vmatpush.bf16.msrb.mxu2 %v5157_v42  ;;  %v4962_v42 = vld [vmem:[%s7455_s29 + $0x258] sm:$0xf0]  ;;  %4436 = vst [vmem:[#allocation2] sm:$0xff] %v4432_v29  ;;  %v8501_v45 = vadd.f32 %v4011_v48, %v3998_v36  ;;  %v6875_v57 = vld [vmem:[%s7455_s29 + $0x10c] sm:$0xf] }
 0x1c5   : > { %4263 = vmatpush.bf16.msrb.mxu3 %v5285_v44  ;;  %v6979_v44 = vld [vmem:[%s7455_s29 + $0x44c] sm:$0xf]  ;;  %v5426_v13 = vld [vmem:[%s7455_s29 + $0x5f8] sm:$0xf0]  ;;  %v4805_v26 = vor.u32 %v6875_v57, %v4802_v62 }
 0x1c6   : > { %4225 = vmatpush.bf16.msrb.mxu0 %v4885_v3  ;;  %v3987_v3 = vpop.f32.mrf.mxu1  ;;  %v5221_v55 = vor.u32 %v6979_v44, %v5218_v47  ;;  %v6907_v8 = vld [vmem:[%s7455_s29 + $0x20c] sm:$0xf]  ;;  %v5554_v29 = vld [vmem:[%s7455_s29 + $0x6f8] sm:$0xf0] }
 0x1c7   : > { %4238 = vmatpush.bf16.msrb.mxu1 %v5013_v51  ;;  %v4965_v51 = vor.u32 %v6915_v43, %v4962_v42  ;;  %v6971_v37 = vld [vmem:[%s7455_s29 + $0x40c] sm:$0xf]  ;;  %v5682_v34 = vld [vmem:[%s7455_s29 + $0x7f8] sm:$0xf0] }
 0x1c8   : > { %4251 = vmatpush.bf16.msrb.mxu2 %v5141_v52  ;;  %v5093_v52 = vor.u32 %v6947_v58, %v5090_v15  ;;  %v7031_v12 = vld [vmem:[%s7455_s29 + $0x5ec] sm:$0xf]  ;;  %v5810_v43 = vld [vmem:[%s7455_s29 + $0x8f8] sm:$0xf0] }
 0x1c9   : > { %4264 = vmatpush.bf16.msrb.mxu3 %v5269_v59  ;;  %v4946_v59 = vld [vmem:[%s7455_s29 + $0x238] sm:$0xf0]  ;;  %v7063_v19 = vld [vmem:[%s7455_s29 + $0x6ec] sm:$0xf] }
 0x1ca   : > { %4226 = vmatpush.bf16.msrb.mxu0 %v4869_v6  ;;  %v4949_v6 = vor.u32 %v6911_v54, %v4946_v59  ;;  %v4000_v11 = vpop.f32.mrf.mxu2  ;;  %v7127_v40 = vld [vmem:[%s7455_s29 + $0x8ec] sm:$0xf]  ;;  %v5557_v58 = vor.u32 %v7063_v19, %v5554_v29  ;;  %v5410_v44 = vld [vmem:[%s7455_s29 + $0x5d8] sm:$0xf0] }
 0x1cb   : > { %4239 = vmatpush.bf16.msrb.mxu1 %v4997_v63  ;;  %v4930_v63 = vld [vmem:[%s7455_s29 + $0x218] sm:$0xf0]  ;;  %v4013_v23 = vpop.f32.mrf.mxu3  ;;  %v7027_v36 = vld [vmem:[%s7455_s29 + $0x5cc] sm:$0xf]  ;;  %v5813_v48 = vor.u32 %v7127_v40, %v5810_v43 }
 0x1cc   : > { %4252 = vmatpush.bf16.msrb.mxu2 %v5125_v33  ;;  %v6939_v33 = vld [vmem:[%s7455_s29 + $0x30c] sm:$0xf]  ;;  %v5538_v49 = vld [vmem:[%s7455_s29 + $0x6d8] sm:$0xf0]  ;;  %v5413_v53 = vor.u32 %v7027_v36, %v5410_v44 }
 0x1cd   : > { %4265 = vmatpush.bf16.msrb.mxu3 %v5253_v5  ;;  %v5186_v5 = vld [vmem:[%s7455_s29 + $0x418] sm:$0xf0]  ;;  %v7059_v47 = vld [vmem:[%s7455_s29 + $0x6cc] sm:$0xf] }
 0x1ce   : > { %4227 = vmatpush.bf16.msrb.mxu0 %v4853_v30  ;;  %v7095_v30 = vld [vmem:[%s7455_s29 + $0x7ec] sm:$0xf]  ;;  %v5189_v42 = vor.u32 %v6971_v37, %v5186_v5  ;;  %v5666_v3 = vld [vmem:[%s7455_s29 + $0x7d8] sm:$0xf0]  ;;  %v5541_v56 = vor.u32 %v7059_v47, %v5538_v49 }
 0x1cf   : > { %4240 = vmatpush.bf16.msrb.mxu1 %v4981_v31  ;;  %v4933_v31 = vor.u32 %v6907_v8, %v4930_v63  ;;  %v5685_v15 = vor.u32 %v7095_v30, %v5682_v34  ;;  %v5394_v59 = vld [vmem:[%s7455_s29 + $0x5b8] sm:$0xf0]  ;;  %v7055_v60 = vld [vmem:[%s7455_s29 + $0x6ac] sm:$0xf] }
 0x1d0   : > { %4253 = vmatpush.bf16.msrb.mxu2 %v5109_v32  ;;  %v5061_v32 = vor.u32 %v6939_v33, %v5058_v46  ;;  %v5522_v1 = vld [vmem:[%s7455_s29 + $0x6b8] sm:$0xf0]  ;;  %v7087_v2 = vld [vmem:[%s7455_s29 + $0x7ac] sm:$0xf] }
 0x1d1   : > { %4266 = vmatpush.bf16.msrb.mxu3 %v5237_v4  ;;  %v5429_v4 = vor.u32 %v7031_v12, %v5426_v13  ;;  %v7119_v57 = vld [vmem:[%s7455_s29 + $0x8ac] sm:$0xf]  ;;  %v5778_v62 = vld [vmem:[%s7455_s29 + $0x8b8] sm:$0xf0] }
 0x1d2   : > { %4228 = vmatpush.bf16.msrb.mxu0 %v4837_v50  ;;  %v7091_v50 = vld [vmem:[%s7455_s29 + $0x7cc] sm:$0xf]  ;;  %v5378_v63 = vld [vmem:[%s7455_s29 + $0x598] sm:$0xf0] }
 0x1d3   : > { %4241 = vmatpush.bf16.msrb.mxu1 %v4965_v51  ;;  %v7123_v51 = vld [vmem:[%s7455_s29 + $0x8cc] sm:$0xf]  ;;  %v5669_v54 = vor.u32 %v7091_v50, %v5666_v3  ;;  %v5506_v33 = vld [vmem:[%s7455_s29 + $0x698] sm:$0xf0] }
 0x1d4   : > { %4254 = vmatpush.bf16.msrb.mxu2 %v5093_v52  ;;  %v5794_v52 = vld [vmem:[%s7455_s29 + $0x8d8] sm:$0xf0]  ;;  %v7019_v8 = vld [vmem:[%s7455_s29 + $0x58c] sm:$0xf] }
 0x1d5   : > { %4267 = vmatpush.bf16.msrb.mxu3 %v5221_v55  ;;  %v7023_v55 = vld [vmem:[%s7455_s29 + $0x5ac] sm:$0xf]  ;;  %v5797_v61 = vor.u32 %v7123_v51, %v5794_v52  ;;  %v5634_v46 = vld [vmem:[%s7455_s29 + $0x798] sm:$0xf0] }
 0x1d6   : > { %4229 = vmatpush.bf16.msrb.mxu0 %v4821_v10  ;;  %v5650_v10 = vld [vmem:[%s7455_s29 + $0x7b8] sm:$0xf0]  ;;  %v7115_v37 = vld [vmem:[%s7455_s29 + $0x88c] sm:$0xf] }
 0x1d7   : > { %4242 = vmatpush.bf16.msrb.mxu1 %v4949_v6  ;;  %v5525_v6 = vor.u32 %v7055_v60, %v5522_v1  ;;  %v5762_v5 = vld [vmem:[%s7455_s29 + $0x898] sm:$0xf0]  ;;  %v7015_v19 = vld [vmem:[%s7455_s29 + $0x56c] sm:$0xf] }
 0x1d8   : > { %4255 = vmatpush.bf16.msrb.mxu2 %v5077_v7  ;;  %v5653_v7 = vor.u32 %v7087_v2, %v5650_v10  ;;  %v5362_v23 = vld [vmem:[%s7455_s29 + $0x578] sm:$0xf0]  ;;  %v5765_v34 = vor.u32 %v7115_v37, %v5762_v5  ;;  %v7111_v43 = vld [vmem:[%s7455_s29 + $0x86c] sm:$0xf] }
 0x1d9   : > { %4268 = vmatpush.bf16.msrb.mxu3 %v5205_v9  ;;  %v7083_v9 = vld [vmem:[%s7455_s29 + $0x78c] sm:$0xf]  ;;  %v5618_v40 = vld [vmem:[%s7455_s29 + $0x778] sm:$0xf0] }
 0x1da   : > { %4230 = vmatpush.bf16.msrb.mxu0 %v4805_v26  ;;  %v4024_v11 = vpop.f32.mrf.mxu0  ;;  %v5637_v13 = vor.u32 %v7083_v9, %v5634_v46  ;;  %v7047_v26 = vld [vmem:[%s7455_s29 + $0x66c] sm:$0xf]  ;;  %v5346_v44 = vld [vmem:[%s7455_s29 + $0x558] sm:$0xf0] }
 0x1db   : > { %4243 = vmatpush.bf16.msrb.mxu1 %v4933_v31  ;;  %v4025_v29 = vadd.f32 %v4024_v11, %v8501_v45  ;;  %v4037_v30 = vpop.f32.mrf.mxu1  ;;  %v5490_v31 = vld [vmem:[%s7455_s29 + $0x678] sm:$0xf0]  ;;  %v7011_v36 = vld [vmem:[%s7455_s29 + $0x54c] sm:$0xf] }
 0x1dc   : > { %4256 = vmatpush.bf16.msrb.mxu2 %v5061_v32  ;;  %v7079_v32 = vld [vmem:[%s7455_s29 + $0x76c] sm:$0xf]  ;;  %v5493_v45 = vor.u32 %v7047_v26, %v5490_v31  ;;  %v5474_v50 = vld [vmem:[%s7455_s29 + $0x658] sm:$0xf0] }
 0x1dd   : > { %4269 = vmatpush.bf16.msrb.mxu3 %v5189_v42  ;;  %4231 = vmatmul.bf16.vlgmr.msrb.gmra.mxu0 %v7563_v18  ;;  %v7051_v18 = vld [vmem:[%s7455_s29 + $0x68c] sm:$0xf]  ;;  %v5746_v42 = vld [vmem:[%s7455_s29 + $0x878] sm:$0xf0] }
 0x1de   : > { %4275 = vmatpush.bf16.msra.mxu0 %v5429_v4  ;;  %4244 = vmatmul.bf16.vlgmr.msrb.gmra.mxu1 %v7545_v0  ;;  %v5381_v0 = vor.u32 %v7019_v8, %v5378_v63  ;;  %v5509_v12 = vor.u32 %v7051_v18, %v5506_v33  ;;  %v4038_v4 = vadd.f32 %v4037_v30, %v4025_v29  ;;  %v7043_v47 = vld [vmem:[%s7455_s29 + $0x64c] sm:$0xf]  ;;  %v5602_v51 = vld [vmem:[%s7455_s29 + $0x758] sm:$0xf0] }
 0x1df   : > { %4288 = vmatpush.bf16.msra.mxu1 %v5557_v58  ;;  %4257 = vmatmul.bf16.vlgmr.msrb.gmra.mxu2 %v7561_v17  ;;  %v5397_v17 = vor.u32 %v7023_v55, %v5394_v59  ;;  %v5365_v58 = vor.u32 %v7015_v19, %v5362_v23  ;;  %v5749_v49 = vor.u32 %v7111_v43, %v5746_v42  ;;  %v7075_v3 = vld [vmem:[%s7455_s29 + $0x74c] sm:$0xf]  ;;  %v5330_v10 = vld [vmem:[%s7455_s29 + $0x538] sm:$0xf0] }
 0x1e0   : > { %4301 = vmatpush.bf16.msra.mxu2 %v5685_v15  ;;  %4270 = vmatmul.bf16.vlgmr.msrb.gmra.mxu3 %v7624_v38  ;;  %v5781_v38 = vor.u32 %v7119_v57, %v5778_v62  ;;  %v5621_v15 = vor.u32 %v7079_v32, %v5618_v40  ;;  %v5349_v55 = vor.u32 %v7011_v36, %v5346_v44  ;;  %v7007_v2 = vld [vmem:[%s7455_s29 + $0x52c] sm:$0xf]  ;;  %v5586_v8 = vld [vmem:[%s7455_s29 + $0x738] sm:$0xf0] }
 0x1e1   : > { %4314 = vmatpush.bf16.msra.mxu3 %v5813_v48  ;;  %v5605_v1 = vor.u32 %v7075_v3, %v5602_v51  ;;  %v7039_v57 = vld [vmem:[%s7455_s29 + $0x62c] sm:$0xf]  ;;  %v5714_v18 = vld [vmem:[%s7455_s29 + $0x838] sm:$0xf0] }
 0x1e2   : > { %4276 = vmatpush.bf16.msra.mxu0 %v5413_v53  ;;  %v4050_v48 = vpop.f32.mrf.mxu2  ;;  %v4026_v60 = vpop.f32.mrf.mxu0  ;;  %v7103_v63 = vld [vmem:[%s7455_s29 + $0x82c] sm:$0xf]  ;;  %v5314_v9 = vld [vmem:[%s7455_s29 + $0x518] sm:$0xf0] }
 0x1e3   : > { %4289 = vmatpush.bf16.msra.mxu1 %v5541_v56  ;;  %v4051_v52 = vadd.f32 %v4050_v48, %v4038_v4  ;;  %v4063_v53 = vpop.f32.mrf.mxu3  ;;  %v7107_v56 = vld [vmem:[%s7455_s29 + $0x84c] sm:$0xf]  ;;  %v4039_v62 = vpop.f32.mrf.mxu1  ;;  %v5570_v19 = vld [vmem:[%s7455_s29 + $0x718] sm:$0xf0] }
 0x1e4   : > { %4302 = vmatpush.bf16.msra.mxu2 %v5669_v54  ;;  %v5730_v54 = vld [vmem:[%s7455_s29 + $0x858] sm:$0xf0]  ;;  %v7003_v33 = vld [vmem:[%s7455_s29 + $0x50c] sm:$0xf] }
 0x1e5   : > { %4315 = vmatpush.bf16.msra.mxu3 %v5797_v61  ;;  %v8572_v59 = vadd.f32 %v4063_v53, %v4051_v52  ;;  %v5477_v61 = vor.u32 %v7043_v47, %v5474_v50  ;;  %v7035_v5 = vld [vmem:[%s7455_s29 + $0x60c] sm:$0xf]  ;;  %v5698_v26 = vld [vmem:[%s7455_s29 + $0x818] sm:$0xf0]  ;;  %v5317_v32 = vor.u32 %v7003_v33, %v5314_v9 }
 0x1e6   : > { %4277 = vmatpush.bf16.msra.mxu0 %v5397_v17  ;;  %v5733_v17 = vor.u32 %v7107_v56, %v5730_v54  ;;  %v7067_v11 = vld [vmem:[%s7455_s29 + $0x70c] sm:$0xf]  ;;  %v6066_v40 = vld [vmem:[%s7455_s29 + $0xaf8] sm:$0xf0] }
 0x1e7   : > { %4290 = vmatpush.bf16.msra.mxu1 %v5525_v6  ;;  %v5458_v6 = vld [vmem:[%s7455_s29 + $0x638] sm:$0xf0]  ;;  %v7099_v23 = vld [vmem:[%s7455_s29 + $0x80c] sm:$0xf] }
 0x1e8   : > { %4303 = vmatpush.bf16.msra.mxu2 %v5653_v7  ;;  %v7071_v7 = vld [vmem:[%s7455_s29 + $0x72c] sm:$0xf]  ;;  %v5461_v46 = vor.u32 %v7039_v57, %v5458_v6  ;;  %v6194_v42 = vld [vmem:[%s7455_s29 + $0xbf8] sm:$0xf0]  ;;  %v5701_v36 = vor.u32 %v7099_v23, %v5698_v26 }
 0x1e9   : > { %4316 = vmatpush.bf16.msra.mxu3 %v5781_v38  ;;  %v5333_v38 = vor.u32 %v7007_v2, %v5330_v10  ;;  %v5589_v37 = vor.u32 %v7071_v7, %v5586_v8  ;;  %v7159_v30 = vld [vmem:[%s7455_s29 + $0x9ec] sm:$0xf]  ;;  %v5922_v50 = vld [vmem:[%s7455_s29 + $0x9d8] sm:$0xf0] }
 0x1ea   : > { %4278 = vmatpush.bf16.msra.mxu0 %v5381_v0  ;;  %v5442_v0 = vld [vmem:[%s7455_s29 + $0x618] sm:$0xf0]  ;;  %v7191_v31 = vld [vmem:[%s7455_s29 + $0xaec] sm:$0xf] }
 0x1eb   : > { %4291 = vmatpush.bf16.msra.mxu1 %v5509_v12  ;;  %v4052_v12 = vpop.f32.mrf.mxu2  ;;  %v4065_v29 = vpop.f32.mrf.mxu3  ;;  %v7223_v43 = vld [vmem:[%s7455_s29 + $0xbec] sm:$0xf]  ;;  %v5445_v4 = vor.u32 %v7035_v5, %v5442_v0  ;;  %v6069_v47 = vor.u32 %v7191_v31, %v6066_v40  ;;  %v6050_v52 = vld [vmem:[%s7455_s29 + $0xad8] sm:$0xf0] }
 0x1ec   : > { %4304 = vmatpush.bf16.msra.mxu2 %v5637_v13  ;;  %v5717_v13 = vor.u32 %v7103_v63, %v5714_v18  ;;  %v6197_v48 = vor.u32 %v7223_v43, %v6194_v42  ;;  %v7187_v3 = vld [vmem:[%s7455_s29 + $0xacc] sm:$0xf]  ;;  %v6178_v56 = vld [vmem:[%s7455_s29 + $0xbd8] sm:$0xf0] }
 0x1ed   : > { %4317 = vmatpush.bf16.msra.mxu3 %v5765_v34  ;;  %v5938_v34 = vld [vmem:[%s7455_s29 + $0x9f8] sm:$0xf0]  ;;  %v7219_v53 = vld [vmem:[%s7455_s29 + $0xbcc] sm:$0xf] }
 0x1ee   : > { %4279 = vmatpush.bf16.msra.mxu0 %v5365_v58  ;;  %v5573_v58 = vor.u32 %v7067_v11, %v5570_v19  ;;  %v5941_v44 = vor.u32 %v7159_v30, %v5938_v34  ;;  %v7251_v54 = vld [vmem:[%s7455_s29 + $0xccc] sm:$0xf]  ;;  %v5906_v10 = vld [vmem:[%s7455_s29 + $0x9b8] sm:$0xf0] }
 0x1ef   : > { %4292 = vmatpush.bf16.msra.mxu1 %v5493_v45  ;;  %v7255_v45 = vld [vmem:[%s7455_s29 + $0xcec] sm:$0xf]  ;;  %v6162_v7 = vld [vmem:[%s7455_s29 + $0xbb8] sm:$0xf0] }
 0x1f0   : > { %4305 = vmatpush.bf16.msra.mxu2 %v5621_v15  ;;  %v6322_v15 = vld [vmem:[%s7455_s29 + $0xcf8] sm:$0xf0]  ;;  %v7151_v2 = vld [vmem:[%s7455_s29 + $0x9ac] sm:$0xf] }
 0x1f1   : > { %4318 = vmatpush.bf16.msra.mxu3 %v5749_v49  ;;  %v7155_v49 = vld [vmem:[%s7455_s29 + $0x9cc] sm:$0xf]  ;;  %v6325_v51 = vor.u32 %v7255_v45, %v6322_v15  ;;  %v6290_v63 = vld [vmem:[%s7455_s29 + $0xcb8] sm:$0xf0] }
 0x1f2   : > { %4280 = vmatpush.bf16.msra.mxu0 %v5349_v55  ;;  %v6306_v55 = vld [vmem:[%s7455_s29 + $0xcd8] sm:$0xf0]  ;;  %v5925_v60 = vor.u32 %v7155_v49, %v5922_v50  ;;  %v7183_v57 = vld [vmem:[%s7455_s29 + $0xaac] sm:$0xf] }
 0x1f3   : > { %4293 = vmatpush.bf16.msra.mxu1 %v5477_v61  ;;  %v6053_v61 = vor.u32 %v7187_v3, %v6050_v52  ;;  %v6309_v62 = vor.u32 %v7251_v54, %v6306_v55  ;;  %v7215_v6 = vld [vmem:[%s7455_s29 + $0xbac] sm:$0xf]  ;;  %v5890_v9 = vld [vmem:[%s7455_s29 + $0x998] sm:$0xf0] }
 0x1f4   : > { %4306 = vmatpush.bf16.msra.mxu2 %v5605_v1  ;;  %v6181_v1 = vor.u32 %v7219_v53, %v6178_v56  ;;  %v7247_v8 = vld [vmem:[%s7455_s29 + $0xcac] sm:$0xf]  ;;  %v6146_v5 = vld [vmem:[%s7455_s29 + $0xb98] sm:$0xf0] }
 0x1f5   : > { %4319 = vmatpush.bf16.msra.mxu3 %v5733_v17  ;;  %v6034_v17 = vld [vmem:[%s7455_s29 + $0xab8] sm:$0xf0]  ;;  %v7147_v33 = vld [vmem:[%s7455_s29 + $0x98c] sm:$0xf] }
 0x1f6   : > { %4281 = vmatpush.bf16.msra.mxu0 %v5333_v38  ;;  %v6037_v18 = vor.u32 %v7183_v57, %v6034_v17  ;;  %v6165_v38 = vor.u32 %v7215_v6, %v6162_v7  ;;  %v7243_v0 = vld [vmem:[%s7455_s29 + $0xc8c] sm:$0xf]  ;;  %v6274_v11 = vld [vmem:[%s7455_s29 + $0xc98] sm:$0xf0]  ;;  %v5893_v12 = vor.u32 %v7147_v33, %v5890_v9 }
 0x1f7   : > { %4294 = vmatpush.bf16.msra.mxu1 %v5461_v46  ;;  %v6018_v46 = vld [vmem:[%s7455_s29 + $0xa98] sm:$0xf0]  ;;  %v7143_v26 = vld [vmem:[%s7455_s29 + $0x96c] sm:$0xf]  ;;  %v6277_v34 = vor.u32 %v7243_v0, %v6274_v11 }
 0x1f8   : > { %4307 = vmatpush.bf16.msra.mxu2 %v5589_v37  ;;  %v7211_v37 = vld [vmem:[%s7455_s29 + $0xb8c] sm:$0xf]  ;;  %v5874_v29 = vld [vmem:[%s7455_s29 + $0x978] sm:$0xf0] }
 0x1f9   : > { %4320 = vmatpush.bf16.msra.mxu3 %v5717_v13  ;;  %v6149_v23 = vor.u32 %v7211_v37, %v6146_v5  ;;  %v7175_v30 = vld [vmem:[%s7455_s29 + $0xa6c] sm:$0xf]  ;;  %v6002_v31 = vld [vmem:[%s7455_s29 + $0xa78] sm:$0xf0] }
 0x1fa   : > { %4282 = vmatpush.bf16.msra.mxu0 %v5317_v32  ;;  %v7207_v32 = vld [vmem:[%s7455_s29 + $0xb6c] sm:$0xf]  ;;  %v6130_v40 = vld [vmem:[%s7455_s29 + $0xb78] sm:$0xf0] }
 0x1fb   : > { %4295 = vmatpush.bf16.msra.mxu1 %v5445_v4  ;;  %v8628_v13 = vpop.f32.mrf.mxu1  ;;  %v7239_v43 = vld [vmem:[%s7455_s29 + $0xc6c] sm:$0xf]  ;;  %v6258_v42 = vld [vmem:[%s7455_s29 + $0xc78] sm:$0xf0]  ;;  %v5877_v4 = vor.u32 %v7143_v26, %v5874_v29  ;;  %v6133_v45 = vor.u32 %v7207_v32, %v6130_v40 }
 0x1fc   : > { %4308 = vmatpush.bf16.msra.mxu2 %v5573_v58  ;;  %v6005_v58 = vor.u32 %v7175_v30, %v6002_v31  ;;  %v7139_v15 = vld [vmem:[%s7455_s29 + $0x94c] sm:$0xf]  ;;  %v5986_v49 = vld [vmem:[%s7455_s29 + $0xa58] sm:$0xf0] }
 0x1fd   : > { %4321 = vmatpush.bf16.msra.mxu3 %v5701_v36  ;;  %4283 = vmatmul.bf16.vlgmr.msra.gmra.mxu0 %v7628_v41  ;;  %v5909_v41 = vor.u32 %v7151_v2, %v5906_v10  ;;  %v5858_v36 = vld [vmem:[%s7455_s29 + $0x958] sm:$0xf0]  ;;  %v7203_v50 = vld [vmem:[%s7455_s29 + $0xb4c] sm:$0xf] }
 0x1fe   : > { %4327 = vmatpush.bf16.msrb.mxu0 %v5941_v44  ;;  %4296 = vmatmul.bf16.vlgmr.msra.gmra.mxu1 %v7620_v35  ;;  %v6293_v35 = vor.u32 %v7247_v8, %v6290_v63  ;;  %v7171_v44 = vld [vmem:[%s7455_s29 + $0xa4c] sm:$0xf]  ;;  %v6114_v3 = vld [vmem:[%s7455_s29 + $0xb58] sm:$0xf0]  ;;  %v5861_v54 = vor.u32 %v7139_v15, %v5858_v36 }
 0x1ff   : > { %4340 = vmatpush.bf16.msrb.mxu1 %v6069_v47  ;;  %4309 = vmatmul.bf16.vlgmr.msra.gmra.mxu2 %v7626_v39  ;;  %v7179_v39 = vld [vmem:[%s7455_s29 + $0xa8c] sm:$0xf]  ;;  %v6261_v47 = vor.u32 %v7239_v43, %v6258_v42  ;;  %v6242_v53 = vld [vmem:[%s7455_s29 + $0xc58] sm:$0xf0] }
 0x200   : > { %4353 = vmatpush.bf16.msrb.mxu2 %v6197_v48  ;;  %4322 = vmatmul.bf16.vlgmr.msra.gmra.mxu3 %v7697_v20  ;;  %v8624_v20 = vpop.f32.mrf.mxu0  ;;  %v6021_v19 = vor.u32 %v7179_v39, %v6018_v46  ;;  %v7235_v52 = vld [vmem:[%s7455_s29 + $0xc4c] sm:$0xf]  ;;  %v5842_v2 = vld [vmem:[%s7455_s29 + $0x938] sm:$0xf0] }
 0x201   : > { %4366 = vmatpush.bf16.msrb.mxu3 %v6325_v51  ;;  %v7167_v10 = vld [vmem:[%s7455_s29 + $0xa2c] sm:$0xf]  ;;  %v6245_v57 = vor.u32 %v7235_v52, %v6242_v53  ;;  %v6098_v6 = vld [vmem:[%s7455_s29 + $0xb38] sm:$0xf0] }
 0x202   : > { %4328 = vmatpush.bf16.msrb.mxu0 %v5925_v60  ;;  %v8641_v48 = vpop.f32.mrf.mxu2  ;;  %v5989_v60 = vor.u32 %v7171_v44, %v5986_v49  ;;  %v7199_v17 = vld [vmem:[%s7455_s29 + $0xb2c] sm:$0xf]  ;;  %v6226_v8 = vld [vmem:[%s7455_s29 + $0xc38] sm:$0xf0] }
 0x203   : > { %4341 = vmatpush.bf16.msrb.mxu1 %v6053_v61  ;;  %v8646_v51 = vpop.f32.mrf.mxu3  ;;  %v4091_v55 = vpop.f32.mrf.mxu1  ;;  %v6117_v61 = vor.u32 %v7203_v50, %v6114_v3  ;;  %v7231_v7 = vld [vmem:[%s7455_s29 + $0xc2c] sm:$0xf]  ;;  %v6101_v33 = vor.u32 %v7199_v17, %v6098_v6  ;;  %v5954_v39 = vld [vmem:[%s7455_s29 + $0xa18] sm:$0xf0] }
 0x204   : > { %4354 = vmatpush.bf16.msrb.mxu2 %v6181_v1  ;;  %v7135_v1 = vld [vmem:[%s7455_s29 + $0x92c] sm:$0xf]  ;;  %v6229_v46 = vor.u32 %v7231_v7, %v6226_v8  ;;  %v6082_v37 = vld [vmem:[%s7455_s29 + $0xb18] sm:$0xf0] }
 0x205   : > { %4367 = vmatpush.bf16.msrb.mxu3 %v6309_v62  ;;  %v5970_v62 = vld [vmem:[%s7455_s29 + $0xa38] sm:$0xf0]  ;;  %v5845_v63 = vor.u32 %v7135_v1, %v5842_v2  ;;  %v7163_v9 = vld [vmem:[%s7455_s29 + $0xa0c] sm:$0xf] }
 0x206   : > { %4329 = vmatpush.bf16.msrb.mxu0 %v5909_v41  ;;  %v7131_v41 = vld [vmem:[%s7455_s29 + $0x90c] sm:$0xf]  ;;  %v6210_v0 = vld [vmem:[%s7455_s29 + $0xc18] sm:$0xf0]  ;;  %v5957_v32 = vor.u32 %v7163_v9, %v5954_v39 }
 0x207   : > { %4342 = vmatpush.bf16.msrb.mxu1 %v6037_v18  ;;  %v5826_v18 = vld [vmem:[%s7455_s29 + $0x918] sm:$0xf0]  ;;  %v7227_v5 = vld [vmem:[%s7455_s29 + $0xc0c] sm:$0xf] }
 0x208   : > { %4355 = vmatpush.bf16.msrb.mxu2 %v6165_v38  ;;  %v4078_v56 = vpop.f32.mrf.mxu0  ;;  %v5973_v38 = vor.u32 %v7167_v10, %v5970_v62  ;;  %v5829_v29 = vor.u32 %v7131_v41, %v5826_v18  ;;  %v6578_v30 = vld [vmem:[%s7455_s29 + $0xef8] sm:$0xf0]  ;;  %v7383_v43 = vld [vmem:[%s7455_s29 + $0x10ec] sm:$0xf] }
 0x209   : > { %4368 = vmatpush.bf16.msrb.mxu3 %v6293_v35  ;;  %v7195_v35 = vld [vmem:[%s7455_s29 + $0xb0c] sm:$0xf]  ;;  %v6706_v31 = vld [vmem:[%s7455_s29 + $0xff8] sm:$0xf0] }
 0x20a   : > { %4330 = vmatpush.bf16.msrb.mxu0 %v5893_v12  ;;  %v4104_v11 = vpop.f32.mrf.mxu2  ;;  %v7287_v12 = vld [vmem:[%s7455_s29 + $0xdec] sm:$0xf]  ;;  %v6085_v40 = vor.u32 %v7195_v35, %v6082_v37  ;;  %v6834_v42 = vld [vmem:[%s7455_s29 + $0x10f8] sm:$0xf0] }
 0x20b   : > { %4343 = vmatpush.bf16.msrb.mxu1 %v6021_v19  ;;  %v6450_v19 = vld [vmem:[%s7455_s29 + $0xdf8] sm:$0xf0]  ;;  %v4117_v26 = vpop.f32.mrf.mxu3  ;;  %v7283_v36 = vld [vmem:[%s7455_s29 + $0xdcc] sm:$0xf]  ;;  %v6837_v49 = vor.u32 %v7383_v43, %v6834_v42 }
 0x20c   : > { %4356 = vmatpush.bf16.msrb.mxu2 %v6149_v23  ;;  %v7319_v23 = vld [vmem:[%s7455_s29 + $0xeec] sm:$0xf]  ;;  %v6434_v44 = vld [vmem:[%s7455_s29 + $0xdd8] sm:$0xf0] }
 0x20d   : > { %4369 = vmatpush.bf16.msrb.mxu3 %v6277_v34  ;;  %v7351_v34 = vld [vmem:[%s7455_s29 + $0xfec] sm:$0xf]  ;;  %v6562_v50 = vld [vmem:[%s7455_s29 + $0xed8] sm:$0xf0] }
 0x20e   : > { %4331 = vmatpush.bf16.msrb.mxu0 %v5877_v4  ;;  %v6213_v4 = vor.u32 %v7227_v5, %v6210_v0  ;;  %v6709_v15 = vor.u32 %v7351_v34, %v6706_v31  ;;  %v7347_v3 = vld [vmem:[%s7455_s29 + $0xfcc] sm:$0xf]  ;;  %v6690_v52 = vld [vmem:[%s7455_s29 + $0xfd8] sm:$0xf0] }
 0x20f   : > { %4344 = vmatpush.bf16.msrb.mxu1 %v6005_v58  ;;  %v6453_v58 = vor.u32 %v7287_v12, %v6450_v19  ;;  %v7379_v53 = vld [vmem:[%s7455_s29 + $0x10cc] sm:$0xf]  ;;  %v6818_v56 = vld [vmem:[%s7455_s29 + $0x10d8] sm:$0xf0] }
 0x210   : > { %4357 = vmatpush.bf16.msrb.mxu2 %v6133_v45  ;;  %v6581_v45 = vor.u32 %v7319_v23, %v6578_v30  ;;  %v6418_v1 = vld [vmem:[%s7455_s29 + $0xdb8] sm:$0xf0]  ;;  %v7311_v2 = vld [vmem:[%s7455_s29 + $0xeac] sm:$0xf]  ;;  %v6821_v10 = vor.u32 %v7379_v53, %v6818_v56 }
 0x211   : > { %4370 = vmatpush.bf16.msrb.mxu3 %v6261_v47  ;;  %v7315_v47 = vld [vmem:[%s7455_s29 + $0xecc] sm:$0xf]  ;;  %v6674_v17 = vld [vmem:[%s7455_s29 + $0xfb8] sm:$0xf0] }
 0x212   : > { %4332 = vmatpush.bf16.msrb.mxu0 %v5861_v54  ;;  %v6437_v54 = vor.u32 %v7283_v36, %v6434_v44  ;;  %v6565_v55 = vor.u32 %v7315_v47, %v6562_v50  ;;  %v7343_v62 = vld [vmem:[%s7455_s29 + $0xfac] sm:$0xf]  ;;  %v6802_v7 = vld [vmem:[%s7455_s29 + $0x10b8] sm:$0xf0] }
 0x213   : > { %4345 = vmatpush.bf16.msrb.mxu1 %v5989_v60  ;;  %v6693_v60 = vor.u32 %v7347_v3, %v6690_v52  ;;  %v7375_v6 = vld [vmem:[%s7455_s29 + $0x10ac] sm:$0xf]  ;;  %v6402_v18 = vld [vmem:[%s7455_s29 + $0xd98] sm:$0xf0] }
 0x214   : > { %4358 = vmatpush.bf16.msrb.mxu2 %v6117_v61  ;;  %v7279_v61 = vld [vmem:[%s7455_s29 + $0xdac] sm:$0xf]  ;;  %v6658_v9 = vld [vmem:[%s7455_s29 + $0xf98] sm:$0xf0] }
 0x215   : > { %4371 = vmatpush.bf16.msrb.mxu3 %v6245_v57  ;;  %v6546_v57 = vld [vmem:[%s7455_s29 + $0xeb8] sm:$0xf0]  ;;  %v7275_v41 = vld [vmem:[%s7455_s29 + $0xd8c] sm:$0xf] }
 0x216   : > { %4333 = vmatpush.bf16.msrb.mxu0 %v5845_v63  ;;  %v6549_v8 = vor.u32 %v7311_v2, %v6546_v57  ;;  %v6677_v63 = vor.u32 %v7343_v62, %v6674_v17  ;;  %v7371_v39 = vld [vmem:[%s7455_s29 + $0x108c] sm:$0xf]  ;;  %v6786_v35 = vld [vmem:[%s7455_s29 + $0x1098] sm:$0xf0] }
 0x217   : > { %4346 = vmatpush.bf16.msrb.mxu1 %v5973_v38  ;;  %v6530_v38 = vld [vmem:[%s7455_s29 + $0xe98] sm:$0xf0]  ;;  %v7271_v11 = vld [vmem:[%s7455_s29 + $0xd6c] sm:$0xf]  ;;  %v6789_v23 = vor.u32 %v7371_v39, %v6786_v35 }
 0x218   : > { %4359 = vmatpush.bf16.msrb.mxu2 %v6101_v33  ;;  %v7339_v33 = vld [vmem:[%s7455_s29 + $0xf8c] sm:$0xf]  ;;  %v6386_v12 = vld [vmem:[%s7455_s29 + $0xd78] sm:$0xf0] }
 0x219   : > { %4372 = vmatpush.bf16.msrb.mxu3 %v6229_v46  ;;  %v6405_v46 = vor.u32 %v7275_v41, %v6402_v18  ;;  %v6661_v0 = vor.u32 %v7339_v33, %v6658_v9  ;;  %v7303_v19 = vld [vmem:[%s7455_s29 + $0xe6c] sm:$0xf]  ;;  %v6514_v26 = vld [vmem:[%s7455_s29 + $0xe78] sm:$0xf0] }
 0x21a   : > { %4334 = vmatpush.bf16.msrb.mxu0 %v5829_v29  ;;  %v7335_v29 = vld [vmem:[%s7455_s29 + $0xf6c] sm:$0xf]  ;;  %v6642_v30 = vld [vmem:[%s7455_s29 + $0xf78] sm:$0xf0] }
 0x21b   : > { %4347 = vmatpush.bf16.msrb.mxu1 %v5957_v32  ;;  %v8704_v37 = vpop.f32.mrf.mxu1  ;;  %v7367_v34 = vld [vmem:[%s7455_s29 + $0x106c] sm:$0xf]  ;;  %v6770_v31 = vld [vmem:[%s7455_s29 + $0x1078] sm:$0xf0]  ;;  %v6389_v32 = vor.u32 %v7271_v11, %v6386_v12  ;;  %v6645_v43 = vor.u32 %v7335_v29, %v6642_v30 }
 0x21c   : > { %4360 = vmatpush.bf16.msrb.mxu2 %v6085_v40  ;;  %v6517_v40 = vor.u32 %v7303_v19, %v6514_v26  ;;  %v7267_v42 = vld [vmem:[%s7455_s29 + $0xd4c] sm:$0xf]  ;;  %v6498_v36 = vld [vmem:[%s7455_s29 + $0xe58] sm:$0xf0] }
 0x21d   : > { %4373 = vmatpush.bf16.msrb.mxu3 %v6213_v4  ;;  %4335 = vmatmul.bf16.vlgmr.msrb.gmra.mxu0 %v7704_v25  ;;  %v6421_v25 = vor.u32 %v7279_v61, %v6418_v1  ;;  %v6370_v4 = vld [vmem:[%s7455_s29 + $0xd58] sm:$0xf0]  ;;  %v7331_v44 = vld [vmem:[%s7455_s29 + $0xf4c] sm:$0xf] }
 0x21e   : > { %4379 = vmatpush.bf16.msra.mxu0 %v6453_v58  ;;  %4348 = vmatmul.bf16.vlgmr.msrb.gmra.mxu1 %v7702_v24  ;;  %v6805_v24 = vor.u32 %v7375_v6, %v6802_v7  ;;  %v7299_v58 = vld [vmem:[%s7455_s29 + $0xe4c] sm:$0xf]  ;;  %v6626_v47 = vld [vmem:[%s7455_s29 + $0xf58] sm:$0xf0]  ;;  %v6373_v56 = vor.u32 %v7267_v42, %v6370_v4 }
 0x21f   : > { %4392 = vmatpush.bf16.msra.mxu1 %v6581_v45  ;;  %4361 = vmatmul.bf16.vlgmr.msrb.gmra.mxu2 %v7708_v28  ;;  %v7307_v28 = vld [vmem:[%s7455_s29 + $0xe8c] sm:$0xf]  ;;  %v6773_v45 = vor.u32 %v7367_v34, %v6770_v31  ;;  %v6754_v52 = vld [vmem:[%s7455_s29 + $0x1058] sm:$0xf0] }
 0x220   : > { %4405 = vmatpush.bf16.msra.mxu2 %v6709_v15  ;;  %4374 = vmatmul.bf16.vlgmr.msrb.gmra.mxu3 %v7777_v14  ;;  %v8700_v14 = vpop.f32.mrf.mxu0  ;;  %v6533_v5 = vor.u32 %v7307_v28, %v6530_v38  ;;  %v7363_v3 = vld [vmem:[%s7455_s29 + $0x104c] sm:$0xf]  ;;  %v6354_v1 = vld [vmem:[%s7455_s29 + $0xd38] sm:$0xf0] }
 0x221   : > { %4418 = vmatpush.bf16.msra.mxu3 %v6837_v49  ;;  %v4077_v49 = vadd.f32 %v8624_v20, %v8572_v59  ;;  %v7263_v61 = vld [vmem:[%s7455_s29 + $0xd2c] sm:$0xf]  ;;  %v6757_v59 = vor.u32 %v7363_v3, %v6754_v52  ;;  %v6482_v20 = vld [vmem:[%s7455_s29 + $0xe38] sm:$0xf0] }
 0x222   : > { %4380 = vmatpush.bf16.msra.mxu0 %v6437_v54  ;;  %v8717_v15 = vpop.f32.mrf.mxu2  ;;  %v7295_v2 = vld [vmem:[%s7455_s29 + $0xe2c] sm:$0xf]  ;;  %v6610_v57 = vld [vmem:[%s7455_s29 + $0xf38] sm:$0xf0]  ;;  %v6357_v7 = vor.u32 %v7263_v61, %v6354_v1 }
 0x223   : > { %4393 = vmatpush.bf16.msra.mxu1 %v6565_v55  ;;  %v4167_v50 = vpop.f32.mrf.mxu3  ;;  %v4143_v54 = vpop.f32.mrf.mxu1  ;;  %v6501_v55 = vor.u32 %v7299_v58, %v6498_v36  ;;  %v4090_v62 = vadd.f32 %v8628_v13, %v4077_v49  ;;  %v7359_v17 = vld [vmem:[%s7455_s29 + $0x102c] sm:$0xf]  ;;  %v6738_v6 = vld [vmem:[%s7455_s29 + $0x1038] sm:$0xf0] }
 0x224   : > { %4406 = vmatpush.bf16.msra.mxu2 %v6693_v60  ;;  %v6629_v60 = vor.u32 %v7331_v44, %v6626_v47  ;;  %v7259_v41 = vld [vmem:[%s7455_s29 + $0xd0c] sm:$0xf]  ;;  %v6338_v18 = vld [vmem:[%s7455_s29 + $0xd18] sm:$0xf0] }
 0x225   : > { %4419 = vmatpush.bf16.msra.mxu3 %v6821_v10  ;;  %v7327_v10 = vld [vmem:[%s7455_s29 + $0xf2c] sm:$0xf]  ;;  %v6466_v13 = vld [vmem:[%s7455_s29 + $0xe18] sm:$0xf0] }
 0x226   : > { %4381 = vmatpush.bf16.msra.mxu0 %v6421_v25  ;;  %v4103_v25 = vadd.f32 %v8641_v48, %v4090_v62  ;;  %v7291_v28 = vld [vmem:[%s7455_s29 + $0xe0c] sm:$0xf]  ;;  %v6594_v33 = vld [vmem:[%s7455_s29 + $0xf18] sm:$0xf0] }
 0x227   : > { %4394 = vmatpush.bf16.msra.mxu1 %v6549_v8  ;;  %v6485_v8 = vor.u32 %v7295_v2, %v6482_v20  ;;  %v7323_v38 = vld [vmem:[%s7455_s29 + $0xf0c] sm:$0xf]  ;;  %v6722_v35 = vld [vmem:[%s7455_s29 + $0x1018] sm:$0xf0] }
 0x228   : > { %4407 = vmatpush.bf16.msra.mxu2 %v6677_v63  ;;  %v4130_v53 = vpop.f32.mrf.mxu0  ;;  %v6613_v63 = vor.u32 %v7327_v10, %v6610_v57  ;;  %v7355_v39 = vld [vmem:[%s7455_s29 + $0x100c] sm:$0xf]  ;;  %v4116_v48 = vadd.f32 %v8646_v51, %v4103_v25  ;;  %v6597_v11 = vor.u32 %v7323_v38, %v6594_v33  ;;  %v247_v31 = vld [vmem:[#allocation2 + $0x18] sm:$0xff] }
 0x229   : > { %4420 = vmatpush.bf16.msra.mxu3 %v6805_v24  ;;  %v6741_v24 = vor.u32 %v7359_v17, %v6738_v6  ;;  %v6725_v12 = vor.u32 %v7355_v39, %v6722_v35 }
 0x22a   : > { %4382 = vmatpush.bf16.msra.mxu0 %v6405_v46  ;;  %v4156_v9 = vpop.f32.mrf.mxu2  ;;  %v4129_v19 = vadd.f32 %v8700_v14, %v4116_v48 }
 0x22b   : > { %4395 = vmatpush.bf16.msra.mxu1 %v6533_v5  ;;  %v4169_v46 = vpop.f32.mrf.mxu3  ;;  %v6341_v5 = vor.u32 %v7259_v41, %v6338_v18 }
 0x22c   : > { %4408 = vmatpush.bf16.msra.mxu2 %v6661_v0  ;;  %v6469_v0 = vor.u32 %v7291_v28, %v6466_v13 }
 0x22d   : > { %4421 = vmatpush.bf16.msra.mxu3 %v6789_v23  ;;  %v4142_v23 = vadd.f32 %v8704_v37, %v4129_v19 }
 0x22e   : > { %4383 = vmatpush.bf16.msra.mxu0 %v6389_v32 }
 0x22f   : > { %4396 = vmatpush.bf16.msra.mxu1 %v6517_v40  ;;  %v4155_v51 = vadd.f32 %v8717_v15, %v4142_v23 }
 0x230   : > { %4409 = vmatpush.bf16.msra.mxu2 %v6645_v43 }
 0x231   : > { %4422 = vmatpush.bf16.msra.mxu3 %v6773_v45  ;;  %v4168_v26 = vadd.f32 %v4167_v50, %v4155_v51 }
 0x232   : > { %4384 = vmatpush.bf16.msra.mxu0 %v6373_v56 }
 0x233   : > { %4397 = vmatpush.bf16.msra.mxu1 %v6501_v55 }
 0x234   : > { %4410 = vmatpush.bf16.msra.mxu2 %v6629_v60 }
 0x235   : > { %4423 = vmatpush.bf16.msra.mxu3 %v6757_v59 }
 0x236   : > { %4385 = vmatpush.bf16.msra.mxu0 %v6357_v7 }
 0x237   : > { %4398 = vmatpush.bf16.msra.mxu1 %v6485_v8 }
 0x238   : > { %4411 = vmatpush.bf16.msra.mxu2 %v6613_v63 }
 0x239   : > { %4424 = vmatpush.bf16.msra.mxu3 %v6741_v24 }
 0x23a   : > { %4386 = vmatpush.bf16.msra.mxu0 %v6341_v5  ;;  %v4180_v29 = vpop.f32.mrf.mxu0 }
 0x23b   : > { %4399 = vmatpush.bf16.msra.mxu1 %v6469_v0  ;;  %v4193_v30 = vpop.f32.mrf.mxu1  ;;  %v4181_v14 = vadd.f32 %v4180_v29, %v4168_v26  ;;  %v248_v0 = vld [vmem:[#allocation2 + $0x8] sm:$0xff] }
 0x23c   : > { %4412 = vmatpush.bf16.msra.mxu2 %v6597_v11 }
 0x23d   : > { %4425 = vmatpush.bf16.msra.mxu3 %v6725_v12  ;;  %4387 = vmatmul.bf16.vlgmr.msra.gmra.mxu0 %v7784_v22  ;;  %v4194_v34 = vadd.f32 %v4193_v30, %v4181_v14 }
 0x23e   : > { %4400 = vmatmul.bf16.vlgmr.msra.gmra.mxu1 %v7782_v21 }
 0x23f   : > { %4413 = vmatmul.bf16.vlgmr.msra.gmra.mxu2 %v7788_v27 }
 0x240   : > { %4426 = vmatmul.bf16.vlgmr.msra.gmra.mxu3 %v7854_v16 }
 0x242   : > { %v4206_v32 = vpop.f32.mrf.mxu2  ;;  %v4182_v37 = vpop.f32.mrf.mxu0 }
 0x243   : > { %v4207_v40 = vadd.f32 %v4206_v32, %v4194_v34  ;;  %v4219_v43 = vpop.f32.mrf.mxu3  ;;  %v4195_v42 = vpop.f32.mrf.mxu1 }
 0x245   : > { %v4433_v22 = vadd.f32 %v4207_v40, %v247_v31 }
 0x247   : > { %4437 = vst [vmem:[#allocation2 + $0x18] sm:$0xff] %v4433_v22 }
 0x24a   : > { %v4208_v21 = vpop.f32.mrf.mxu2 }
 0x24b   : > { %v4221_v4 = vpop.f32.mrf.mxu3 }
 0x25a   : > { %v4232_v27 = vpop.f32.mrf.mxu0 }
 0x25b   : > { %v4233_v58 = vadd.f32 %v4232_v27, %v4219_v43  ;;  %v4245_v45 = vpop.f32.mrf.mxu1 }
 0x25d   : > { %v4246_v15 = vadd.f32 %v4245_v45, %v4233_v58 }
 0x262   : > { %v4258_v16 = vpop.f32.mrf.mxu2  ;;  %v4234_v49 = vpop.f32.mrf.mxu0 }
 0x263   : > { %v4259_v36 = vadd.f32 %v4258_v16, %v4246_v15  ;;  %v4271_v44 = vpop.f32.mrf.mxu3  ;;  %v4247_v50 = vpop.f32.mrf.mxu1 }
 0x265   : > { %v4272_v47 = vadd.f32 %v4271_v44, %v4259_v36 }
 0x26a   : > { %v4260_v3 = vpop.f32.mrf.mxu2 }
 0x26b   : > { %v4273_v52 = vpop.f32.mrf.mxu3 }
 0x27a   : > { %v4284_v53 = vpop.f32.mrf.mxu0 }
 0x27b   : > { %v4297_v56 = vpop.f32.mrf.mxu1  ;;  %v4285_v10 = vadd.f32 %v4284_v53, %v4272_v47 }
 0x27d   : > { %v4298_v7 = vadd.f32 %v4297_v56, %v4285_v10 }
 0x282   : > { %v4310_v54 = vpop.f32.mrf.mxu2  ;;  %v4286_v60 = vpop.f32.mrf.mxu0 }
 0x283   : > { %v4323_v55 = vpop.f32.mrf.mxu3  ;;  %v4299_v61 = vpop.f32.mrf.mxu1  ;;  %v4311_v25 = vadd.f32 %v4310_v54, %v4298_v7 }
 0x285   : > { %v4324_v41 = vadd.f32 %v4323_v55, %v4311_v25 }
 0x28a   : > { %v4312_v1 = vpop.f32.mrf.mxu2 }
 0x28b   : > { %v4325_v2 = vpop.f32.mrf.mxu3 }
 0x29a   : > { %v4336_v59 = vpop.f32.mrf.mxu0 }
 0x29b   : > { %v4349_v20 = vpop.f32.mrf.mxu1  ;;  %v4337_v18 = vadd.f32 %v4336_v59, %v4324_v41 }
 0x29d   : > { %v4350_v28 = vadd.f32 %v4349_v20, %v4337_v18 }
 0x2a2   : > { %v4362_v57 = vpop.f32.mrf.mxu2  ;;  %v4338_v17 = vpop.f32.mrf.mxu0 }
 0x2a3   : > { %v4375_v62 = vpop.f32.mrf.mxu3  ;;  %v4351_v6 = vpop.f32.mrf.mxu1  ;;  %v4363_v24 = vadd.f32 %v4362_v57, %v4350_v28 }
 0x2a5   : > { %v4376_v13 = vadd.f32 %v4375_v62, %v4363_v24 }
 0x2aa   : > { %v4364_v8 = vpop.f32.mrf.mxu2 }
 0x2ab   : > { %v4377_v63 = vpop.f32.mrf.mxu3 }
 0x2ba   : > { %v4388_v38 = vpop.f32.mrf.mxu0 }
 0x2bb   : > { %v4401_v33 = vpop.f32.mrf.mxu1  ;;  %v4389_v9 = vadd.f32 %v4388_v38, %v4376_v13 }
 0x2bd   : > { %v4402_v39 = vadd.f32 %v4401_v33, %v4389_v9 }
 0x2c2   : > { %v4414_v35 = vpop.f32.mrf.mxu2  ;;  %v4390_v48 = vpop.f32.mrf.mxu0 }
 0x2c3   : > { %v4415_v46 = vadd.f32 %v4414_v35, %v4402_v39  ;;  %v4427_v5 = vpop.f32.mrf.mxu3  ;;  %v4403_v11 = vpop.f32.mrf.mxu1 }
 0x2c5   : > { %v4428_v12 = vadd.f32 %v4427_v5, %v4415_v46 }
 0x2c7   : > { %v4434_v19 = vadd.f32 %v4428_v12, %v248_v0  ;;  %4442 = sbr.rel (%p6838_p6) target bundleno = 886 (0x376), region = 48 }
 0x2c9   : > { %4438 = vst [vmem:[#allocation2 + $0x8] sm:$0xff] %v4434_v19 }
 0x2ca   : > { %v4416_v23 = vpop.f32.mrf.mxu2 }
 0x2cb   : > { %v4429_v51 = vpop.f32.mrf.mxu3 }
 0x2cc   : > { %v4512_v26 = vld [vmem:[%s8960_s3 + $0x178] sm:$0xff]  ;;  %v4511_v30 = vld [vmem:[%s8960_s3 + $0x170] sm:$0xff]  ;;  %v4510_v32 = vld [vmem:[%s8960_s3 + $0x168] sm:$0xff] }
 0x2cd   : > { %v4480_v29 = vld [vmem:[%s8960_s3 + $0x78] sm:$0xff]  ;;  %4573 = vmatpush.msra.mxu2 %v4512_v26  ;;  %v4479_v34 = vld [vmem:[%s8960_s3 + $0x70] sm:$0xff]  ;;  %v4478_v43 = vld [vmem:[%s8960_s3 + $0x68] sm:$0xff] }
 0x2ce   : > { %4533 = vmatpush.msra.mxu0 %v4480_v29  ;;  %v4528_v14 = vld [vmem:[%s8960_s3 + $0x1f8] sm:$0xff]  ;;  %v4527_v40 = vld [vmem:[%s8960_s3 + $0x1f0] sm:$0xff]  ;;  %v4526_v42 = vld [vmem:[%s8960_s3 + $0x1e8] sm:$0xff] }
 0x2cf   : > { %v4496_v31 = vld [vmem:[%s8960_s3 + $0xf8] sm:$0xff]  ;;  %4593 = vmatpush.msra.mxu3 %v4528_v14  ;;  %4574 = vmatpush.msra.mxu2 %v4511_v30  ;;  %v4495_v37 = vld [vmem:[%s8960_s3 + $0xf0] sm:$0xff]  ;;  %v4509_v22 = vld [vmem:[%s8960_s3 + $0x160] sm:$0xff] }
 0x2d0   : > { %4553 = vmatpush.msra.mxu1 %v4496_v31  ;;  %4534 = vmatpush.msra.mxu0 %v4479_v34  ;;  %v4477_v21 = vld [vmem:[%s8960_s3 + $0x60] sm:$0xff]  ;;  %v4494_v4 = vld [vmem:[%s8960_s3 + $0xe8] sm:$0xff]  ;;  %v4508_v45 = vld [vmem:[%s8960_s3 + $0x158] sm:$0xff] }
 0x2d1   : > { %4594 = vmatpush.msra.mxu3 %v4527_v40  ;;  %4575 = vmatpush.msra.mxu2 %v4510_v32  ;;  %v4525_v27 = vld [vmem:[%s8960_s3 + $0x1e0] sm:$0xff]  ;;  %v4476_v15 = vld [vmem:[%s8960_s3 + $0x58] sm:$0xff]  ;;  %v4507_v44 = vld [vmem:[%s8960_s3 + $0x150] sm:$0xff] }
 0x2d2   : > { %4554 = vmatpush.msra.mxu1 %v4495_v37  ;;  %4535 = vmatpush.msra.mxu0 %v4478_v43  ;;  %v4493_v58 = vld [vmem:[%s8960_s3 + $0xe0] sm:$0xff]  ;;  %v4524_v16 = vld [vmem:[%s8960_s3 + $0x1d8] sm:$0xff]  ;;  %v4475_v47 = vld [vmem:[%s8960_s3 + $0x50] sm:$0xff] }
 0x2d3   : > { %4595 = vmatpush.msra.mxu3 %v4526_v42  ;;  %4576 = vmatpush.msra.mxu2 %v4509_v22  ;;  %v4492_v36 = vld [vmem:[%s8960_s3 + $0xd8] sm:$0xff]  ;;  %v4523_v49 = vld [vmem:[%s8960_s3 + $0x1d0] sm:$0xff]  ;;  %v4506_v3 = vld [vmem:[%s8960_s3 + $0x148] sm:$0xff] }
 0x2d4   : > { %4555 = vmatpush.msra.mxu1 %v4494_v4  ;;  %4536 = vmatpush.msra.mxu0 %v4477_v21  ;;  %v4491_v50 = vld [vmem:[%s8960_s3 + $0xd0] sm:$0xff]  ;;  %v4474_v52 = vld [vmem:[%s8960_s3 + $0x48] sm:$0xff]  ;;  %v4505_v54 = vld [vmem:[%s8960_s3 + $0x140] sm:$0xff] }
 0x2d5   : > { %4596 = vmatpush.msra.mxu3 %v4525_v27  ;;  %4577 = vmatpush.msra.mxu2 %v4508_v45  ;;  %v4522_v53 = vld [vmem:[%s8960_s3 + $0x1c8] sm:$0xff]  ;;  %v4473_v55 = vld [vmem:[%s8960_s3 + $0x40] sm:$0xff]  ;;  %v4504_v1 = vld [vmem:[%s8960_s3 + $0x138] sm:$0xff] }
 0x2d6   : > { %4556 = vmatpush.msra.mxu1 %v4493_v58  ;;  %4537 = vmatpush.msra.mxu0 %v4476_v15  ;;  %v4490_v56 = vld [vmem:[%s8960_s3 + $0xc8] sm:$0xff]  ;;  %v4521_v60 = vld [vmem:[%s8960_s3 + $0x1c0] sm:$0xff]  ;;  %v4472_v2 = vld [vmem:[%s8960_s3 + $0x38] sm:$0xff] }
 0x2d7   : > { %4597 = vmatpush.msra.mxu3 %v4524_v16  ;;  %4578 = vmatpush.msra.mxu2 %v4507_v44  ;;  %v4489_v61 = vld [vmem:[%s8960_s3 + $0xc0] sm:$0xff]  ;;  %v4520_v59 = vld [vmem:[%s8960_s3 + $0x1b8] sm:$0xff]  ;;  %v4503_v10 = vld [vmem:[%s8960_s3 + $0x130] sm:$0xff] }
 0x2d8   : > { %4557 = vmatpush.msra.mxu1 %v4492_v36  ;;  %4538 = vmatpush.msra.mxu0 %v4475_v47  ;;  %v4488_v20 = vld [vmem:[%s8960_s3 + $0xb8] sm:$0xff]  ;;  %v4471_v57 = vld [vmem:[%s8960_s3 + $0x30] sm:$0xff]  ;;  %v4502_v6 = vld [vmem:[%s8960_s3 + $0x128] sm:$0xff] }
 0x2d9   : > { %4598 = vmatpush.msra.mxu3 %v4523_v49  ;;  %4579 = vmatpush.msra.mxu2 %v4506_v3  ;;  %v4519_v62 = vld [vmem:[%s8960_s3 + $0x1b0] sm:$0xff]  ;;  %v4470_v7 = vld [vmem:[%s8960_s3 + $0x28] sm:$0xff]  ;;  %v4501_v25 = vld [vmem:[%s8960_s3 + $0x120] sm:$0xff] }
 0x2da   : > { %4558 = vmatpush.msra.mxu1 %v4491_v50  ;;  %4539 = vmatpush.msra.mxu0 %v4474_v52  ;;  %v4487_v17 = vld [vmem:[%s8960_s3 + $0xb0] sm:$0xff]  ;;  %v4518_v8 = vld [vmem:[%s8960_s3 + $0x1a8] sm:$0xff]  ;;  %v4469_v41 = vld [vmem:[%s8960_s3 + $0x20] sm:$0xff] }
 0x2db   : > { %4599 = vmatpush.msra.mxu3 %v4522_v53  ;;  %4580 = vmatpush.msra.mxu2 %v4505_v54  ;;  %v4486_v63 = vld [vmem:[%s8960_s3 + $0xa8] sm:$0xff]  ;;  %v4500_v18 = vld [vmem:[%s8960_s3 + $0x118] sm:$0xff]  ;;  %v4447_v28 = vld [vmem:[%s8959_s2] sm:$0xf] }
 0x2dc   : > { %4559 = vmatpush.msra.mxu1 %v4490_v56  ;;  %4540 = vmatpush.msra.mxu0 %v4473_v55  ;;  %v4517_v24 = vld [vmem:[%s8960_s3 + $0x1a0] sm:$0xff]  ;;  %v4445_v38 = vld [vmem:[#allocation2 + $0x18] sm:$0xff]  ;;  %v4451_v33 = vperm.slane %v4447_v28, 2  ;;  %v4449_v9 = vperm.slane %v4447_v28, 0  ;;  %v4452_v39 = vperm.slane %v4447_v28, 3  ;;  %v4443_v46 = vld [vmem:[#allocation2 + $0x10] sm:$0xff] }
 0x2dd   : > { %4600 = vmatpush.msra.mxu3 %v4521_v60  ;;  %4581 = vmatpush.msra.mxu2 %v4504_v1  ;;  %v4485_v13 = vld [vmem:[%s8960_s3 + $0xa0] sm:$0xff]  ;;  %v4468_v35 = vld [vmem:[%s8960_s3 + $0x18] sm:$0xff]  ;;  %v4446_v5 = vld [vmem:[#allocation2 + $0x8] sm:$0xff]  ;;  %v4450_v11 = vperm.slane %v4447_v28, 1 }
 0x2de   : > { %4560 = vmatpush.msra.mxu1 %v4489_v61  ;;  %4541 = vmatpush.msra.mxu0 %v4472_v2  ;;  %v4516_v48 = vld [vmem:[%s8960_s3 + $0x198] sm:$0xff]  ;;  %v4499_v12 = vld [vmem:[%s8960_s3 + $0x110] sm:$0xff]  ;;  %v4459_v23 = vadd.f32 %v4451_v33, %v4445_v38  ;;  %v4444_v51 = vld [vmem:[#allocation2] sm:$0xff]  ;;  %v4457_v30 = vadd.f32 %v4449_v9, %v4443_v46  ;;  %v4460_v14 = vadd.f32 %v4452_v39, %v4446_v5 }
 0x2df   : > { %4601 = vmatpush.msra.mxu3 %v4520_v59  ;;  %4582 = vmatpush.msra.mxu2 %v4503_v10  ;;  %v4484_v0 = vld [vmem:[%s8960_s3 + $0x98] sm:$0xff]  ;;  %v4467_v19 = vld [vmem:[%s8960_s3 + $0x10] sm:$0xff]  ;;  %v4498_v34 = vld [vmem:[%s8960_s3 + $0x108] sm:$0xff]  ;;  %v4458_v43 = vadd.f32 %v4450_v11, %v4444_v51 }
 0x2e0   : > { %4561 = vmatpush.msra.mxu1 %v4488_v20  ;;  %4542 = vmatpush.msra.mxu0 %v4471_v57  ;;  %v4515_v26 = vld [vmem:[%s8960_s3 + $0x190] sm:$0xff]  ;;  %v4466_v31 = vld [vmem:[%s8960_s3 + $0x8] sm:$0xff]  ;;  %v4497_v37 = vld [vmem:[%s8960_s3 + $0x100] sm:$0xff]  ;;  %v4463_v42 = vmax.f32 %v4459_v23, 0.0  ;;  %v4461_v4 = vmax.f32 %v4457_v30, 0.0  ;;  %v4464_v27 = vmax.f32 %v4460_v14, 0.0 }
 0x2e1   : > { %4602 = vmatpush.msra.mxu3 %v4519_v62  ;;  %4583 = vmatpush.msra.mxu2 %v4502_v6  ;;  %v4483_v29 = vld [vmem:[%s8960_s3 + $0x90] sm:$0xff]  ;;  %v4514_v32 = vld [vmem:[%s8960_s3 + $0x188] sm:$0xff]  ;;  %v4465_v22 = vld [vmem:[%s8960_s3] sm:$0xff]  ;;  %v4462_v45 = vmax.f32 %v4458_v43, 0.0 }
 0x2e2   : > { %4562 = vmatpush.msra.mxu1 %v4487_v17  ;;  %4543 = vmatpush.msra.mxu0 %v4470_v7  ;;  %v4482_v40 = vld [vmem:[%s8960_s3 + $0x88] sm:$0xff]  ;;  %v4513_v21 = vld [vmem:[%s8960_s3 + $0x180] sm:$0xff] }
 0x2e3   : > { %4603 = vmatpush.msra.mxu3 %v4518_v8  ;;  %4584 = vmatpush.msra.mxu2 %v4501_v25  ;;  %v4481_v58 = vld [vmem:[%s8960_s3 + $0x80] sm:$0xff] }
 0x2e4   : > { %4563 = vmatpush.msra.mxu1 %v4486_v63  ;;  %4544 = vmatpush.msra.mxu0 %v4469_v41  ;;  %v7395_v15 = vld [vmem:[%s8961_s4] ss:$0 sm:$0xff] }
 0x2e5   : > { %4604 = vmatpush.msra.mxu3 %v4517_v24  ;;  %4585 = vmatpush.msra.mxu2 %v4500_v18 }
 0x2e6   : > { %4564 = vmatpush.msra.mxu1 %v4485_v13  ;;  %4545 = vmatpush.msra.mxu0 %v4468_v35 }
 0x2e7   : > { %4605 = vmatpush.msra.mxu3 %v4516_v48  ;;  %4586 = vmatpush.msra.mxu2 %v4499_v12 }
 0x2e8   : > { %4565 = vmatpush.msra.mxu1 %v4484_v0  ;;  %4546 = vmatpush.msra.mxu0 %v4467_v19 }
 0x2e9   : > { %4606 = vmatpush.msra.mxu3 %v4515_v26  ;;  %4587 = vmatpush.msra.mxu2 %v4498_v34 }
 0x2ea   : > { %4566 = vmatpush.msra.mxu1 %v4483_v29  ;;  %4547 = vmatpush.msra.mxu0 %v4466_v31 }
 0x2eb   : > { %4607 = vmatpush.msra.mxu3 %v4514_v32  ;;  %4588 = vmatpush.msra.mxu2 %v4497_v37 }
 0x2ec   : > { %4567 = vmatpush.msra.mxu1 %v4482_v40  ;;  %4548 = vmatpush.msra.mxu0 %v4465_v22 }
 0x2ed   : > { %4589 = vmatmul.f32.vlgmr.msra.gmra.mxu2 %v4463_v42  ;;  %4608 = vmatpush.msra.mxu3 %v4513_v21 }
 0x2ee   : > { %4549 = vmatmul.f32.vlgmr.msra.gmra.mxu0 %v4461_v4  ;;  %4609 = vmatmul.f32.vlgmr.msra.gmra.mxu3 %v4464_v27 }
 0x2ef   : > { %4568 = vmatpush.msra.mxu1 %v4481_v58 }
 0x2f0   : > { %4569 = vmatmul.f32.vlgmr.msra.gmra.mxu1 %v4462_v45 }
 0x36b   : > { %v4550_v16 = vpop.f32.mrf.mxu0 }
 0x36c   : > { %v4551_v36 = vadd.f32 %v7395_v15, %v4550_v16 }
 0x36d   : > { %v4570_v44 = vpop.f32.mrf.mxu1 }
 0x36e   : > { %v4571_v47 = vadd.f32 %v4570_v44, %v4551_v36 }
 0x370   : > { %v4590_v49 = vpop.f32.mrf.mxu2 }
 0x371   : > { %v4591_v50 = vadd.f32 %v4590_v49, %v4571_v47  ;;  %v4610_v3 = vpop.f32.mrf.mxu3 }
 0x373   : > { %v4611_v52 = vadd.f32 %v4610_v3, %v4591_v50 }
 0x375   : > { %4613 = vst [vmem:[%s8962_s5] sm:$0xff] %v4611_v52 }
 0x376 PF: > { %s15_s18 = sadd.s32 1, %s7402_s18  }
 0x377   : > { %p12_p7 = scmp.ge.s32.totalorder %s15_s18, 6  }
 0x379   :  { %14 = sbr.rel (!%p12_p7) target bundleno = 1 (0x1), region = 77 }

</bundles_post_ra>
